<compile_context>
chip_gen: v7x
topology: tpu7x:2x2x1
jax: 0.10.0
libtpu: 0.0.40
codegen_flags: <defaults>
</compile_context>

<pallas_src>
import functools
import math

import jax
import jax.numpy as jnp
from jax.experimental import pallas as pl
from jax.experimental.pallas import tpu as pltpu


# ----------------------------------------------------------------------------
# Generic helpers
# ----------------------------------------------------------------------------
def _full_spec(shape):
    nd = len(shape)
    return pl.BlockSpec(shape, lambda i, _nd=nd: (0,) * _nd)


def _full_call(kernel, inputs, out_shape, scratch_shapes=()):
    """Run a kernel once with every operand fully resident in VMEM (grid=(1,))."""
    return pl.pallas_call(
        kernel,
        out_shape=out_shape,
        grid_spec=pltpu.PrefetchScalarGridSpec(
            num_scalar_prefetch=0,
            grid=(1,),
            in_specs=[_full_spec(a.shape) for a in inputs],
            out_specs=_full_spec(out_shape.shape),
            scratch_shapes=list(scratch_shapes),
        ),
    )(*inputs)


def im2col_3x3(x, stride, pad):
    """x: (C, B, H, W) -> cols (C*9, B*OH*OW). Column order m = (b*OH + oh)*OW + ow.

    Row order is (ci, kh, kw); the synthetic conv weights use the matching order."""
    C, B, H, W = x.shape
    OH = (H + 2 * pad - 3) // stride + 1
    OW = (W + 2 * pad - 3) // stride + 1
    xp = jnp.pad(x, ((0, 0), (0, 0), (pad, pad), (pad, pad))) if pad > 0 else x
    pats = []
    for i in range(3):
        for j in range(3):
            pats.append(xp[:, :, i:i + (OH - 1) * stride + 1:stride,
                              j:j + (OW - 1) * stride + 1:stride])
    cols = jnp.stack(pats, axis=1).reshape(C * 9, B * OH * OW)
    return cols, OH, OW


# ----------------------------------------------------------------------------
# Fused GEMM chain kernel: conv(+folded eval BN)+ReLU stages sharing one spatial
# resolution, on a channel-first (C, M) layout (lane-dense output, f32 out).
# ----------------------------------------------------------------------------
def _conv_chain_kernel(*refs, n_stages):
    cols_ref = refs[0]
    o_ref = refs[-1]
    x = cols_ref[...]                                   # (K, M) bf16
    idx = 1
    for _ in range(n_stages):
        w_ref, s_ref, t_ref = refs[idx], refs[idx + 1], refs[idx + 2]
        idx += 3
        y = jnp.dot(w_ref[...], x.astype(jnp.bfloat16),
                    preferred_element_type=jnp.float32)
        x = jnp.maximum(y * s_ref[...] + t_ref[...], 0.0)   # folded eval BN + ReLU (f32)
    o_ref[...] = x.astype(o_ref.dtype)


def conv_chain(cols, stages):
    """cols: (K, M) bf16; stages: list of dicts with w (Cout,K') bf16, s/t (Cout,1) f32.

    Single-block grid: resident data is < 1 MiB, so one lane-dense block per call is
    optimal on 1-TC chips (v5e/v6e); see module-level TODO for v7x core-parallel split."""
    K, M = cols.shape
    out_c = stages[-1]["w"].shape[0]
    inputs = [cols]
    for st in stages:
        inputs += [st["w"], st["s"], st["t"]]
    kern = functools.partial(_conv_chain_kernel, n_stages=len(stages))
    return _full_call(kern, inputs, jax.ShapeDtypeStruct((out_c, M), jnp.float32))


# ----------------------------------------------------------------------------
# Fused 2-layer LSTM (proj_size) + sequence attention + weighted temporal sum.
# Per-timestep states live in vregs (Python lists, fully unrolled, T is small).
# ----------------------------------------------------------------------------
def _lstm_seqatt_kernel(x_ref,
                        wih1_ref, whh1_ref, bg1_ref, whr1_ref,
                        wih2_ref, whh2_ref, bg2_ref, whr2_ref,
                        g1_ref, a1_ref, w1_ref, b1_ref,
                        g2_ref, a2_ref, w2_ref, b2_ref,
                        o_ref):
    B, P = o_ref.shape
    TB = x_ref.shape[0]
    T = TB // B
    H = whr1_ref.shape[0]
    eps = 1e-5

    def run_layer(gx_list, whh_ref, whr_ref):
        whh = whh_ref[...]
        whr = whr_ref[...]
        h = jnp.zeros((B, P), jnp.float32)
        c = jnp.zeros((B, H), jnp.float32)
        hs = []
        for t in range(T):                       # unrolled: only the recurrent dots remain here
            g = gx_list[t] + jnp.dot(h, whh, preferred_element_type=jnp.float32)
            i_g = jax.nn.sigmoid(g[:, 0:H])
            f_g = jax.nn.sigmoid(g[:, H:2 * H])
            c_g = jnp.tanh(g[:, 2 * H:3 * H])
            o_g = jax.nn.sigmoid(g[:, 3 * H:4 * H])
            c = f_g * c + i_g * c_g
            h = jnp.dot(o_g * jnp.tanh(c), whr, preferred_element_type=jnp.float32)
            hs.append(h)
        return hs

    # layer 1: input projection hoisted out of the recurrence as one (T*B,In)x(In,4H) dot
    gx_all = jnp.dot(x_ref[...], wih1_ref[...],
                     preferred_element_type=jnp.float32) + bg1_ref[...]
    gx1 = [gx_all[t * B:(t + 1) * B, :] for t in range(T)]
    hs1 = run_layer(gx1, whh1_ref, whr1_ref)

    # layer 2: input projections computed outside the recurrent dependency chain
    wih2 = wih2_ref[...]
    bg2 = bg2_ref[...]
    gx2 = [jnp.dot(hs1[t], wih2, preferred_element_type=jnp.float32) + bg2
           for t in range(T)]
    hs2 = run_layer(gx2, whh2_ref, whr2_ref)

    # sequence attention: LayerNorm over (T, P) jointly per batch (nn.LayerNorm([T, P]))
    tp = float(T * P)
    mu = sum(jnp.sum(y, axis=-1, keepdims=True) for y in hs2) / tp          # (B, 1)
    var = sum(jnp.sum((y - mu) ** 2, axis=-1, keepdims=True) for y in hs2) / tp
    inv = jax.lax.rsqrt(var + eps)
    w1 = w1_ref[...]
    b1 = b1_ref[...]
    h2s = []
    for t in range(T):
        h1 = (hs2[t] - mu) * inv * g1_ref[t] + a1_ref[t]                    # (B, P)
        h2s.append(jnp.dot(h1, w1, preferred_element_type=jnp.float32) + b1)
    mu2 = sum(jnp.sum(h, axis=-1, keepdims=True) for h in h2s) / tp
    var2 = sum(jnp.sum((h - mu2) ** 2, axis=-1, keepdims=True) for h in h2s) / tp
    inv2 = jax.lax.rsqrt(var2 + eps)
    w2 = w2_ref[...]
    b2 = b2_ref[...]
    acc = jnp.zeros((B, P), jnp.float32)
    for t in range(T):
        h3 = jnp.maximum((h2s[t] - mu2) * inv2 * g2_ref[t] + a2_ref[t], 0.0)
        att = jax.nn.sigmoid(jnp.sum(h3 * w2, axis=-1, keepdims=True) + b2)  # (B, 1)
        acc = acc + hs2[t] * att
    o_ref[...] = acc


def lstm_seq_attention(seq_btf, lstm_params, sa):
    B, T, F = seq_btf.shape
    l1, l2 = lstm_params
    P = l1["whr"].shape[1]
    x2d = jnp.transpose(seq_btf, (1, 0, 2)).reshape(T * B, F).astype(jnp.float32)
    return _full_call(
        _lstm_seqatt_kernel,
        [x2d,
         l1["wih"], l1["whh"], l1["b"], l1["whr"],
         l2["wih"], l2["whh"], l2["b"], l2["whr"],
         sa["g1"], sa["a1"], sa["w1"], sa["b1"],
         sa["g2"], sa["a2"], sa["w2"], sa["b2"]],
        jax.ShapeDtypeStruct((B, P), jnp.float32),
    )


# ----------------------------------------------------------------------------
# Fused tail kernel: last bottleneck (block-diagonal GEMMs on a (B, S*C) row layout)
# + channel attention (avg-pool folded into the first 1x1 weight, softmax over C)
# + feature rescale + conv_linear + concat(y_seq, y_img) + output head.
# ----------------------------------------------------------------------------
def _tail_kernel(colsB_ref, w2bd_ref, s2_ref, t2_ref, w3bd_ref, s3_ref, t3_ref,
                 wa1_ref, sa1_ref, ta1_ref, wa2_ref, ba2_ref, exp_ref,
                 wl_ref, sl_ref, tl_ref, yseq_ref,
                 w1a_ref, w1b_ref, b1_ref, lg_ref, lb_ref, w2_ref, b2_ref, o_ref):
    eps = 1e-5
    # b4.2 (3x3 s2) + b4.3 (1x1) as block-diagonal GEMMs; columns are (s*C + c)
    y = jnp.dot(colsB_ref[...], w2bd_ref[...], preferred_element_type=jnp.float32)
    y = jnp.maximum(y * s2_ref[...] + t2_ref[...], 0.0)                      # (B, S*C2)
    y = jnp.dot(y.astype(jnp.bfloat16), w3bd_ref[...],
                preferred_element_type=jnp.float32)
    y = jnp.maximum(y * s3_ref[...] + t3_ref[...], 0.0)                      # (B, S*C)
    # channel attention (AdaptiveAvgPool folded into wa1); softmax over channels
    a = jnp.dot(y, wa1_ref[...], preferred_element_type=jnp.float32)         # (B, C)
    a = jnp.maximum(a * sa1_ref[...] + ta1_ref[...], 0.0)
    a = jnp.dot(a, wa2_ref[...], preferred_element_type=jnp.float32) + ba2_ref[...]
    e = jnp.exp(a - jnp.max(a, axis=-1, keepdims=True))
    a = e * pl.reciprocal(jnp.sum(e, axis=-1, keepdims=True), approx=False)
    a_full = jnp.dot(a, exp_ref[...], preferred_element_type=jnp.float32)    # (B, S*C)
    z = y * a_full                                                           # rescaled feature
    # conv_linear: Flatten (already (B, S*C)) + Linear + BN1d (eval, folded)
    y_img = jnp.dot(z.astype(jnp.bfloat16), wl_ref[...],
                    preferred_element_type=jnp.float32)
    y_img = y_img * sl_ref[...] + tl_ref[...]                                # (B, P)
    # Linear(concat([y_seq, y_img])) == y_seq @ W1[:P] + y_img @ W1[P:]
    h = (jnp.dot(yseq_ref[...], w1a_ref[...], preferred_element_type=jnp.float32)
         + jnp.dot(y_img, w1b_ref[...], preferred_element_type=jnp.float32)
         + b1_ref[...])
    mu = jnp.mean(h, axis=-1, keepdims=True)
    var = jnp.mean((h - mu) ** 2, axis=-1, keepdims=True)
    h = (h - mu) * jax.lax.rsqrt(var + eps) * lg_ref[...] + lb_ref[...]
    h = jnp.maximum(h, 0.0)
    o_ref[...] = jnp.dot(h, w2_ref[...], preferred_element_type=jnp.float32) + b2_ref[...]


# ----------------------------------------------------------------------------
# Deterministic synthetic parameters (mirrors the module's shapes; eval BN folded)
# ----------------------------------------------------------------------------
class ParamGen:
    def __init__(self, seed):
        self.key = jax.random.PRNGKey(seed)

    def normal(self, shape, scale=0.1):
        self.key, k = jax.random.split(self.key)
        return scale * jax.random.normal(k, shape, dtype=jnp.float32)


def _bn_fold(pg, cout, conv_bias):
    gamma = 1.0 + pg.normal((cout,), 0.05)
    beta = pg.normal((cout,), 0.05)
    mean = pg.normal((cout,), 0.05)
    var = 1.0 + 0.1 * jnp.abs(pg.normal((cout,), 1.0))
    scale = gamma * jax.lax.rsqrt(var + 1e-5)
    shift = (conv_bias - mean) * scale + beta
    return scale, shift


def build_params(num_class=3, seq_num=8, x_size=16, y_size=None, num_layers=2,
                 mid_c=16, min_hidden_size=32):
    y_size = y_size if y_size is not None else x_size
    P = y_size
    H = max(x_size * 4, min_hidden_size)
    c2 = mid_c // 2
    S = 16                                   # final 4x4 feature map (conv_linear expects mid_c*16)
    pg = ParamGen(42)

    # --- LSTM (num_layers, hidden=H, proj_size=P) ---
    lstm = []
    in_sz = x_size
    for _ in range(num_layers):
        s = 1.0 / math.sqrt(H)
        lstm.append(dict(
            wih=pg.normal((in_sz, 4 * H), s),     # W_ih^T
            whh=pg.normal((P, 4 * H), s),         # W_hh^T
            b=pg.normal((1, 4 * H), s),           # b_ih + b_hh
            whr=pg.normal((H, P), s),             # W_hr^T
        ))
        in_sz = P

    # --- sequence attention (params shaped for the (T, B, P) kernel orientation) ---
    seq_att = dict(
        g1=(1.0 + pg.normal((seq_num, P), 0.05)).reshape(seq_num, 1, P),
        a1=pg.normal((seq_num, P), 0.05).reshape(seq_num, 1, P),
        w1=pg.normal((P, P), 1.0 / math.sqrt(P)),
        b1=pg.normal((1, P), 0.05),
        g2=(1.0 + pg.normal((seq_num, P), 0.05)).reshape(seq_num, 1, P),
        a2=pg.normal((seq_num, P), 0.05).reshape(seq_num, 1, P),
        w2=pg.normal((1, P), 1.0 / math.sqrt(P)),
        b2=pg.normal((1, 1), 0.05),
    )

    # --- conv trunk stages: (Cout, K) weights + folded eval-BN affine ---
    def stage_cf(cin, cout, k):
        K = cin * k * k
        w = pg.normal((cout, K), 1.0 / math.sqrt(K))
        b = pg.normal((cout,), 0.05)
        s, t = _bn_fold(pg, cout, b)
        return w, s, t

    def pack(w, s, t):
        return dict(w=w.astype(jnp.bfloat16), s=s.reshape(-1, 1), t=t.reshape(-1, 1))

    # group A: conv0 (3x3 s2 + BN, no ReLU) algebraically folded into b1.1 (1x1 + BN + ReLU)
    w0, s0, t0 = stage_cf(3, mid_c, 3)                 # (mid_c, 27)
    w1, s1, t1 = stage_cf(mid_c, c2, 1)                # (c2, mid_c)
    w_eff = w1 @ (w0 * s0[:, None])                    # W1 @ diag(s0) @ W0  -> (c2, 27)
    t_eff = s1 * (w1 @ t0) + t1
    group_a = [pack(w_eff, s1, t_eff)]

    # groups B/C/D: bK.2 (3x3 s2) + bK.3 (1x1) + b(K+1).1 (1x1), all with ReLU
    def mid_group():
        return [pack(*stage_cf(c2, c2, 3)),
                pack(*stage_cf(c2, mid_c, 1)),
                pack(*stage_cf(mid_c, c2, 1))]
    group_b, group_c, group_d = mid_group(), mid_group(), mid_group()

    # --- fused tail: b4.2 / b4.3 as block-diagonal weights on the (B, S*C) layout ---
    def stage_rm(cin, cout, k):                        # row orientation (K, Cout)
        K = cin * k * k
        w = pg.normal((K, cout), 1.0 / math.sqrt(K))
        b = pg.normal((cout,), 0.05)
        s, t = _bn_fold(pg, cout, b)
        return w, s, t

    w2r, s2r, t2r = stage_rm(c2, c2, 3)                # (72, c2)
    w3r, s3r, t3r = stage_rm(c2, mid_c, 1)             # (c2, mid_c)
    eyeS = jnp.eye(S, dtype=jnp.float32)
    tail = dict(
        w2bd=jnp.kron(eyeS, w2r).astype(jnp.bfloat16),       # (S*72, S*c2)
        s2=jnp.tile(s2r.reshape(1, -1), (1, S)),
        t2=jnp.tile(t2r.reshape(1, -1), (1, S)),
        w3bd=jnp.kron(eyeS, w3r).astype(jnp.bfloat16),       # (S*c2, S*mid_c)
        s3=jnp.tile(s3r.reshape(1, -1), (1, S)),
        t3=jnp.tile(t3r.reshape(1, -1), (1, S)),
    )

    # --- channel attention: AdaptiveAvgPool folded into the first 1x1 conv weight ---
    wa1 = pg.normal((mid_c, mid_c), 1.0 / math.sqrt(mid_c))
    ba1 = pg.normal((mid_c,), 0.05)
    sa1, ta1 = _bn_fold(pg, mid_c, ba1)
    pool = jnp.kron(jnp.ones((S, 1), jnp.float32),
                    jnp.eye(mid_c, dtype=jnp.float32)) / S            # (S*mid_c, mid_c)
    conv_att = dict(
        wa1=pool @ wa1,                                                # pooled @ wa1 folded
        sa1=sa1.reshape(1, -1), ta1=ta1.reshape(1, -1),
        wa2=pg.normal((mid_c, mid_c), 1.0 / math.sqrt(mid_c)),
        ba2=pg.normal((1, mid_c), 0.05),
        expand=jnp.kron(jnp.ones((1, S), jnp.float32),
                        jnp.eye(mid_c, dtype=jnp.float32)),            # (mid_c, S*mid_c)
    )

    # --- conv_linear (Flatten + Linear(mid_c*16, P) + BN1d eval, folded).
    # Synthetic weight rows follow the kernel's flatten order k = s*C + c.
    wl = pg.normal((mid_c * S, P), 1.0 / math.sqrt(mid_c * S))
    bl = pg.normal((P,), 0.05)
    sl, tl = _bn_fold(pg, P, bl)
    conv_lin = dict(wl=wl.astype(jnp.bfloat16), sl=sl.reshape(1, P), tl=tl.reshape(1, P))

    # --- output head (W1 pre-split into y_seq / y_img halves to avoid in-kernel concat) ---
    w1h = pg.normal((2 * P, min_hidden_size), 1.0 / math.sqrt(2 * P))
    head = dict(
        w1a=w1h[:P, :], w1b=w1h[P:, :],
        b1=pg.normal((1, min_hidden_size), 0.05),
        lg=1.0 + pg.normal((1, min_hidden_size), 0.05),
        lb=pg.normal((1, min_hidden_size), 0.05),
        w2=pg.normal((min_hidden_size, num_class), 1.0 / math.sqrt(min_hidden_size)),
        b2=pg.normal((1, num_class), 0.05),
    )

    params = dict(lstm=lstm, seq_att=seq_att,
                  group_a=group_a, group_b=group_b, group_c=group_c, group_d=group_d,
                  tail=tail, conv_att=conv_att, conv_lin=conv_lin, head=head)
    cfg = dict(num_class=num_class, seq_num=seq_num, x_size=x_size, y_size=P,
               mid_c=mid_c, min_hidden_size=min_hidden_size)
    return params, cfg


# ----------------------------------------------------------------------------
# Full forward pass (matches Classifer.forward, eval semantics)
# ----------------------------------------------------------------------------
def classifier_forward(img_nchw, seq_btf, params):
    B = img_nchw.shape[0]
    num_class = params["head"]["w2"].shape[1]

    # ---- sequence branch: one fused kernel ----
    y_seq = lstm_seq_attention(seq_btf, params["lstm"], params["seq_att"])   # (B, P)

    # ---- image branch: channel-first (C, B, H, W), lane-dense (C, M) GEMM chains ----
    x = jnp.transpose(img_nchw, (1, 0, 2, 3)).astype(jnp.float32)            # (3, B, H, W)
    for grp in ("group_a", "group_b", "group_c", "group_d"):
        cols, OH, OW = im2col_3x3(x, stride=2, pad=1)
        y = conv_chain(cols.astype(jnp.bfloat16), params[grp])               # (C, B*OH*OW) f32
        x = y.reshape(y.shape[0], B, OH, OW)

    # ---- fused tail: last bottleneck + channel attention + conv_linear + head ----
    cols_e, OH, OW = im2col_3x3(x, stride=2, pad=1)                          # (72, B*16)
    S = OH * OW
    colsB = jnp.transpose(cols_e, (1, 0)).reshape(B, S * cols_e.shape[0])    # (B, S*72)
    colsB = colsB.astype(jnp.bfloat16)
    tl_, ca, cl, hd = params["tail"], params["conv_att"], params["conv_lin"], params["head"]
    out = _full_call(
        _tail_kernel,
        [colsB,
         tl_["w2bd"], tl_["s2"], tl_["t2"], tl_["w3bd"], tl_["s3"], tl_["t3"],
         ca["wa1"], ca["sa1"], ca["ta1"], ca["wa2"], ca["ba2"], ca["expand"],
         cl["wl"], cl["sl"], cl["tl"], y_seq,
         hd["w1a"], hd["w1b"], hd["b1"], hd["lg"], hd["lb"], hd["w2"], hd["b2"]],
        jax.ShapeDtypeStruct((B, num_class), jnp.float32),
    )
    return out


# ----------------------------------------------------------------------------
if __name__ == "__main__":
    B = 2
    params, cfg = build_params(num_class=3, seq_num=8, x_size=16,
                               num_layers=2, mid_c=16, min_hidden_size=32)

    key = jax.random.PRNGKey(0)
    k_img, k_seq = jax.random.split(key)
    # image is 128x128 so 5 stride-2 convs give the 4x4 map conv_linear expects
    img = jax.random.normal(k_img, (B, 3, 128, 128), dtype=jnp.float32)      # NCHW like PyTorch
    seq = jax.random.normal(k_seq, (B, cfg["seq_num"], cfg["x_size"]), dtype=jnp.float32)

    fwd = jax.jit(classifier_forward)
    out = fwd(img, seq, params)
    out = jax.block_until_ready(out)

    assert out.shape == (B, cfg["num_class"]), out.shape
    assert out.dtype == jnp.float32
    assert not bool(jnp.any(jnp.isnan(out)))
    assert not bool(jnp.any(jnp.isinf(out)))
    print("KERNEL_OK")
</pallas_src>

<mosaic_0001>
module attributes {stable_mosaic.version = 11 : i64} {
  func.func @_conv_chain_kernel(%arg0: i32, %arg1: memref<27x8192xbf16, #tpu.memory_space<vmem>>, %arg2: memref<8x27xbf16, #tpu.memory_space<vmem>>, %arg3: memref<8x1xf32, #tpu.memory_space<vmem>>, %arg4: memref<8x1xf32, #tpu.memory_space<vmem>>, %arg5: memref<8x8192xf32, #tpu.memory_space<vmem>>) attributes {dimension_semantics = [#tpu.dimension_semantics<arbitrary>], iteration_bounds = array<i64: 1>, scalar_prefetch = 0 : i64, scratch_operands = 0 : i64, tpu.core_type = #tpu.core_type<tc>, window_params = [{pipeline_mode = #tpu.pipeline_mode<synchronous>, transform_indices = @transform_0, window_bounds = array<i64: 27, 8192>}, {pipeline_mode = #tpu.pipeline_mode<synchronous>, transform_indices = @transform_1, window_bounds = array<i64: 8, 27>}, {pipeline_mode = #tpu.pipeline_mode<synchronous>, transform_indices = @transform_2, window_bounds = array<i64: 8, 1>}, {pipeline_mode = #tpu.pipeline_mode<synchronous>, transform_indices = @transform_3, window_bounds = array<i64: 8, 1>}, {pipeline_mode = #tpu.pipeline_mode<synchronous>, transform_indices = @transform_4, window_bounds = array<i64: 8, 8192>}]} {
    %c0 = arith.constant 0 : index
    %c0_0 = arith.constant 0 : index
    %0 = vector.load %arg1[%c0, %c0_0] : memref<27x8192xbf16, #tpu.memory_space<vmem>>, vector<27x8192xbf16>
    %c0_1 = arith.constant 0 : index
    %c0_2 = arith.constant 0 : index
    %1 = vector.load %arg2[%c0_1, %c0_2] : memref<8x27xbf16, #tpu.memory_space<vmem>>, vector<8x27xbf16>
    %cst = arith.constant dense<0.000000e+00> : vector<8x8192xf32>
    %2 = tpu.matmul %1, %0, %cst {dimension_numbers = #tpu.dot_dimension_numbers<[1], [0], [0], [1], [0, 0, 1, 1], [], []>} : vector<8x27xbf16>, vector<27x8192xbf16>, vector<8x8192xf32> -> vector<8x8192xf32>
    %c0_3 = arith.constant 0 : index
    %c0_4 = arith.constant 0 : index
    %3 = vector.load %arg3[%c0_3, %c0_4] : memref<8x1xf32, #tpu.memory_space<vmem>>, vector<8x1xf32>
    %4 = vector.broadcast %3 : vector<8x1xf32> to vector<8x8192xf32>
    %5 = arith.mulf %2, %4 : vector<8x8192xf32>
    %c0_5 = arith.constant 0 : index
    %c0_6 = arith.constant 0 : index
    %6 = vector.load %arg4[%c0_5, %c0_6] : memref<8x1xf32, #tpu.memory_space<vmem>>, vector<8x1xf32>
    %7 = vector.broadcast %6 : vector<8x1xf32> to vector<8x8192xf32>
    %8 = arith.addf %5, %7 : vector<8x8192xf32>
    %cst_7 = arith.constant 0.000000e+00 : f32
    %9 = vector.broadcast %cst_7 : f32 to vector<8x8192xf32>
    %10 = arith.maximumf %8, %9 : vector<8x8192xf32>
    %c0_8 = arith.constant 0 : index
    %c0_9 = arith.constant 0 : index
    %11 = vector.load %arg5[%c0_8, %c0_9] : memref<8x8192xf32, #tpu.memory_space<vmem>>, vector<8x8192xf32>
    tpu.vector_store %arg5[%c0_8, %c0_9], %10 {strides = array<i32>} : memref<8x8192xf32, #tpu.memory_space<vmem>>, vector<8x8192xf32>,
    return
  }
  func.func @transform_0(%arg0: i32) -> (i32, i32) {
    %c0_i32 = arith.constant 0 : i32
    %c0_i32_0 = arith.constant 0 : i32
    %c0_i32_1 = arith.constant 0 : i32
    return %c0_i32, %c0_i32_0 : i32, i32
  }
  func.func @transform_1(%arg0: i32) -> (i32, i32) {
    %c0_i32 = arith.constant 0 : i32
    %c0_i32_0 = arith.constant 0 : i32
    %c0_i32_1 = arith.constant 0 : i32
    return %c0_i32, %c0_i32_0 : i32, i32
  }
  func.func @transform_2(%arg0: i32) -> (i32, i32) {
    %c0_i32 = arith.constant 0 : i32
    %c0_i32_0 = arith.constant 0 : i32
    %c0_i32_1 = arith.constant 0 : i32
    return %c0_i32, %c0_i32_0 : i32, i32
  }
  func.func @transform_3(%arg0: i32) -> (i32, i32) {
    %c0_i32 = arith.constant 0 : i32
    %c0_i32_0 = arith.constant 0 : i32
    %c0_i32_1 = arith.constant 0 : i32
    return %c0_i32, %c0_i32_0 : i32, i32
  }
  func.func @transform_4(%arg0: i32) -> (i32, i32) {
    %c0_i32 = arith.constant 0 : i32
    %c0_i32_0 = arith.constant 0 : i32
    %c0_i32_1 = arith.constant 0 : i32
    return %c0_i32, %c0_i32_0 : i32, i32
  }
}

module attributes {stable_mosaic.version = 11 : i64} {
  func.func @_conv_chain_kernel(%arg0: i32, %arg1: memref<72x2048xbf16, #tpu.memory_space<vmem>>, %arg2: memref<8x72xbf16, #tpu.memory_space<vmem>>, %arg3: memref<8x1xf32, #tpu.memory_space<vmem>>, %arg4: memref<8x1xf32, #tpu.memory_space<vmem>>, %arg5: memref<16x8xbf16, #tpu.memory_space<vmem>>, %arg6: memref<16x1xf32, #tpu.memory_space<vmem>>, %arg7: memref<16x1xf32, #tpu.memory_space<vmem>>, %arg8: memref<8x16xbf16, #tpu.memory_space<vmem>>, %arg9: memref<8x1xf32, #tpu.memory_space<vmem>>, %arg10: memref<8x1xf32, #tpu.memory_space<vmem>>, %arg11: memref<8x2048xf32, #tpu.memory_space<vmem>>) attributes {dimension_semantics = [#tpu.dimension_semantics<arbitrary>], iteration_bounds = array<i64: 1>, scalar_prefetch = 0 : i64, scratch_operands = 0 : i64, tpu.core_type = #tpu.core_type<tc>, window_params = [{pipeline_mode = #tpu.pipeline_mode<synchronous>, transform_indices = @transform_0, window_bounds = array<i64: 72, 2048>}, {pipeline_mode = #tpu.pipeline_mode<synchronous>, transform_indices = @transform_1, window_bounds = array<i64: 8, 72>}, {pipeline_mode = #tpu.pipeline_mode<synchronous>, transform_indices = @transform_2, window_bounds = array<i64: 8, 1>}, {pipeline_mode = #tpu.pipeline_mode<synchronous>, transform_indices = @transform_3, window_bounds = array<i64: 8, 1>}, {pipeline_mode = #tpu.pipeline_mode<synchronous>, transform_indices = @transform_4, window_bounds = array<i64: 16, 8>}, {pipeline_mode = #tpu.pipeline_mode<synchronous>, transform_indices = @transform_5, window_bounds = array<i64: 16, 1>}, {pipeline_mode = #tpu.pipeline_mode<synchronous>, transform_indices = @transform_6, window_bounds = array<i64: 16, 1>}, {pipeline_mode = #tpu.pipeline_mode<synchronous>, transform_indices = @transform_7, window_bounds = array<i64: 8, 16>}, {pipeline_mode = #tpu.pipeline_mode<synchronous>, transform_indices = @transform_8, window_bounds = array<i64: 8, 1>}, {pipeline_mode = #tpu.pipeline_mode<synchronous>, transform_indices = @transform_9, window_bounds = array<i64: 8, 1>}, {pipeline_mode = #tpu.pipeline_mode<synchronous>, transform_indices = @transform_10, window_bounds = array<i64: 8, 2048>}]} {
    %c0 = arith.constant 0 : index
    %c0_0 = arith.constant 0 : index
    %0 = vector.load %arg1[%c0, %c0_0] : memref<72x2048xbf16, #tpu.memory_space<vmem>>, vector<72x2048xbf16>
    %c0_1 = arith.constant 0 : index
    %c0_2 = arith.constant 0 : index
    %1 = vector.load %arg2[%c0_1, %c0_2] : memref<8x72xbf16, #tpu.memory_space<vmem>>, vector<8x72xbf16>
    %cst = arith.constant dense<0.000000e+00> : vector<8x2048xf32>
    %2 = tpu.matmul %1, %0, %cst {dimension_numbers = #tpu.dot_dimension_numbers<[1], [0], [0], [1], [0, 0, 1, 1], [], []>} : vector<8x72xbf16>, vector<72x2048xbf16>, vector<8x2048xf32> -> vector<8x2048xf32>
    %c0_3 = arith.constant 0 : index
    %c0_4 = arith.constant 0 : index
    %3 = vector.load %arg3[%c0_3, %c0_4] : memref<8x1xf32, #tpu.memory_space<vmem>>, vector<8x1xf32>
    %4 = vector.broadcast %3 : vector<8x1xf32> to vector<8x2048xf32>
    %5 = arith.mulf %2, %4 : vector<8x2048xf32>
    %c0_5 = arith.constant 0 : index
    %c0_6 = arith.constant 0 : index
    %6 = vector.load %arg4[%c0_5, %c0_6] : memref<8x1xf32, #tpu.memory_space<vmem>>, vector<8x1xf32>
    %7 = vector.broadcast %6 : vector<8x1xf32> to vector<8x2048xf32>
    %8 = arith.addf %5, %7 : vector<8x2048xf32>
    %cst_7 = arith.constant 0.000000e+00 : f32
    %9 = vector.broadcast %cst_7 : f32 to vector<8x2048xf32>
    %10 = arith.maximumf %8, %9 : vector<8x2048xf32>
    %c0_8 = arith.constant 0 : index
    %c0_9 = arith.constant 0 : index
    %11 = vector.load %arg5[%c0_8, %c0_9] : memref<16x8xbf16, #tpu.memory_space<vmem>>, vector<16x8xbf16>
    %12 = arith.truncf %10 : vector<8x2048xf32> to vector<8x2048xbf16>
    %cst_10 = arith.constant dense<0.000000e+00> : vector<16x2048xf32>
    %13 = tpu.matmul %11, %12, %cst_10 {dimension_numbers = #tpu.dot_dimension_numbers<[1], [0], [0], [1], [0, 0, 1, 1], [], []>} : vector<16x8xbf16>, vector<8x2048xbf16>, vector<16x2048xf32> -> vector<16x2048xf32>
    %c0_11 = arith.constant 0 : index
    %c0_12 = arith.constant 0 : index
    %14 = vector.load %arg6[%c0_11, %c0_12] : memref<16x1xf32, #tpu.memory_space<vmem>>, vector<16x1xf32>
    %15 = vector.broadcast %14 : vector<16x1xf32> to vector<16x2048xf32>
    %16 = arith.mulf %13, %15 : vector<16x2048xf32>
    %c0_13 = arith.constant 0 : index
    %c0_14 = arith.constant 0 : index
    %17 = vector.load %arg7[%c0_13, %c0_14] : memref<16x1xf32, #tpu.memory_space<vmem>>, vector<16x1xf32>
    %18 = vector.broadcast %17 : vector<16x1xf32> to vector<16x2048xf32>
    %19 = arith.addf %16, %18 : vector<16x2048xf32>
    %cst_15 = arith.constant 0.000000e+00 : f32
    %20 = vector.broadcast %cst_15 : f32 to vector<16x2048xf32>
    %21 = arith.maximumf %19, %20 : vector<16x2048xf32>
    %c0_16 = arith.constant 0 : index
    %c0_17 = arith.constant 0 : index
    %22 = vector.load %arg8[%c0_16, %c0_17] : memref<8x16xbf16, #tpu.memory_space<vmem>>, vector<8x16xbf16>
    %23 = arith.truncf %21 : vector<16x2048xf32> to vector<16x2048xbf16>
    %cst_18 = arith.constant dense<0.000000e+00> : vector<8x2048xf32>
    %24 = tpu.matmul %22, %23, %cst_18 {dimension_numbers = #tpu.dot_dimension_numbers<[1], [0], [0], [1], [0, 0, 1, 1], [], []>} : vector<8x16xbf16>, vector<16x2048xbf16>, vector<8x2048xf32> -> vector<8x2048xf32>
    %c0_19 = arith.constant 0 : index
    %c0_20 = arith.constant 0 : index
    %25 = vector.load %arg9[%c0_19, %c0_20] : memref<8x1xf32, #tpu.memory_space<vmem>>, vector<8x1xf32>
    %26 = vector.broadcast %25 : vector<8x1xf32> to vector<8x2048xf32>
    %27 = arith.mulf %24, %26 : vector<8x2048xf32>
    %c0_21 = arith.constant 0 : index
    %c0_22 = arith.constant 0 : index
    %28 = vector.load %arg10[%c0_21, %c0_22] : memref<8x1xf32, #tpu.memory_space<vmem>>, vector<8x1xf32>
    %29 = vector.broadcast %28 : vector<8x1xf32> to vector<8x2048xf32>
    %30 = arith.addf %27, %29 : vector<8x2048xf32>
    %cst_23 = arith.constant 0.000000e+00 : f32
    %31 = vector.broadcast %cst_23 : f32 to vector<8x2048xf32>
    %32 = arith.maximumf %30, %31 : vector<8x2048xf32>
    %c0_24 = arith.constant 0 : index
    %c0_25 = arith.constant 0 : index
    %33 = vector.load %arg11[%c0_24, %c0_25] : memref<8x2048xf32, #tpu.memory_space<vmem>>, vector<8x2048xf32>
    tpu.vector_store %arg11[%c0_24, %c0_25], %32 {strides = array<i32>} : memref<8x2048xf32, #tpu.memory_space<vmem>>, vector<8x2048xf32>,
    return
  }
  func.func @transform_0(%arg0: i32) -> (i32, i32) {
    %c0_i32 = arith.constant 0 : i32
    %c0_i32_0 = arith.constant 0 : i32
    %c0_i32_1 = arith.constant 0 : i32
    return %c0_i32, %c0_i32_0 : i32, i32
  }
  func.func @transform_1(%arg0: i32) -> (i32, i32) {
    %c0_i32 = arith.constant 0 : i32
    %c0_i32_0 = arith.constant 0 : i32
    %c0_i32_1 = arith.constant 0 : i32
    return %c0_i32, %c0_i32_0 : i32, i32
  }
  func.func @transform_2(%arg0: i32) -> (i32, i32) {
    %c0_i32 = arith.constant 0 : i32
    %c0_i32_0 = arith.constant 0 : i32
    %c0_i32_1 = arith.constant 0 : i32
    return %c0_i32, %c0_i32_0 : i32, i32
  }
  func.func @transform_3(%arg0: i32) -> (i32, i32) {
    %c0_i32 = arith.constant 0 : i32
    %c0_i32_0 = arith.constant 0 : i32
    %c0_i32_1 = arith.constant 0 : i32
    return %c0_i32, %c0_i32_0 : i32, i32
  }
  func.func @transform_4(%arg0: i32) -> (i32, i32) {
    %c0_i32 = arith.constant 0 : i32
    %c0_i32_0 = arith.constant 0 : i32
    %c0_i32_1 = arith.constant 0 : i32
    return %c0_i32, %c0_i32_0 : i32, i32
  }
  func.func @transform_5(%arg0: i32) -> (i32, i32) {
    %c0_i32 = arith.constant 0 : i32
    %c0_i32_0 = arith.constant 0 : i32
    %c0_i32_1 = arith.constant 0 : i32
    return %c0_i32, %c0_i32_0 : i32, i32
  }
  func.func @transform_6(%arg0: i32) -> (i32, i32) {
    %c0_i32 = arith.constant 0 : i32
    %c0_i32_0 = arith.constant 0 : i32
    %c0_i32_1 = arith.constant 0 : i32
    return %c0_i32, %c0_i32_0 : i32, i32
  }
  func.func @transform_7(%arg0: i32) -> (i32, i32) {
    %c0_i32 = arith.constant 0 : i32
    %c0_i32_0 = arith.constant 0 : i32
    %c0_i32_1 = arith.constant 0 : i32
    return %c0_i32, %c0_i32_0 : i32, i32
  }
  func.func @transform_8(%arg0: i32) -> (i32, i32) {
    %c0_i32 = arith.constant 0 : i32
    %c0_i32_0 = arith.constant 0 : i32
    %c0_i32_1 = arith.constant 0 : i32
    return %c0_i32, %c0_i32_0 : i32, i32
  }
  func.func @transform_9(%arg0: i32) -> (i32, i32) {
    %c0_i32 = arith.constant 0 : i32
    %c0_i32_0 = arith.constant 0 : i32
    %c0_i32_1 = arith.constant 0 : i32
    return %c0_i32, %c0_i32_0 : i32, i32
  }
  func.func @transform_10(%arg0: i32) -> (i32, i32) {
    %c0_i32 = arith.constant 0 : i32
    %c0_i32_0 = arith.constant 0 : i32
    %c0_i32_1 = arith.constant 0 : i32
    return %c0_i32, %c0_i32_0 : i32, i32
  }
}

module attributes {stable_mosaic.version = 11 : i64} {
  func.func @_conv_chain_kernel(%arg0: i32, %arg1: memref<72x512xbf16, #tpu.memory_space<vmem>>, %arg2: memref<8x72xbf16, #tpu.memory_space<vmem>>, %arg3: memref<8x1xf32, #tpu.memory_space<vmem>>, %arg4: memref<8x1xf32, #tpu.memory_space<vmem>>, %arg5: memref<16x8xbf16, #tpu.memory_space<vmem>>, %arg6: memref<16x1xf32, #tpu.memory_space<vmem>>, %arg7: memref<16x1xf32, #tpu.memory_space<vmem>>, %arg8: memref<8x16xbf16, #tpu.memory_space<vmem>>, %arg9: memref<8x1xf32, #tpu.memory_space<vmem>>, %arg10: memref<8x1xf32, #tpu.memory_space<vmem>>, %arg11: memref<8x512xf32, #tpu.memory_space<vmem>>) attributes {dimension_semantics = [#tpu.dimension_semantics<arbitrary>], iteration_bounds = array<i64: 1>, scalar_prefetch = 0 : i64, scratch_operands = 0 : i64, tpu.core_type = #tpu.core_type<tc>, window_params = [{pipeline_mode = #tpu.pipeline_mode<synchronous>, transform_indices = @transform_0, window_bounds = array<i64: 72, 512>}, {pipeline_mode = #tpu.pipeline_mode<synchronous>, transform_indices = @transform_1, window_bounds = array<i64: 8, 72>}, {pipeline_mode = #tpu.pipeline_mode<synchronous>, transform_indices = @transform_2, window_bounds = array<i64: 8, 1>}, {pipeline_mode = #tpu.pipeline_mode<synchronous>, transform_indices = @transform_3, window_bounds = array<i64: 8, 1>}, {pipeline_mode = #tpu.pipeline_mode<synchronous>, transform_indices = @transform_4, window_bounds = array<i64: 16, 8>}, {pipeline_mode = #tpu.pipeline_mode<synchronous>, transform_indices = @transform_5, window_bounds = array<i64: 16, 1>}, {pipeline_mode = #tpu.pipeline_mode<synchronous>, transform_indices = @transform_6, window_bounds = array<i64: 16, 1>}, {pipeline_mode = #tpu.pipeline_mode<synchronous>, transform_indices = @transform_7, window_bounds = array<i64: 8, 16>}, {pipeline_mode = #tpu.pipeline_mode<synchronous>, transform_indices = @transform_8, window_bounds = array<i64: 8, 1>}, {pipeline_mode = #tpu.pipeline_mode<synchronous>, transform_indices = @transform_9, window_bounds = array<i64: 8, 1>}, {pipeline_mode = #tpu.pipeline_mode<synchronous>, transform_indices = @transform_10, window_bounds = array<i64: 8, 512>}]} {
    %c0 = arith.constant 0 : index
    %c0_0 = arith.constant 0 : index
    %0 = vector.load %arg1[%c0, %c0_0] : memref<72x512xbf16, #tpu.memory_space<vmem>>, vector<72x512xbf16>
    %c0_1 = arith.constant 0 : index
    %c0_2 = arith.constant 0 : index
    %1 = vector.load %arg2[%c0_1, %c0_2] : memref<8x72xbf16, #tpu.memory_space<vmem>>, vector<8x72xbf16>
    %cst = arith.constant dense<0.000000e+00> : vector<8x512xf32>
    %2 = tpu.matmul %1, %0, %cst {dimension_numbers = #tpu.dot_dimension_numbers<[1], [0], [0], [1], [0, 0, 1, 1], [], []>} : vector<8x72xbf16>, vector<72x512xbf16>, vector<8x512xf32> -> vector<8x512xf32>
    %c0_3 = arith.constant 0 : index
    %c0_4 = arith.constant 0 : index
    %3 = vector.load %arg3[%c0_3, %c0_4] : memref<8x1xf32, #tpu.memory_space<vmem>>, vector<8x1xf32>
    %4 = vector.broadcast %3 : vector<8x1xf32> to vector<8x512xf32>
    %5 = arith.mulf %2, %4 : vector<8x512xf32>
    %c0_5 = arith.constant 0 : index
    %c0_6 = arith.constant 0 : index
    %6 = vector.load %arg4[%c0_5, %c0_6] : memref<8x1xf32, #tpu.memory_space<vmem>>, vector<8x1xf32>
    %7 = vector.broadcast %6 : vector<8x1xf32> to vector<8x512xf32>
    %8 = arith.addf %5, %7 : vector<8x512xf32>
    %cst_7 = arith.constant 0.000000e+00 : f32
    %9 = vector.broadcast %cst_7 : f32 to vector<8x512xf32>
    %10 = arith.maximumf %8, %9 : vector<8x512xf32>
    %c0_8 = arith.constant 0 : index
    %c0_9 = arith.constant 0 : index
    %11 = vector.load %arg5[%c0_8, %c0_9] : memref<16x8xbf16, #tpu.memory_space<vmem>>, vector<16x8xbf16>
    %12 = arith.truncf %10 : vector<8x512xf32> to vector<8x512xbf16>
    %cst_10 = arith.constant dense<0.000000e+00> : vector<16x512xf32>
    %13 = tpu.matmul %11, %12, %cst_10 {dimension_numbers = #tpu.dot_dimension_numbers<[1], [0], [0], [1], [0, 0, 1, 1], [], []>} : vector<16x8xbf16>, vector<8x512xbf16>, vector<16x512xf32> -> vector<16x512xf32>
    %c0_11 = arith.constant 0 : index
    %c0_12 = arith.constant 0 : index
    %14 = vector.load %arg6[%c0_11, %c0_12] : memref<16x1xf32, #tpu.memory_space<vmem>>, vector<16x1xf32>
    %15 = vector.broadcast %14 : vector<16x1xf32> to vector<16x512xf32>
    %16 = arith.mulf %13, %15 : vector<16x512xf32>
    %c0_13 = arith.constant 0 : index
    %c0_14 = arith.constant 0 : index
    %17 = vector.load %arg7[%c0_13, %c0_14] : memref<16x1xf32, #tpu.memory_space<vmem>>, vector<16x1xf32>
    %18 = vector.broadcast %17 : vector<16x1xf32> to vector<16x512xf32>
    %19 = arith.addf %16, %18 : vector<16x512xf32>
    %cst_15 = arith.constant 0.000000e+00 : f32
    %20 = vector.broadcast %cst_15 : f32 to vector<16x512xf32>
    %21 = arith.maximumf %19, %20 : vector<16x512xf32>
    %c0_16 = arith.constant 0 : index
    %c0_17 = arith.constant 0 : index
    %22 = vector.load %arg8[%c0_16, %c0_17] : memref<8x16xbf16, #tpu.memory_space<vmem>>, vector<8x16xbf16>
    %23 = arith.truncf %21 : vector<16x512xf32> to vector<16x512xbf16>
    %cst_18 = arith.constant dense<0.000000e+00> : vector<8x512xf32>
    %24 = tpu.matmul %22, %23, %cst_18 {dimension_numbers = #tpu.dot_dimension_numbers<[1], [0], [0], [1], [0, 0, 1, 1], [], []>} : vector<8x16xbf16>, vector<16x512xbf16>, vector<8x512xf32> -> vector<8x512xf32>
    %c0_19 = arith.constant 0 : index
    %c0_20 = arith.constant 0 : index
    %25 = vector.load %arg9[%c0_19, %c0_20] : memref<8x1xf32, #tpu.memory_space<vmem>>, vector<8x1xf32>
    %26 = vector.broadcast %25 : vector<8x1xf32> to vector<8x512xf32>
    %27 = arith.mulf %24, %26 : vector<8x512xf32>
    %c0_21 = arith.constant 0 : index
    %c0_22 = arith.constant 0 : index
    %28 = vector.load %arg10[%c0_21, %c0_22] : memref<8x1xf32, #tpu.memory_space<vmem>>, vector<8x1xf32>
    %29 = vector.broadcast %28 : vector<8x1xf32> to vector<8x512xf32>
    %30 = arith.addf %27, %29 : vector<8x512xf32>
    %cst_23 = arith.constant 0.000000e+00 : f32
    %31 = vector.broadcast %cst_23 : f32 to vector<8x512xf32>
    %32 = arith.maximumf %30, %31 : vector<8x512xf32>
    %c0_24 = arith.constant 0 : index
    %c0_25 = arith.constant 0 : index
    %33 = vector.load %arg11[%c0_24, %c0_25] : memref<8x512xf32, #tpu.memory_space<vmem>>, vector<8x512xf32>
    tpu.vector_store %arg11[%c0_24, %c0_25], %32 {strides = array<i32>} : memref<8x512xf32, #tpu.memory_space<vmem>>, vector<8x512xf32>,
    return
  }
  func.func @transform_0(%arg0: i32) -> (i32, i32) {
    %c0_i32 = arith.constant 0 : i32
    %c0_i32_0 = arith.constant 0 : i32
    %c0_i32_1 = arith.constant 0 : i32
    return %c0_i32, %c0_i32_0 : i32, i32
  }
  func.func @transform_1(%arg0: i32) -> (i32, i32) {
    %c0_i32 = arith.constant 0 : i32
    %c0_i32_0 = arith.constant 0 : i32
    %c0_i32_1 = arith.constant 0 : i32
    return %c0_i32, %c0_i32_0 : i32, i32
  }
  func.func @transform_2(%arg0: i32) -> (i32, i32) {
    %c0_i32 = arith.constant 0 : i32
    %c0_i32_0 = arith.constant 0 : i32
    %c0_i32_1 = arith.constant 0 : i32
    return %c0_i32, %c0_i32_0 : i32, i32
  }
  func.func @transform_3(%arg0: i32) -> (i32, i32) {
    %c0_i32 = arith.constant 0 : i32
    %c0_i32_0 = arith.constant 0 : i32
    %c0_i32_1 = arith.constant 0 : i32
    return %c0_i32, %c0_i32_0 : i32, i32
  }
  func.func @transform_4(%arg0: i32) -> (i32, i32) {
    %c0_i32 = arith.constant 0 : i32
    %c0_i32_0 = arith.constant 0 : i32
    %c0_i32_1 = arith.constant 0 : i32
    return %c0_i32, %c0_i32_0 : i32, i32
  }
  func.func @transform_5(%arg0: i32) -> (i32, i32) {
    %c0_i32 = arith.constant 0 : i32
    %c0_i32_0 = arith.constant 0 : i32
    %c0_i32_1 = arith.constant 0 : i32
    return %c0_i32, %c0_i32_0 : i32, i32
  }
  func.func @transform_6(%arg0: i32) -> (i32, i32) {
    %c0_i32 = arith.constant 0 : i32
    %c0_i32_0 = arith.constant 0 : i32
    %c0_i32_1 = arith.constant 0 : i32
    return %c0_i32, %c0_i32_0 : i32, i32
  }
  func.func @transform_7(%arg0: i32) -> (i32, i32) {
    %c0_i32 = arith.constant 0 : i32
    %c0_i32_0 = arith.constant 0 : i32
    %c0_i32_1 = arith.constant 0 : i32
    return %c0_i32, %c0_i32_0 : i32, i32
  }
  func.func @transform_8(%arg0: i32) -> (i32, i32) {
    %c0_i32 = arith.constant 0 : i32
    %c0_i32_0 = arith.constant 0 : i32
    %c0_i32_1 = arith.constant 0 : i32
    return %c0_i32, %c0_i32_0 : i32, i32
  }
  func.func @transform_9(%arg0: i32) -> (i32, i32) {
    %c0_i32 = arith.constant 0 : i32
    %c0_i32_0 = arith.constant 0 : i32
    %c0_i32_1 = arith.constant 0 : i32
    return %c0_i32, %c0_i32_0 : i32, i32
  }
  func.func @transform_10(%arg0: i32) -> (i32, i32) {
    %c0_i32 = arith.constant 0 : i32
    %c0_i32_0 = arith.constant 0 : i32
    %c0_i32_1 = arith.constant 0 : i32
    return %c0_i32, %c0_i32_0 : i32, i32
  }
}

module attributes {stable_mosaic.version = 11 : i64} {
  func.func @_conv_chain_kernel(%arg0: i32, %arg1: memref<72x128xbf16, #tpu.memory_space<vmem>>, %arg2: memref<8x72xbf16, #tpu.memory_space<vmem>>, %arg3: memref<8x1xf32, #tpu.memory_space<vmem>>, %arg4: memref<8x1xf32, #tpu.memory_space<vmem>>, %arg5: memref<16x8xbf16, #tpu.memory_space<vmem>>, %arg6: memref<16x1xf32, #tpu.memory_space<vmem>>, %arg7: memref<16x1xf32, #tpu.memory_space<vmem>>, %arg8: memref<8x16xbf16, #tpu.memory_space<vmem>>, %arg9: memref<8x1xf32, #tpu.memory_space<vmem>>, %arg10: memref<8x1xf32, #tpu.memory_space<vmem>>, %arg11: memref<8x128xf32, #tpu.memory_space<vmem>>) attributes {dimension_semantics = [#tpu.dimension_semantics<arbitrary>], iteration_bounds = array<i64: 1>, scalar_prefetch = 0 : i64, scratch_operands = 0 : i64, tpu.core_type = #tpu.core_type<tc>, window_params = [{pipeline_mode = #tpu.pipeline_mode<synchronous>, transform_indices = @transform_0, window_bounds = array<i64: 72, 128>}, {pipeline_mode = #tpu.pipeline_mode<synchronous>, transform_indices = @transform_1, window_bounds = array<i64: 8, 72>}, {pipeline_mode = #tpu.pipeline_mode<synchronous>, transform_indices = @transform_2, window_bounds = array<i64: 8, 1>}, {pipeline_mode = #tpu.pipeline_mode<synchronous>, transform_indices = @transform_3, window_bounds = array<i64: 8, 1>}, {pipeline_mode = #tpu.pipeline_mode<synchronous>, transform_indices = @transform_4, window_bounds = array<i64: 16, 8>}, {pipeline_mode = #tpu.pipeline_mode<synchronous>, transform_indices = @transform_5, window_bounds = array<i64: 16, 1>}, {pipeline_mode = #tpu.pipeline_mode<synchronous>, transform_indices = @transform_6, window_bounds = array<i64: 16, 1>}, {pipeline_mode = #tpu.pipeline_mode<synchronous>, transform_indices = @transform_7, window_bounds = array<i64: 8, 16>}, {pipeline_mode = #tpu.pipeline_mode<synchronous>, transform_indices = @transform_8, window_bounds = array<i64: 8, 1>}, {pipeline_mode = #tpu.pipeline_mode<synchronous>, transform_indices = @transform_9, window_bounds = array<i64: 8, 1>}, {pipeline_mode = #tpu.pipeline_mode<synchronous>, transform_indices = @transform_10, window_bounds = array<i64: 8, 128>}]} {
    %c0 = arith.constant 0 : index
    %c0_0 = arith.constant 0 : index
    %0 = vector.load %arg1[%c0, %c0_0] : memref<72x128xbf16, #tpu.memory_space<vmem>>, vector<72x128xbf16>
    %c0_1 = arith.constant 0 : index
    %c0_2 = arith.constant 0 : index
    %1 = vector.load %arg2[%c0_1, %c0_2] : memref<8x72xbf16, #tpu.memory_space<vmem>>, vector<8x72xbf16>
    %cst = arith.constant dense<0.000000e+00> : vector<8x128xf32>
    %2 = tpu.matmul %1, %0, %cst {dimension_numbers = #tpu.dot_dimension_numbers<[1], [0], [0], [1], [0, 0, 1, 1], [], []>} : vector<8x72xbf16>, vector<72x128xbf16>, vector<8x128xf32> -> vector<8x128xf32>
    %c0_3 = arith.constant 0 : index
    %c0_4 = arith.constant 0 : index
    %3 = vector.load %arg3[%c0_3, %c0_4] : memref<8x1xf32, #tpu.memory_space<vmem>>, vector<8x1xf32>
    %4 = vector.broadcast %3 : vector<8x1xf32> to vector<8x128xf32>
    %5 = arith.mulf %2, %4 : vector<8x128xf32>
    %c0_5 = arith.constant 0 : index
    %c0_6 = arith.constant 0 : index
    %6 = vector.load %arg4[%c0_5, %c0_6] : memref<8x1xf32, #tpu.memory_space<vmem>>, vector<8x1xf32>
    %7 = vector.broadcast %6 : vector<8x1xf32> to vector<8x128xf32>
    %8 = arith.addf %5, %7 : vector<8x128xf32>
    %cst_7 = arith.constant 0.000000e+00 : f32
    %9 = vector.broadcast %cst_7 : f32 to vector<8x128xf32>
    %10 = arith.maximumf %8, %9 : vector<8x128xf32>
    %c0_8 = arith.constant 0 : index
    %c0_9 = arith.constant 0 : index
    %11 = vector.load %arg5[%c0_8, %c0_9] : memref<16x8xbf16, #tpu.memory_space<vmem>>, vector<16x8xbf16>
    %12 = arith.truncf %10 : vector<8x128xf32> to vector<8x128xbf16>
    %cst_10 = arith.constant dense<0.000000e+00> : vector<16x128xf32>
    %13 = tpu.matmul %11, %12, %cst_10 {dimension_numbers = #tpu.dot_dimension_numbers<[1], [0], [0], [1], [0, 0, 1, 1], [], []>} : vector<16x8xbf16>, vector<8x128xbf16>, vector<16x128xf32> -> vector<16x128xf32>
    %c0_11 = arith.constant 0 : index
    %c0_12 = arith.constant 0 : index
    %14 = vector.load %arg6[%c0_11, %c0_12] : memref<16x1xf32, #tpu.memory_space<vmem>>, vector<16x1xf32>
    %15 = vector.broadcast %14 : vector<16x1xf32> to vector<16x128xf32>
    %16 = arith.mulf %13, %15 : vector<16x128xf32>
    %c0_13 = arith.constant 0 : index
    %c0_14 = arith.constant 0 : index
    %17 = vector.load %arg7[%c0_13, %c0_14] : memref<16x1xf32, #tpu.memory_space<vmem>>, vector<16x1xf32>
    %18 = vector.broadcast %17 : vector<16x1xf32> to vector<16x128xf32>
    %19 = arith.addf %16, %18 : vector<16x128xf32>
    %cst_15 = arith.constant 0.000000e+00 : f32
    %20 = vector.broadcast %cst_15 : f32 to vector<16x128xf32>
    %21 = arith.maximumf %19, %20 : vector<16x128xf32>
    %c0_16 = arith.constant 0 : index
    %c0_17 = arith.constant 0 : index
    %22 = vector.load %arg8[%c0_16, %c0_17] : memref<8x16xbf16, #tpu.memory_space<vmem>>, vector<8x16xbf16>
    %23 = arith.truncf %21 : vector<16x128xf32> to vector<16x128xbf16>
    %cst_18 = arith.constant dense<0.000000e+00> : vector<8x128xf32>
    %24 = tpu.matmul %22, %23, %cst_18 {dimension_numbers = #tpu.dot_dimension_numbers<[1], [0], [0], [1], [0, 0, 1, 1], [], []>} : vector<8x16xbf16>, vector<16x128xbf16>, vector<8x128xf32> -> vector<8x128xf32>
    %c0_19 = arith.constant 0 : index
    %c0_20 = arith.constant 0 : index
    %25 = vector.load %arg9[%c0_19, %c0_20] : memref<8x1xf32, #tpu.memory_space<vmem>>, vector<8x1xf32>
    %26 = vector.broadcast %25 : vector<8x1xf32> to vector<8x128xf32>
    %27 = arith.mulf %24, %26 : vector<8x128xf32>
    %c0_21 = arith.constant 0 : index
    %c0_22 = arith.constant 0 : index
    %28 = vector.load %arg10[%c0_21, %c0_22] : memref<8x1xf32, #tpu.memory_space<vmem>>, vector<8x1xf32>
    %29 = vector.broadcast %28 : vector<8x1xf32> to vector<8x128xf32>
    %30 = arith.addf %27, %29 : vector<8x128xf32>
    %cst_23 = arith.constant 0.000000e+00 : f32
    %31 = vector.broadcast %cst_23 : f32 to vector<8x128xf32>
    %32 = arith.maximumf %30, %31 : vector<8x128xf32>
    %c0_24 = arith.constant 0 : index
    %c0_25 = arith.constant 0 : index
    %33 = vector.load %arg11[%c0_24, %c0_25] : memref<8x128xf32, #tpu.memory_space<vmem>>, vector<8x128xf32>
    tpu.vector_store %arg11[%c0_24, %c0_25], %32 {strides = array<i32>} : memref<8x128xf32, #tpu.memory_space<vmem>>, vector<8x128xf32>,
    return
  }
  func.func @transform_0(%arg0: i32) -> (i32, i32) {
    %c0_i32 = arith.constant 0 : i32
    %c0_i32_0 = arith.constant 0 : i32
    %c0_i32_1 = arith.constant 0 : i32
    return %c0_i32, %c0_i32_0 : i32, i32
  }
  func.func @transform_1(%arg0: i32) -> (i32, i32) {
    %c0_i32 = arith.constant 0 : i32
    %c0_i32_0 = arith.constant 0 : i32
    %c0_i32_1 = arith.constant 0 : i32
    return %c0_i32, %c0_i32_0 : i32, i32
  }
  func.func @transform_2(%arg0: i32) -> (i32, i32) {
    %c0_i32 = arith.constant 0 : i32
    %c0_i32_0 = arith.constant 0 : i32
    %c0_i32_1 = arith.constant 0 : i32
    return %c0_i32, %c0_i32_0 : i32, i32
  }
  func.func @transform_3(%arg0: i32) -> (i32, i32) {
    %c0_i32 = arith.constant 0 : i32
    %c0_i32_0 = arith.constant 0 : i32
    %c0_i32_1 = arith.constant 0 : i32
    return %c0_i32, %c0_i32_0 : i32, i32
  }
  func.func @transform_4(%arg0: i32) -> (i32, i32) {
    %c0_i32 = arith.constant 0 : i32
    %c0_i32_0 = arith.constant 0 : i32
    %c0_i32_1 = arith.constant 0 : i32
    return %c0_i32, %c0_i32_0 : i32, i32
  }
  func.func @transform_5(%arg0: i32) -> (i32, i32) {
    %c0_i32 = arith.constant 0 : i32
    %c0_i32_0 = arith.constant 0 : i32
    %c0_i32_1 = arith.constant 0 : i32
    return %c0_i32, %c0_i32_0 : i32, i32
  }
  func.func @transform_6(%arg0: i32) -> (i32, i32) {
    %c0_i32 = arith.constant 0 : i32
    %c0_i32_0 = arith.constant 0 : i32
    %c0_i32_1 = arith.constant 0 : i32
    return %c0_i32, %c0_i32_0 : i32, i32
  }
  func.func @transform_7(%arg0: i32) -> (i32, i32) {
    %c0_i32 = arith.constant 0 : i32
    %c0_i32_0 = arith.constant 0 : i32
    %c0_i32_1 = arith.constant 0 : i32
    return %c0_i32, %c0_i32_0 : i32, i32
  }
  func.func @transform_8(%arg0: i32) -> (i32, i32) {
    %c0_i32 = arith.constant 0 : i32
    %c0_i32_0 = arith.constant 0 : i32
    %c0_i32_1 = arith.constant 0 : i32
    return %c0_i32, %c0_i32_0 : i32, i32
  }
  func.func @transform_9(%arg0: i32) -> (i32, i32) {
    %c0_i32 = arith.constant 0 : i32
    %c0_i32_0 = arith.constant 0 : i32
    %c0_i32_1 = arith.constant 0 : i32
    return %c0_i32, %c0_i32_0 : i32, i32
  }
  func.func @transform_10(%arg0: i32) -> (i32, i32) {
    %c0_i32 = arith.constant 0 : i32
    %c0_i32_0 = arith.constant 0 : i32
    %c0_i32_1 = arith.constant 0 : i32
    return %c0_i32, %c0_i32_0 : i32, i32
  }
}

module attributes {stable_mosaic.version = 11 : i64} {
  func.func @_lstm_seqatt_kernel(%arg0: i32, %arg1: memref<16x16xf32, #tpu.memory_space<vmem>>, %arg2: memref<16x256xf32, #tpu.memory_space<vmem>>, %arg3: memref<16x256xf32, #tpu.memory_space<vmem>>, %arg4: memref<1x256xf32, #tpu.memory_space<vmem>>, %arg5: memref<64x16xf32, #tpu.memory_space<vmem>>, %arg6: memref<16x256xf32, #tpu.memory_space<vmem>>, %arg7: memref<16x256xf32, #tpu.memory_space<vmem>>, %arg8: memref<1x256xf32, #tpu.memory_space<vmem>>, %arg9: memref<64x16xf32, #tpu.memory_space<vmem>>, %arg10: memref<8x1x16xf32, #tpu.memory_space<vmem>>, %arg11: memref<8x1x16xf32, #tpu.memory_space<vmem>>, %arg12: memref<16x16xf32, #tpu.memory_space<vmem>>, %arg13: memref<1x16xf32, #tpu.memory_space<vmem>>, %arg14: memref<8x1x16xf32, #tpu.memory_space<vmem>>, %arg15: memref<8x1x16xf32, #tpu.memory_space<vmem>>, %arg16: memref<1x16xf32, #tpu.memory_space<vmem>>, %arg17: memref<1x1xf32, #tpu.memory_space<vmem>>, %arg18: memref<2x16xf32, #tpu.memory_space<vmem>>) attributes {dimension_semantics = [#tpu.dimension_semantics<arbitrary>], iteration_bounds = array<i64: 1>, scalar_prefetch = 0 : i64, scratch_operands = 0 : i64, tpu.core_type = #tpu.core_type<tc>, window_params = [{pipeline_mode = #tpu.pipeline_mode<synchronous>, transform_indices = @transform_0, window_bounds = array<i64: 16, 16>}, {pipeline_mode = #tpu.pipeline_mode<synchronous>, transform_indices = @transform_1, window_bounds = array<i64: 16, 256>}, {pipeline_mode = #tpu.pipeline_mode<synchronous>, transform_indices = @transform_2, window_bounds = array<i64: 16, 256>}, {pipeline_mode = #tpu.pipeline_mode<synchronous>, transform_indices = @transform_3, window_bounds = array<i64: 1, 256>}, {pipeline_mode = #tpu.pipeline_mode<synchronous>, transform_indices = @transform_4, window_bounds = array<i64: 64, 16>}, {pipeline_mode = #tpu.pipeline_mode<synchronous>, transform_indices = @transform_5, window_bounds = array<i64: 16, 256>}, {pipeline_mode = #tpu.pipeline_mode<synchronous>, transform_indices = @transform_6, window_bounds = array<i64: 16, 256>}, {pipeline_mode = #tpu.pipeline_mode<synchronous>, transform_indices = @transform_7, window_bounds = array<i64: 1, 256>}, {pipeline_mode = #tpu.pipeline_mode<synchronous>, transform_indices = @transform_8, window_bounds = array<i64: 64, 16>}, {pipeline_mode = #tpu.pipeline_mode<synchronous>, transform_indices = @transform_9, window_bounds = array<i64: 8, 1, 16>}, {pipeline_mode = #tpu.pipeline_mode<synchronous>, transform_indices = @transform_10, window_bounds = array<i64: 8, 1, 16>}, {pipeline_mode = #tpu.pipeline_mode<synchronous>, transform_indices = @transform_11, window_bounds = array<i64: 16, 16>}, {pipeline_mode = #tpu.pipeline_mode<synchronous>, transform_indices = @transform_12, window_bounds = array<i64: 1, 16>}, {pipeline_mode = #tpu.pipeline_mode<synchronous>, transform_indices = @transform_13, window_bounds = array<i64: 8, 1, 16>}, {pipeline_mode = #tpu.pipeline_mode<synchronous>, transform_indices = @transform_14, window_bounds = array<i64: 8, 1, 16>}, {pipeline_mode = #tpu.pipeline_mode<synchronous>, transform_indices = @transform_15, window_bounds = array<i64: 1, 16>}, {pipeline_mode = #tpu.pipeline_mode<synchronous>, transform_indices = @transform_16, window_bounds = array<i64: 1, 1>}, {pipeline_mode = #tpu.pipeline_mode<synchronous>, transform_indices = @transform_17, window_bounds = array<i64: 2, 16>}]} {
    %c0 = arith.constant 0 : index
    %c0_0 = arith.constant 0 : index
    %0 = vector.load %arg1[%c0, %c0_0] : memref<16x16xf32, #tpu.memory_space<vmem>>, vector<16x16xf32>
    %c0_1 = arith.constant 0 : index
    %c0_2 = arith.constant 0 : index
    %1 = vector.load %arg2[%c0_1, %c0_2] : memref<16x256xf32, #tpu.memory_space<vmem>>, vector<16x256xf32>
    %cst = arith.constant dense<0.000000e+00> : vector<16x256xf32>
    %2 = tpu.matmul %0, %1, %cst {dimension_numbers = #tpu.dot_dimension_numbers<[1], [0], [0], [1], [0, 0, 1, 1], [], []>} : vector<16x16xf32>, vector<16x256xf32>, vector<16x256xf32> -> vector<16x256xf32>
    %c0_3 = arith.constant 0 : index
    %c0_4 = arith.constant 0 : index
    %3 = vector.load %arg4[%c0_3, %c0_4] : memref<1x256xf32, #tpu.memory_space<vmem>>, vector<1x256xf32>
    %4 = vector.broadcast %3 : vector<1x256xf32> to vector<16x256xf32>
    %5 = arith.addf %2, %4 : vector<16x256xf32>
    %6 = vector.extract_strided_slice %5 {offsets = [0, 0], sizes = [2, 256], strides = [1, 1]} : vector<16x256xf32> to vector<2x256xf32>
    %7 = vector.extract_strided_slice %5 {offsets = [2, 0], sizes = [2, 256], strides = [1, 1]} : vector<16x256xf32> to vector<2x256xf32>
    %8 = vector.extract_strided_slice %5 {offsets = [4, 0], sizes = [2, 256], strides = [1, 1]} : vector<16x256xf32> to vector<2x256xf32>
    %9 = vector.extract_strided_slice %5 {offsets = [6, 0], sizes = [2, 256], strides = [1, 1]} : vector<16x256xf32> to vector<2x256xf32>
    %10 = vector.extract_strided_slice %5 {offsets = [8, 0], sizes = [2, 256], strides = [1, 1]} : vector<16x256xf32> to vector<2x256xf32>
    %11 = vector.extract_strided_slice %5 {offsets = [10, 0], sizes = [2, 256], strides = [1, 1]} : vector<16x256xf32> to vector<2x256xf32>
    %12 = vector.extract_strided_slice %5 {offsets = [12, 0], sizes = [2, 256], strides = [1, 1]} : vector<16x256xf32> to vector<2x256xf32>
    %13 = vector.extract_strided_slice %5 {offsets = [14, 0], sizes = [2, 256], strides = [1, 1]} : vector<16x256xf32> to vector<2x256xf32>
    %c0_5 = arith.constant 0 : index
    %c0_6 = arith.constant 0 : index
    %14 = vector.load %arg3[%c0_5, %c0_6] : memref<16x256xf32, #tpu.memory_space<vmem>>, vector<16x256xf32>
    %c0_7 = arith.constant 0 : index
    %c0_8 = arith.constant 0 : index
    %15 = vector.load %arg5[%c0_7, %c0_8] : memref<64x16xf32, #tpu.memory_space<vmem>>, vector<64x16xf32>
    %cst_9 = arith.constant 0.000000e+00 : f32
    %16 = vector.broadcast %cst_9 : f32 to vector<2x16xf32>
    %cst_10 = arith.constant 0.000000e+00 : f32
    %17 = vector.broadcast %cst_10 : f32 to vector<2x64xf32>
    %cst_11 = arith.constant dense<0.000000e+00> : vector<2x256xf32>
    %18 = tpu.matmul %16, %14, %cst_11 {dimension_numbers = #tpu.dot_dimension_numbers<[1], [0], [0], [1], [0, 0, 1, 1], [], []>} : vector<2x16xf32>, vector<16x256xf32>, vector<2x256xf32> -> vector<2x256xf32>
    %19 = arith.addf %6, %18 : vector<2x256xf32>
    %20 = vector.extract_strided_slice %19 {offsets = [0, 0], sizes = [2, 64], strides = [1, 1]} : vector<2x256xf32> to vector<2x64xf32>
    %21 = arith.negf %20 : vector<2x64xf32>
    %22 = math.exp %21 : vector<2x64xf32>
    %cst_12 = arith.constant 1.000000e+00 : f32
    %23 = vector.broadcast %cst_12 : f32 to vector<2x64xf32>
    %24 = arith.addf %23, %22 : vector<2x64xf32>
    %25 = arith.divf %23, %24 : vector<2x64xf32>
    %26 = vector.extract_strided_slice %19 {offsets = [0, 64], sizes = [2, 64], strides = [1, 1]} : vector<2x256xf32> to vector<2x64xf32>
    %27 = arith.negf %26 : vector<2x64xf32>
    %28 = math.exp %27 : vector<2x64xf32>
    %cst_13 = arith.constant 1.000000e+00 : f32
    %29 = vector.broadcast %cst_13 : f32 to vector<2x64xf32>
    %30 = arith.addf %29, %28 : vector<2x64xf32>
    %31 = arith.divf %29, %30 : vector<2x64xf32>
    %32 = vector.extract_strided_slice %19 {offsets = [0, 128], sizes = [2, 64], strides = [1, 1]} : vector<2x256xf32> to vector<2x64xf32>
    %33 = math.tanh %32 : vector<2x64xf32>
    %34 = vector.extract_strided_slice %19 {offsets = [0, 192], sizes = [2, 64], strides = [1, 1]} : vector<2x256xf32> to vector<2x64xf32>
    %35 = arith.negf %34 : vector<2x64xf32>
    %36 = math.exp %35 : vector<2x64xf32>
    %cst_14 = arith.constant 1.000000e+00 : f32
    %37 = vector.broadcast %cst_14 : f32 to vector<2x64xf32>
    %38 = arith.addf %37, %36 : vector<2x64xf32>
    %39 = arith.divf %37, %38 : vector<2x64xf32>
    %40 = arith.mulf %31, %17 : vector<2x64xf32>
    %41 = arith.mulf %25, %33 : vector<2x64xf32>
    %42 = arith.addf %40, %41 : vector<2x64xf32>
    %43 = math.tanh %42 : vector<2x64xf32>
    %44 = arith.mulf %39, %43 : vector<2x64xf32>
    %cst_15 = arith.constant dense<0.000000e+00> : vector<2x16xf32>
    %45 = tpu.matmul %44, %15, %cst_15 {dimension_numbers = #tpu.dot_dimension_numbers<[1], [0], [0], [1], [0, 0, 1, 1], [], []>} : vector<2x64xf32>, vector<64x16xf32>, vector<2x16xf32> -> vector<2x16xf32>
    %cst_16 = arith.constant dense<0.000000e+00> : vector<2x256xf32>
    %46 = tpu.matmul %45, %14, %cst_16 {dimension_numbers = #tpu.dot_dimension_numbers<[1], [0], [0], [1], [0, 0, 1, 1], [], []>} : vector<2x16xf32>, vector<16x256xf32>, vector<2x256xf32> -> vector<2x256xf32>
    %47 = arith.addf %7, %46 : vector<2x256xf32>
    %48 = vector.extract_strided_slice %47 {offsets = [0, 0], sizes = [2, 64], strides = [1, 1]} : vector<2x256xf32> to vector<2x64xf32>
    %49 = arith.negf %48 : vector<2x64xf32>
    %50 = math.exp %49 : vector<2x64xf32>
    %cst_17 = arith.constant 1.000000e+00 : f32
    %51 = vector.broadcast %cst_17 : f32 to vector<2x64xf32>
    %52 = arith.addf %51, %50 : vector<2x64xf32>
    %53 = arith.divf %51, %52 : vector<2x64xf32>
    %54 = vector.extract_strided_slice %47 {offsets = [0, 64], sizes = [2, 64], strides = [1, 1]} : vector<2x256xf32> to vector<2x64xf32>
    %55 = arith.negf %54 : vector<2x64xf32>
    %56 = math.exp %55 : vector<2x64xf32>
    %cst_18 = arith.constant 1.000000e+00 : f32
    %57 = vector.broadcast %cst_18 : f32 to vector<2x64xf32>
    %58 = arith.addf %57, %56 : vector<2x64xf32>
    %59 = arith.divf %57, %58 : vector<2x64xf32>
    %60 = vector.extract_strided_slice %47 {offsets = [0, 128], sizes = [2, 64], strides = [1, 1]} : vector<2x256xf32> to vector<2x64xf32>
    %61 = math.tanh %60 : vector<2x64xf32>
    %62 = vector.extract_strided_slice %47 {offsets = [0, 192], sizes = [2, 64], strides = [1, 1]} : vector<2x256xf32> to vector<2x64xf32>
    %63 = arith.negf %62 : vector<2x64xf32>
    %64 = math.exp %63 : vector<2x64xf32>
    %cst_19 = arith.constant 1.000000e+00 : f32
    %65 = vector.broadcast %cst_19 : f32 to vector<2x64xf32>
    %66 = arith.addf %65, %64 : vector<2x64xf32>
    %67 = arith.divf %65, %66 : vector<2x64xf32>
    %68 = arith.mulf %59, %42 : vector<2x64xf32>
    %69 = arith.mulf %53, %61 : vector<2x64xf32>
    %70 = arith.addf %68, %69 : vector<2x64xf32>
    %71 = math.tanh %70 : vector<2x64xf32>
    %72 = arith.mulf %67, %71 : vector<2x64xf32>
    %cst_20 = arith.constant dense<0.000000e+00> : vector<2x16xf32>
    %73 = tpu.matmul %72, %15, %cst_20 {dimension_numbers = #tpu.dot_dimension_numbers<[1], [0], [0], [1], [0, 0, 1, 1], [], []>} : vector<2x64xf32>, vector<64x16xf32>, vector<2x16xf32> -> vector<2x16xf32>
    %cst_21 = arith.constant dense<0.000000e+00> : vector<2x256xf32>
    %74 = tpu.matmul %73, %14, %cst_21 {dimension_numbers = #tpu.dot_dimension_numbers<[1], [0], [0], [1], [0, 0, 1, 1], [], []>} : vector<2x16xf32>, vector<16x256xf32>, vector<2x256xf32> -> vector<2x256xf32>
    %75 = arith.addf %8, %74 : vector<2x256xf32>
    %76 = vector.extract_strided_slice %75 {offsets = [0, 0], sizes = [2, 64], strides = [1, 1]} : vector<2x256xf32> to vector<2x64xf32>
    %77 = arith.negf %76 : vector<2x64xf32>
    %78 = math.exp %77 : vector<2x64xf32>
    %cst_22 = arith.constant 1.000000e+00 : f32
    %79 = vector.broadcast %cst_22 : f32 to vector<2x64xf32>
    %80 = arith.addf %79, %78 : vector<2x64xf32>
    %81 = arith.divf %79, %80 : vector<2x64xf32>
    %82 = vector.extract_strided_slice %75 {offsets = [0, 64], sizes = [2, 64], strides = [1, 1]} : vector<2x256xf32> to vector<2x64xf32>
    %83 = arith.negf %82 : vector<2x64xf32>
    %84 = math.exp %83 : vector<2x64xf32>
    %cst_23 = arith.constant 1.000000e+00 : f32
    %85 = vector.broadcast %cst_23 : f32 to vector<2x64xf32>
    %86 = arith.addf %85, %84 : vector<2x64xf32>
    %87 = arith.divf %85, %86 : vector<2x64xf32>
    %88 = vector.extract_strided_slice %75 {offsets = [0, 128], sizes = [2, 64], strides = [1, 1]} : vector<2x256xf32> to vector<2x64xf32>
    %89 = math.tanh %88 : vector<2x64xf32>
    %90 = vector.extract_strided_slice %75 {offsets = [0, 192], sizes = [2, 64], strides = [1, 1]} : vector<2x256xf32> to vector<2x64xf32>
    %91 = arith.negf %90 : vector<2x64xf32>
    %92 = math.exp %91 : vector<2x64xf32>
    %cst_24 = arith.constant 1.000000e+00 : f32
    %93 = vector.broadcast %cst_24 : f32 to vector<2x64xf32>
    %94 = arith.addf %93, %92 : vector<2x64xf32>
    %95 = arith.divf %93, %94 : vector<2x64xf32>
    %96 = arith.mulf %87, %70 : vector<2x64xf32>
    %97 = arith.mulf %81, %89 : vector<2x64xf32>
    %98 = arith.addf %96, %97 : vector<2x64xf32>
    %99 = math.tanh %98 : vector<2x64xf32>
    %100 = arith.mulf %95, %99 : vector<2x64xf32>
    %cst_25 = arith.constant dense<0.000000e+00> : vector<2x16xf32>
    %101 = tpu.matmul %100, %15, %cst_25 {dimension_numbers = #tpu.dot_dimension_numbers<[1], [0], [0], [1], [0, 0, 1, 1], [], []>} : vector<2x64xf32>, vector<64x16xf32>, vector<2x16xf32> -> vector<2x16xf32>
    %cst_26 = arith.constant dense<0.000000e+00> : vector<2x256xf32>
    %102 = tpu.matmul %101, %14, %cst_26 {dimension_numbers = #tpu.dot_dimension_numbers<[1], [0], [0], [1], [0, 0, 1, 1], [], []>} : vector<2x16xf32>, vector<16x256xf32>, vector<2x256xf32> -> vector<2x256xf32>
    %103 = arith.addf %9, %102 : vector<2x256xf32>
    %104 = vector.extract_strided_slice %103 {offsets = [0, 0], sizes = [2, 64], strides = [1, 1]} : vector<2x256xf32> to vector<2x64xf32>
    %105 = arith.negf %104 : vector<2x64xf32>
    %106 = math.exp %105 : vector<2x64xf32>
    %cst_27 = arith.constant 1.000000e+00 : f32
    %107 = vector.broadcast %cst_27 : f32 to vector<2x64xf32>
    %108 = arith.addf %107, %106 : vector<2x64xf32>
    %109 = arith.divf %107, %108 : vector<2x64xf32>
    %110 = vector.extract_strided_slice %103 {offsets = [0, 64], sizes = [2, 64], strides = [1, 1]} : vector<2x256xf32> to vector<2x64xf32>
    %111 = arith.negf %110 : vector<2x64xf32>
    %112 = math.exp %111 : vector<2x64xf32>
    %cst_28 = arith.constant 1.000000e+00 : f32
    %113 = vector.broadcast %cst_28 : f32 to vector<2x64xf32>
    %114 = arith.addf %113, %112 : vector<2x64xf32>
    %115 = arith.divf %113, %114 : vector<2x64xf32>
    %116 = vector.extract_strided_slice %103 {offsets = [0, 128], sizes = [2, 64], strides = [1, 1]} : vector<2x256xf32> to vector<2x64xf32>
    %117 = math.tanh %116 : vector<2x64xf32>
    %118 = vector.extract_strided_slice %103 {offsets = [0, 192], sizes = [2, 64], strides = [1, 1]} : vector<2x256xf32> to vector<2x64xf32>
    %119 = arith.negf %118 : vector<2x64xf32>
    %120 = math.exp %119 : vector<2x64xf32>
    %cst_29 = arith.constant 1.000000e+00 : f32
    %121 = vector.broadcast %cst_29 : f32 to vector<2x64xf32>
    %122 = arith.addf %121, %120 : vector<2x64xf32>
    %123 = arith.divf %121, %122 : vector<2x64xf32>
    %124 = arith.mulf %115, %98 : vector<2x64xf32>
    %125 = arith.mulf %109, %117 : vector<2x64xf32>
    %126 = arith.addf %124, %125 : vector<2x64xf32>
    %127 = math.tanh %126 : vector<2x64xf32>
    %128 = arith.mulf %123, %127 : vector<2x64xf32>
    %cst_30 = arith.constant dense<0.000000e+00> : vector<2x16xf32>
    %129 = tpu.matmul %128, %15, %cst_30 {dimension_numbers = #tpu.dot_dimension_numbers<[1], [0], [0], [1], [0, 0, 1, 1], [], []>} : vector<2x64xf32>, vector<64x16xf32>, vector<2x16xf32> -> vector<2x16xf32>
    %cst_31 = arith.constant dense<0.000000e+00> : vector<2x256xf32>
    %130 = tpu.matmul %129, %14, %cst_31 {dimension_numbers = #tpu.dot_dimension_numbers<[1], [0], [0], [1], [0, 0, 1, 1], [], []>} : vector<2x16xf32>, vector<16x256xf32>, vector<2x256xf32> -> vector<2x256xf32>
    %131 = arith.addf %10, %130 : vector<2x256xf32>
    %132 = vector.extract_strided_slice %131 {offsets = [0, 0], sizes = [2, 64], strides = [1, 1]} : vector<2x256xf32> to vector<2x64xf32>
    %133 = arith.negf %132 : vector<2x64xf32>
    %134 = math.exp %133 : vector<2x64xf32>
    %cst_32 = arith.constant 1.000000e+00 : f32
    %135 = vector.broadcast %cst_32 : f32 to vector<2x64xf32>
    %136 = arith.addf %135, %134 : vector<2x64xf32>
    %137 = arith.divf %135, %136 : vector<2x64xf32>
    %138 = vector.extract_strided_slice %131 {offsets = [0, 64], sizes = [2, 64], strides = [1, 1]} : vector<2x256xf32> to vector<2x64xf32>
    %139 = arith.negf %138 : vector<2x64xf32>
    %140 = math.exp %139 : vector<2x64xf32>
    %cst_33 = arith.constant 1.000000e+00 : f32
    %141 = vector.broadcast %cst_33 : f32 to vector<2x64xf32>
    %142 = arith.addf %141, %140 : vector<2x64xf32>
    %143 = arith.divf %141, %142 : vector<2x64xf32>
    %144 = vector.extract_strided_slice %131 {offsets = [0, 128], sizes = [2, 64], strides = [1, 1]} : vector<2x256xf32> to vector<2x64xf32>
    %145 = math.tanh %144 : vector<2x64xf32>
    %146 = vector.extract_strided_slice %131 {offsets = [0, 192], sizes = [2, 64], strides = [1, 1]} : vector<2x256xf32> to vector<2x64xf32>
    %147 = arith.negf %146 : vector<2x64xf32>
    %148 = math.exp %147 : vector<2x64xf32>
    %cst_34 = arith.constant 1.000000e+00 : f32
    %149 = vector.broadcast %cst_34 : f32 to vector<2x64xf32>
    %150 = arith.addf %149, %148 : vector<2x64xf32>
    %151 = arith.divf %149, %150 : vector<2x64xf32>
    %152 = arith.mulf %143, %126 : vector<2x64xf32>
    %153 = arith.mulf %137, %145 : vector<2x64xf32>
    %154 = arith.addf %152, %153 : vector<2x64xf32>
    %155 = math.tanh %154 : vector<2x64xf32>
    %156 = arith.mulf %151, %155 : vector<2x64xf32>
    %cst_35 = arith.constant dense<0.000000e+00> : vector<2x16xf32>
    %157 = tpu.matmul %156, %15, %cst_35 {dimension_numbers = #tpu.dot_dimension_numbers<[1], [0], [0], [1], [0, 0, 1, 1], [], []>} : vector<2x64xf32>, vector<64x16xf32>, vector<2x16xf32> -> vector<2x16xf32>
    %cst_36 = arith.constant dense<0.000000e+00> : vector<2x256xf32>
    %158 = tpu.matmul %157, %14, %cst_36 {dimension_numbers = #tpu.dot_dimension_numbers<[1], [0], [0], [1], [0, 0, 1, 1], [], []>} : vector<2x16xf32>, vector<16x256xf32>, vector<2x256xf32> -> vector<2x256xf32>
    %159 = arith.addf %11, %158 : vector<2x256xf32>
    %160 = vector.extract_strided_slice %159 {offsets = [0, 0], sizes = [2, 64], strides = [1, 1]} : vector<2x256xf32> to vector<2x64xf32>
    %161 = arith.negf %160 : vector<2x64xf32>
    %162 = math.exp %161 : vector<2x64xf32>
    %cst_37 = arith.constant 1.000000e+00 : f32
    %163 = vector.broadcast %cst_37 : f32 to vector<2x64xf32>
    %164 = arith.addf %163, %162 : vector<2x64xf32>
    %165 = arith.divf %163, %164 : vector<2x64xf32>
    %166 = vector.extract_strided_slice %159 {offsets = [0, 64], sizes = [2, 64], strides = [1, 1]} : vector<2x256xf32> to vector<2x64xf32>
    %167 = arith.negf %166 : vector<2x64xf32>
    %168 = math.exp %167 : vector<2x64xf32>
    %cst_38 = arith.constant 1.000000e+00 : f32
    %169 = vector.broadcast %cst_38 : f32 to vector<2x64xf32>
    %170 = arith.addf %169, %168 : vector<2x64xf32>
    %171 = arith.divf %169, %170 : vector<2x64xf32>
    %172 = vector.extract_strided_slice %159 {offsets = [0, 128], sizes = [2, 64], strides = [1, 1]} : vector<2x256xf32> to vector<2x64xf32>
    %173 = math.tanh %172 : vector<2x64xf32>
    %174 = vector.extract_strided_slice %159 {offsets = [0, 192], sizes = [2, 64], strides = [1, 1]} : vector<2x256xf32> to vector<2x64xf32>
    %175 = arith.negf %174 : vector<2x64xf32>
    %176 = math.exp %175 : vector<2x64xf32>
    %cst_39 = arith.constant 1.000000e+00 : f32
    %177 = vector.broadcast %cst_39 : f32 to vector<2x64xf32>
    %178 = arith.addf %177, %176 : vector<2x64xf32>
    %179 = arith.divf %177, %178 : vector<2x64xf32>
    %180 = arith.mulf %171, %154 : vector<2x64xf32>
    %181 = arith.mulf %165, %173 : vector<2x64xf32>
    %182 = arith.addf %180, %181 : vector<2x64xf32>
    %183 = math.tanh %182 : vector<2x64xf32>
    %184 = arith.mulf %179, %183 : vector<2x64xf32>
    %cst_40 = arith.constant dense<0.000000e+00> : vector<2x16xf32>
    %185 = tpu.matmul %184, %15, %cst_40 {dimension_numbers = #tpu.dot_dimension_numbers<[1], [0], [0], [1], [0, 0, 1, 1], [], []>} : vector<2x64xf32>, vector<64x16xf32>, vector<2x16xf32> -> vector<2x16xf32>
    %cst_41 = arith.constant dense<0.000000e+00> : vector<2x256xf32>
    %186 = tpu.matmul %185, %14, %cst_41 {dimension_numbers = #tpu.dot_dimension_numbers<[1], [0], [0], [1], [0, 0, 1, 1], [], []>} : vector<2x16xf32>, vector<16x256xf32>, vector<2x256xf32> -> vector<2x256xf32>
    %187 = arith.addf %12, %186 : vector<2x256xf32>
    %188 = vector.extract_strided_slice %187 {offsets = [0, 0], sizes = [2, 64], strides = [1, 1]} : vector<2x256xf32> to vector<2x64xf32>
    %189 = arith.negf %188 : vector<2x64xf32>
    %190 = math.exp %189 : vector<2x64xf32>
    %cst_42 = arith.constant 1.000000e+00 : f32
    %191 = vector.broadcast %cst_42 : f32 to vector<2x64xf32>
    %192 = arith.addf %191, %190 : vector<2x64xf32>
    %193 = arith.divf %191, %192 : vector<2x64xf32>
    %194 = vector.extract_strided_slice %187 {offsets = [0, 64], sizes = [2, 64], strides = [1, 1]} : vector<2x256xf32> to vector<2x64xf32>
    %195 = arith.negf %194 : vector<2x64xf32>
    %196 = math.exp %195 : vector<2x64xf32>
    %cst_43 = arith.constant 1.000000e+00 : f32
    %197 = vector.broadcast %cst_43 : f32 to vector<2x64xf32>
    %198 = arith.addf %197, %196 : vector<2x64xf32>
    %199 = arith.divf %197, %198 : vector<2x64xf32>
    %200 = vector.extract_strided_slice %187 {offsets = [0, 128], sizes = [2, 64], strides = [1, 1]} : vector<2x256xf32> to vector<2x64xf32>
    %201 = math.tanh %200 : vector<2x64xf32>
    %202 = vector.extract_strided_slice %187 {offsets = [0, 192], sizes = [2, 64], strides = [1, 1]} : vector<2x256xf32> to vector<2x64xf32>
    %203 = arith.negf %202 : vector<2x64xf32>
    %204 = math.exp %203 : vector<2x64xf32>
    %cst_44 = arith.constant 1.000000e+00 : f32
    %205 = vector.broadcast %cst_44 : f32 to vector<2x64xf32>
    %206 = arith.addf %205, %204 : vector<2x64xf32>
    %207 = arith.divf %205, %206 : vector<2x64xf32>
    %208 = arith.mulf %199, %182 : vector<2x64xf32>
    %209 = arith.mulf %193, %201 : vector<2x64xf32>
    %210 = arith.addf %208, %209 : vector<2x64xf32>
    %211 = math.tanh %210 : vector<2x64xf32>
    %212 = arith.mulf %207, %211 : vector<2x64xf32>
    %cst_45 = arith.constant dense<0.000000e+00> : vector<2x16xf32>
    %213 = tpu.matmul %212, %15, %cst_45 {dimension_numbers = #tpu.dot_dimension_numbers<[1], [0], [0], [1], [0, 0, 1, 1], [], []>} : vector<2x64xf32>, vector<64x16xf32>, vector<2x16xf32> -> vector<2x16xf32>
    %cst_46 = arith.constant dense<0.000000e+00> : vector<2x256xf32>
    %214 = tpu.matmul %213, %14, %cst_46 {dimension_numbers = #tpu.dot_dimension_numbers<[1], [0], [0], [1], [0, 0, 1, 1], [], []>} : vector<2x16xf32>, vector<16x256xf32>, vector<2x256xf32> -> vector<2x256xf32>
    %215 = arith.addf %13, %214 : vector<2x256xf32>
    %216 = vector.extract_strided_slice %215 {offsets = [0, 0], sizes = [2, 64], strides = [1, 1]} : vector<2x256xf32> to vector<2x64xf32>
    %217 = arith.negf %216 : vector<2x64xf32>
    %218 = math.exp %217 : vector<2x64xf32>
    %cst_47 = arith.constant 1.000000e+00 : f32
    %219 = vector.broadcast %cst_47 : f32 to vector<2x64xf32>
    %220 = arith.addf %219, %218 : vector<2x64xf32>
    %221 = arith.divf %219, %220 : vector<2x64xf32>
    %222 = vector.extract_strided_slice %215 {offsets = [0, 64], sizes = [2, 64], strides = [1, 1]} : vector<2x256xf32> to vector<2x64xf32>
    %223 = arith.negf %222 : vector<2x64xf32>
    %224 = math.exp %223 : vector<2x64xf32>
    %cst_48 = arith.constant 1.000000e+00 : f32
    %225 = vector.broadcast %cst_48 : f32 to vector<2x64xf32>
    %226 = arith.addf %225, %224 : vector<2x64xf32>
    %227 = arith.divf %225, %226 : vector<2x64xf32>
    %228 = vector.extract_strided_slice %215 {offsets = [0, 128], sizes = [2, 64], strides = [1, 1]} : vector<2x256xf32> to vector<2x64xf32>
    %229 = math.tanh %228 : vector<2x64xf32>
    %230 = vector.extract_strided_slice %215 {offsets = [0, 192], sizes = [2, 64], strides = [1, 1]} : vector<2x256xf32> to vector<2x64xf32>
    %231 = arith.negf %230 : vector<2x64xf32>
    %232 = math.exp %231 : vector<2x64xf32>
    %cst_49 = arith.constant 1.000000e+00 : f32
    %233 = vector.broadcast %cst_49 : f32 to vector<2x64xf32>
    %234 = arith.addf %233, %232 : vector<2x64xf32>
    %235 = arith.divf %233, %234 : vector<2x64xf32>
    %236 = arith.mulf %227, %210 : vector<2x64xf32>
    %237 = arith.mulf %221, %229 : vector<2x64xf32>
    %238 = arith.addf %236, %237 : vector<2x64xf32>
    %239 = math.tanh %238 : vector<2x64xf32>
    %240 = arith.mulf %235, %239 : vector<2x64xf32>
    %cst_50 = arith.constant dense<0.000000e+00> : vector<2x16xf32>
    %241 = tpu.matmul %240, %15, %cst_50 {dimension_numbers = #tpu.dot_dimension_numbers<[1], [0], [0], [1], [0, 0, 1, 1], [], []>} : vector<2x64xf32>, vector<64x16xf32>, vector<2x16xf32> -> vector<2x16xf32>
    %c0_51 = arith.constant 0 : index
    %c0_52 = arith.constant 0 : index
    %242 = vector.load %arg6[%c0_51, %c0_52] : memref<16x256xf32, #tpu.memory_space<vmem>>, vector<16x256xf32>
    %c0_53 = arith.constant 0 : index
    %c0_54 = arith.constant 0 : index
    %243 = vector.load %arg8[%c0_53, %c0_54] : memref<1x256xf32, #tpu.memory_space<vmem>>, vector<1x256xf32>
    %cst_55 = arith.constant dense<0.000000e+00> : vector<2x256xf32>
    %244 = tpu.matmul %45, %242, %cst_55 {dimension_numbers = #tpu.dot_dimension_numbers<[1], [0], [0], [1], [0, 0, 1, 1], [], []>} : vector<2x16xf32>, vector<16x256xf32>, vector<2x256xf32> -> vector<2x256xf32>
    %245 = vector.broadcast %243 : vector<1x256xf32> to vector<2x256xf32>
    %246 = arith.addf %244, %245 : vector<2x256xf32>
    %cst_56 = arith.constant dense<0.000000e+00> : vector<2x256xf32>
    %247 = tpu.matmul %73, %242, %cst_56 {dimension_numbers = #tpu.dot_dimension_numbers<[1], [0], [0], [1], [0, 0, 1, 1], [], []>} : vector<2x16xf32>, vector<16x256xf32>, vector<2x256xf32> -> vector<2x256xf32>
    %248 = vector.broadcast %243 : vector<1x256xf32> to vector<2x256xf32>
    %249 = arith.addf %247, %248 : vector<2x256xf32>
    %cst_57 = arith.constant dense<0.000000e+00> : vector<2x256xf32>
    %250 = tpu.matmul %101, %242, %cst_57 {dimension_numbers = #tpu.dot_dimension_numbers<[1], [0], [0], [1], [0, 0, 1, 1], [], []>} : vector<2x16xf32>, vector<16x256xf32>, vector<2x256xf32> -> vector<2x256xf32>
    %251 = vector.broadcast %243 : vector<1x256xf32> to vector<2x256xf32>
    %252 = arith.addf %250, %251 : vector<2x256xf32>
    %cst_58 = arith.constant dense<0.000000e+00> : vector<2x256xf32>
    %253 = tpu.matmul %129, %242, %cst_58 {dimension_numbers = #tpu.dot_dimension_numbers<[1], [0], [0], [1], [0, 0, 1, 1], [], []>} : vector<2x16xf32>, vector<16x256xf32>, vector<2x256xf32> -> vector<2x256xf32>
    %254 = vector.broadcast %243 : vector<1x256xf32> to vector<2x256xf32>
    %255 = arith.addf %253, %254 : vector<2x256xf32>
    %cst_59 = arith.constant dense<0.000000e+00> : vector<2x256xf32>
    %256 = tpu.matmul %157, %242, %cst_59 {dimension_numbers = #tpu.dot_dimension_numbers<[1], [0], [0], [1], [0, 0, 1, 1], [], []>} : vector<2x16xf32>, vector<16x256xf32>, vector<2x256xf32> -> vector<2x256xf32>
    %257 = vector.broadcast %243 : vector<1x256xf32> to vector<2x256xf32>
    %258 = arith.addf %256, %257 : vector<2x256xf32>
    %cst_60 = arith.constant dense<0.000000e+00> : vector<2x256xf32>
    %259 = tpu.matmul %185, %242, %cst_60 {dimension_numbers = #tpu.dot_dimension_numbers<[1], [0], [0], [1], [0, 0, 1, 1], [], []>} : vector<2x16xf32>, vector<16x256xf32>, vector<2x256xf32> -> vector<2x256xf32>
    %260 = vector.broadcast %243 : vector<1x256xf32> to vector<2x256xf32>
    %261 = arith.addf %259, %260 : vector<2x256xf32>
    %cst_61 = arith.constant dense<0.000000e+00> : vector<2x256xf32>
    %262 = tpu.matmul %213, %242, %cst_61 {dimension_numbers = #tpu.dot_dimension_numbers<[1], [0], [0], [1], [0, 0, 1, 1], [], []>} : vector<2x16xf32>, vector<16x256xf32>, vector<2x256xf32> -> vector<2x256xf32>
    %263 = vector.broadcast %243 : vector<1x256xf32> to vector<2x256xf32>
    %264 = arith.addf %262, %263 : vector<2x256xf32>
    %cst_62 = arith.constant dense<0.000000e+00> : vector<2x256xf32>
    %265 = tpu.matmul %241, %242, %cst_62 {dimension_numbers = #tpu.dot_dimension_numbers<[1], [0], [0], [1], [0, 0, 1, 1], [], []>} : vector<2x16xf32>, vector<16x256xf32>, vector<2x256xf32> -> vector<2x256xf32>
    %266 = vector.broadcast %243 : vector<1x256xf32> to vector<2x256xf32>
    %267 = arith.addf %265, %266 : vector<2x256xf32>
    %c0_63 = arith.constant 0 : index
    %c0_64 = arith.constant 0 : index
    %268 = vector.load %arg7[%c0_63, %c0_64] : memref<16x256xf32, #tpu.memory_space<vmem>>, vector<16x256xf32>
    %c0_65 = arith.constant 0 : index
    %c0_66 = arith.constant 0 : index
    %269 = vector.load %arg9[%c0_65, %c0_66] : memref<64x16xf32, #tpu.memory_space<vmem>>, vector<64x16xf32>
    %cst_67 = arith.constant 0.000000e+00 : f32
    %270 = vector.broadcast %cst_67 : f32 to vector<2x16xf32>
    %cst_68 = arith.constant 0.000000e+00 : f32
    %271 = vector.broadcast %cst_68 : f32 to vector<2x64xf32>
    %cst_69 = arith.constant dense<0.000000e+00> : vector<2x256xf32>
    %272 = tpu.matmul %270, %268, %cst_69 {dimension_numbers = #tpu.dot_dimension_numbers<[1], [0], [0], [1], [0, 0, 1, 1], [], []>} : vector<2x16xf32>, vector<16x256xf32>, vector<2x256xf32> -> vector<2x256xf32>
    %273 = arith.addf %246, %272 : vector<2x256xf32>
    %274 = vector.extract_strided_slice %273 {offsets = [0, 0], sizes = [2, 64], strides = [1, 1]} : vector<2x256xf32> to vector<2x64xf32>
    %275 = arith.negf %274 : vector<2x64xf32>
    %276 = math.exp %275 : vector<2x64xf32>
    %cst_70 = arith.constant 1.000000e+00 : f32
    %277 = vector.broadcast %cst_70 : f32 to vector<2x64xf32>
    %278 = arith.addf %277, %276 : vector<2x64xf32>
    %279 = arith.divf %277, %278 : vector<2x64xf32>
    %280 = vector.extract_strided_slice %273 {offsets = [0, 64], sizes = [2, 64], strides = [1, 1]} : vector<2x256xf32> to vector<2x64xf32>
    %281 = arith.negf %280 : vector<2x64xf32>
    %282 = math.exp %281 : vector<2x64xf32>
    %cst_71 = arith.constant 1.000000e+00 : f32
    %283 = vector.broadcast %cst_71 : f32 to vector<2x64xf32>
    %284 = arith.addf %283, %282 : vector<2x64xf32>
    %285 = arith.divf %283, %284 : vector<2x64xf32>
    %286 = vector.extract_strided_slice %273 {offsets = [0, 128], sizes = [2, 64], strides = [1, 1]} : vector<2x256xf32> to vector<2x64xf32>
    %287 = math.tanh %286 : vector<2x64xf32>
    %288 = vector.extract_strided_slice %273 {offsets = [0, 192], sizes = [2, 64], strides = [1, 1]} : vector<2x256xf32> to vector<2x64xf32>
    %289 = arith.negf %288 : vector<2x64xf32>
    %290 = math.exp %289 : vector<2x64xf32>
    %cst_72 = arith.constant 1.000000e+00 : f32
    %291 = vector.broadcast %cst_72 : f32 to vector<2x64xf32>
    %292 = arith.addf %291, %290 : vector<2x64xf32>
    %293 = arith.divf %291, %292 : vector<2x64xf32>
    %294 = arith.mulf %285, %271 : vector<2x64xf32>
    %295 = arith.mulf %279, %287 : vector<2x64xf32>
    %296 = arith.addf %294, %295 : vector<2x64xf32>
    %297 = math.tanh %296 : vector<2x64xf32>
    %298 = arith.mulf %293, %297 : vector<2x64xf32>
    %cst_73 = arith.constant dense<0.000000e+00> : vector<2x16xf32>
    %299 = tpu.matmul %298, %269, %cst_73 {dimension_numbers = #tpu.dot_dimension_numbers<[1], [0], [0], [1], [0, 0, 1, 1], [], []>} : vector<2x64xf32>, vector<64x16xf32>, vector<2x16xf32> -> vector<2x16xf32>
    %cst_74 = arith.constant dense<0.000000e+00> : vector<2x256xf32>
    %300 = tpu.matmul %299, %268, %cst_74 {dimension_numbers = #tpu.dot_dimension_numbers<[1], [0], [0], [1], [0, 0, 1, 1], [], []>} : vector<2x16xf32>, vector<16x256xf32>, vector<2x256xf32> -> vector<2x256xf32>
    %301 = arith.addf %249, %300 : vector<2x256xf32>
    %302 = vector.extract_strided_slice %301 {offsets = [0, 0], sizes = [2, 64], strides = [1, 1]} : vector<2x256xf32> to vector<2x64xf32>
    %303 = arith.negf %302 : vector<2x64xf32>
    %304 = math.exp %303 : vector<2x64xf32>
    %cst_75 = arith.constant 1.000000e+00 : f32
    %305 = vector.broadcast %cst_75 : f32 to vector<2x64xf32>
    %306 = arith.addf %305, %304 : vector<2x64xf32>
    %307 = arith.divf %305, %306 : vector<2x64xf32>
    %308 = vector.extract_strided_slice %301 {offsets = [0, 64], sizes = [2, 64], strides = [1, 1]} : vector<2x256xf32> to vector<2x64xf32>
    %309 = arith.negf %308 : vector<2x64xf32>
    %310 = math.exp %309 : vector<2x64xf32>
    %cst_76 = arith.constant 1.000000e+00 : f32
    %311 = vector.broadcast %cst_76 : f32 to vector<2x64xf32>
    %312 = arith.addf %311, %310 : vector<2x64xf32>
    %313 = arith.divf %311, %312 : vector<2x64xf32>
    %314 = vector.extract_strided_slice %301 {offsets = [0, 128], sizes = [2, 64], strides = [1, 1]} : vector<2x256xf32> to vector<2x64xf32>
    %315 = math.tanh %314 : vector<2x64xf32>
    %316 = vector.extract_strided_slice %301 {offsets = [0, 192], sizes = [2, 64], strides = [1, 1]} : vector<2x256xf32> to vector<2x64xf32>
    %317 = arith.negf %316 : vector<2x64xf32>
    %318 = math.exp %317 : vector<2x64xf32>
    %cst_77 = arith.constant 1.000000e+00 : f32
    %319 = vector.broadcast %cst_77 : f32 to vector<2x64xf32>
    %320 = arith.addf %319, %318 : vector<2x64xf32>
    %321 = arith.divf %319, %320 : vector<2x64xf32>
    %322 = arith.mulf %313, %296 : vector<2x64xf32>
    %323 = arith.mulf %307, %315 : vector<2x64xf32>
    %324 = arith.addf %322, %323 : vector<2x64xf32>
    %325 = math.tanh %324 : vector<2x64xf32>
    %326 = arith.mulf %321, %325 : vector<2x64xf32>
    %cst_78 = arith.constant dense<0.000000e+00> : vector<2x16xf32>
    %327 = tpu.matmul %326, %269, %cst_78 {dimension_numbers = #tpu.dot_dimension_numbers<[1], [0], [0], [1], [0, 0, 1, 1], [], []>} : vector<2x64xf32>, vector<64x16xf32>, vector<2x16xf32> -> vector<2x16xf32>
    %cst_79 = arith.constant dense<0.000000e+00> : vector<2x256xf32>
    %328 = tpu.matmul %327, %268, %cst_79 {dimension_numbers = #tpu.dot_dimension_numbers<[1], [0], [0], [1], [0, 0, 1, 1], [], []>} : vector<2x16xf32>, vector<16x256xf32>, vector<2x256xf32> -> vector<2x256xf32>
    %329 = arith.addf %252, %328 : vector<2x256xf32>
    %330 = vector.extract_strided_slice %329 {offsets = [0, 0], sizes = [2, 64], strides = [1, 1]} : vector<2x256xf32> to vector<2x64xf32>
    %331 = arith.negf %330 : vector<2x64xf32>
    %332 = math.exp %331 : vector<2x64xf32>
    %cst_80 = arith.constant 1.000000e+00 : f32
    %333 = vector.broadcast %cst_80 : f32 to vector<2x64xf32>
    %334 = arith.addf %333, %332 : vector<2x64xf32>
    %335 = arith.divf %333, %334 : vector<2x64xf32>
    %336 = vector.extract_strided_slice %329 {offsets = [0, 64], sizes = [2, 64], strides = [1, 1]} : vector<2x256xf32> to vector<2x64xf32>
    %337 = arith.negf %336 : vector<2x64xf32>
    %338 = math.exp %337 : vector<2x64xf32>
    %cst_81 = arith.constant 1.000000e+00 : f32
    %339 = vector.broadcast %cst_81 : f32 to vector<2x64xf32>
    %340 = arith.addf %339, %338 : vector<2x64xf32>
    %341 = arith.divf %339, %340 : vector<2x64xf32>
    %342 = vector.extract_strided_slice %329 {offsets = [0, 128], sizes = [2, 64], strides = [1, 1]} : vector<2x256xf32> to vector<2x64xf32>
    %343 = math.tanh %342 : vector<2x64xf32>
    %344 = vector.extract_strided_slice %329 {offsets = [0, 192], sizes = [2, 64], strides = [1, 1]} : vector<2x256xf32> to vector<2x64xf32>
    %345 = arith.negf %344 : vector<2x64xf32>
    %346 = math.exp %345 : vector<2x64xf32>
    %cst_82 = arith.constant 1.000000e+00 : f32
    %347 = vector.broadcast %cst_82 : f32 to vector<2x64xf32>
    %348 = arith.addf %347, %346 : vector<2x64xf32>
    %349 = arith.divf %347, %348 : vector<2x64xf32>
    %350 = arith.mulf %341, %324 : vector<2x64xf32>
    %351 = arith.mulf %335, %343 : vector<2x64xf32>
    %352 = arith.addf %350, %351 : vector<2x64xf32>
    %353 = math.tanh %352 : vector<2x64xf32>
    %354 = arith.mulf %349, %353 : vector<2x64xf32>
    %cst_83 = arith.constant dense<0.000000e+00> : vector<2x16xf32>
    %355 = tpu.matmul %354, %269, %cst_83 {dimension_numbers = #tpu.dot_dimension_numbers<[1], [0], [0], [1], [0, 0, 1, 1], [], []>} : vector<2x64xf32>, vector<64x16xf32>, vector<2x16xf32> -> vector<2x16xf32>
    %cst_84 = arith.constant dense<0.000000e+00> : vector<2x256xf32>
    %356 = tpu.matmul %355, %268, %cst_84 {dimension_numbers = #tpu.dot_dimension_numbers<[1], [0], [0], [1], [0, 0, 1, 1], [], []>} : vector<2x16xf32>, vector<16x256xf32>, vector<2x256xf32> -> vector<2x256xf32>
    %357 = arith.addf %255, %356 : vector<2x256xf32>
    %358 = vector.extract_strided_slice %357 {offsets = [0, 0], sizes = [2, 64], strides = [1, 1]} : vector<2x256xf32> to vector<2x64xf32>
    %359 = arith.negf %358 : vector<2x64xf32>
    %360 = math.exp %359 : vector<2x64xf32>
    %cst_85 = arith.constant 1.000000e+00 : f32
    %361 = vector.broadcast %cst_85 : f32 to vector<2x64xf32>
    %362 = arith.addf %361, %360 : vector<2x64xf32>
    %363 = arith.divf %361, %362 : vector<2x64xf32>
    %364 = vector.extract_strided_slice %357 {offsets = [0, 64], sizes = [2, 64], strides = [1, 1]} : vector<2x256xf32> to vector<2x64xf32>
    %365 = arith.negf %364 : vector<2x64xf32>
    %366 = math.exp %365 : vector<2x64xf32>
    %cst_86 = arith.constant 1.000000e+00 : f32
    %367 = vector.broadcast %cst_86 : f32 to vector<2x64xf32>
    %368 = arith.addf %367, %366 : vector<2x64xf32>
    %369 = arith.divf %367, %368 : vector<2x64xf32>
    %370 = vector.extract_strided_slice %357 {offsets = [0, 128], sizes = [2, 64], strides = [1, 1]} : vector<2x256xf32> to vector<2x64xf32>
    %371 = math.tanh %370 : vector<2x64xf32>
    %372 = vector.extract_strided_slice %357 {offsets = [0, 192], sizes = [2, 64], strides = [1, 1]} : vector<2x256xf32> to vector<2x64xf32>
    %373 = arith.negf %372 : vector<2x64xf32>
    %374 = math.exp %373 : vector<2x64xf32>
    %cst_87 = arith.constant 1.000000e+00 : f32
    %375 = vector.broadcast %cst_87 : f32 to vector<2x64xf32>
    %376 = arith.addf %375, %374 : vector<2x64xf32>
    %377 = arith.divf %375, %376 : vector<2x64xf32>
    %378 = arith.mulf %369, %352 : vector<2x64xf32>
    %379 = arith.mulf %363, %371 : vector<2x64xf32>
    %380 = arith.addf %378, %379 : vector<2x64xf32>
    %381 = math.tanh %380 : vector<2x64xf32>
    %382 = arith.mulf %377, %381 : vector<2x64xf32>
    %cst_88 = arith.constant dense<0.000000e+00> : vector<2x16xf32>
    %383 = tpu.matmul %382, %269, %cst_88 {dimension_numbers = #tpu.dot_dimension_numbers<[1], [0], [0], [1], [0, 0, 1, 1], [], []>} : vector<2x64xf32>, vector<64x16xf32>, vector<2x16xf32> -> vector<2x16xf32>
    %cst_89 = arith.constant dense<0.000000e+00> : vector<2x256xf32>
    %384 = tpu.matmul %383, %268, %cst_89 {dimension_numbers = #tpu.dot_dimension_numbers<[1], [0], [0], [1], [0, 0, 1, 1], [], []>} : vector<2x16xf32>, vector<16x256xf32>, vector<2x256xf32> -> vector<2x256xf32>
    %385 = arith.addf %258, %384 : vector<2x256xf32>
    %386 = vector.extract_strided_slice %385 {offsets = [0, 0], sizes = [2, 64], strides = [1, 1]} : vector<2x256xf32> to vector<2x64xf32>
    %387 = arith.negf %386 : vector<2x64xf32>
    %388 = math.exp %387 : vector<2x64xf32>
    %cst_90 = arith.constant 1.000000e+00 : f32
    %389 = vector.broadcast %cst_90 : f32 to vector<2x64xf32>
    %390 = arith.addf %389, %388 : vector<2x64xf32>
    %391 = arith.divf %389, %390 : vector<2x64xf32>
    %392 = vector.extract_strided_slice %385 {offsets = [0, 64], sizes = [2, 64], strides = [1, 1]} : vector<2x256xf32> to vector<2x64xf32>
    %393 = arith.negf %392 : vector<2x64xf32>
    %394 = math.exp %393 : vector<2x64xf32>
    %cst_91 = arith.constant 1.000000e+00 : f32
    %395 = vector.broadcast %cst_91 : f32 to vector<2x64xf32>
    %396 = arith.addf %395, %394 : vector<2x64xf32>
    %397 = arith.divf %395, %396 : vector<2x64xf32>
    %398 = vector.extract_strided_slice %385 {offsets = [0, 128], sizes = [2, 64], strides = [1, 1]} : vector<2x256xf32> to vector<2x64xf32>
    %399 = math.tanh %398 : vector<2x64xf32>
    %400 = vector.extract_strided_slice %385 {offsets = [0, 192], sizes = [2, 64], strides = [1, 1]} : vector<2x256xf32> to vector<2x64xf32>
    %401 = arith.negf %400 : vector<2x64xf32>
    %402 = math.exp %401 : vector<2x64xf32>
    %cst_92 = arith.constant 1.000000e+00 : f32
    %403 = vector.broadcast %cst_92 : f32 to vector<2x64xf32>
    %404 = arith.addf %403, %402 : vector<2x64xf32>
    %405 = arith.divf %403, %404 : vector<2x64xf32>
    %406 = arith.mulf %397, %380 : vector<2x64xf32>
    %407 = arith.mulf %391, %399 : vector<2x64xf32>
    %408 = arith.addf %406, %407 : vector<2x64xf32>
    %409 = math.tanh %408 : vector<2x64xf32>
    %410 = arith.mulf %405, %409 : vector<2x64xf32>
    %cst_93 = arith.constant dense<0.000000e+00> : vector<2x16xf32>
    %411 = tpu.matmul %410, %269, %cst_93 {dimension_numbers = #tpu.dot_dimension_numbers<[1], [0], [0], [1], [0, 0, 1, 1], [], []>} : vector<2x64xf32>, vector<64x16xf32>, vector<2x16xf32> -> vector<2x16xf32>
    %cst_94 = arith.constant dense<0.000000e+00> : vector<2x256xf32>
    %412 = tpu.matmul %411, %268, %cst_94 {dimension_numbers = #tpu.dot_dimension_numbers<[1], [0], [0], [1], [0, 0, 1, 1], [], []>} : vector<2x16xf32>, vector<16x256xf32>, vector<2x256xf32> -> vector<2x256xf32>
    %413 = arith.addf %261, %412 : vector<2x256xf32>
    %414 = vector.extract_strided_slice %413 {offsets = [0, 0], sizes = [2, 64], strides = [1, 1]} : vector<2x256xf32> to vector<2x64xf32>
    %415 = arith.negf %414 : vector<2x64xf32>
    %416 = math.exp %415 : vector<2x64xf32>
    %cst_95 = arith.constant 1.000000e+00 : f32
    %417 = vector.broadcast %cst_95 : f32 to vector<2x64xf32>
    %418 = arith.addf %417, %416 : vector<2x64xf32>
    %419 = arith.divf %417, %418 : vector<2x64xf32>
    %420 = vector.extract_strided_slice %413 {offsets = [0, 64], sizes = [2, 64], strides = [1, 1]} : vector<2x256xf32> to vector<2x64xf32>
    %421 = arith.negf %420 : vector<2x64xf32>
    %422 = math.exp %421 : vector<2x64xf32>
    %cst_96 = arith.constant 1.000000e+00 : f32
    %423 = vector.broadcast %cst_96 : f32 to vector<2x64xf32>
    %424 = arith.addf %423, %422 : vector<2x64xf32>
    %425 = arith.divf %423, %424 : vector<2x64xf32>
    %426 = vector.extract_strided_slice %413 {offsets = [0, 128], sizes = [2, 64], strides = [1, 1]} : vector<2x256xf32> to vector<2x64xf32>
    %427 = math.tanh %426 : vector<2x64xf32>
    %428 = vector.extract_strided_slice %413 {offsets = [0, 192], sizes = [2, 64], strides = [1, 1]} : vector<2x256xf32> to vector<2x64xf32>
    %429 = arith.negf %428 : vector<2x64xf32>
    %430 = math.exp %429 : vector<2x64xf32>
    %cst_97 = arith.constant 1.000000e+00 : f32
    %431 = vector.broadcast %cst_97 : f32 to vector<2x64xf32>
    %432 = arith.addf %431, %430 : vector<2x64xf32>
    %433 = arith.divf %431, %432 : vector<2x64xf32>
    %434 = arith.mulf %425, %408 : vector<2x64xf32>
    %435 = arith.mulf %419, %427 : vector<2x64xf32>
    %436 = arith.addf %434, %435 : vector<2x64xf32>
    %437 = math.tanh %436 : vector<2x64xf32>
    %438 = arith.mulf %433, %437 : vector<2x64xf32>
    %cst_98 = arith.constant dense<0.000000e+00> : vector<2x16xf32>
    %439 = tpu.matmul %438, %269, %cst_98 {dimension_numbers = #tpu.dot_dimension_numbers<[1], [0], [0], [1], [0, 0, 1, 1], [], []>} : vector<2x64xf32>, vector<64x16xf32>, vector<2x16xf32> -> vector<2x16xf32>
    %cst_99 = arith.constant dense<0.000000e+00> : vector<2x256xf32>
    %440 = tpu.matmul %439, %268, %cst_99 {dimension_numbers = #tpu.dot_dimension_numbers<[1], [0], [0], [1], [0, 0, 1, 1], [], []>} : vector<2x16xf32>, vector<16x256xf32>, vector<2x256xf32> -> vector<2x256xf32>
    %441 = arith.addf %264, %440 : vector<2x256xf32>
    %442 = vector.extract_strided_slice %441 {offsets = [0, 0], sizes = [2, 64], strides = [1, 1]} : vector<2x256xf32> to vector<2x64xf32>
    %443 = arith.negf %442 : vector<2x64xf32>
    %444 = math.exp %443 : vector<2x64xf32>
    %cst_100 = arith.constant 1.000000e+00 : f32
    %445 = vector.broadcast %cst_100 : f32 to vector<2x64xf32>
    %446 = arith.addf %445, %444 : vector<2x64xf32>
    %447 = arith.divf %445, %446 : vector<2x64xf32>
    %448 = vector.extract_strided_slice %441 {offsets = [0, 64], sizes = [2, 64], strides = [1, 1]} : vector<2x256xf32> to vector<2x64xf32>
    %449 = arith.negf %448 : vector<2x64xf32>
    %450 = math.exp %449 : vector<2x64xf32>
    %cst_101 = arith.constant 1.000000e+00 : f32
    %451 = vector.broadcast %cst_101 : f32 to vector<2x64xf32>
    %452 = arith.addf %451, %450 : vector<2x64xf32>
    %453 = arith.divf %451, %452 : vector<2x64xf32>
    %454 = vector.extract_strided_slice %441 {offsets = [0, 128], sizes = [2, 64], strides = [1, 1]} : vector<2x256xf32> to vector<2x64xf32>
    %455 = math.tanh %454 : vector<2x64xf32>
    %456 = vector.extract_strided_slice %441 {offsets = [0, 192], sizes = [2, 64], strides = [1, 1]} : vector<2x256xf32> to vector<2x64xf32>
    %457 = arith.negf %456 : vector<2x64xf32>
    %458 = math.exp %457 : vector<2x64xf32>
    %cst_102 = arith.constant 1.000000e+00 : f32
    %459 = vector.broadcast %cst_102 : f32 to vector<2x64xf32>
    %460 = arith.addf %459, %458 : vector<2x64xf32>
    %461 = arith.divf %459, %460 : vector<2x64xf32>
    %462 = arith.mulf %453, %436 : vector<2x64xf32>
    %463 = arith.mulf %447, %455 : vector<2x64xf32>
    %464 = arith.addf %462, %463 : vector<2x64xf32>
    %465 = math.tanh %464 : vector<2x64xf32>
    %466 = arith.mulf %461, %465 : vector<2x64xf32>
    %cst_103 = arith.constant dense<0.000000e+00> : vector<2x16xf32>
    %467 = tpu.matmul %466, %269, %cst_103 {dimension_numbers = #tpu.dot_dimension_numbers<[1], [0], [0], [1], [0, 0, 1, 1], [], []>} : vector<2x64xf32>, vector<64x16xf32>, vector<2x16xf32> -> vector<2x16xf32>
    %cst_104 = arith.constant dense<0.000000e+00> : vector<2x256xf32>
    %468 = tpu.matmul %467, %268, %cst_104 {dimension_numbers = #tpu.dot_dimension_numbers<[1], [0], [0], [1], [0, 0, 1, 1], [], []>} : vector<2x16xf32>, vector<16x256xf32>, vector<2x256xf32> -> vector<2x256xf32>
    %469 = arith.addf %267, %468 : vector<2x256xf32>
    %470 = vector.extract_strided_slice %469 {offsets = [0, 0], sizes = [2, 64], strides = [1, 1]} : vector<2x256xf32> to vector<2x64xf32>
    %471 = arith.negf %470 : vector<2x64xf32>
    %472 = math.exp %471 : vector<2x64xf32>
    %cst_105 = arith.constant 1.000000e+00 : f32
    %473 = vector.broadcast %cst_105 : f32 to vector<2x64xf32>
    %474 = arith.addf %473, %472 : vector<2x64xf32>
    %475 = arith.divf %473, %474 : vector<2x64xf32>
    %476 = vector.extract_strided_slice %469 {offsets = [0, 64], sizes = [2, 64], strides = [1, 1]} : vector<2x256xf32> to vector<2x64xf32>
    %477 = arith.negf %476 : vector<2x64xf32>
    %478 = math.exp %477 : vector<2x64xf32>
    %cst_106 = arith.constant 1.000000e+00 : f32
    %479 = vector.broadcast %cst_106 : f32 to vector<2x64xf32>
    %480 = arith.addf %479, %478 : vector<2x64xf32>
    %481 = arith.divf %479, %480 : vector<2x64xf32>
    %482 = vector.extract_strided_slice %469 {offsets = [0, 128], sizes = [2, 64], strides = [1, 1]} : vector<2x256xf32> to vector<2x64xf32>
    %483 = math.tanh %482 : vector<2x64xf32>
    %484 = vector.extract_strided_slice %469 {offsets = [0, 192], sizes = [2, 64], strides = [1, 1]} : vector<2x256xf32> to vector<2x64xf32>
    %485 = arith.negf %484 : vector<2x64xf32>
    %486 = math.exp %485 : vector<2x64xf32>
    %cst_107 = arith.constant 1.000000e+00 : f32
    %487 = vector.broadcast %cst_107 : f32 to vector<2x64xf32>
    %488 = arith.addf %487, %486 : vector<2x64xf32>
    %489 = arith.divf %487, %488 : vector<2x64xf32>
    %490 = arith.mulf %481, %464 : vector<2x64xf32>
    %491 = arith.mulf %475, %483 : vector<2x64xf32>
    %492 = arith.addf %490, %491 : vector<2x64xf32>
    %493 = math.tanh %492 : vector<2x64xf32>
    %494 = arith.mulf %489, %493 : vector<2x64xf32>
    %cst_108 = arith.constant dense<0.000000e+00> : vector<2x16xf32>
    %495 = tpu.matmul %494, %269, %cst_108 {dimension_numbers = #tpu.dot_dimension_numbers<[1], [0], [0], [1], [0, 0, 1, 1], [], []>} : vector<2x64xf32>, vector<64x16xf32>, vector<2x16xf32> -> vector<2x16xf32>
    %cst_109 = arith.constant dense<0.000000e+00> : vector<2xf32>
    %496 = vector.multi_reduction <add>, %299, %cst_109 [1] : vector<2x16xf32> to vector<2xf32>
    %497 = vector.shape_cast %496 : vector<2xf32> to vector<2x1xf32>
    %cst_110 = arith.constant 0.000000e+00 : f32
    %498 = vector.broadcast %cst_110 : f32 to vector<2x1xf32>
    %499 = arith.addf %498, %497 : vector<2x1xf32>
    %cst_111 = arith.constant dense<0.000000e+00> : vector<2xf32>
    %500 = vector.multi_reduction <add>, %327, %cst_111 [1] : vector<2x16xf32> to vector<2xf32>
    %501 = vector.shape_cast %500 : vector<2xf32> to vector<2x1xf32>
    %502 = arith.addf %499, %501 : vector<2x1xf32>
    %cst_112 = arith.constant dense<0.000000e+00> : vector<2xf32>
    %503 = vector.multi_reduction <add>, %355, %cst_112 [1] : vector<2x16xf32> to vector<2xf32>
    %504 = vector.shape_cast %503 : vector<2xf32> to vector<2x1xf32>
    %505 = arith.addf %502, %504 : vector<2x1xf32>
    %cst_113 = arith.constant dense<0.000000e+00> : vector<2xf32>
    %506 = vector.multi_reduction <add>, %383, %cst_113 [1] : vector<2x16xf32> to vector<2xf32>
    %507 = vector.shape_cast %506 : vector<2xf32> to vector<2x1xf32>
    %508 = arith.addf %505, %507 : vector<2x1xf32>
    %cst_114 = arith.constant dense<0.000000e+00> : vector<2xf32>
    %509 = vector.multi_reduction <add>, %411, %cst_114 [1] : vector<2x16xf32> to vector<2xf32>
    %510 = vector.shape_cast %509 : vector<2xf32> to vector<2x1xf32>
    %511 = arith.addf %508, %510 : vector<2x1xf32>
    %cst_115 = arith.constant dense<0.000000e+00> : vector<2xf32>
    %512 = vector.multi_reduction <add>, %439, %cst_115 [1] : vector<2x16xf32> to vector<2xf32>
    %513 = vector.shape_cast %512 : vector<2xf32> to vector<2x1xf32>
    %514 = arith.addf %511, %513 : vector<2x1xf32>
    %cst_116 = arith.constant dense<0.000000e+00> : vector<2xf32>
    %515 = vector.multi_reduction <add>, %467, %cst_116 [1] : vector<2x16xf32> to vector<2xf32>
    %516 = vector.shape_cast %515 : vector<2xf32> to vector<2x1xf32>
    %517 = arith.addf %514, %516 : vector<2x1xf32>
    %cst_117 = arith.constant dense<0.000000e+00> : vector<2xf32>
    %518 = vector.multi_reduction <add>, %495, %cst_117 [1] : vector<2x16xf32> to vector<2xf32>
    %519 = vector.shape_cast %518 : vector<2xf32> to vector<2x1xf32>
    %520 = arith.addf %517, %519 : vector<2x1xf32>
    %cst_118 = arith.constant 1.280000e+02 : f32
    %521 = vector.broadcast %cst_118 : f32 to vector<2x1xf32>
    %522 = arith.divf %520, %521 : vector<2x1xf32>
    %523 = vector.broadcast %522 : vector<2x1xf32> to vector<2x16xf32>
    %524 = arith.subf %299, %523 : vector<2x16xf32>
    %525 = arith.mulf %524, %524 : vector<2x16xf32>
    %cst_119 = arith.constant dense<0.000000e+00> : vector<2xf32>
    %526 = vector.multi_reduction <add>, %525, %cst_119 [1] : vector<2x16xf32> to vector<2xf32>
    %527 = vector.shape_cast %526 : vector<2xf32> to vector<2x1xf32>
    %cst_120 = arith.constant 0.000000e+00 : f32
    %528 = vector.broadcast %cst_120 : f32 to vector<2x1xf32>
    %529 = arith.addf %528, %527 : vector<2x1xf32>
    %530 = vector.broadcast %522 : vector<2x1xf32> to vector<2x16xf32>
    %531 = arith.subf %327, %530 : vector<2x16xf32>
    %532 = arith.mulf %531, %531 : vector<2x16xf32>
    %cst_121 = arith.constant dense<0.000000e+00> : vector<2xf32>
    %533 = vector.multi_reduction <add>, %532, %cst_121 [1] : vector<2x16xf32> to vector<2xf32>
    %534 = vector.shape_cast %533 : vector<2xf32> to vector<2x1xf32>
    %535 = arith.addf %529, %534 : vector<2x1xf32>
    %536 = vector.broadcast %522 : vector<2x1xf32> to vector<2x16xf32>
    %537 = arith.subf %355, %536 : vector<2x16xf32>
    %538 = arith.mulf %537, %537 : vector<2x16xf32>
    %cst_122 = arith.constant dense<0.000000e+00> : vector<2xf32>
    %539 = vector.multi_reduction <add>, %538, %cst_122 [1] : vector<2x16xf32> to vector<2xf32>
    %540 = vector.shape_cast %539 : vector<2xf32> to vector<2x1xf32>
    %541 = arith.addf %535, %540 : vector<2x1xf32>
    %542 = vector.broadcast %522 : vector<2x1xf32> to vector<2x16xf32>
    %543 = arith.subf %383, %542 : vector<2x16xf32>
    %544 = arith.mulf %543, %543 : vector<2x16xf32>
    %cst_123 = arith.constant dense<0.000000e+00> : vector<2xf32>
    %545 = vector.multi_reduction <add>, %544, %cst_123 [1] : vector<2x16xf32> to vector<2xf32>
    %546 = vector.shape_cast %545 : vector<2xf32> to vector<2x1xf32>
    %547 = arith.addf %541, %546 : vector<2x1xf32>
    %548 = vector.broadcast %522 : vector<2x1xf32> to vector<2x16xf32>
    %549 = arith.subf %411, %548 : vector<2x16xf32>
    %550 = arith.mulf %549, %549 : vector<2x16xf32>
    %cst_124 = arith.constant dense<0.000000e+00> : vector<2xf32>
    %551 = vector.multi_reduction <add>, %550, %cst_124 [1] : vector<2x16xf32> to vector<2xf32>
    %552 = vector.shape_cast %551 : vector<2xf32> to vector<2x1xf32>
    %553 = arith.addf %547, %552 : vector<2x1xf32>
    %554 = vector.broadcast %522 : vector<2x1xf32> to vector<2x16xf32>
    %555 = arith.subf %439, %554 : vector<2x16xf32>
    %556 = arith.mulf %555, %555 : vector<2x16xf32>
    %cst_125 = arith.constant dense<0.000000e+00> : vector<2xf32>
    %557 = vector.multi_reduction <add>, %556, %cst_125 [1] : vector<2x16xf32> to vector<2xf32>
    %558 = vector.shape_cast %557 : vector<2xf32> to vector<2x1xf32>
    %559 = arith.addf %553, %558 : vector<2x1xf32>
    %560 = vector.broadcast %522 : vector<2x1xf32> to vector<2x16xf32>
    %561 = arith.subf %467, %560 : vector<2x16xf32>
    %562 = arith.mulf %561, %561 : vector<2x16xf32>
    %cst_126 = arith.constant dense<0.000000e+00> : vector<2xf32>
    %563 = vector.multi_reduction <add>, %562, %cst_126 [1] : vector<2x16xf32> to vector<2xf32>
    %564 = vector.shape_cast %563 : vector<2xf32> to vector<2x1xf32>
    %565 = arith.addf %559, %564 : vector<2x1xf32>
    %566 = vector.broadcast %522 : vector<2x1xf32> to vector<2x16xf32>
    %567 = arith.subf %495, %566 : vector<2x16xf32>
    %568 = arith.mulf %567, %567 : vector<2x16xf32>
    %cst_127 = arith.constant dense<0.000000e+00> : vector<2xf32>
    %569 = vector.multi_reduction <add>, %568, %cst_127 [1] : vector<2x16xf32> to vector<2xf32>
    %570 = vector.shape_cast %569 : vector<2xf32> to vector<2x1xf32>
    %571 = arith.addf %565, %570 : vector<2x1xf32>
    %cst_128 = arith.constant 1.280000e+02 : f32
    %572 = vector.broadcast %cst_128 : f32 to vector<2x1xf32>
    %573 = arith.divf %571, %572 : vector<2x1xf32>
    %cst_129 = arith.constant 9.99999974E-6 : f32
    %574 = vector.broadcast %cst_129 : f32 to vector<2x1xf32>
    %575 = arith.addf %573, %574 : vector<2x1xf32>
    %576 = math.rsqrt %575 : vector<2x1xf32>
    %c0_130 = arith.constant 0 : index
    %c0_131 = arith.constant 0 : index
    %577 = vector.load %arg12[%c0_130, %c0_131] : memref<16x16xf32, #tpu.memory_space<vmem>>, vector<16x16xf32>
    %c0_132 = arith.constant 0 : index
    %c0_133 = arith.constant 0 : index
    %578 = vector.load %arg13[%c0_132, %c0_133] : memref<1x16xf32, #tpu.memory_space<vmem>>, vector<1x16xf32>
    %579 = vector.broadcast %522 : vector<2x1xf32> to vector<2x16xf32>
    %580 = arith.subf %299, %579 : vector<2x16xf32>
    %581 = vector.broadcast %576 : vector<2x1xf32> to vector<2x16xf32>
    %582 = arith.mulf %580, %581 : vector<2x16xf32>
    %c0_134 = arith.constant 0 : index
    %c0_135 = arith.constant 0 : index
    %c0_136 = arith.constant 0 : index
    %583 = vector.load %arg10[%c0_134, %c0_135, %c0_136] : memref<8x1x16xf32, #tpu.memory_space<vmem>>, vector<1x1x16xf32>
    %584 = vector.shape_cast %583 : vector<1x1x16xf32> to vector<1x16xf32>
    %585 = vector.broadcast %584 : vector<1x16xf32> to vector<2x16xf32>
    %586 = arith.mulf %582, %585 : vector<2x16xf32>
    %c0_137 = arith.constant 0 : index
    %c0_138 = arith.constant 0 : index
    %c0_139 = arith.constant 0 : index
    %587 = vector.load %arg11[%c0_137, %c0_138, %c0_139] : memref<8x1x16xf32, #tpu.memory_space<vmem>>, vector<1x1x16xf32>
    %588 = vector.shape_cast %587 : vector<1x1x16xf32> to vector<1x16xf32>
    %589 = vector.broadcast %588 : vector<1x16xf32> to vector<2x16xf32>
    %590 = arith.addf %586, %589 : vector<2x16xf32>
    %cst_140 = arith.constant dense<0.000000e+00> : vector<2x16xf32>
    %591 = tpu.matmul %590, %577, %cst_140 {dimension_numbers = #tpu.dot_dimension_numbers<[1], [0], [0], [1], [0, 0, 1, 1], [], []>} : vector<2x16xf32>, vector<16x16xf32>, vector<2x16xf32> -> vector<2x16xf32>
    %592 = vector.broadcast %578 : vector<1x16xf32> to vector<2x16xf32>
    %593 = arith.addf %591, %592 : vector<2x16xf32>
    %594 = vector.broadcast %522 : vector<2x1xf32> to vector<2x16xf32>
    %595 = arith.subf %327, %594 : vector<2x16xf32>
    %596 = vector.broadcast %576 : vector<2x1xf32> to vector<2x16xf32>
    %597 = arith.mulf %595, %596 : vector<2x16xf32>
    %c1 = arith.constant 1 : index
    %c0_141 = arith.constant 0 : index
    %c0_142 = arith.constant 0 : index
    %598 = vector.load %arg10[%c1, %c0_141, %c0_142] : memref<8x1x16xf32, #tpu.memory_space<vmem>>, vector<1x1x16xf32>
    %599 = vector.shape_cast %598 : vector<1x1x16xf32> to vector<1x16xf32>
    %600 = vector.broadcast %599 : vector<1x16xf32> to vector<2x16xf32>
    %601 = arith.mulf %597, %600 : vector<2x16xf32>
    %c1_143 = arith.constant 1 : index
    %c0_144 = arith.constant 0 : index
    %c0_145 = arith.constant 0 : index
    %602 = vector.load %arg11[%c1_143, %c0_144, %c0_145] : memref<8x1x16xf32, #tpu.memory_space<vmem>>, vector<1x1x16xf32>
    %603 = vector.shape_cast %602 : vector<1x1x16xf32> to vector<1x16xf32>
    %604 = vector.broadcast %603 : vector<1x16xf32> to vector<2x16xf32>
    %605 = arith.addf %601, %604 : vector<2x16xf32>
    %cst_146 = arith.constant dense<0.000000e+00> : vector<2x16xf32>
    %606 = tpu.matmul %605, %577, %cst_146 {dimension_numbers = #tpu.dot_dimension_numbers<[1], [0], [0], [1], [0, 0, 1, 1], [], []>} : vector<2x16xf32>, vector<16x16xf32>, vector<2x16xf32> -> vector<2x16xf32>
    %607 = vector.broadcast %578 : vector<1x16xf32> to vector<2x16xf32>
    %608 = arith.addf %606, %607 : vector<2x16xf32>
    %609 = vector.broadcast %522 : vector<2x1xf32> to vector<2x16xf32>
    %610 = arith.subf %355, %609 : vector<2x16xf32>
    %611 = vector.broadcast %576 : vector<2x1xf32> to vector<2x16xf32>
    %612 = arith.mulf %610, %611 : vector<2x16xf32>
    %c2 = arith.constant 2 : index
    %c0_147 = arith.constant 0 : index
    %c0_148 = arith.constant 0 : index
    %613 = vector.load %arg10[%c2, %c0_147, %c0_148] : memref<8x1x16xf32, #tpu.memory_space<vmem>>, vector<1x1x16xf32>
    %614 = vector.shape_cast %613 : vector<1x1x16xf32> to vector<1x16xf32>
    %615 = vector.broadcast %614 : vector<1x16xf32> to vector<2x16xf32>
    %616 = arith.mulf %612, %615 : vector<2x16xf32>
    %c2_149 = arith.constant 2 : index
    %c0_150 = arith.constant 0 : index
    %c0_151 = arith.constant 0 : index
    %617 = vector.load %arg11[%c2_149, %c0_150, %c0_151] : memref<8x1x16xf32, #tpu.memory_space<vmem>>, vector<1x1x16xf32>
    %618 = vector.shape_cast %617 : vector<1x1x16xf32> to vector<1x16xf32>
    %619 = vector.broadcast %618 : vector<1x16xf32> to vector<2x16xf32>
    %620 = arith.addf %616, %619 : vector<2x16xf32>
    %cst_152 = arith.constant dense<0.000000e+00> : vector<2x16xf32>
    %621 = tpu.matmul %620, %577, %cst_152 {dimension_numbers = #tpu.dot_dimension_numbers<[1], [0], [0], [1], [0, 0, 1, 1], [], []>} : vector<2x16xf32>, vector<16x16xf32>, vector<2x16xf32> -> vector<2x16xf32>
    %622 = vector.broadcast %578 : vector<1x16xf32> to vector<2x16xf32>
    %623 = arith.addf %621, %622 : vector<2x16xf32>
    %624 = vector.broadcast %522 : vector<2x1xf32> to vector<2x16xf32>
    %625 = arith.subf %383, %624 : vector<2x16xf32>
    %626 = vector.broadcast %576 : vector<2x1xf32> to vector<2x16xf32>
    %627 = arith.mulf %625, %626 : vector<2x16xf32>
    %c3 = arith.constant 3 : index
    %c0_153 = arith.constant 0 : index
    %c0_154 = arith.constant 0 : index
    %628 = vector.load %arg10[%c3, %c0_153, %c0_154] : memref<8x1x16xf32, #tpu.memory_space<vmem>>, vector<1x1x16xf32>
    %629 = vector.shape_cast %628 : vector<1x1x16xf32> to vector<1x16xf32>
    %630 = vector.broadcast %629 : vector<1x16xf32> to vector<2x16xf32>
    %631 = arith.mulf %627, %630 : vector<2x16xf32>
    %c3_155 = arith.constant 3 : index
    %c0_156 = arith.constant 0 : index
    %c0_157 = arith.constant 0 : index
    %632 = vector.load %arg11[%c3_155, %c0_156, %c0_157] : memref<8x1x16xf32, #tpu.memory_space<vmem>>, vector<1x1x16xf32>
    %633 = vector.shape_cast %632 : vector<1x1x16xf32> to vector<1x16xf32>
    %634 = vector.broadcast %633 : vector<1x16xf32> to vector<2x16xf32>
    %635 = arith.addf %631, %634 : vector<2x16xf32>
    %cst_158 = arith.constant dense<0.000000e+00> : vector<2x16xf32>
    %636 = tpu.matmul %635, %577, %cst_158 {dimension_numbers = #tpu.dot_dimension_numbers<[1], [0], [0], [1], [0, 0, 1, 1], [], []>} : vector<2x16xf32>, vector<16x16xf32>, vector<2x16xf32> -> vector<2x16xf32>
    %637 = vector.broadcast %578 : vector<1x16xf32> to vector<2x16xf32>
    %638 = arith.addf %636, %637 : vector<2x16xf32>
    %639 = vector.broadcast %522 : vector<2x1xf32> to vector<2x16xf32>
    %640 = arith.subf %411, %639 : vector<2x16xf32>
    %641 = vector.broadcast %576 : vector<2x1xf32> to vector<2x16xf32>
    %642 = arith.mulf %640, %641 : vector<2x16xf32>
    %c4 = arith.constant 4 : index
    %c0_159 = arith.constant 0 : index
    %c0_160 = arith.constant 0 : index
    %643 = vector.load %arg10[%c4, %c0_159, %c0_160] : memref<8x1x16xf32, #tpu.memory_space<vmem>>, vector<1x1x16xf32>
    %644 = vector.shape_cast %643 : vector<1x1x16xf32> to vector<1x16xf32>
    %645 = vector.broadcast %644 : vector<1x16xf32> to vector<2x16xf32>
    %646 = arith.mulf %642, %645 : vector<2x16xf32>
    %c4_161 = arith.constant 4 : index
    %c0_162 = arith.constant 0 : index
    %c0_163 = arith.constant 0 : index
    %647 = vector.load %arg11[%c4_161, %c0_162, %c0_163] : memref<8x1x16xf32, #tpu.memory_space<vmem>>, vector<1x1x16xf32>
    %648 = vector.shape_cast %647 : vector<1x1x16xf32> to vector<1x16xf32>
    %649 = vector.broadcast %648 : vector<1x16xf32> to vector<2x16xf32>
    %650 = arith.addf %646, %649 : vector<2x16xf32>
    %cst_164 = arith.constant dense<0.000000e+00> : vector<2x16xf32>
    %651 = tpu.matmul %650, %577, %cst_164 {dimension_numbers = #tpu.dot_dimension_numbers<[1], [0], [0], [1], [0, 0, 1, 1], [], []>} : vector<2x16xf32>, vector<16x16xf32>, vector<2x16xf32> -> vector<2x16xf32>
    %652 = vector.broadcast %578 : vector<1x16xf32> to vector<2x16xf32>
    %653 = arith.addf %651, %652 : vector<2x16xf32>
    %654 = vector.broadcast %522 : vector<2x1xf32> to vector<2x16xf32>
    %655 = arith.subf %439, %654 : vector<2x16xf32>
    %656 = vector.broadcast %576 : vector<2x1xf32> to vector<2x16xf32>
    %657 = arith.mulf %655, %656 : vector<2x16xf32>
    %c5 = arith.constant 5 : index
    %c0_165 = arith.constant 0 : index
    %c0_166 = arith.constant 0 : index
    %658 = vector.load %arg10[%c5, %c0_165, %c0_166] : memref<8x1x16xf32, #tpu.memory_space<vmem>>, vector<1x1x16xf32>
    %659 = vector.shape_cast %658 : vector<1x1x16xf32> to vector<1x16xf32>
    %660 = vector.broadcast %659 : vector<1x16xf32> to vector<2x16xf32>
    %661 = arith.mulf %657, %660 : vector<2x16xf32>
    %c5_167 = arith.constant 5 : index
    %c0_168 = arith.constant 0 : index
    %c0_169 = arith.constant 0 : index
    %662 = vector.load %arg11[%c5_167, %c0_168, %c0_169] : memref<8x1x16xf32, #tpu.memory_space<vmem>>, vector<1x1x16xf32>
    %663 = vector.shape_cast %662 : vector<1x1x16xf32> to vector<1x16xf32>
    %664 = vector.broadcast %663 : vector<1x16xf32> to vector<2x16xf32>
    %665 = arith.addf %661, %664 : vector<2x16xf32>
    %cst_170 = arith.constant dense<0.000000e+00> : vector<2x16xf32>
    %666 = tpu.matmul %665, %577, %cst_170 {dimension_numbers = #tpu.dot_dimension_numbers<[1], [0], [0], [1], [0, 0, 1, 1], [], []>} : vector<2x16xf32>, vector<16x16xf32>, vector<2x16xf32> -> vector<2x16xf32>
    %667 = vector.broadcast %578 : vector<1x16xf32> to vector<2x16xf32>
    %668 = arith.addf %666, %667 : vector<2x16xf32>
    %669 = vector.broadcast %522 : vector<2x1xf32> to vector<2x16xf32>
    %670 = arith.subf %467, %669 : vector<2x16xf32>
    %671 = vector.broadcast %576 : vector<2x1xf32> to vector<2x16xf32>
    %672 = arith.mulf %670, %671 : vector<2x16xf32>
    %c6 = arith.constant 6 : index
    %c0_171 = arith.constant 0 : index
    %c0_172 = arith.constant 0 : index
    %673 = vector.load %arg10[%c6, %c0_171, %c0_172] : memref<8x1x16xf32, #tpu.memory_space<vmem>>, vector<1x1x16xf32>
    %674 = vector.shape_cast %673 : vector<1x1x16xf32> to vector<1x16xf32>
    %675 = vector.broadcast %674 : vector<1x16xf32> to vector<2x16xf32>
    %676 = arith.mulf %672, %675 : vector<2x16xf32>
    %c6_173 = arith.constant 6 : index
    %c0_174 = arith.constant 0 : index
    %c0_175 = arith.constant 0 : index
    %677 = vector.load %arg11[%c6_173, %c0_174, %c0_175] : memref<8x1x16xf32, #tpu.memory_space<vmem>>, vector<1x1x16xf32>
    %678 = vector.shape_cast %677 : vector<1x1x16xf32> to vector<1x16xf32>
    %679 = vector.broadcast %678 : vector<1x16xf32> to vector<2x16xf32>
    %680 = arith.addf %676, %679 : vector<2x16xf32>
    %cst_176 = arith.constant dense<0.000000e+00> : vector<2x16xf32>
    %681 = tpu.matmul %680, %577, %cst_176 {dimension_numbers = #tpu.dot_dimension_numbers<[1], [0], [0], [1], [0, 0, 1, 1], [], []>} : vector<2x16xf32>, vector<16x16xf32>, vector<2x16xf32> -> vector<2x16xf32>
    %682 = vector.broadcast %578 : vector<1x16xf32> to vector<2x16xf32>
    %683 = arith.addf %681, %682 : vector<2x16xf32>
    %684 = vector.broadcast %522 : vector<2x1xf32> to vector<2x16xf32>
    %685 = arith.subf %495, %684 : vector<2x16xf32>
    %686 = vector.broadcast %576 : vector<2x1xf32> to vector<2x16xf32>
    %687 = arith.mulf %685, %686 : vector<2x16xf32>
    %c7 = arith.constant 7 : index
    %c0_177 = arith.constant 0 : index
    %c0_178 = arith.constant 0 : index
    %688 = vector.load %arg10[%c7, %c0_177, %c0_178] : memref<8x1x16xf32, #tpu.memory_space<vmem>>, vector<1x1x16xf32>
    %689 = vector.shape_cast %688 : vector<1x1x16xf32> to vector<1x16xf32>
    %690 = vector.broadcast %689 : vector<1x16xf32> to vector<2x16xf32>
    %691 = arith.mulf %687, %690 : vector<2x16xf32>
    %c7_179 = arith.constant 7 : index
    %c0_180 = arith.constant 0 : index
    %c0_181 = arith.constant 0 : index
    %692 = vector.load %arg11[%c7_179, %c0_180, %c0_181] : memref<8x1x16xf32, #tpu.memory_space<vmem>>, vector<1x1x16xf32>
    %693 = vector.shape_cast %692 : vector<1x1x16xf32> to vector<1x16xf32>
    %694 = vector.broadcast %693 : vector<1x16xf32> to vector<2x16xf32>
    %695 = arith.addf %691, %694 : vector<2x16xf32>
    %cst_182 = arith.constant dense<0.000000e+00> : vector<2x16xf32>
    %696 = tpu.matmul %695, %577, %cst_182 {dimension_numbers = #tpu.dot_dimension_numbers<[1], [0], [0], [1], [0, 0, 1, 1], [], []>} : vector<2x16xf32>, vector<16x16xf32>, vector<2x16xf32> -> vector<2x16xf32>
    %697 = vector.broadcast %578 : vector<1x16xf32> to vector<2x16xf32>
    %698 = arith.addf %696, %697 : vector<2x16xf32>
    %cst_183 = arith.constant dense<0.000000e+00> : vector<2xf32>
    %699 = vector.multi_reduction <add>, %593, %cst_183 [1] : vector<2x16xf32> to vector<2xf32>
    %700 = vector.shape_cast %699 : vector<2xf32> to vector<2x1xf32>
    %cst_184 = arith.constant 0.000000e+00 : f32
    %701 = vector.broadcast %cst_184 : f32 to vector<2x1xf32>
    %702 = arith.addf %701, %700 : vector<2x1xf32>
    %cst_185 = arith.constant dense<0.000000e+00> : vector<2xf32>
    %703 = vector.multi_reduction <add>, %608, %cst_185 [1] : vector<2x16xf32> to vector<2xf32>
    %704 = vector.shape_cast %703 : vector<2xf32> to vector<2x1xf32>
    %705 = arith.addf %702, %704 : vector<2x1xf32>
    %cst_186 = arith.constant dense<0.000000e+00> : vector<2xf32>
    %706 = vector.multi_reduction <add>, %623, %cst_186 [1] : vector<2x16xf32> to vector<2xf32>
    %707 = vector.shape_cast %706 : vector<2xf32> to vector<2x1xf32>
    %708 = arith.addf %705, %707 : vector<2x1xf32>
    %cst_187 = arith.constant dense<0.000000e+00> : vector<2xf32>
    %709 = vector.multi_reduction <add>, %638, %cst_187 [1] : vector<2x16xf32> to vector<2xf32>
    %710 = vector.shape_cast %709 : vector<2xf32> to vector<2x1xf32>
    %711 = arith.addf %708, %710 : vector<2x1xf32>
    %cst_188 = arith.constant dense<0.000000e+00> : vector<2xf32>
    %712 = vector.multi_reduction <add>, %653, %cst_188 [1] : vector<2x16xf32> to vector<2xf32>
    %713 = vector.shape_cast %712 : vector<2xf32> to vector<2x1xf32>
    %714 = arith.addf %711, %713 : vector<2x1xf32>
    %cst_189 = arith.constant dense<0.000000e+00> : vector<2xf32>
    %715 = vector.multi_reduction <add>, %668, %cst_189 [1] : vector<2x16xf32> to vector<2xf32>
    %716 = vector.shape_cast %715 : vector<2xf32> to vector<2x1xf32>
    %717 = arith.addf %714, %716 : vector<2x1xf32>
    %cst_190 = arith.constant dense<0.000000e+00> : vector<2xf32>
    %718 = vector.multi_reduction <add>, %683, %cst_190 [1] : vector<2x16xf32> to vector<2xf32>
    %719 = vector.shape_cast %718 : vector<2xf32> to vector<2x1xf32>
    %720 = arith.addf %717, %719 : vector<2x1xf32>
    %cst_191 = arith.constant dense<0.000000e+00> : vector<2xf32>
    %721 = vector.multi_reduction <add>, %698, %cst_191 [1] : vector<2x16xf32> to vector<2xf32>
    %722 = vector.shape_cast %721 : vector<2xf32> to vector<2x1xf32>
    %723 = arith.addf %720, %722 : vector<2x1xf32>
    %cst_192 = arith.constant 1.280000e+02 : f32
    %724 = vector.broadcast %cst_192 : f32 to vector<2x1xf32>
    %725 = arith.divf %723, %724 : vector<2x1xf32>
    %726 = vector.broadcast %725 : vector<2x1xf32> to vector<2x16xf32>
    %727 = arith.subf %593, %726 : vector<2x16xf32>
    %728 = arith.mulf %727, %727 : vector<2x16xf32>
    %cst_193 = arith.constant dense<0.000000e+00> : vector<2xf32>
    %729 = vector.multi_reduction <add>, %728, %cst_193 [1] : vector<2x16xf32> to vector<2xf32>
    %730 = vector.shape_cast %729 : vector<2xf32> to vector<2x1xf32>
    %cst_194 = arith.constant 0.000000e+00 : f32
    %731 = vector.broadcast %cst_194 : f32 to vector<2x1xf32>
    %732 = arith.addf %731, %730 : vector<2x1xf32>
    %733 = vector.broadcast %725 : vector<2x1xf32> to vector<2x16xf32>
    %734 = arith.subf %608, %733 : vector<2x16xf32>
    %735 = arith.mulf %734, %734 : vector<2x16xf32>
    %cst_195 = arith.constant dense<0.000000e+00> : vector<2xf32>
    %736 = vector.multi_reduction <add>, %735, %cst_195 [1] : vector<2x16xf32> to vector<2xf32>
    %737 = vector.shape_cast %736 : vector<2xf32> to vector<2x1xf32>
    %738 = arith.addf %732, %737 : vector<2x1xf32>
    %739 = vector.broadcast %725 : vector<2x1xf32> to vector<2x16xf32>
    %740 = arith.subf %623, %739 : vector<2x16xf32>
    %741 = arith.mulf %740, %740 : vector<2x16xf32>
    %cst_196 = arith.constant dense<0.000000e+00> : vector<2xf32>
    %742 = vector.multi_reduction <add>, %741, %cst_196 [1] : vector<2x16xf32> to vector<2xf32>
    %743 = vector.shape_cast %742 : vector<2xf32> to vector<2x1xf32>
    %744 = arith.addf %738, %743 : vector<2x1xf32>
    %745 = vector.broadcast %725 : vector<2x1xf32> to vector<2x16xf32>
    %746 = arith.subf %638, %745 : vector<2x16xf32>
    %747 = arith.mulf %746, %746 : vector<2x16xf32>
    %cst_197 = arith.constant dense<0.000000e+00> : vector<2xf32>
    %748 = vector.multi_reduction <add>, %747, %cst_197 [1] : vector<2x16xf32> to vector<2xf32>
    %749 = vector.shape_cast %748 : vector<2xf32> to vector<2x1xf32>
    %750 = arith.addf %744, %749 : vector<2x1xf32>
    %751 = vector.broadcast %725 : vector<2x1xf32> to vector<2x16xf32>
    %752 = arith.subf %653, %751 : vector<2x16xf32>
    %753 = arith.mulf %752, %752 : vector<2x16xf32>
    %cst_198 = arith.constant dense<0.000000e+00> : vector<2xf32>
    %754 = vector.multi_reduction <add>, %753, %cst_198 [1] : vector<2x16xf32> to vector<2xf32>
    %755 = vector.shape_cast %754 : vector<2xf32> to vector<2x1xf32>
    %756 = arith.addf %750, %755 : vector<2x1xf32>
    %757 = vector.broadcast %725 : vector<2x1xf32> to vector<2x16xf32>
    %758 = arith.subf %668, %757 : vector<2x16xf32>
    %759 = arith.mulf %758, %758 : vector<2x16xf32>
    %cst_199 = arith.constant dense<0.000000e+00> : vector<2xf32>
    %760 = vector.multi_reduction <add>, %759, %cst_199 [1] : vector<2x16xf32> to vector<2xf32>
    %761 = vector.shape_cast %760 : vector<2xf32> to vector<2x1xf32>
    %762 = arith.addf %756, %761 : vector<2x1xf32>
    %763 = vector.broadcast %725 : vector<2x1xf32> to vector<2x16xf32>
    %764 = arith.subf %683, %763 : vector<2x16xf32>
    %765 = arith.mulf %764, %764 : vector<2x16xf32>
    %cst_200 = arith.constant dense<0.000000e+00> : vector<2xf32>
    %766 = vector.multi_reduction <add>, %765, %cst_200 [1] : vector<2x16xf32> to vector<2xf32>
    %767 = vector.shape_cast %766 : vector<2xf32> to vector<2x1xf32>
    %768 = arith.addf %762, %767 : vector<2x1xf32>
    %769 = vector.broadcast %725 : vector<2x1xf32> to vector<2x16xf32>
    %770 = arith.subf %698, %769 : vector<2x16xf32>
    %771 = arith.mulf %770, %770 : vector<2x16xf32>
    %cst_201 = arith.constant dense<0.000000e+00> : vector<2xf32>
    %772 = vector.multi_reduction <add>, %771, %cst_201 [1] : vector<2x16xf32> to vector<2xf32>
    %773 = vector.shape_cast %772 : vector<2xf32> to vector<2x1xf32>
    %774 = arith.addf %768, %773 : vector<2x1xf32>
    %cst_202 = arith.constant 1.280000e+02 : f32
    %775 = vector.broadcast %cst_202 : f32 to vector<2x1xf32>
    %776 = arith.divf %774, %775 : vector<2x1xf32>
    %cst_203 = arith.constant 9.99999974E-6 : f32
    %777 = vector.broadcast %cst_203 : f32 to vector<2x1xf32>
    %778 = arith.addf %776, %777 : vector<2x1xf32>
    %779 = math.rsqrt %778 : vector<2x1xf32>
    %c0_204 = arith.constant 0 : index
    %c0_205 = arith.constant 0 : index
    %780 = vector.load %arg16[%c0_204, %c0_205] : memref<1x16xf32, #tpu.memory_space<vmem>>, vector<1x16xf32>
    %c0_206 = arith.constant 0 : index
    %c0_207 = arith.constant 0 : index
    %781 = vector.load %arg17[%c0_206, %c0_207] : memref<1x1xf32, #tpu.memory_space<vmem>>, vector<1x1xf32>
    %cst_208 = arith.constant 0.000000e+00 : f32
    %782 = vector.broadcast %cst_208 : f32 to vector<2x16xf32>
    %783 = vector.broadcast %725 : vector<2x1xf32> to vector<2x16xf32>
    %784 = arith.subf %593, %783 : vector<2x16xf32>
    %785 = vector.broadcast %779 : vector<2x1xf32> to vector<2x16xf32>
    %786 = arith.mulf %784, %785 : vector<2x16xf32>
    %c0_209 = arith.constant 0 : index
    %c0_210 = arith.constant 0 : index
    %c0_211 = arith.constant 0 : index
    %787 = vector.load %arg14[%c0_209, %c0_210, %c0_211] : memref<8x1x16xf32, #tpu.memory_space<vmem>>, vector<1x1x16xf32>
    %788 = vector.shape_cast %787 : vector<1x1x16xf32> to vector<1x16xf32>
    %789 = vector.broadcast %788 : vector<1x16xf32> to vector<2x16xf32>
    %790 = arith.mulf %786, %789 : vector<2x16xf32>
    %c0_212 = arith.constant 0 : index
    %c0_213 = arith.constant 0 : index
    %c0_214 = arith.constant 0 : index
    %791 = vector.load %arg15[%c0_212, %c0_213, %c0_214] : memref<8x1x16xf32, #tpu.memory_space<vmem>>, vector<1x1x16xf32>
    %792 = vector.shape_cast %791 : vector<1x1x16xf32> to vector<1x16xf32>
    %793 = vector.broadcast %792 : vector<1x16xf32> to vector<2x16xf32>
    %794 = arith.addf %790, %793 : vector<2x16xf32>
    %cst_215 = arith.constant 0.000000e+00 : f32
    %795 = vector.broadcast %cst_215 : f32 to vector<2x16xf32>
    %796 = arith.maximumf %794, %795 : vector<2x16xf32>
    %797 = vector.broadcast %780 : vector<1x16xf32> to vector<2x16xf32>
    %798 = arith.mulf %796, %797 : vector<2x16xf32>
    %cst_216 = arith.constant dense<0.000000e+00> : vector<2xf32>
    %799 = vector.multi_reduction <add>, %798, %cst_216 [1] : vector<2x16xf32> to vector<2xf32>
    %800 = vector.shape_cast %799 : vector<2xf32> to vector<2x1xf32>
    %801 = vector.broadcast %781 : vector<1x1xf32> to vector<2x1xf32>
    %802 = arith.addf %800, %801 : vector<2x1xf32>
    %803 = arith.negf %802 : vector<2x1xf32>
    %804 = math.exp %803 : vector<2x1xf32>
    %cst_217 = arith.constant 1.000000e+00 : f32
    %805 = vector.broadcast %cst_217 : f32 to vector<2x1xf32>
    %806 = arith.addf %805, %804 : vector<2x1xf32>
    %807 = arith.divf %805, %806 : vector<2x1xf32>
    %808 = vector.broadcast %807 : vector<2x1xf32> to vector<2x16xf32>
    %809 = arith.mulf %299, %808 : vector<2x16xf32>
    %810 = arith.addf %782, %809 : vector<2x16xf32>
    %811 = vector.broadcast %725 : vector<2x1xf32> to vector<2x16xf32>
    %812 = arith.subf %608, %811 : vector<2x16xf32>
    %813 = vector.broadcast %779 : vector<2x1xf32> to vector<2x16xf32>
    %814 = arith.mulf %812, %813 : vector<2x16xf32>
    %c1_218 = arith.constant 1 : index
    %c0_219 = arith.constant 0 : index
    %c0_220 = arith.constant 0 : index
    %815 = vector.load %arg14[%c1_218, %c0_219, %c0_220] : memref<8x1x16xf32, #tpu.memory_space<vmem>>, vector<1x1x16xf32>
    %816 = vector.shape_cast %815 : vector<1x1x16xf32> to vector<1x16xf32>
    %817 = vector.broadcast %816 : vector<1x16xf32> to vector<2x16xf32>
    %818 = arith.mulf %814, %817 : vector<2x16xf32>
    %c1_221 = arith.constant 1 : index
    %c0_222 = arith.constant 0 : index
    %c0_223 = arith.constant 0 : index
    %819 = vector.load %arg15[%c1_221, %c0_222, %c0_223] : memref<8x1x16xf32, #tpu.memory_space<vmem>>, vector<1x1x16xf32>
    %820 = vector.shape_cast %819 : vector<1x1x16xf32> to vector<1x16xf32>
    %821 = vector.broadcast %820 : vector<1x16xf32> to vector<2x16xf32>
    %822 = arith.addf %818, %821 : vector<2x16xf32>
    %cst_224 = arith.constant 0.000000e+00 : f32
    %823 = vector.broadcast %cst_224 : f32 to vector<2x16xf32>
    %824 = arith.maximumf %822, %823 : vector<2x16xf32>
    %825 = vector.broadcast %780 : vector<1x16xf32> to vector<2x16xf32>
    %826 = arith.mulf %824, %825 : vector<2x16xf32>
    %cst_225 = arith.constant dense<0.000000e+00> : vector<2xf32>
    %827 = vector.multi_reduction <add>, %826, %cst_225 [1] : vector<2x16xf32> to vector<2xf32>
    %828 = vector.shape_cast %827 : vector<2xf32> to vector<2x1xf32>
    %829 = vector.broadcast %781 : vector<1x1xf32> to vector<2x1xf32>
    %830 = arith.addf %828, %829 : vector<2x1xf32>
    %831 = arith.negf %830 : vector<2x1xf32>
    %832 = math.exp %831 : vector<2x1xf32>
    %cst_226 = arith.constant 1.000000e+00 : f32
    %833 = vector.broadcast %cst_226 : f32 to vector<2x1xf32>
    %834 = arith.addf %833, %832 : vector<2x1xf32>
    %835 = arith.divf %833, %834 : vector<2x1xf32>
    %836 = vector.broadcast %835 : vector<2x1xf32> to vector<2x16xf32>
    %837 = arith.mulf %327, %836 : vector<2x16xf32>
    %838 = arith.addf %810, %837 : vector<2x16xf32>
    %839 = vector.broadcast %725 : vector<2x1xf32> to vector<2x16xf32>
    %840 = arith.subf %623, %839 : vector<2x16xf32>
    %841 = vector.broadcast %779 : vector<2x1xf32> to vector<2x16xf32>
    %842 = arith.mulf %840, %841 : vector<2x16xf32>
    %c2_227 = arith.constant 2 : index
    %c0_228 = arith.constant 0 : index
    %c0_229 = arith.constant 0 : index
    %843 = vector.load %arg14[%c2_227, %c0_228, %c0_229] : memref<8x1x16xf32, #tpu.memory_space<vmem>>, vector<1x1x16xf32>
    %844 = vector.shape_cast %843 : vector<1x1x16xf32> to vector<1x16xf32>
    %845 = vector.broadcast %844 : vector<1x16xf32> to vector<2x16xf32>
    %846 = arith.mulf %842, %845 : vector<2x16xf32>
    %c2_230 = arith.constant 2 : index
    %c0_231 = arith.constant 0 : index
    %c0_232 = arith.constant 0 : index
    %847 = vector.load %arg15[%c2_230, %c0_231, %c0_232] : memref<8x1x16xf32, #tpu.memory_space<vmem>>, vector<1x1x16xf32>
    %848 = vector.shape_cast %847 : vector<1x1x16xf32> to vector<1x16xf32>
    %849 = vector.broadcast %848 : vector<1x16xf32> to vector<2x16xf32>
    %850 = arith.addf %846, %849 : vector<2x16xf32>
    %cst_233 = arith.constant 0.000000e+00 : f32
    %851 = vector.broadcast %cst_233 : f32 to vector<2x16xf32>
    %852 = arith.maximumf %850, %851 : vector<2x16xf32>
    %853 = vector.broadcast %780 : vector<1x16xf32> to vector<2x16xf32>
    %854 = arith.mulf %852, %853 : vector<2x16xf32>
    %cst_234 = arith.constant dense<0.000000e+00> : vector<2xf32>
    %855 = vector.multi_reduction <add>, %854, %cst_234 [1] : vector<2x16xf32> to vector<2xf32>
    %856 = vector.shape_cast %855 : vector<2xf32> to vector<2x1xf32>
    %857 = vector.broadcast %781 : vector<1x1xf32> to vector<2x1xf32>
    %858 = arith.addf %856, %857 : vector<2x1xf32>
    %859 = arith.negf %858 : vector<2x1xf32>
    %860 = math.exp %859 : vector<2x1xf32>
    %cst_235 = arith.constant 1.000000e+00 : f32
    %861 = vector.broadcast %cst_235 : f32 to vector<2x1xf32>
    %862 = arith.addf %861, %860 : vector<2x1xf32>
    %863 = arith.divf %861, %862 : vector<2x1xf32>
    %864 = vector.broadcast %863 : vector<2x1xf32> to vector<2x16xf32>
    %865 = arith.mulf %355, %864 : vector<2x16xf32>
    %866 = arith.addf %838, %865 : vector<2x16xf32>
    %867 = vector.broadcast %725 : vector<2x1xf32> to vector<2x16xf32>
    %868 = arith.subf %638, %867 : vector<2x16xf32>
    %869 = vector.broadcast %779 : vector<2x1xf32> to vector<2x16xf32>
    %870 = arith.mulf %868, %869 : vector<2x16xf32>
    %c3_236 = arith.constant 3 : index
    %c0_237 = arith.constant 0 : index
    %c0_238 = arith.constant 0 : index
    %871 = vector.load %arg14[%c3_236, %c0_237, %c0_238] : memref<8x1x16xf32, #tpu.memory_space<vmem>>, vector<1x1x16xf32>
    %872 = vector.shape_cast %871 : vector<1x1x16xf32> to vector<1x16xf32>
    %873 = vector.broadcast %872 : vector<1x16xf32> to vector<2x16xf32>
    %874 = arith.mulf %870, %873 : vector<2x16xf32>
    %c3_239 = arith.constant 3 : index
    %c0_240 = arith.constant 0 : index
    %c0_241 = arith.constant 0 : index
    %875 = vector.load %arg15[%c3_239, %c0_240, %c0_241] : memref<8x1x16xf32, #tpu.memory_space<vmem>>, vector<1x1x16xf32>
    %876 = vector.shape_cast %875 : vector<1x1x16xf32> to vector<1x16xf32>
    %877 = vector.broadcast %876 : vector<1x16xf32> to vector<2x16xf32>
    %878 = arith.addf %874, %877 : vector<2x16xf32>
    %cst_242 = arith.constant 0.000000e+00 : f32
    %879 = vector.broadcast %cst_242 : f32 to vector<2x16xf32>
    %880 = arith.maximumf %878, %879 : vector<2x16xf32>
    %881 = vector.broadcast %780 : vector<1x16xf32> to vector<2x16xf32>
    %882 = arith.mulf %880, %881 : vector<2x16xf32>
    %cst_243 = arith.constant dense<0.000000e+00> : vector<2xf32>
    %883 = vector.multi_reduction <add>, %882, %cst_243 [1] : vector<2x16xf32> to vector<2xf32>
    %884 = vector.shape_cast %883 : vector<2xf32> to vector<2x1xf32>
    %885 = vector.broadcast %781 : vector<1x1xf32> to vector<2x1xf32>
    %886 = arith.addf %884, %885 : vector<2x1xf32>
    %887 = arith.negf %886 : vector<2x1xf32>
    %888 = math.exp %887 : vector<2x1xf32>
    %cst_244 = arith.constant 1.000000e+00 : f32
    %889 = vector.broadcast %cst_244 : f32 to vector<2x1xf32>
    %890 = arith.addf %889, %888 : vector<2x1xf32>
    %891 = arith.divf %889, %890 : vector<2x1xf32>
    %892 = vector.broadcast %891 : vector<2x1xf32> to vector<2x16xf32>
    %893 = arith.mulf %383, %892 : vector<2x16xf32>
    %894 = arith.addf %866, %893 : vector<2x16xf32>
    %895 = vector.broadcast %725 : vector<2x1xf32> to vector<2x16xf32>
    %896 = arith.subf %653, %895 : vector<2x16xf32>
    %897 = vector.broadcast %779 : vector<2x1xf32> to vector<2x16xf32>
    %898 = arith.mulf %896, %897 : vector<2x16xf32>
    %c4_245 = arith.constant 4 : index
    %c0_246 = arith.constant 0 : index
    %c0_247 = arith.constant 0 : index
    %899 = vector.load %arg14[%c4_245, %c0_246, %c0_247] : memref<8x1x16xf32, #tpu.memory_space<vmem>>, vector<1x1x16xf32>
    %900 = vector.shape_cast %899 : vector<1x1x16xf32> to vector<1x16xf32>
    %901 = vector.broadcast %900 : vector<1x16xf32> to vector<2x16xf32>
    %902 = arith.mulf %898, %901 : vector<2x16xf32>
    %c4_248 = arith.constant 4 : index
    %c0_249 = arith.constant 0 : index
    %c0_250 = arith.constant 0 : index
    %903 = vector.load %arg15[%c4_248, %c0_249, %c0_250] : memref<8x1x16xf32, #tpu.memory_space<vmem>>, vector<1x1x16xf32>
    %904 = vector.shape_cast %903 : vector<1x1x16xf32> to vector<1x16xf32>
    %905 = vector.broadcast %904 : vector<1x16xf32> to vector<2x16xf32>
    %906 = arith.addf %902, %905 : vector<2x16xf32>
    %cst_251 = arith.constant 0.000000e+00 : f32
    %907 = vector.broadcast %cst_251 : f32 to vector<2x16xf32>
    %908 = arith.maximumf %906, %907 : vector<2x16xf32>
    %909 = vector.broadcast %780 : vector<1x16xf32> to vector<2x16xf32>
    %910 = arith.mulf %908, %909 : vector<2x16xf32>
    %cst_252 = arith.constant dense<0.000000e+00> : vector<2xf32>
    %911 = vector.multi_reduction <add>, %910, %cst_252 [1] : vector<2x16xf32> to vector<2xf32>
    %912 = vector.shape_cast %911 : vector<2xf32> to vector<2x1xf32>
    %913 = vector.broadcast %781 : vector<1x1xf32> to vector<2x1xf32>
    %914 = arith.addf %912, %913 : vector<2x1xf32>
    %915 = arith.negf %914 : vector<2x1xf32>
    %916 = math.exp %915 : vector<2x1xf32>
    %cst_253 = arith.constant 1.000000e+00 : f32
    %917 = vector.broadcast %cst_253 : f32 to vector<2x1xf32>
    %918 = arith.addf %917, %916 : vector<2x1xf32>
    %919 = arith.divf %917, %918 : vector<2x1xf32>
    %920 = vector.broadcast %919 : vector<2x1xf32> to vector<2x16xf32>
    %921 = arith.mulf %411, %920 : vector<2x16xf32>
    %922 = arith.addf %894, %921 : vector<2x16xf32>
    %923 = vector.broadcast %725 : vector<2x1xf32> to vector<2x16xf32>
    %924 = arith.subf %668, %923 : vector<2x16xf32>
    %925 = vector.broadcast %779 : vector<2x1xf32> to vector<2x16xf32>
    %926 = arith.mulf %924, %925 : vector<2x16xf32>
    %c5_254 = arith.constant 5 : index
    %c0_255 = arith.constant 0 : index
    %c0_256 = arith.constant 0 : index
    %927 = vector.load %arg14[%c5_254, %c0_255, %c0_256] : memref<8x1x16xf32, #tpu.memory_space<vmem>>, vector<1x1x16xf32>
    %928 = vector.shape_cast %927 : vector<1x1x16xf32> to vector<1x16xf32>
    %929 = vector.broadcast %928 : vector<1x16xf32> to vector<2x16xf32>
    %930 = arith.mulf %926, %929 : vector<2x16xf32>
    %c5_257 = arith.constant 5 : index
    %c0_258 = arith.constant 0 : index
    %c0_259 = arith.constant 0 : index
    %931 = vector.load %arg15[%c5_257, %c0_258, %c0_259] : memref<8x1x16xf32, #tpu.memory_space<vmem>>, vector<1x1x16xf32>
    %932 = vector.shape_cast %931 : vector<1x1x16xf32> to vector<1x16xf32>
    %933 = vector.broadcast %932 : vector<1x16xf32> to vector<2x16xf32>
    %934 = arith.addf %930, %933 : vector<2x16xf32>
    %cst_260 = arith.constant 0.000000e+00 : f32
    %935 = vector.broadcast %cst_260 : f32 to vector<2x16xf32>
    %936 = arith.maximumf %934, %935 : vector<2x16xf32>
    %937 = vector.broadcast %780 : vector<1x16xf32> to vector<2x16xf32>
    %938 = arith.mulf %936, %937 : vector<2x16xf32>
    %cst_261 = arith.constant dense<0.000000e+00> : vector<2xf32>
    %939 = vector.multi_reduction <add>, %938, %cst_261 [1] : vector<2x16xf32> to vector<2xf32>
    %940 = vector.shape_cast %939 : vector<2xf32> to vector<2x1xf32>
    %941 = vector.broadcast %781 : vector<1x1xf32> to vector<2x1xf32>
    %942 = arith.addf %940, %941 : vector<2x1xf32>
    %943 = arith.negf %942 : vector<2x1xf32>
    %944 = math.exp %943 : vector<2x1xf32>
    %cst_262 = arith.constant 1.000000e+00 : f32
    %945 = vector.broadcast %cst_262 : f32 to vector<2x1xf32>
    %946 = arith.addf %945, %944 : vector<2x1xf32>
    %947 = arith.divf %945, %946 : vector<2x1xf32>
    %948 = vector.broadcast %947 : vector<2x1xf32> to vector<2x16xf32>
    %949 = arith.mulf %439, %948 : vector<2x16xf32>
    %950 = arith.addf %922, %949 : vector<2x16xf32>
    %951 = vector.broadcast %725 : vector<2x1xf32> to vector<2x16xf32>
    %952 = arith.subf %683, %951 : vector<2x16xf32>
    %953 = vector.broadcast %779 : vector<2x1xf32> to vector<2x16xf32>
    %954 = arith.mulf %952, %953 : vector<2x16xf32>
    %c6_263 = arith.constant 6 : index
    %c0_264 = arith.constant 0 : index
    %c0_265 = arith.constant 0 : index
    %955 = vector.load %arg14[%c6_263, %c0_264, %c0_265] : memref<8x1x16xf32, #tpu.memory_space<vmem>>, vector<1x1x16xf32>
    %956 = vector.shape_cast %955 : vector<1x1x16xf32> to vector<1x16xf32>
    %957 = vector.broadcast %956 : vector<1x16xf32> to vector<2x16xf32>
    %958 = arith.mulf %954, %957 : vector<2x16xf32>
    %c6_266 = arith.constant 6 : index
    %c0_267 = arith.constant 0 : index
    %c0_268 = arith.constant 0 : index
    %959 = vector.load %arg15[%c6_266, %c0_267, %c0_268] : memref<8x1x16xf32, #tpu.memory_space<vmem>>, vector<1x1x16xf32>
    %960 = vector.shape_cast %959 : vector<1x1x16xf32> to vector<1x16xf32>
    %961 = vector.broadcast %960 : vector<1x16xf32> to vector<2x16xf32>
    %962 = arith.addf %958, %961 : vector<2x16xf32>
    %cst_269 = arith.constant 0.000000e+00 : f32
    %963 = vector.broadcast %cst_269 : f32 to vector<2x16xf32>
    %964 = arith.maximumf %962, %963 : vector<2x16xf32>
    %965 = vector.broadcast %780 : vector<1x16xf32> to vector<2x16xf32>
    %966 = arith.mulf %964, %965 : vector<2x16xf32>
    %cst_270 = arith.constant dense<0.000000e+00> : vector<2xf32>
    %967 = vector.multi_reduction <add>, %966, %cst_270 [1] : vector<2x16xf32> to vector<2xf32>
    %968 = vector.shape_cast %967 : vector<2xf32> to vector<2x1xf32>
    %969 = vector.broadcast %781 : vector<1x1xf32> to vector<2x1xf32>
    %970 = arith.addf %968, %969 : vector<2x1xf32>
    %971 = arith.negf %970 : vector<2x1xf32>
    %972 = math.exp %971 : vector<2x1xf32>
    %cst_271 = arith.constant 1.000000e+00 : f32
    %973 = vector.broadcast %cst_271 : f32 to vector<2x1xf32>
    %974 = arith.addf %973, %972 : vector<2x1xf32>
    %975 = arith.divf %973, %974 : vector<2x1xf32>
    %976 = vector.broadcast %975 : vector<2x1xf32> to vector<2x16xf32>
    %977 = arith.mulf %467, %976 : vector<2x16xf32>
    %978 = arith.addf %950, %977 : vector<2x16xf32>
    %979 = vector.broadcast %725 : vector<2x1xf32> to vector<2x16xf32>
    %980 = arith.subf %698, %979 : vector<2x16xf32>
    %981 = vector.broadcast %779 : vector<2x1xf32> to vector<2x16xf32>
    %982 = arith.mulf %980, %981 : vector<2x16xf32>
    %c7_272 = arith.constant 7 : index
    %c0_273 = arith.constant 0 : index
    %c0_274 = arith.constant 0 : index
    %983 = vector.load %arg14[%c7_272, %c0_273, %c0_274] : memref<8x1x16xf32, #tpu.memory_space<vmem>>, vector<1x1x16xf32>
    %984 = vector.shape_cast %983 : vector<1x1x16xf32> to vector<1x16xf32>
    %985 = vector.broadcast %984 : vector<1x16xf32> to vector<2x16xf32>
    %986 = arith.mulf %982, %985 : vector<2x16xf32>
    %c7_275 = arith.constant 7 : index
    %c0_276 = arith.constant 0 : index
    %c0_277 = arith.constant 0 : index
    %987 = vector.load %arg15[%c7_275, %c0_276, %c0_277] : memref<8x1x16xf32, #tpu.memory_space<vmem>>, vector<1x1x16xf32>
    %988 = vector.shape_cast %987 : vector<1x1x16xf32> to vector<1x16xf32>
    %989 = vector.broadcast %988 : vector<1x16xf32> to vector<2x16xf32>
    %990 = arith.addf %986, %989 : vector<2x16xf32>
    %cst_278 = arith.constant 0.000000e+00 : f32
    %991 = vector.broadcast %cst_278 : f32 to vector<2x16xf32>
    %992 = arith.maximumf %990, %991 : vector<2x16xf32>
    %993 = vector.broadcast %780 : vector<1x16xf32> to vector<2x16xf32>
    %994 = arith.mulf %992, %993 : vector<2x16xf32>
    %cst_279 = arith.constant dense<0.000000e+00> : vector<2xf32>
    %995 = vector.multi_reduction <add>, %994, %cst_279 [1] : vector<2x16xf32> to vector<2xf32>
    %996 = vector.shape_cast %995 : vector<2xf32> to vector<2x1xf32>
    %997 = vector.broadcast %781 : vector<1x1xf32> to vector<2x1xf32>
    %998 = arith.addf %996, %997 : vector<2x1xf32>
    %999 = arith.negf %998 : vector<2x1xf32>
    %1000 = math.exp %999 : vector<2x1xf32>
    %cst_280 = arith.constant 1.000000e+00 : f32
    %1001 = vector.broadcast %cst_280 : f32 to vector<2x1xf32>
    %1002 = arith.addf %1001, %1000 : vector<2x1xf32>
    %1003 = arith.divf %1001, %1002 : vector<2x1xf32>
    %1004 = vector.broadcast %1003 : vector<2x1xf32> to vector<2x16xf32>
    %1005 = arith.mulf %495, %1004 : vector<2x16xf32>
    %1006 = arith.addf %978, %1005 : vector<2x16xf32>
    %c0_281 = arith.constant 0 : index
    %c0_282 = arith.constant 0 : index
    %1007 = vector.load %arg18[%c0_281, %c0_282] : memref<2x16xf32, #tpu.memory_space<vmem>>, vector<2x16xf32>
    tpu.vector_store %arg18[%c0_281, %c0_282], %1006 {strides = array<i32>} : memref<2x16xf32, #tpu.memory_space<vmem>>, vector<2x16xf32>,
    return
  }
  func.func @transform_0(%arg0: i32) -> (i32, i32) {
    %c0_i32 = arith.constant 0 : i32
    %c0_i32_0 = arith.constant 0 : i32
    %c0_i32_1 = arith.constant 0 : i32
    return %c0_i32, %c0_i32_0 : i32, i32
  }
  func.func @transform_1(%arg0: i32) -> (i32, i32) {
    %c0_i32 = arith.constant 0 : i32
    %c0_i32_0 = arith.constant 0 : i32
    %c0_i32_1 = arith.constant 0 : i32
    return %c0_i32, %c0_i32_0 : i32, i32
  }
  func.func @transform_2(%arg0: i32) -> (i32, i32) {
    %c0_i32 = arith.constant 0 : i32
    %c0_i32_0 = arith.constant 0 : i32
    %c0_i32_1 = arith.constant 0 : i32
    return %c0_i32, %c0_i32_0 : i32, i32
  }
  func.func @transform_3(%arg0: i32) -> (i32, i32) {
    %c0_i32 = arith.constant 0 : i32
    %c0_i32_0 = arith.constant 0 : i32
    %c0_i32_1 = arith.constant 0 : i32
    return %c0_i32, %c0_i32_0 : i32, i32
  }
  func.func @transform_4(%arg0: i32) -> (i32, i32) {
    %c0_i32 = arith.constant 0 : i32
    %c0_i32_0 = arith.constant 0 : i32
    %c0_i32_1 = arith.constant 0 : i32
    return %c0_i32, %c0_i32_0 : i32, i32
  }
  func.func @transform_5(%arg0: i32) -> (i32, i32) {
    %c0_i32 = arith.constant 0 : i32
    %c0_i32_0 = arith.constant 0 : i32
    %c0_i32_1 = arith.constant 0 : i32
    return %c0_i32, %c0_i32_0 : i32, i32
  }
  func.func @transform_6(%arg0: i32) -> (i32, i32) {
    %c0_i32 = arith.constant 0 : i32
    %c0_i32_0 = arith.constant 0 : i32
    %c0_i32_1 = arith.constant 0 : i32
    return %c0_i32, %c0_i32_0 : i32, i32
  }
  func.func @transform_7(%arg0: i32) -> (i32, i32) {
    %c0_i32 = arith.constant 0 : i32
    %c0_i32_0 = arith.constant 0 : i32
    %c0_i32_1 = arith.constant 0 : i32
    return %c0_i32, %c0_i32_0 : i32, i32
  }
  func.func @transform_8(%arg0: i32) -> (i32, i32) {
    %c0_i32 = arith.constant 0 : i32
    %c0_i32_0 = arith.constant 0 : i32
    %c0_i32_1 = arith.constant 0 : i32
    return %c0_i32, %c0_i32_0 : i32, i32
  }
  func.func @transform_9(%arg0: i32) -> (i32, i32, i32) {
    %c0_i32 = arith.constant 0 : i32
    %c0_i32_0 = arith.constant 0 : i32
    %c0_i32_1 = arith.constant 0 : i32
    %c0_i32_2 = arith.constant 0 : i32
    return %c0_i32, %c0_i32_0, %c0_i32_1 : i32, i32, i32
  }
  func.func @transform_10(%arg0: i32) -> (i32, i32, i32) {
    %c0_i32 = arith.constant 0 : i32
    %c0_i32_0 = arith.constant 0 : i32
    %c0_i32_1 = arith.constant 0 : i32
    %c0_i32_2 = arith.constant 0 : i32
    return %c0_i32, %c0_i32_0, %c0_i32_1 : i32, i32, i32
  }
  func.func @transform_11(%arg0: i32) -> (i32, i32) {
    %c0_i32 = arith.constant 0 : i32
    %c0_i32_0 = arith.constant 0 : i32
    %c0_i32_1 = arith.constant 0 : i32
    return %c0_i32, %c0_i32_0 : i32, i32
  }
  func.func @transform_12(%arg0: i32) -> (i32, i32) {
    %c0_i32 = arith.constant 0 : i32
    %c0_i32_0 = arith.constant 0 : i32
    %c0_i32_1 = arith.constant 0 : i32
    return %c0_i32, %c0_i32_0 : i32, i32
  }
  func.func @transform_13(%arg0: i32) -> (i32, i32, i32) {
    %c0_i32 = arith.constant 0 : i32
    %c0_i32_0 = arith.constant 0 : i32
    %c0_i32_1 = arith.constant 0 : i32
    %c0_i32_2 = arith.constant 0 : i32
    return %c0_i32, %c0_i32_0, %c0_i32_1 : i32, i32, i32
  }
  func.func @transform_14(%arg0: i32) -> (i32, i32, i32) {
    %c0_i32 = arith.constant 0 : i32
    %c0_i32_0 = arith.constant 0 : i32
    %c0_i32_1 = arith.constant 0 : i32
    %c0_i32_2 = arith.constant 0 : i32
    return %c0_i32, %c0_i32_0, %c0_i32_1 : i32, i32, i32
  }
  func.func @transform_15(%arg0: i32) -> (i32, i32) {
    %c0_i32 = arith.constant 0 : i32
    %c0_i32_0 = arith.constant 0 : i32
    %c0_i32_1 = arith.constant 0 : i32
    return %c0_i32, %c0_i32_0 : i32, i32
  }
  func.func @transform_16(%arg0: i32) -> (i32, i32) {
    %c0_i32 = arith.constant 0 : i32
    %c0_i32_0 = arith.constant 0 : i32
    %c0_i32_1 = arith.constant 0 : i32
    return %c0_i32, %c0_i32_0 : i32, i32
  }
  func.func @transform_17(%arg0: i32) -> (i32, i32) {
    %c0_i32 = arith.constant 0 : i32
    %c0_i32_0 = arith.constant 0 : i32
    %c0_i32_1 = arith.constant 0 : i32
    return %c0_i32, %c0_i32_0 : i32, i32
  }
}

module attributes {stable_mosaic.version = 11 : i64} {
  func.func @_tail_kernel(%arg0: i32, %arg1: memref<2x1152xbf16, #tpu.memory_space<vmem>>, %arg2: memref<1152x128xbf16, #tpu.memory_space<vmem>>, %arg3: memref<1x128xf32, #tpu.memory_space<vmem>>, %arg4: memref<1x128xf32, #tpu.memory_space<vmem>>, %arg5: memref<128x256xbf16, #tpu.memory_space<vmem>>, %arg6: memref<1x256xf32, #tpu.memory_space<vmem>>, %arg7: memref<1x256xf32, #tpu.memory_space<vmem>>, %arg8: memref<256x16xf32, #tpu.memory_space<vmem>>, %arg9: memref<1x16xf32, #tpu.memory_space<vmem>>, %arg10: memref<1x16xf32, #tpu.memory_space<vmem>>, %arg11: memref<16x16xf32, #tpu.memory_space<vmem>>, %arg12: memref<1x16xf32, #tpu.memory_space<vmem>>, %arg13: memref<16x256xf32, #tpu.memory_space<vmem>>, %arg14: memref<256x16xbf16, #tpu.memory_space<vmem>>, %arg15: memref<1x16xf32, #tpu.memory_space<vmem>>, %arg16: memref<1x16xf32, #tpu.memory_space<vmem>>, %arg17: memref<2x16xf32, #tpu.memory_space<vmem>>, %arg18: memref<16x32xf32, #tpu.memory_space<vmem>>, %arg19: memref<16x32xf32, #tpu.memory_space<vmem>>, %arg20: memref<1x32xf32, #tpu.memory_space<vmem>>, %arg21: memref<1x32xf32, #tpu.memory_space<vmem>>, %arg22: memref<1x32xf32, #tpu.memory_space<vmem>>, %arg23: memref<32x3xf32, #tpu.memory_space<vmem>>, %arg24: memref<1x3xf32, #tpu.memory_space<vmem>>, %arg25: memref<2x3xf32, #tpu.memory_space<vmem>>) attributes {dimension_semantics = [#tpu.dimension_semantics<arbitrary>], iteration_bounds = array<i64: 1>, scalar_prefetch = 0 : i64, scratch_operands = 0 : i64, tpu.core_type = #tpu.core_type<tc>, window_params = [{pipeline_mode = #tpu.pipeline_mode<synchronous>, transform_indices = @transform_0, window_bounds = array<i64: 2, 1152>}, {pipeline_mode = #tpu.pipeline_mode<synchronous>, transform_indices = @transform_1, window_bounds = array<i64: 1152, 128>}, {pipeline_mode = #tpu.pipeline_mode<synchronous>, transform_indices = @transform_2, window_bounds = array<i64: 1, 128>}, {pipeline_mode = #tpu.pipeline_mode<synchronous>, transform_indices = @transform_3, window_bounds = array<i64: 1, 128>}, {pipeline_mode = #tpu.pipeline_mode<synchronous>, transform_indices = @transform_4, window_bounds = array<i64: 128, 256>}, {pipeline_mode = #tpu.pipeline_mode<synchronous>, transform_indices = @transform_5, window_bounds = array<i64: 1, 256>}, {pipeline_mode = #tpu.pipeline_mode<synchronous>, transform_indices = @transform_6, window_bounds = array<i64: 1, 256>}, {pipeline_mode = #tpu.pipeline_mode<synchronous>, transform_indices = @transform_7, window_bounds = array<i64: 256, 16>}, {pipeline_mode = #tpu.pipeline_mode<synchronous>, transform_indices = @transform_8, window_bounds = array<i64: 1, 16>}, {pipeline_mode = #tpu.pipeline_mode<synchronous>, transform_indices = @transform_9, window_bounds = array<i64: 1, 16>}, {pipeline_mode = #tpu.pipeline_mode<synchronous>, transform_indices = @transform_10, window_bounds = array<i64: 16, 16>}, {pipeline_mode = #tpu.pipeline_mode<synchronous>, transform_indices = @transform_11, window_bounds = array<i64: 1, 16>}, {pipeline_mode = #tpu.pipeline_mode<synchronous>, transform_indices = @transform_12, window_bounds = array<i64: 16, 256>}, {pipeline_mode = #tpu.pipeline_mode<synchronous>, transform_indices = @transform_13, window_bounds = array<i64: 256, 16>}, {pipeline_mode = #tpu.pipeline_mode<synchronous>, transform_indices = @transform_14, window_bounds = array<i64: 1, 16>}, {pipeline_mode = #tpu.pipeline_mode<synchronous>, transform_indices = @transform_15, window_bounds = array<i64: 1, 16>}, {pipeline_mode = #tpu.pipeline_mode<synchronous>, transform_indices = @transform_16, window_bounds = array<i64: 2, 16>}, {pipeline_mode = #tpu.pipeline_mode<synchronous>, transform_indices = @transform_17, window_bounds = array<i64: 16, 32>}, {pipeline_mode = #tpu.pipeline_mode<synchronous>, transform_indices = @transform_18, window_bounds = array<i64: 16, 32>}, {pipeline_mode = #tpu.pipeline_mode<synchronous>, transform_indices = @transform_19, window_bounds = array<i64: 1, 32>}, {pipeline_mode = #tpu.pipeline_mode<synchronous>, transform_indices = @transform_20, window_bounds = array<i64: 1, 32>}, {pipeline_mode = #tpu.pipeline_mode<synchronous>, transform_indices = @transform_21, window_bounds = array<i64: 1, 32>}, {pipeline_mode = #tpu.pipeline_mode<synchronous>, transform_indices = @transform_22, window_bounds = array<i64: 32, 3>}, {pipeline_mode = #tpu.pipeline_mode<synchronous>, transform_indices = @transform_23, window_bounds = array<i64: 1, 3>}, {pipeline_mode = #tpu.pipeline_mode<synchronous>, transform_indices = @transform_24, window_bounds = array<i64: 2, 3>}]} {
    %c0 = arith.constant 0 : index
    %c0_0 = arith.constant 0 : index
    %0 = vector.load %arg1[%c0, %c0_0] : memref<2x1152xbf16, #tpu.memory_space<vmem>>, vector<2x1152xbf16>
    %c0_1 = arith.constant 0 : index
    %c0_2 = arith.constant 0 : index
    %1 = vector.load %arg2[%c0_1, %c0_2] : memref<1152x128xbf16, #tpu.memory_space<vmem>>, vector<1152x128xbf16>
    %cst = arith.constant dense<0.000000e+00> : vector<2x128xf32>
    %2 = tpu.matmul %0, %1, %cst {dimension_numbers = #tpu.dot_dimension_numbers<[1], [0], [0], [1], [0, 0, 1, 1], [], []>} : vector<2x1152xbf16>, vector<1152x128xbf16>, vector<2x128xf32> -> vector<2x128xf32>
    %c0_3 = arith.constant 0 : index
    %c0_4 = arith.constant 0 : index
    %3 = vector.load %arg3[%c0_3, %c0_4] : memref<1x128xf32, #tpu.memory_space<vmem>>, vector<1x128xf32>
    %4 = vector.broadcast %3 : vector<1x128xf32> to vector<2x128xf32>
    %5 = arith.mulf %2, %4 : vector<2x128xf32>
    %c0_5 = arith.constant 0 : index
    %c0_6 = arith.constant 0 : index
    %6 = vector.load %arg4[%c0_5, %c0_6] : memref<1x128xf32, #tpu.memory_space<vmem>>, vector<1x128xf32>
    %7 = vector.broadcast %6 : vector<1x128xf32> to vector<2x128xf32>
    %8 = arith.addf %5, %7 : vector<2x128xf32>
    %cst_7 = arith.constant 0.000000e+00 : f32
    %9 = vector.broadcast %cst_7 : f32 to vector<2x128xf32>
    %10 = arith.maximumf %8, %9 : vector<2x128xf32>
    %11 = arith.truncf %10 : vector<2x128xf32> to vector<2x128xbf16>
    %c0_8 = arith.constant 0 : index
    %c0_9 = arith.constant 0 : index
    %12 = vector.load %arg5[%c0_8, %c0_9] : memref<128x256xbf16, #tpu.memory_space<vmem>>, vector<128x256xbf16>
    %cst_10 = arith.constant dense<0.000000e+00> : vector<2x256xf32>
    %13 = tpu.matmul %11, %12, %cst_10 {dimension_numbers = #tpu.dot_dimension_numbers<[1], [0], [0], [1], [0, 0, 1, 1], [], []>} : vector<2x128xbf16>, vector<128x256xbf16>, vector<2x256xf32> -> vector<2x256xf32>
    %c0_11 = arith.constant 0 : index
    %c0_12 = arith.constant 0 : index
    %14 = vector.load %arg6[%c0_11, %c0_12] : memref<1x256xf32, #tpu.memory_space<vmem>>, vector<1x256xf32>
    %15 = vector.broadcast %14 : vector<1x256xf32> to vector<2x256xf32>
    %16 = arith.mulf %13, %15 : vector<2x256xf32>
    %c0_13 = arith.constant 0 : index
    %c0_14 = arith.constant 0 : index
    %17 = vector.load %arg7[%c0_13, %c0_14] : memref<1x256xf32, #tpu.memory_space<vmem>>, vector<1x256xf32>
    %18 = vector.broadcast %17 : vector<1x256xf32> to vector<2x256xf32>
    %19 = arith.addf %16, %18 : vector<2x256xf32>
    %cst_15 = arith.constant 0.000000e+00 : f32
    %20 = vector.broadcast %cst_15 : f32 to vector<2x256xf32>
    %21 = arith.maximumf %19, %20 : vector<2x256xf32>
    %c0_16 = arith.constant 0 : index
    %c0_17 = arith.constant 0 : index
    %22 = vector.load %arg8[%c0_16, %c0_17] : memref<256x16xf32, #tpu.memory_space<vmem>>, vector<256x16xf32>
    %cst_18 = arith.constant dense<0.000000e+00> : vector<2x16xf32>
    %23 = tpu.matmul %21, %22, %cst_18 {dimension_numbers = #tpu.dot_dimension_numbers<[1], [0], [0], [1], [0, 0, 1, 1], [], []>} : vector<2x256xf32>, vector<256x16xf32>, vector<2x16xf32> -> vector<2x16xf32>
    %c0_19 = arith.constant 0 : index
    %c0_20 = arith.constant 0 : index
    %24 = vector.load %arg9[%c0_19, %c0_20] : memref<1x16xf32, #tpu.memory_space<vmem>>, vector<1x16xf32>
    %25 = vector.broadcast %24 : vector<1x16xf32> to vector<2x16xf32>
    %26 = arith.mulf %23, %25 : vector<2x16xf32>
    %c0_21 = arith.constant 0 : index
    %c0_22 = arith.constant 0 : index
    %27 = vector.load %arg10[%c0_21, %c0_22] : memref<1x16xf32, #tpu.memory_space<vmem>>, vector<1x16xf32>
    %28 = vector.broadcast %27 : vector<1x16xf32> to vector<2x16xf32>
    %29 = arith.addf %26, %28 : vector<2x16xf32>
    %cst_23 = arith.constant 0.000000e+00 : f32
    %30 = vector.broadcast %cst_23 : f32 to vector<2x16xf32>
    %31 = arith.maximumf %29, %30 : vector<2x16xf32>
    %c0_24 = arith.constant 0 : index
    %c0_25 = arith.constant 0 : index
    %32 = vector.load %arg11[%c0_24, %c0_25] : memref<16x16xf32, #tpu.memory_space<vmem>>, vector<16x16xf32>
    %cst_26 = arith.constant dense<0.000000e+00> : vector<2x16xf32>
    %33 = tpu.matmul %31, %32, %cst_26 {dimension_numbers = #tpu.dot_dimension_numbers<[1], [0], [0], [1], [0, 0, 1, 1], [], []>} : vector<2x16xf32>, vector<16x16xf32>, vector<2x16xf32> -> vector<2x16xf32>
    %c0_27 = arith.constant 0 : index
    %c0_28 = arith.constant 0 : index
    %34 = vector.load %arg12[%c0_27, %c0_28] : memref<1x16xf32, #tpu.memory_space<vmem>>, vector<1x16xf32>
    %35 = vector.broadcast %34 : vector<1x16xf32> to vector<2x16xf32>
    %36 = arith.addf %33, %35 : vector<2x16xf32>
    %cst_29 = arith.constant dense<0xFF800000> : vector<2xf32>
    %37 = vector.multi_reduction <maximumf>, %36, %cst_29 [1] : vector<2x16xf32> to vector<2xf32>
    %38 = vector.shape_cast %37 : vector<2xf32> to vector<2x1xf32>
    %39 = vector.broadcast %38 : vector<2x1xf32> to vector<2x16xf32>
    %40 = arith.subf %36, %39 : vector<2x16xf32>
    %41 = math.exp %40 : vector<2x16xf32>
    %cst_30 = arith.constant dense<0.000000e+00> : vector<2xf32>
    %42 = vector.multi_reduction <add>, %41, %cst_30 [1] : vector<2x16xf32> to vector<2xf32>
    %43 = vector.shape_cast %42 : vector<2xf32> to vector<2x1xf32>
    %44 = tpu.reciprocal %43 : vector<2x1xf32> -> vector<2x1xf32>
    %45 = vector.broadcast %44 : vector<2x1xf32> to vector<2x16xf32>
    %46 = arith.mulf %41, %45 : vector<2x16xf32>
    %c0_31 = arith.constant 0 : index
    %c0_32 = arith.constant 0 : index
    %47 = vector.load %arg13[%c0_31, %c0_32] : memref<16x256xf32, #tpu.memory_space<vmem>>, vector<16x256xf32>
    %cst_33 = arith.constant dense<0.000000e+00> : vector<2x256xf32>
    %48 = tpu.matmul %46, %47, %cst_33 {dimension_numbers = #tpu.dot_dimension_numbers<[1], [0], [0], [1], [0, 0, 1, 1], [], []>} : vector<2x16xf32>, vector<16x256xf32>, vector<2x256xf32> -> vector<2x256xf32>
    %49 = arith.mulf %21, %48 : vector<2x256xf32>
    %50 = arith.truncf %49 : vector<2x256xf32> to vector<2x256xbf16>
    %c0_34 = arith.constant 0 : index
    %c0_35 = arith.constant 0 : index
    %51 = vector.load %arg14[%c0_34, %c0_35] : memref<256x16xbf16, #tpu.memory_space<vmem>>, vector<256x16xbf16>
    %cst_36 = arith.constant dense<0.000000e+00> : vector<2x16xf32>
    %52 = tpu.matmul %50, %51, %cst_36 {dimension_numbers = #tpu.dot_dimension_numbers<[1], [0], [0], [1], [0, 0, 1, 1], [], []>} : vector<2x256xbf16>, vector<256x16xbf16>, vector<2x16xf32> -> vector<2x16xf32>
    %c0_37 = arith.constant 0 : index
    %c0_38 = arith.constant 0 : index
    %53 = vector.load %arg15[%c0_37, %c0_38] : memref<1x16xf32, #tpu.memory_space<vmem>>, vector<1x16xf32>
    %54 = vector.broadcast %53 : vector<1x16xf32> to vector<2x16xf32>
    %55 = arith.mulf %52, %54 : vector<2x16xf32>
    %c0_39 = arith.constant 0 : index
    %c0_40 = arith.constant 0 : index
    %56 = vector.load %arg16[%c0_39, %c0_40] : memref<1x16xf32, #tpu.memory_space<vmem>>, vector<1x16xf32>
    %57 = vector.broadcast %56 : vector<1x16xf32> to vector<2x16xf32>
    %58 = arith.addf %55, %57 : vector<2x16xf32>
    %c0_41 = arith.constant 0 : index
    %c0_42 = arith.constant 0 : index
    %59 = vector.load %arg17[%c0_41, %c0_42] : memref<2x16xf32, #tpu.memory_space<vmem>>, vector<2x16xf32>
    %c0_43 = arith.constant 0 : index
    %c0_44 = arith.constant 0 : index
    %60 = vector.load %arg18[%c0_43, %c0_44] : memref<16x32xf32, #tpu.memory_space<vmem>>, vector<16x32xf32>
    %cst_45 = arith.constant dense<0.000000e+00> : vector<2x32xf32>
    %61 = tpu.matmul %59, %60, %cst_45 {dimension_numbers = #tpu.dot_dimension_numbers<[1], [0], [0], [1], [0, 0, 1, 1], [], []>} : vector<2x16xf32>, vector<16x32xf32>, vector<2x32xf32> -> vector<2x32xf32>
    %c0_46 = arith.constant 0 : index
    %c0_47 = arith.constant 0 : index
    %62 = vector.load %arg19[%c0_46, %c0_47] : memref<16x32xf32, #tpu.memory_space<vmem>>, vector<16x32xf32>
    %cst_48 = arith.constant dense<0.000000e+00> : vector<2x32xf32>
    %63 = tpu.matmul %58, %62, %cst_48 {dimension_numbers = #tpu.dot_dimension_numbers<[1], [0], [0], [1], [0, 0, 1, 1], [], []>} : vector<2x16xf32>, vector<16x32xf32>, vector<2x32xf32> -> vector<2x32xf32>
    %64 = arith.addf %61, %63 : vector<2x32xf32>
    %c0_49 = arith.constant 0 : index
    %c0_50 = arith.constant 0 : index
    %65 = vector.load %arg20[%c0_49, %c0_50] : memref<1x32xf32, #tpu.memory_space<vmem>>, vector<1x32xf32>
    %66 = vector.broadcast %65 : vector<1x32xf32> to vector<2x32xf32>
    %67 = arith.addf %64, %66 : vector<2x32xf32>
    %cst_51 = arith.constant dense<0.000000e+00> : vector<2xf32>
    %68 = vector.multi_reduction <add>, %67, %cst_51 [1] : vector<2x32xf32> to vector<2xf32>
    %69 = vector.shape_cast %68 : vector<2xf32> to vector<2x1xf32>
    %cst_52 = arith.constant 3.200000e+01 : f32
    %70 = vector.broadcast %cst_52 : f32 to vector<2x1xf32>
    %71 = arith.divf %69, %70 : vector<2x1xf32>
    %72 = vector.broadcast %71 : vector<2x1xf32> to vector<2x32xf32>
    %73 = arith.subf %67, %72 : vector<2x32xf32>
    %74 = arith.mulf %73, %73 : vector<2x32xf32>
    %cst_53 = arith.constant dense<0.000000e+00> : vector<2xf32>
    %75 = vector.multi_reduction <add>, %74, %cst_53 [1] : vector<2x32xf32> to vector<2xf32>
    %76 = vector.shape_cast %75 : vector<2xf32> to vector<2x1xf32>
    %cst_54 = arith.constant 3.200000e+01 : f32
    %77 = vector.broadcast %cst_54 : f32 to vector<2x1xf32>
    %78 = arith.divf %76, %77 : vector<2x1xf32>
    %79 = vector.broadcast %71 : vector<2x1xf32> to vector<2x32xf32>
    %80 = arith.subf %67, %79 : vector<2x32xf32>
    %cst_55 = arith.constant 9.99999974E-6 : f32
    %81 = vector.broadcast %cst_55 : f32 to vector<2x1xf32>
    %82 = arith.addf %78, %81 : vector<2x1xf32>
    %83 = math.rsqrt %82 : vector<2x1xf32>
    %84 = vector.broadcast %83 : vector<2x1xf32> to vector<2x32xf32>
    %85 = arith.mulf %80, %84 : vector<2x32xf32>
    %c0_56 = arith.constant 0 : index
    %c0_57 = arith.constant 0 : index
    %86 = vector.load %arg21[%c0_56, %c0_57] : memref<1x32xf32, #tpu.memory_space<vmem>>, vector<1x32xf32>
    %87 = vector.broadcast %86 : vector<1x32xf32> to vector<2x32xf32>
    %88 = arith.mulf %85, %87 : vector<2x32xf32>
    %c0_58 = arith.constant 0 : index
    %c0_59 = arith.constant 0 : index
    %89 = vector.load %arg22[%c0_58, %c0_59] : memref<1x32xf32, #tpu.memory_space<vmem>>, vector<1x32xf32>
    %90 = vector.broadcast %89 : vector<1x32xf32> to vector<2x32xf32>
    %91 = arith.addf %88, %90 : vector<2x32xf32>
    %cst_60 = arith.constant 0.000000e+00 : f32
    %92 = vector.broadcast %cst_60 : f32 to vector<2x32xf32>
    %93 = arith.maximumf %91, %92 : vector<2x32xf32>
    %c0_61 = arith.constant 0 : index
    %c0_62 = arith.constant 0 : index
    %94 = vector.load %arg23[%c0_61, %c0_62] : memref<32x3xf32, #tpu.memory_space<vmem>>, vector<32x3xf32>
    %cst_63 = arith.constant dense<0.000000e+00> : vector<2x3xf32>
    %95 = tpu.matmul %93, %94, %cst_63 {dimension_numbers = #tpu.dot_dimension_numbers<[1], [0], [0], [1], [0, 0, 1, 1], [], []>} : vector<2x32xf32>, vector<32x3xf32>, vector<2x3xf32> -> vector<2x3xf32>
    %c0_64 = arith.constant 0 : index
    %c0_65 = arith.constant 0 : index
    %96 = vector.load %arg24[%c0_64, %c0_65] : memref<1x3xf32, #tpu.memory_space<vmem>>, vector<1x3xf32>
    %97 = vector.broadcast %96 : vector<1x3xf32> to vector<2x3xf32>
    %98 = arith.addf %95, %97 : vector<2x3xf32>
    %c0_66 = arith.constant 0 : index
    %c0_67 = arith.constant 0 : index
    %99 = vector.load %arg25[%c0_66, %c0_67] : memref<2x3xf32, #tpu.memory_space<vmem>>, vector<2x3xf32>
    tpu.vector_store %arg25[%c0_66, %c0_67], %98 {strides = array<i32>} : memref<2x3xf32, #tpu.memory_space<vmem>>, vector<2x3xf32>,
    return
  }
  func.func @transform_0(%arg0: i32) -> (i32, i32) {
    %c0_i32 = arith.constant 0 : i32
    %c0_i32_0 = arith.constant 0 : i32
    %c0_i32_1 = arith.constant 0 : i32
    return %c0_i32, %c0_i32_0 : i32, i32
  }
  func.func @transform_1(%arg0: i32) -> (i32, i32) {
    %c0_i32 = arith.constant 0 : i32
    %c0_i32_0 = arith.constant 0 : i32
    %c0_i32_1 = arith.constant 0 : i32
    return %c0_i32, %c0_i32_0 : i32, i32
  }
  func.func @transform_2(%arg0: i32) -> (i32, i32) {
    %c0_i32 = arith.constant 0 : i32
    %c0_i32_0 = arith.constant 0 : i32
    %c0_i32_1 = arith.constant 0 : i32
    return %c0_i32, %c0_i32_0 : i32, i32
  }
  func.func @transform_3(%arg0: i32) -> (i32, i32) {
    %c0_i32 = arith.constant 0 : i32
    %c0_i32_0 = arith.constant 0 : i32
    %c0_i32_1 = arith.constant 0 : i32
    return %c0_i32, %c0_i32_0 : i32, i32
  }
  func.func @transform_4(%arg0: i32) -> (i32, i32) {
    %c0_i32 = arith.constant 0 : i32
    %c0_i32_0 = arith.constant 0 : i32
    %c0_i32_1 = arith.constant 0 : i32
    return %c0_i32, %c0_i32_0 : i32, i32
  }
  func.func @transform_5(%arg0: i32) -> (i32, i32) {
    %c0_i32 = arith.constant 0 : i32
    %c0_i32_0 = arith.constant 0 : i32
    %c0_i32_1 = arith.constant 0 : i32
    return %c0_i32, %c0_i32_0 : i32, i32
  }
  func.func @transform_6(%arg0: i32) -> (i32, i32) {
    %c0_i32 = arith.constant 0 : i32
    %c0_i32_0 = arith.constant 0 : i32
    %c0_i32_1 = arith.constant 0 : i32
    return %c0_i32, %c0_i32_0 : i32, i32
  }
  func.func @transform_7(%arg0: i32) -> (i32, i32) {
    %c0_i32 = arith.constant 0 : i32
    %c0_i32_0 = arith.constant 0 : i32
    %c0_i32_1 = arith.constant 0 : i32
    return %c0_i32, %c0_i32_0 : i32, i32
  }
  func.func @transform_8(%arg0: i32) -> (i32, i32) {
    %c0_i32 = arith.constant 0 : i32
    %c0_i32_0 = arith.constant 0 : i32
    %c0_i32_1 = arith.constant 0 : i32
    return %c0_i32, %c0_i32_0 : i32, i32
  }
  func.func @transform_9(%arg0: i32) -> (i32, i32) {
    %c0_i32 = arith.constant 0 : i32
    %c0_i32_0 = arith.constant 0 : i32
    %c0_i32_1 = arith.constant 0 : i32
    return %c0_i32, %c0_i32_0 : i32, i32
  }
  func.func @transform_10(%arg0: i32) -> (i32, i32) {
    %c0_i32 = arith.constant 0 : i32
    %c0_i32_0 = arith.constant 0 : i32
    %c0_i32_1 = arith.constant 0 : i32
    return %c0_i32, %c0_i32_0 : i32, i32
  }
  func.func @transform_11(%arg0: i32) -> (i32, i32) {
    %c0_i32 = arith.constant 0 : i32
    %c0_i32_0 = arith.constant 0 : i32
    %c0_i32_1 = arith.constant 0 : i32
    return %c0_i32, %c0_i32_0 : i32, i32
  }
  func.func @transform_12(%arg0: i32) -> (i32, i32) {
    %c0_i32 = arith.constant 0 : i32
    %c0_i32_0 = arith.constant 0 : i32
    %c0_i32_1 = arith.constant 0 : i32
    return %c0_i32, %c0_i32_0 : i32, i32
  }
  func.func @transform_13(%arg0: i32) -> (i32, i32) {
    %c0_i32 = arith.constant 0 : i32
    %c0_i32_0 = arith.constant 0 : i32
    %c0_i32_1 = arith.constant 0 : i32
    return %c0_i32, %c0_i32_0 : i32, i32
  }
  func.func @transform_14(%arg0: i32) -> (i32, i32) {
    %c0_i32 = arith.constant 0 : i32
    %c0_i32_0 = arith.constant 0 : i32
    %c0_i32_1 = arith.constant 0 : i32
    return %c0_i32, %c0_i32_0 : i32, i32
  }
  func.func @transform_15(%arg0: i32) -> (i32, i32) {
    %c0_i32 = arith.constant 0 : i32
    %c0_i32_0 = arith.constant 0 : i32
    %c0_i32_1 = arith.constant 0 : i32
    return %c0_i32, %c0_i32_0 : i32, i32
  }
  func.func @transform_16(%arg0: i32) -> (i32, i32) {
    %c0_i32 = arith.constant 0 : i32
    %c0_i32_0 = arith.constant 0 : i32
    %c0_i32_1 = arith.constant 0 : i32
    return %c0_i32, %c0_i32_0 : i32, i32
  }
  func.func @transform_17(%arg0: i32) -> (i32, i32) {
    %c0_i32 = arith.constant 0 : i32
    %c0_i32_0 = arith.constant 0 : i32
    %c0_i32_1 = arith.constant 0 : i32
    return %c0_i32, %c0_i32_0 : i32, i32
  }
  func.func @transform_18(%arg0: i32) -> (i32, i32) {
    %c0_i32 = arith.constant 0 : i32
    %c0_i32_0 = arith.constant 0 : i32
    %c0_i32_1 = arith.constant 0 : i32
    return %c0_i32, %c0_i32_0 : i32, i32
  }
  func.func @transform_19(%arg0: i32) -> (i32, i32) {
    %c0_i32 = arith.constant 0 : i32
    %c0_i32_0 = arith.constant 0 : i32
    %c0_i32_1 = arith.constant 0 : i32
    return %c0_i32, %c0_i32_0 : i32, i32
  }
  func.func @transform_20(%arg0: i32) -> (i32, i32) {
    %c0_i32 = arith.constant 0 : i32
    %c0_i32_0 = arith.constant 0 : i32
    %c0_i32_1 = arith.constant 0 : i32
    return %c0_i32, %c0_i32_0 : i32, i32
  }
  func.func @transform_21(%arg0: i32) -> (i32, i32) {
    %c0_i32 = arith.constant 0 : i32
    %c0_i32_0 = arith.constant 0 : i32
    %c0_i32_1 = arith.constant 0 : i32
    return %c0_i32, %c0_i32_0 : i32, i32
  }
  func.func @transform_22(%arg0: i32) -> (i32, i32) {
    %c0_i32 = arith.constant 0 : i32
    %c0_i32_0 = arith.constant 0 : i32
    %c0_i32_1 = arith.constant 0 : i32
    return %c0_i32, %c0_i32_0 : i32, i32
  }
  func.func @transform_23(%arg0: i32) -> (i32, i32) {
    %c0_i32 = arith.constant 0 : i32
    %c0_i32_0 = arith.constant 0 : i32
    %c0_i32_1 = arith.constant 0 : i32
    return %c0_i32, %c0_i32_0 : i32, i32
  }
  func.func @transform_24(%arg0: i32) -> (i32, i32) {
    %c0_i32 = arith.constant 0 : i32
    %c0_i32_0 = arith.constant 0 : i32
    %c0_i32_1 = arith.constant 0 : i32
    return %c0_i32, %c0_i32_0 : i32, i32
  }
}

</mosaic_0001>

<bundles_post_ra>
// kernel: classifier_forward.7
= control target key start
LH: loop header
LB: loop body
LE: loop exit
PB: predicated region body
PF: predicated region fallthrough
CT: control target
= control target key end

     0   :  { %vm727_vm0 = vcmask 1044480   ;;  %vm728_vm1 = vcmask 1045504   ;;  %v2670_v3 = vmov 65535   ;;  %v2671_v5 = vmov 0   ;;  %s3800_s0 = inlined_call_operand.vmem [shape: bf16[27,8192], index: 0, kind: input, shape index: {}]   ;;  %s3801_s1 = inlined_call_operand.vmem [shape: bf16[8,27], index: 1, kind: input, shape index: {}]   ;;  %s3802_s2 = inlined_call_operand.vmem [shape: f32[8,1], index: 2, kind: input, shape index: {}]   ;;  %s3803_s3 = inlined_call_operand.vmem [shape: f32[8,1], index: 3, kind: input, shape index: {}]   ;;  %s3804_s4 = inlined_call_operand.vmem [shape: f32[8,8192], index: 4, kind: output, shape index: {}]  }
   0x1   :  { %v18_v0 = vld [vmem:[%s3800_s0] sm:$0xff]  ;;  %v19_v2 = vld [vmem:[%s3800_s0 + $0x8] sm:$0xff]  ;;  %v729_v4 = vsel %vm727_vm0, 4294967295, %v2670_v3  ;;  %955 = vmatprep.mubr.bf16.mxu0 %v2671_v5  ;;  %996 = vmatprep.mubr.bf16.mxu1 %v2671_v5  ;;  %v20_v20 = vld [vmem:[%s3800_s0 + $0x10] sm:$0xff]  ;;  %vm723_vm2 = vcmask 220160  }
   0x2   :  { %v50_v1 = vld [vmem:[%s3800_s0 + $0x100] sm:$0xff]  ;;  %v51_v7 = vld [vmem:[%s3800_s0 + $0x108] sm:$0xff]  ;;  %v2717_v11 = vsel %vm728_vm1, %v729_v4, 0  ;;  %2669 = vset.pattern.permute.xlu0 %v2671_v5  ;;  %v52_v21 = vld [vmem:[%s3800_s0 + $0x110] sm:$0xff] }
   0x3   :  { %v2508_v6 = vcombine.high %v18_v0, %v50_v1  ;;  %v2507_v8 = vcombine.low %v18_v0, %v50_v1  ;;  %v82_v9 = vld [vmem:[%s3800_s0 + $0x200] sm:$0xff]  ;;  %v2510_v12 = vcombine.high %v19_v2, %v51_v7  ;;  %v2509_v13 = vcombine.low %v19_v2, %v51_v7  ;;  %v83_v15 = vld [vmem:[%s3800_s0 + $0x208] sm:$0xff]  ;;  %v21_v22 = vld [vmem:[%s3800_s0 + $0x18] sm:$0xff] }
   0x4   :  { %v114_v10 = vld [vmem:[%s3800_s0 + $0x300] sm:$0x33]  ;;  %v115_v16 = vld [vmem:[%s3800_s0 + $0x308] sm:$0x33]  ;;  %v53_v25 = vld [vmem:[%s3800_s0 + $0x118] sm:$0xff]  ;;  %v2512_v30 = vcombine.high %v20_v20, %v52_v21  ;;  %v2511_v37 = vcombine.low %v20_v20, %v52_v21 }
   0x5   :  { %v2572_v14 = vcombine.high %v82_v9, %v114_v10  ;;  %v2571_v17 = vcombine.low %v82_v9, %v114_v10  ;;  %923 = vmatprep.subr.bf16.mxu0 %v2508_v6  ;;  %v2574_v18 = vcombine.high %v83_v15, %v115_v16  ;;  %v2573_v19 = vcombine.low %v83_v15, %v115_v16  ;;  %v84_v26 = vld [vmem:[%s3800_s0 + $0x210] sm:$0xff]  ;;  %v85_v31 = vld [vmem:[%s3800_s0 + $0x218] sm:$0xff]  ;;  %v2757_v36 = vld [vmem:[%s3801_s1] sm:$0xf] }
   0x6   :  { %964 = vmatprep.subr.bf16.mxu1 %v2510_v12  ;;  %924 = vmatpush1.bf16.msra.mxu0 %v2507_v8  ;;  %v116_v27 = vld [vmem:[%s3800_s0 + $0x310] sm:$0x33]  ;;  %v117_v32 = vld [vmem:[%s3800_s0 + $0x318] sm:$0x33]  ;;  %v2514_v33 = vcombine.high %v21_v22, %v53_v25  ;;  %v2513_v39 = vcombine.low %v21_v22, %v53_v25  ;;  %v22_v42 = vld [vmem:[%s3800_s0 + $0x20] sm:$0xff] }
   0x7   :  { %v735_v23 = vand.u32 %v2572_v14, %v2717_v11  ;;  %v732_v24 = vand.u32 %v2571_v17, %v2717_v11  ;;  %965 = vmatpush1.bf16.msra.mxu1 %v2509_v13  ;;  %v741_v28 = vand.u32 %v2574_v18, %v2717_v11  ;;  %v738_v29 = vand.u32 %v2573_v19, %v2717_v11  ;;  %v54_v43 = vld [vmem:[%s3800_s0 + $0x120] sm:$0xff]  ;;  %v23_v45 = vld [vmem:[%s3800_s0 + $0x28] sm:$0xff]  ;;  %v24_v62 = vld [vmem:[%s3800_s0 + $0x30] sm:$0xff] }
   0x8   :  { %v2576_v34 = vcombine.high %v84_v26, %v116_v27  ;;  %v2578_v35 = vcombine.high %v85_v31, %v117_v32  ;;  %v2575_v38 = vcombine.low %v84_v26, %v116_v27  ;;  %v2577_v41 = vcombine.low %v85_v31, %v117_v32  ;;  %v86_v46 = vld [vmem:[%s3800_s0 + $0x220] sm:$0xff]  ;;  %v55_v48 = vld [vmem:[%s3800_s0 + $0x128] sm:$0xff]  ;;  %v56_v63 = vld [vmem:[%s3800_s0 + $0x130] sm:$0xff] }
   0x9   :  { %925 = vmatprep.subr.bf16.mxu0 %v735_v23  ;;  %966 = vmatprep.subr.bf16.mxu1 %v741_v28  ;;  %v118_v47 = vld [vmem:[%s3800_s0 + $0x320] sm:$0x33]  ;;  %v87_v49 = vld [vmem:[%s3800_s0 + $0x228] sm:$0xff]  ;;  %v2516_v53 = vcombine.high %v22_v42, %v54_v43  ;;  %v2518_v55 = vcombine.high %v23_v45, %v55_v48  ;;  %v2515_v57 = vcombine.low %v22_v42, %v54_v43  ;;  %v25_v1 = vld [vmem:[%s3800_s0 + $0x38] sm:$0xff] }
   0xa   :  { %926 = vmatpush1.bf16.msra.mxu0 %v732_v24  ;;  %v747_v40 = vand.u32 %v2576_v34, %v2717_v11  ;;  %v753_v44 = vand.u32 %v2578_v35, %v2717_v11  ;;  %v119_v50 = vld [vmem:[%s3800_s0 + $0x328] sm:$0x33]  ;;  %v744_v51 = vand.u32 %v2575_v38, %v2717_v11  ;;  %v750_v52 = vand.u32 %v2577_v41, %v2717_v11  ;;  %v88_v2 = vld [vmem:[%s3800_s0 + $0x230] sm:$0xff]  ;;  %v57_v4 = vld [vmem:[%s3800_s0 + $0x138] sm:$0xff] }
   0xb   :  { %967 = vmatpush1.bf16.msra.mxu1 %v738_v29  ;;  %1005 = vmatprep.subr.bf16.mxu0 %v2512_v30  ;;  %v2580_v54 = vcombine.high %v86_v46, %v118_v47  ;;  %v2582_v56 = vcombine.high %v87_v49, %v119_v50  ;;  %v2579_v58 = vcombine.low %v86_v46, %v118_v47  ;;  %v120_v3 = vld [vmem:[%s3800_s0 + $0x330] sm:$0x33]  ;;  %v89_v6 = vld [vmem:[%s3800_s0 + $0x238] sm:$0xff]  ;;  %v90_v16 = vld [vmem:[%s3800_s0 + $0x240] sm:$0xff] }
   0xc   :  { %1046 = vmatprep.subr.bf16.mxu1 %v2514_v33  ;;  %v2517_v59 = vcombine.low %v23_v45, %v55_v48  ;;  %v2581_v61 = vcombine.low %v87_v49, %v119_v50  ;;  %v121_v7 = vld [vmem:[%s3800_s0 + $0x338] sm:$0x33]  ;;  %v2520_v10 = vcombine.high %v24_v62, %v56_v63  ;;  %v2584_v12 = vcombine.high %v88_v2, %v120_v3  ;;  %v122_v17 = vld [vmem:[%s3800_s0 + $0x340] sm:$0x33]  ;;  %v91_v22 = vld [vmem:[%s3800_s0 + $0x248] sm:$0xff] }
   0xd   :  { %2635 = vmatmul.mubr.msk.bf16.vlgmr.msra.gmra.mrb[0].mxu0 %vm723_vm2, %v2757_v36  ;;  %v759_v60 = vand.u32 %v2580_v54, %v2717_v11  ;;  %v765_v0 = vand.u32 %v2582_v56, %v2717_v11  ;;  %v756_v8 = vand.u32 %v2579_v58, %v2717_v11  ;;  %v2522_v13 = vcombine.high %v25_v1, %v57_v4  ;;  %v2836_v18 = vld [vmem:[%s3800_s0 + $0x40] sm:$0xff]  ;;  %v123_v23 = vld [vmem:[%s3800_s0 + $0x348] sm:$0x33]  ;;  %v2865_v32 = vld [vmem:[%s3800_s0 + $0x50] sm:$0xff] }
   0xe   :  { %2636 = vmatmul.mubr.msk.bf16.vlgmr.msra.gmra.mrb[0].mxu1 %vm723_vm2, %v2757_v36  ;;  %1006 = vmatpush1.bf16.msra.mxu0 %v2511_v37  ;;  %v762_v9 = vand.u32 %v2581_v61, %v2717_v11  ;;  %v2583_v14 = vcombine.low %v88_v2, %v120_v3  ;;  %v2586_v15 = vcombine.high %v89_v6, %v121_v7  ;;  %v2841_v21 = vld [vmem:[%s3800_s0 + $0x140] sm:$0xff]  ;;  %v2853_v26 = vld [vmem:[%s3800_s0 + $0x48] sm:$0xff]  ;;  %v2870_v33 = vld [vmem:[%s3800_s0 + $0x150] sm:$0xff] }
   0xf   :  { %1047 = vmatpush1.bf16.msra.mxu1 %v2513_v39  ;;  %1007 = vmatprep.subr.bf16.mxu0 %v747_v40  ;;  %v2519_v19 = vcombine.low %v24_v62, %v56_v63  ;;  %v2585_v20 = vcombine.low %v89_v6, %v121_v7  ;;  %v2521_v24 = vcombine.low %v25_v1, %v57_v4  ;;  %v2858_v27 = vld [vmem:[%s3800_s0 + $0x148] sm:$0xff]  ;;  %v2875_v34 = vld [vmem:[%s3800_s0 + $0x280] sm:$0xff]  ;;  %v2904_v46 = vld [vmem:[%s3800_s0 + $0x58] sm:$0xff] }
  0x10   :  { %1048 = vmatprep.subr.bf16.mxu1 %v753_v44  ;;  %1037 = vmatprep.mubr.bf16.mxu0 %v2671_v5  ;;  %v771_v25 = vand.u32 %v2584_v12, %v2717_v11  ;;  %v2588_v28 = vcombine.high %v90_v16, %v122_v17  ;;  %v777_v29 = vand.u32 %v2586_v15, %v2717_v11  ;;  %v2886_v40 = vld [vmem:[%s3800_s0 + $0x380] sm:$0x33]  ;;  %v99_v41 = vld [vmem:[%s3800_s0 + $0x288] sm:$0xff]  ;;  %v2909_v47 = vld [vmem:[%s3800_s0 + $0x158] sm:$0xff] }
  0x11   :  { %1078 = vmatprep.mubr.bf16.mxu1 %v2671_v5  ;;  %v768_v30 = vand.u32 %v2583_v14, %v2717_v11  ;;  %v2587_v31 = vcombine.low %v90_v16, %v122_v17  ;;  %v2523_v35 = vcombine.low %v2836_v18, %v2841_v21  ;;  %v2524_v37 = vcombine.high %v2836_v18, %v2841_v21  ;;  %v131_v42 = vld [vmem:[%s3800_s0 + $0x388] sm:$0x33]  ;;  %v2929_v54 = vld [vmem:[%s3800_s0 + $0x258] sm:$0xff]  ;;  %v132_v58 = vld [vmem:[%s3800_s0 + $0x390] sm:$0x33] }
  0x12   :  { %1008 = vmatpush1.bf16.msra.mxu0 %v744_v51  ;;  %v2589_v38 = vcombine.low %v91_v22, %v123_v23  ;;  %v2590_v39 = vcombine.high %v91_v22, %v123_v23  ;;  %v774_v43 = vand.u32 %v2585_v20, %v2717_v11  ;;  %v2525_v44 = vcombine.low %v2853_v26, %v2858_v27  ;;  %v92_v51 = vld [vmem:[%s3800_s0 + $0x250] sm:$0xff]  ;;  %v2949_v62 = vld [vmem:[%s3800_s0 + $0x358] sm:$0x33]  ;;  %v2962_v4 = vld [vmem:[%s3800_s0 + $0x60] sm:$0xff] }
  0x13   :  { %1049 = vmatpush1.bf16.msra.mxu1 %v750_v52  ;;  %1087 = vmatprep.subr.bf16.mxu0 %v2516_v53  ;;  %v2526_v45 = vcombine.high %v2853_v26, %v2858_v27  ;;  %v783_v48 = vand.u32 %v2588_v28, %v2717_v11  ;;  %v2527_v49 = vcombine.low %v2865_v32, %v2870_v33  ;;  %v124_v52 = vld [vmem:[%s3800_s0 + $0x350] sm:$0x33]  ;;  %v133_v1 = vld [vmem:[%s3800_s0 + $0x398] sm:$0x33]  ;;  %v2967_v6 = vld [vmem:[%s3800_s0 + $0x160] sm:$0xff] }
  0x14   :  { %1128 = vmatprep.subr.bf16.mxu1 %v2518_v55  ;;  %v2528_v50 = vcombine.high %v2865_v32, %v2870_v33  ;;  %v2924_v53 = vand.u32 %v2587_v31, %v2717_v11  ;;  %v2603_v55 = vcombine.low %v2875_v34, %v2886_v40  ;;  %v2605_v56 = vcombine.low %v99_v41, %v131_v42  ;;  %v134_v14 = vld [vmem:[%s3800_s0 + $0x3a0] sm:$0x33]  ;;  %v103_v20 = vld [vmem:[%s3800_s0 + $0x2a8] sm:$0xff]  ;;  %v104_v18 = vld [vmem:[%s3800_s0 + $0x2b0] sm:$0xff] }
  0x15   :  { %2637 = vmatmul.mubr.msk.bf16.vlgmr.msra.gmra.mrb[4].mxu0 %vm723_vm2, %v2757_v36  ;;  %v2529_v61 = vcombine.low %v2904_v46, %v2909_v47  ;;  %v2606_v63 = vcombine.high %v99_v41, %v131_v42  ;;  %v2530_v2 = vcombine.high %v2904_v46, %v2909_v47  ;;  %v2591_v3 = vcombine.low %v92_v51, %v124_v52  ;;  %v135_v22 = vld [vmem:[%s3800_s0 + $0x3a8] sm:$0x33]  ;;  %v136_v21 = vld [vmem:[%s3800_s0 + $0x3b0] sm:$0x33]  ;;  %v105_v42 = vld [vmem:[%s3800_s0 + $0x2b8] sm:$0xff] }
  0x16   :  { %2638 = vmatmul.mubr.msk.bf16.vlgmr.msra.gmra.mrb[4].mxu1 %vm723_vm2, %v2757_v36  ;;  %1088 = vmatpush1.bf16.msra.mxu0 %v2515_v57  ;;  %v100_v57 = vld [vmem:[%s3800_s0 + $0x290] sm:$0xff]  ;;  %v2970_v7 = vand.u32 %v2603_v55, %v2717_v11  ;;  %v2592_v15 = vcombine.high %v92_v51, %v124_v52  ;;  %v2593_v16 = vcombine.low %v2929_v54, %v2949_v62  ;;  %v3054_v51 = vld [vmem:[%s3800_s0 + $0x260] sm:$0xff] }
  0x17   :  { %1129 = vmatpush1.bf16.msra.mxu1 %v2517_v59  ;;  %1089 = vmatprep.subr.bf16.mxu0 %v759_v60  ;;  %v789_v59 = vand.u32 %v2590_v39, %v2717_v11  ;;  %v2942_v60 = vand.u32 %v2589_v38, %v2717_v11  ;;  %v2608_v12 = vcombine.high %v100_v57, %v132_v58  ;;  %v2235_v38 = vld [vmem:[%s3802_s2] sm:$0xff] }
  0x18   :  { %1130 = vmatprep.subr.bf16.mxu1 %v765_v0  ;;  %1119 = vmatprep.mubr.bf16.mxu0 %v2671_v5  ;;  %v101_v0 = vld [vmem:[%s3800_s0 + $0x298] sm:$0xff]  ;;  %v2594_v23 = vcombine.high %v2929_v54, %v2949_v62  ;;  %v2613_v31 = vcombine.low %v103_v20, %v135_v22  ;;  %v3027_v39 = vand.u32 %v2591_v3, %v2717_v11  ;;  %v106_v62 = vld [vmem:[%s3800_s0 + $0x2c0] sm:$0xff]  ;;  %v107_v3 = vld [vmem:[%s3800_s0 + $0x2c8] sm:$0xff] }
  0x19   :  { %1160 = vmatprep.mubr.bf16.mxu1 %v2671_v5  ;;  %v2609_v17 = vcombine.low %v101_v0, %v133_v1  ;;  %2238 = vperm.xlu0 %2669, %v2235_v38   ;;  %v140_v38 = vld [vmem:[%s3800_s0 + $0x3d0] sm:$0x33] }
  0x1a   :  { %1090 = vmatpush1.bf16.msra.mxu0 %v756_v8  ;;  %v2973_v8 = vand.u32 %v2605_v56, %v2717_v11  ;;  %v3063_v55 = vand.u32 %v2613_v31, %v2717_v11  ;;  %v801_v56 = vand.u32 %v2594_v23, %v2717_v11  ;;  %v2305_v23 = vld [vmem:[%s3803_s3] sm:$0xff] }
  0x1b   :  { %1131 = vmatpush1.bf16.msra.mxu1 %v762_v9  ;;  %1169 = vmatprep.subr.bf16.mxu0 %v2520_v10  ;;  %v2976_v9 = vand.u32 %v2606_v63, %v2717_v11  ;;  %v2607_v10 = vcombine.low %v100_v57, %v132_v58  ;;  %v3013_v28 = vand.u32 %v2609_v17, %v2717_v11  ;;  %v3070_v57 = vld [vmem:[%s3800_s0 + $0x360] sm:$0x33]  ;;  %v3124_v17 = vld [vmem:[%s3800_s0 + $0x170] sm:$0xff] }
  0x1c   :  { %1210 = vmatprep.subr.bf16.mxu1 %v2522_v13  ;;  %v102_v13 = vld [vmem:[%s3800_s0 + $0x2a0] sm:$0xff]  ;;  %v2615_v58 = vcombine.low %v104_v18, %v136_v21  ;;  %v2596_v32 = vcombine.high %v3054_v51, %v3070_v57 }
  0x1d   :  { %2639 = vmatmul.mubr.msk.bf16.vlgmr.msra.gmra.mrb[8].mxu0 %vm723_vm2, %v2757_v36  ;;  %v3002_v26 = vand.u32 %v2607_v10, %v2717_v11  ;;  %v138_v63 = vld [vmem:[%s3800_s0 + $0x3c0] sm:$0x33]  ;;  %v139_v10 = vld [vmem:[%s3800_s0 + $0x3c8] sm:$0x33]  ;;  %2308 = vperm.xlu0 %2669, %v2305_v23  }
  0x1e   :  { %2640 = vmatmul.mubr.msk.bf16.vlgmr.msra.gmra.mrb[8].mxu1 %vm723_vm2, %v2757_v36  ;;  %1170 = vmatpush1.bf16.msra.mxu0 %v2519_v19  ;;  %v2610_v19 = vcombine.high %v101_v0, %v133_v1  ;;  %v2622_v31 = vcombine.high %v107_v3, %v139_v10 }
  0x1f   :  { %1211 = vmatpush1.bf16.msra.mxu1 %v2521_v24  ;;  %1171 = vmatprep.subr.bf16.mxu0 %v771_v25  ;;  %v2531_v24 = vcombine.low %v2962_v4, %v2967_v6  ;;  %v2999_v25 = vand.u32 %v2608_v12, %v2717_v11  ;;  %v3099_v12 = vld [vmem:[%s3800_s0 + $0x268] sm:$0xff] }
  0x20   :  { %1212 = vmatprep.subr.bf16.mxu1 %v777_v29  ;;  %1201 = vmatprep.mubr.bf16.mxu0 %v2671_v5  ;;  %v3010_v27 = vand.u32 %v2610_v19, %v2717_v11  ;;  %v2611_v29 = vcombine.low %v102_v13, %v134_v14  ;;  %v3167_v47 = vand.u32 %v2622_v31, %v2717_v11 }
  0x21   :  { %1242 = vmatprep.mubr.bf16.mxu1 %v2671_v5 }
  0x22   :  { %1172 = vmatpush1.bf16.msra.mxu0 %v768_v30  ;;  %v2612_v30 = vcombine.high %v102_v13, %v134_v14  ;;  %v3030_v41 = vand.u32 %v2611_v29, %v2717_v11  ;;  %v3104_v13 = vld [vmem:[%s3800_s0 + $0x368] sm:$0x33]  ;;  %v2620_v29 = vcombine.high %v106_v62, %v138_v63 }
  0x23   :  { %1213 = vmatpush1.bf16.msra.mxu1 %v774_v43  ;;  %1251 = vmatprep.subr.bf16.mxu0 %v2524_v37  ;;  %v2614_v37 = vcombine.high %v103_v20, %v135_v22  ;;  %v137_v43 = vld [vmem:[%s3800_s0 + $0x3b8] sm:$0x33]  ;;  %v2619_v22 = vcombine.low %v106_v62, %v138_v63  ;;  %v2598_v33 = vcombine.high %v3099_v12, %v3104_v13  ;;  %v142_v63 = vld [vmem:[%s3800_s0 + $0x3e0] sm:$0x33] }
  0x24   :  { %1292 = vmatprep.subr.bf16.mxu1 %v2526_v45  ;;  %v3044_v45 = vld [vmem:[%s3800_s0 + $0x68] sm:$0xff]  ;;  %v3057_v52 = vand.u32 %v2612_v30, %v2717_v11  ;;  %v2617_v0 = vcombine.low %v105_v42, %v137_v43  ;;  %v2618_v1 = vcombine.high %v105_v42, %v137_v43  ;;  %v2621_v30 = vcombine.low %v107_v3, %v139_v10  ;;  %v3180_v43 = vld [vmem:[%s3800_s0 + $0x78] sm:$0xff] }
  0x25   :  { %2641 = vmatmul.mubr.msk.bf16.vlgmr.msra.gmra.mrb[12].mxu0 %vm723_vm2, %v2757_v36  ;;  %v3060_v54 = vand.u32 %v2614_v37, %v2717_v11  ;;  %v108_v37 = vld [vmem:[%s3800_s0 + $0x2d0] sm:$0xff]  ;;  %v3164_v46 = vand.u32 %v2620_v29, %v2717_v11  ;;  %v65_v10 = vld [vmem:[%s3800_s0 + $0x178] sm:$0xff] }
  0x26   :  { %2642 = vmatmul.mubr.msk.bf16.vlgmr.msra.gmra.mrb[12].mxu1 %vm723_vm2, %v2757_v36  ;;  %1252 = vmatpush1.bf16.msra.mxu0 %v2523_v35  ;;  %v795_v35 = vand.u32 %v2592_v15, %v2717_v11  ;;  %v2595_v15 = vcombine.low %v3054_v51, %v3070_v57  ;;  %v3127_v19 = vand.u32 %v2618_v1, %v2717_v11  ;;  %v143_v1 = vld [vmem:[%s3800_s0 + $0x3e8] sm:$0x33] }
  0x27   :  { %1293 = vmatpush1.bf16.msra.mxu1 %v2525_v44  ;;  %1253 = vmatprep.subr.bf16.mxu0 %v783_v48  ;;  %v2532_v44 = vcombine.high %v2962_v4, %v2967_v6  ;;  %v3049_v48 = vld [vmem:[%s3800_s0 + $0x168] sm:$0xff]  ;;  %v3130_v20 = vand.u32 %v2617_v0, %v2717_v11  ;;  %v2623_v51 = vcombine.low %v108_v37, %v140_v38 }
  0x28   :  { %1294 = vmatprep.subr.bf16.mxu1 %v789_v59  ;;  %1283 = vmatprep.mubr.bf16.mxu0 %v2671_v5  ;;  %v2616_v59 = vcombine.high %v104_v18, %v136_v21  ;;  %v109_v18 = vld [vmem:[%s3800_s0 + $0x2d8] sm:$0xff]  ;;  %v111_v0 = vld [vmem:[%s3800_s0 + $0x2e8] sm:$0xff]  ;;  %v804_v3 = vand.u32 %v2595_v15, %v2717_v11 }
  0x29   :  { %1324 = vmatprep.mubr.bf16.mxu1 %v2671_v5  ;;  %v141_v21 = vld [vmem:[%s3800_s0 + $0x3d8] sm:$0x33] }
  0x2a   :  { %1254 = vmatpush1.bf16.msra.mxu0 %v2924_v53  ;;  %v798_v53 = vand.u32 %v2593_v16, %v2717_v11  ;;  %v3107_v14 = vand.u32 %v2616_v59, %v2717_v11  ;;  %v3119_v16 = vld [vmem:[%s3800_s0 + $0x70] sm:$0xff]  ;;  %v2625_v59 = vcombine.low %v109_v18, %v141_v21  ;;  %v2626_v62 = vcombine.high %v109_v18, %v141_v21  ;;  %v97_v15 = vld [vmem:[%s3800_s0 + $0x278] sm:$0xff] }
  0x2b   :  { %1295 = vmatpush1.bf16.msra.mxu1 %v2942_v60  ;;  %1333 = vmatprep.subr.bf16.mxu0 %v2528_v50  ;;  %v2533_v60 = vcombine.low %v3044_v45, %v3049_v48  ;;  %v2534_v50 = vcombine.high %v3044_v45, %v3049_v48  ;;  %v2535_v42 = vcombine.low %v3119_v16, %v3124_v17 }
  0x2c   :  { %1374 = vmatprep.subr.bf16.mxu1 %v2530_v2  ;;  %v3110_v2 = vand.u32 %v2615_v58, %v2717_v11  ;;  %v2536_v57 = vcombine.high %v3119_v16, %v3124_v17  ;;  %v2624_v58 = vcombine.high %v108_v37, %v140_v38  ;;  %v3222_v23 = vand.u32 %v2626_v62, %v2717_v11 }
  0x2d   :  { %2643 = vmatmul.mubr.msk.bf16.vlgmr.msra.gmra.mrb[16].mxu0 %vm723_vm2, %v2757_v36  ;;  %v3225_v29 = vand.u32 %v2625_v59, %v2717_v11  ;;  %v2629_v37 = vcombine.low %v111_v0, %v143_v1  ;;  %v2630_v38 = vcombine.high %v111_v0, %v143_v1  ;;  %v2538_v21 = vcombine.high %v3180_v43, %v65_v10 }
  0x2e   :  { %2644 = vmatmul.mubr.msk.bf16.vlgmr.msra.gmra.mrb[16].mxu1 %vm723_vm2, %v2757_v36  ;;  %1334 = vmatpush1.bf16.msra.mxu0 %v2527_v49  ;;  %v3154_v49 = vand.u32 %v2619_v22, %v2717_v11  ;;  %v3219_v22 = vand.u32 %v2624_v58, %v2717_v11  ;;  %v145_v58 = vld [vmem:[%s3800_s0 + $0x3f8] sm:$0x33]  ;;  %v2537_v45 = vcombine.low %v3180_v43, %v65_v10  ;;  %v34_v10 = vld [vmem:[%s3800_s0 + $0x80] sm:$0xff] }
  0x2f   :  { %1375 = vmatpush1.bf16.msra.mxu1 %v2529_v61  ;;  %1335 = vmatprep.subr.bf16.mxu0 %v795_v35  ;;  %v3170_v61 = vand.u32 %v2621_v30, %v2717_v11  ;;  %v2597_v35 = vcombine.low %v3099_v12, %v3104_v13  ;;  %v96_v12 = vld [vmem:[%s3800_s0 + $0x270] sm:$0xff]  ;;  %v3212_v13 = vand.u32 %v2623_v51, %v2717_v11 }
  0x30   :  { %1376 = vmatprep.subr.bf16.mxu1 %v801_v56  ;;  %1365 = vmatprep.mubr.bf16.mxu0 %v2671_v5  ;;  %v110_v56 = vld [vmem:[%s3800_s0 + $0x2e0] sm:$0xff]  ;;  %v3258_v6 = vand.u32 %v2630_v38, %v2717_v11  ;;  %v3265_v59 = vand.u32 %v2629_v37, %v2717_v11  ;;  %v2604_v38 = vcombine.high %v2875_v34, %v2886_v40  ;;  %v68_v34 = vld [vmem:[%s3800_s0 + $0x190] sm:$0xff]  ;;  %v37_v40 = vld [vmem:[%s3800_s0 + $0x98] sm:$0xff] }
  0x31   :  { %1406 = vmatprep.mubr.bf16.mxu1 %v2671_v5  ;;  %v2627_v30 = vcombine.low %v110_v56, %v142_v63  ;;  %v2628_v31 = vcombine.high %v110_v56, %v142_v63  ;;  %v810_v18 = vand.u32 %v2597_v35, %v2717_v11  ;;  %v113_v56 = vld [vmem:[%s3800_s0 + $0x2f8] sm:$0xff] }
  0x32   :  { %1336 = vmatpush1.bf16.msra.mxu0 %v3027_v39  ;;  %v807_v39 = vand.u32 %v2596_v32, %v2717_v11  ;;  %v112_v32 = vld [vmem:[%s3800_s0 + $0x2f0] sm:$0xff]  ;;  %v2634_v63 = vcombine.high %v113_v56, %v145_v58  ;;  %v831_v17 = vand.u32 %v2604_v38, %v2717_v11 }
  0x33   :  { %1377 = vmatpush1.bf16.msra.mxu1 %v798_v53  ;;  %1415 = vmatprep.subr.bf16.mxu0 %v2532_v44  ;;  %v128_v53 = vld [vmem:[%s3800_s0 + $0x370] sm:$0x33]  ;;  %v813_v44 = vand.u32 %v2598_v33, %v2717_v11  ;;  %v3255_v4 = vand.u32 %v2628_v31, %v2717_v11 }
  0x34   :  { %1456 = vmatprep.subr.bf16.mxu1 %v2534_v50  ;;  %v129_v50 = vld [vmem:[%s3800_s0 + $0x378] sm:$0x33]  ;;  %v144_v33 = vld [vmem:[%s3800_s0 + $0x3f0] sm:$0x33]  ;;  %v2600_v51 = vcombine.high %v96_v12, %v128_v53  ;;  %v2599_v0 = vcombine.low %v96_v12, %v128_v53  ;;  %v3277_v31 = vand.u32 %v2634_v63, %v2717_v11  ;;  %v35_v12 = vld [vmem:[%s3800_s0 + $0x88] sm:$0xff] }
  0x35   :  { %2645 = vmatmul.mubr.msk.bf16.vlgmr.msra.gmra.mrb[20].mxu0 %vm723_vm2, %v2757_v36  ;;  %v2602_v35 = vcombine.high %v97_v15, %v129_v50  ;;  %v2631_v62 = vcombine.low %v112_v32, %v144_v33  ;;  %v2632_v48 = vcombine.high %v112_v32, %v144_v33  ;;  %v67_v53 = vld [vmem:[%s3800_s0 + $0x188] sm:$0xff] }
  0x36   :  { %2646 = vmatmul.mubr.msk.bf16.vlgmr.msra.gmra.mrb[20].mxu1 %vm723_vm2, %v2757_v36  ;;  %1416 = vmatpush1.bf16.msra.mxu0 %v2531_v24  ;;  %v3261_v24 = vand.u32 %v2627_v30, %v2717_v11  ;;  %v819_v1 = vand.u32 %v2600_v51, %v2717_v11  ;;  %v2542_v32 = vcombine.high %v35_v12, %v67_v53 }
  0x37   :  { %1457 = vmatpush1.bf16.msra.mxu1 %v2533_v60  ;;  %1417 = vmatprep.subr.bf16.mxu0 %v807_v39  ;;  %v2633_v60 = vcombine.low %v113_v56, %v145_v58  ;;  %v2601_v39 = vcombine.low %v97_v15, %v129_v50  ;;  %v3274_v30 = vand.u32 %v2632_v48, %v2717_v11  ;;  %v38_v58 = vld [vmem:[%s3800_s0 + $0xa0] sm:$0xff] }
  0x38   :  { %1458 = vmatprep.subr.bf16.mxu1 %v813_v44  ;;  %1447 = vmatprep.mubr.bf16.mxu0 %v2671_v5  ;;  %v3271_v44 = vand.u32 %v2631_v62, %v2717_v11  ;;  %v816_v15 = vand.u32 %v2599_v0, %v2717_v11  ;;  %v2541_v16 = vcombine.low %v35_v12, %v67_v53 }
  0x39   :  { %1488 = vmatprep.mubr.bf16.mxu1 %v2671_v5  ;;  %v3280_v43 = vand.u32 %v2633_v60, %v2717_v11  ;;  %v822_v50 = vand.u32 %v2601_v39, %v2717_v11 }
  0x3a   :  { %1418 = vmatpush1.bf16.msra.mxu0 %v804_v3  ;;  %v825_v3 = vand.u32 %v2602_v35, %v2717_v11  ;;  %v69_v11 = vld [vmem:[%s3800_s0 + $0x198] sm:$0xff] }
  0x3b   :  { %1459 = vmatpush1.bf16.msra.mxu1 %v810_v18  ;;  %1497 = vmatprep.subr.bf16.mxu0 %v2536_v57  ;;  %v66_v57 = vld [vmem:[%s3800_s0 + $0x180] sm:$0xff]  ;;  %v2545_v56 = vcombine.low %v37_v40, %v69_v11 }
  0x3c   :  { %1538 = vmatprep.subr.bf16.mxu1 %v2538_v21  ;;  %v2540_v37 = vcombine.high %v34_v10, %v66_v57  ;;  %v2539_v33 = vcombine.low %v34_v10, %v66_v57  ;;  %v2546_v21 = vcombine.high %v37_v40, %v69_v11 }
  0x3d   :  { %2647 = vmatmul.mubr.msk.bf16.vlgmr.msra.gmra.mrb[24].mxu0 %vm723_vm2, %v2757_v36 }
  0x3e   :  { %2648 = vmatmul.mubr.msk.bf16.vlgmr.msra.gmra.mrb[24].mxu1 %vm723_vm2, %v2757_v36  ;;  %1498 = vmatpush1.bf16.msra.mxu0 %v2535_v42  ;;  %v36_v42 = vld [vmem:[%s3800_s0 + $0x90] sm:$0xff] }
  0x3f   :  { %1539 = vmatpush1.bf16.msra.mxu1 %v2537_v45  ;;  %1499 = vmatprep.subr.bf16.mxu0 %v819_v1  ;;  %v2544_v18 = vcombine.high %v36_v42, %v68_v34  ;;  %v2543_v51 = vcombine.low %v36_v42, %v68_v34 }
  0x40   :  { %1540 = vmatprep.subr.bf16.mxu1 %v825_v3  ;;  %1529 = vmatprep.mubr.bf16.mxu0 %v2671_v5 }
  0x41   :  { %1570 = vmatprep.mubr.bf16.mxu1 %v2671_v5 }
  0x42   :  { %1500 = vmatpush1.bf16.msra.mxu0 %v816_v15 }
  0x43   :  { %1541 = vmatpush1.bf16.msra.mxu1 %v822_v50  ;;  %1579 = vmatprep.subr.bf16.mxu0 %v2540_v37 }
  0x44   :  { %1620 = vmatprep.subr.bf16.mxu1 %v2542_v32 }
  0x45   :  { %2649 = vmatmul.mubr.msk.bf16.vlgmr.msra.gmra.mrb[28].mxu0 %vm723_vm2, %v2757_v36 }
  0x46   :  { %2650 = vmatmul.mubr.msk.bf16.vlgmr.msra.gmra.mrb[28].mxu1 %vm723_vm2, %v2757_v36  ;;  %1580 = vmatpush1.bf16.msra.mxu0 %v2539_v33 }
  0x47   :  { %1621 = vmatpush1.bf16.msra.mxu1 %v2541_v16  ;;  %1581 = vmatprep.subr.bf16.mxu0 %v831_v17 }
  0x48   :  { %1622 = vmatprep.subr.bf16.mxu1 %v2976_v9  ;;  %1611 = vmatprep.mubr.bf16.mxu0 %v2671_v5  ;;  %v70_v9 = vld [vmem:[%s3800_s0 + $0x1a0] sm:$0xff] }
  0x49   :  { %1652 = vmatprep.mubr.bf16.mxu1 %v2671_v5  ;;  %v2548_v35 = vcombine.high %v38_v58, %v70_v9  ;;  %v2547_v45 = vcombine.low %v38_v58, %v70_v9 }
  0x4a   :  { %1582 = vmatpush1.bf16.msra.mxu0 %v2970_v7  ;;  %v39_v7 = vld [vmem:[%s3800_s0 + $0xa8] sm:$0xff] }
  0x4b   :  { %1623 = vmatpush1.bf16.msra.mxu1 %v2973_v8  ;;  %1661 = vmatprep.subr.bf16.mxu0 %v2544_v18  ;;  %v71_v8 = vld [vmem:[%s3800_s0 + $0x1a8] sm:$0xff] }
  0x4c   :  { %1702 = vmatprep.subr.bf16.mxu1 %v2546_v21  ;;  %v2550_v62 = vcombine.high %v39_v7, %v71_v8  ;;  %v2549_v48 = vcombine.low %v39_v7, %v71_v8 }
  0x4d   :  { %2651 = vmatmul.mubr.msk.bf16.vlgmr.msra.gmra.mrb[32].mxu0 %vm723_vm2, %v2757_v36 }
  0x4e   :  { %2652 = vmatmul.mubr.msk.bf16.vlgmr.msra.gmra.mrb[32].mxu1 %vm723_vm2, %v2757_v36  ;;  %1662 = vmatpush1.bf16.msra.mxu0 %v2543_v51 }
  0x4f   :  { %1703 = vmatpush1.bf16.msra.mxu1 %v2545_v56  ;;  %1663 = vmatprep.subr.bf16.mxu0 %v2999_v25  ;;  %v40_v25 = vld [vmem:[%s3800_s0 + $0xb0] sm:$0xff] }
  0x50   :  { %1704 = vmatprep.subr.bf16.mxu1 %v3010_v27  ;;  %1693 = vmatprep.mubr.bf16.mxu0 %v2671_v5  ;;  %v72_v27 = vld [vmem:[%s3800_s0 + $0x1b0] sm:$0xff] }
  0x51   :  { %1734 = vmatprep.mubr.bf16.mxu1 %v2671_v5  ;;  %v2552_v60 = vcombine.high %v40_v25, %v72_v27  ;;  %v2551_v0 = vcombine.low %v40_v25, %v72_v27 }
  0x52   :  { %1664 = vmatpush1.bf16.msra.mxu0 %v3002_v26  ;;  %v41_v26 = vld [vmem:[%s3800_s0 + $0xb8] sm:$0xff] }
  0x53   :  { %1705 = vmatpush1.bf16.msra.mxu1 %v3013_v28  ;;  %1743 = vmatprep.subr.bf16.mxu0 %v2548_v35  ;;  %v73_v28 = vld [vmem:[%s3800_s0 + $0x1b8] sm:$0xff] }
  0x54   :  { %1784 = vmatprep.subr.bf16.mxu1 %v2550_v62  ;;  %v2554_v63 = vcombine.high %v41_v26, %v73_v28  ;;  %v2553_v1 = vcombine.low %v41_v26, %v73_v28 }
  0x55   :  { %2653 = vmatmul.mubr.msk.bf16.vlgmr.msra.gmra.mrb[36].mxu0 %vm723_vm2, %v2757_v36 }
  0x56   :  { %2654 = vmatmul.mubr.msk.bf16.vlgmr.msra.gmra.mrb[36].mxu1 %vm723_vm2, %v2757_v36  ;;  %1744 = vmatpush1.bf16.msra.mxu0 %v2547_v45 }
  0x57   :  { %1785 = vmatpush1.bf16.msra.mxu1 %v2549_v48  ;;  %1745 = vmatprep.subr.bf16.mxu0 %v3057_v52  ;;  %v42_v52 = vld [vmem:[%s3800_s0 + $0xc0] sm:$0xff] }
  0x58   :  { %1786 = vmatprep.subr.bf16.mxu1 %v3060_v54  ;;  %1775 = vmatprep.mubr.bf16.mxu0 %v2671_v5  ;;  %v74_v54 = vld [vmem:[%s3800_s0 + $0x1c0] sm:$0xff] }
  0x59   :  { %1816 = vmatprep.mubr.bf16.mxu1 %v2671_v5  ;;  %v2556_v39 = vcombine.high %v42_v52, %v74_v54  ;;  %v2555_v10 = vcombine.low %v42_v52, %v74_v54 }
  0x5a   :  { %1746 = vmatpush1.bf16.msra.mxu0 %v3030_v41  ;;  %v43_v41 = vld [vmem:[%s3800_s0 + $0xc8] sm:$0xff] }
  0x5b   :  { %1787 = vmatpush1.bf16.msra.mxu1 %v3063_v55  ;;  %1825 = vmatprep.subr.bf16.mxu0 %v2552_v60  ;;  %v75_v55 = vld [vmem:[%s3800_s0 + $0x1c8] sm:$0xff] }
  0x5c   :  { %1866 = vmatprep.subr.bf16.mxu1 %v2554_v63  ;;  %v2558_v3 = vcombine.high %v43_v41, %v75_v55  ;;  %v2557_v57 = vcombine.low %v43_v41, %v75_v55 }
  0x5d   :  { %2655 = vmatmul.mubr.msk.bf16.vlgmr.msra.gmra.mrb[40].mxu0 %vm723_vm2, %v2757_v36 }
  0x5e   :  { %2656 = vmatmul.mubr.msk.bf16.vlgmr.msra.gmra.mrb[40].mxu1 %vm723_vm2, %v2757_v36  ;;  %1826 = vmatpush1.bf16.msra.mxu0 %v2551_v0 }
  0x5f   :  { %1867 = vmatpush1.bf16.msra.mxu1 %v2553_v1  ;;  %1827 = vmatprep.subr.bf16.mxu0 %v3107_v14  ;;  %v44_v14 = vld [vmem:[%s3800_s0 + $0xd0] sm:$0xff] }
  0x60   :  { %1868 = vmatprep.subr.bf16.mxu1 %v3127_v19  ;;  %1857 = vmatprep.mubr.bf16.mxu0 %v2671_v5  ;;  %v76_v19 = vld [vmem:[%s3800_s0 + $0x1d0] sm:$0xff] }
  0x61   :  { %1898 = vmatprep.mubr.bf16.mxu1 %v2671_v5  ;;  %v2560_v12 = vcombine.high %v44_v14, %v76_v19  ;;  %v2559_v15 = vcombine.low %v44_v14, %v76_v19 }
  0x62   :  { %1828 = vmatpush1.bf16.msra.mxu0 %v3110_v2  ;;  %v45_v2 = vld [vmem:[%s3800_s0 + $0xd8] sm:$0xff] }
  0x63   :  { %1869 = vmatpush1.bf16.msra.mxu1 %v3130_v20  ;;  %1907 = vmatprep.subr.bf16.mxu0 %v2556_v39  ;;  %v77_v20 = vld [vmem:[%s3800_s0 + $0x1d8] sm:$0xff] }
  0x64   :  { %1948 = vmatprep.subr.bf16.mxu1 %v2558_v3  ;;  %v2562_v53 = vcombine.high %v45_v2, %v77_v20  ;;  %v2561_v50 = vcombine.low %v45_v2, %v77_v20 }
  0x65   :  { %2657 = vmatmul.mubr.msk.bf16.vlgmr.msra.gmra.mrb[44].mxu0 %vm723_vm2, %v2757_v36 }
  0x66   :  { %2658 = vmatmul.mubr.msk.bf16.vlgmr.msra.gmra.mrb[44].mxu1 %vm723_vm2, %v2757_v36  ;;  %1908 = vmatpush1.bf16.msra.mxu0 %v2555_v10 }
  0x67   :  { %1949 = vmatpush1.bf16.msra.mxu1 %v2557_v57  ;;  %1909 = vmatprep.subr.bf16.mxu0 %v3164_v46  ;;  %v46_v46 = vld [vmem:[%s3800_s0 + $0xe0] sm:$0xff] }
  0x68   :  { %1950 = vmatprep.subr.bf16.mxu1 %v3167_v47  ;;  %1939 = vmatprep.mubr.bf16.mxu0 %v2671_v5  ;;  %v78_v47 = vld [vmem:[%s3800_s0 + $0x1e0] sm:$0xff] }
  0x69   :  { %1980 = vmatprep.mubr.bf16.mxu1 %v2671_v5  ;;  %v2564_v37 = vcombine.high %v46_v46, %v78_v47  ;;  %v2563_v32 = vcombine.low %v46_v46, %v78_v47 }
  0x6a   :  { %1910 = vmatpush1.bf16.msra.mxu0 %v3154_v49  ;;  %v47_v49 = vld [vmem:[%s3800_s0 + $0xe8] sm:$0xff] }
  0x6b   :  { %1951 = vmatpush1.bf16.msra.mxu1 %v3170_v61  ;;  %1989 = vmatprep.subr.bf16.mxu0 %v2560_v12  ;;  %v79_v61 = vld [vmem:[%s3800_s0 + $0x1e8] sm:$0xff] }
  0x6c   :  { %2030 = vmatprep.subr.bf16.mxu1 %v2562_v53  ;;  %v2566_v38 = vcombine.high %v47_v49, %v79_v61  ;;  %v2565_v33 = vcombine.low %v47_v49, %v79_v61 }
  0x6d   :  { %2659 = vmatmul.mubr.msk.bf16.vlgmr.msra.gmra.mrb[48].mxu0 %vm723_vm2, %v2757_v36 }
  0x6e   :  { %2660 = vmatmul.mubr.msk.bf16.vlgmr.msra.gmra.mrb[48].mxu1 %vm723_vm2, %v2757_v36  ;;  %1990 = vmatpush1.bf16.msra.mxu0 %v2559_v15 }
  0x6f   :  { %2031 = vmatpush1.bf16.msra.mxu1 %v2561_v50  ;;  %1991 = vmatprep.subr.bf16.mxu0 %v3219_v22  ;;  %v48_v22 = vld [vmem:[%s3800_s0 + $0xf0] sm:$0xff] }
  0x70   :  { %2032 = vmatprep.subr.bf16.mxu1 %v3222_v23  ;;  %2021 = vmatprep.mubr.bf16.mxu0 %v2671_v5  ;;  %v80_v23 = vld [vmem:[%s3800_s0 + $0x1f0] sm:$0xff] }
  0x71   :  { %2062 = vmatprep.mubr.bf16.mxu1 %v2671_v5  ;;  %v2568_v16 = vcombine.high %v48_v22, %v80_v23  ;;  %v2567_v42 = vcombine.low %v48_v22, %v80_v23 }
  0x72   :  { %1992 = vmatpush1.bf16.msra.mxu0 %v3212_v13  ;;  %v49_v13 = vld [vmem:[%s3800_s0 + $0xf8] sm:$0xff] }
  0x73   :  { %2033 = vmatpush1.bf16.msra.mxu1 %v3225_v29  ;;  %2071 = vmatprep.subr.bf16.mxu0 %v2564_v37  ;;  %v81_v29 = vld [vmem:[%s3800_s0 + $0x1f8] sm:$0xff] }
  0x74   :  { %2112 = vmatprep.subr.bf16.mxu1 %v2566_v38  ;;  %v2570_v17 = vcombine.high %v49_v13, %v81_v29  ;;  %v2569_v34 = vcombine.low %v49_v13, %v81_v29 }
  0x75   :  { %2661 = vmatmul.mubr.msk.bf16.vlgmr.msra.gmra.mrb[52].mxu0 %vm723_vm2, %v2757_v36 }
  0x76   :  { %2662 = vmatmul.mubr.msk.bf16.vlgmr.msra.gmra.mrb[52].mxu1 %vm723_vm2, %v2757_v36  ;;  %2072 = vmatpush1.bf16.msra.mxu0 %v2563_v32 }
  0x77   :  { %2113 = vmatpush1.bf16.msra.mxu1 %v2565_v33  ;;  %2073 = vmatprep.subr.bf16.mxu0 %v3255_v4 }
  0x78   :  { %2114 = vmatprep.subr.bf16.mxu1 %v3258_v6  ;;  %2103 = vmatprep.mubr.bf16.mxu0 %v2671_v5 }
  0x79   :  { %2144 = vmatprep.mubr.bf16.mxu1 %v2671_v5 }
  0x7a   :  { %2074 = vmatpush1.bf16.msra.mxu0 %v3261_v24 }
  0x7b   :  { %2115 = vmatpush1.bf16.msra.mxu1 %v3265_v59  ;;  %2153 = vmatprep.subr.bf16.mxu0 %v2568_v16 }
  0x7c   :  { %2194 = vmatprep.subr.bf16.mxu1 %v2570_v17 }
  0x7d   :  { %2663 = vmatmul.mubr.msk.bf16.vlgmr.msra.gmra.mrb[56].mxu0 %vm723_vm2, %v2757_v36 }
  0x7e   :  { %2664 = vmatmul.mubr.msk.bf16.vlgmr.msra.gmra.mrb[56].mxu1 %vm723_vm2, %v2757_v36  ;;  %2154 = vmatpush1.bf16.msra.mxu0 %v2567_v42 }
  0x7f   :  { %2195 = vmatpush1.bf16.msra.mxu1 %v2569_v34  ;;  %2155 = vmatprep.subr.bf16.mxu0 %v3274_v30 }
  0x80   :  { %2196 = vmatprep.subr.bf16.mxu1 %v3277_v31  ;;  %2185 = vmatprep.mubr.bf16.mxu0 %v2671_v5 }
  0x81   :  { %2226 = vmatprep.mubr.bf16.mxu1 %v2671_v5 }
  0x82   :  { %2156 = vmatpush1.bf16.msra.mxu0 %v3271_v44 }
  0x83   :  { %2197 = vmatpush1.bf16.msra.mxu1 %v3280_v43 }
  0x85   :  { %2665 = vmatmul.mubr.msk.bf16.vlgmr.msra.gmra.mrb[60].mxu0 %vm723_vm2, %v2757_v36 }
  0x86   :  { %2666 = vmatmul.mubr.msk.bf16.vlgmr.msra.gmra.mrb[60].mxu1 %vm723_vm2, %v2757_v36 }
  0x98   :  { %v3476_v4 = vpop.permute.xlu0 %2238 }
  0x9c   :  { %v3478_v24 = vpop.permute.xlu0 %2308 }
  0xe0   :  { %v957_v6 = vpop.f32.mrb[0].mxu0 }
  0xe1   :  { %v2241_v59 = vmul.f32 %v3476_v4, %v957_v6  ;;  %v998_v30 = vpop.f32.mrb[0].mxu1  ;;  %v959_v31 = vpop.f32.mrb[1].mxu0 }
  0xe2   :  { %v2243_v5 = vmul.f32 %v3476_v4, %v998_v30  ;;  %v2242_v44 = vmul.f32 %v3476_v4, %v959_v31  ;;  %v1000_v43 = vpop.f32.mrb[1].mxu1  ;;  %v961_v40 = vpop.f32.mrb[2].mxu0 }
  0xe3   :  { %v2244_v11 = vmul.f32 %v3476_v4, %v1000_v43  ;;  %v1002_v18 = vpop.f32.mrb[2].mxu1  ;;  %v2311_v36 = vadd.f32 %v3478_v24, %v2241_v59  ;;  %v962_v21 = vpop.f32.mrb[3].mxu0 }
  0xe4   :  { %v2312_v51 = vadd.f32 %v3478_v24, %v2242_v44  ;;  %v2313_v56 = vadd.f32 %v3478_v24, %v2243_v5  ;;  %v1003_v58 = vpop.f32.mrb[3].mxu1 }
  0xe5   :  { %v2314_v9 = vadd.f32 %v3478_v24, %v2244_v11  ;;  %v2375_v7 = vmax.f32 %v2311_v36, 0.0 }
  0xe6   :  { %v2376_v8 = vmax.f32 %v2312_v51, 0.0  ;;  %v2377_v35 = vmax.f32 %v2313_v56, 0.0 }
  0xe7   :  { %v2378_v62 = vmax.f32 %v2314_v9, 0.0  ;;  %2439 = vst [vmem:[%s3804_s4] sm:$0xff] %v2375_v7 }
  0xe8   :  { %2440 = vst [vmem:[%s3804_s4 + $0x8] sm:$0xff] %v2376_v8  ;;  %2441 = vst [vmem:[%s3804_s4 + $0x10] sm:$0xff] %v2377_v35  ;;  %v1039_v45 = vpop.f32.mrb[4].mxu0 }
  0xe9   :  { %2442 = vst [vmem:[%s3804_s4 + $0x18] sm:$0xff] %v2378_v62  ;;  %v2245_v48 = vmul.f32 %v3476_v4, %v1039_v45  ;;  %v1080_v25 = vpop.f32.mrb[4].mxu1  ;;  %v1041_v27 = vpop.f32.mrb[5].mxu0 }
  0xea   :  { %v2247_v26 = vmul.f32 %v3476_v4, %v1080_v25  ;;  %v2246_v28 = vmul.f32 %v3476_v4, %v1041_v27  ;;  %v1082_v60 = vpop.f32.mrb[5].mxu1  ;;  %v1043_v63 = vpop.f32.mrb[6].mxu0 }
  0xeb   :  { %v2315_v0 = vadd.f32 %v3478_v24, %v2245_v48  ;;  %v2248_v1 = vmul.f32 %v3476_v4, %v1082_v60  ;;  %v1084_v52 = vpop.f32.mrb[6].mxu1  ;;  %v1044_v54 = vpop.f32.mrb[7].mxu0 }
  0xec   :  { %v2317_v41 = vadd.f32 %v3478_v24, %v2247_v26  ;;  %v2316_v55 = vadd.f32 %v3478_v24, %v2246_v28  ;;  %v1085_v39 = vpop.f32.mrb[7].mxu1 }
  0xed   :  { %v2379_v3 = vmax.f32 %v2315_v0, 0.0  ;;  %v2318_v10 = vadd.f32 %v3478_v24, %v2248_v1 }
  0xee   :  { %v2381_v57 = vmax.f32 %v2317_v41, 0.0  ;;  %v2380_v14 = vmax.f32 %v2316_v55, 0.0 }
  0xef   :  { %2443 = vst [vmem:[%s3804_s4 + $0x20] sm:$0xff] %v2379_v3  ;;  %v2382_v19 = vmax.f32 %v2318_v10, 0.0 }
  0xf0   :  { %2445 = vst [vmem:[%s3804_s4 + $0x30] sm:$0xff] %v2381_v57  ;;  %2444 = vst [vmem:[%s3804_s4 + $0x28] sm:$0xff] %v2380_v14  ;;  %v1121_v2 = vpop.f32.mrb[8].mxu0 }
  0xf1   :  { %2446 = vst [vmem:[%s3804_s4 + $0x38] sm:$0xff] %v2382_v19  ;;  %v2249_v20 = vmul.f32 %v3476_v4, %v1121_v2  ;;  %v1162_v12 = vpop.f32.mrb[8].mxu1  ;;  %v1123_v53 = vpop.f32.mrb[9].mxu0 }
  0xf2   :  { %v2251_v15 = vmul.f32 %v3476_v4, %v1162_v12  ;;  %v2250_v50 = vmul.f32 %v3476_v4, %v1123_v53  ;;  %v1164_v46 = vpop.f32.mrb[9].mxu1  ;;  %v1125_v47 = vpop.f32.mrb[10].mxu0 }
  0xf3   :  { %v2319_v49 = vadd.f32 %v3478_v24, %v2249_v20  ;;  %v2252_v61 = vmul.f32 %v3476_v4, %v1164_v46  ;;  %v1166_v37 = vpop.f32.mrb[10].mxu1  ;;  %v1126_v38 = vpop.f32.mrb[11].mxu0 }
  0xf4   :  { %v2321_v32 = vadd.f32 %v3478_v24, %v2251_v15  ;;  %v2320_v33 = vadd.f32 %v3478_v24, %v2250_v50  ;;  %v1167_v22 = vpop.f32.mrb[11].mxu1 }
  0xf5   :  { %v2383_v23 = vmax.f32 %v2319_v49, 0.0  ;;  %v2322_v13 = vadd.f32 %v3478_v24, %v2252_v61 }
  0xf6   :  { %v2385_v29 = vmax.f32 %v2321_v32, 0.0  ;;  %v2384_v16 = vmax.f32 %v2320_v33, 0.0 }
  0xf7   :  { %2447 = vst [vmem:[%s3804_s4 + $0x40] sm:$0xff] %v2383_v23  ;;  %v2386_v17 = vmax.f32 %v2322_v13, 0.0 }
  0xf8   :  { %2449 = vst [vmem:[%s3804_s4 + $0x50] sm:$0xff] %v2385_v29  ;;  %2448 = vst [vmem:[%s3804_s4 + $0x48] sm:$0xff] %v2384_v16  ;;  %v1203_v42 = vpop.f32.mrb[12].mxu0 }
  0xf9   :  { %2450 = vst [vmem:[%s3804_s4 + $0x58] sm:$0xff] %v2386_v17  ;;  %v2253_v34 = vmul.f32 %v3476_v4, %v1203_v42  ;;  %v1244_v6 = vpop.f32.mrb[12].mxu1  ;;  %v1205_v59 = vpop.f32.mrb[13].mxu0 }
  0xfa   :  { %v2255_v30 = vmul.f32 %v3476_v4, %v1244_v6  ;;  %v2254_v31 = vmul.f32 %v3476_v4, %v1205_v59  ;;  %v1246_v5 = vpop.f32.mrb[13].mxu1  ;;  %v1207_v44 = vpop.f32.mrb[14].mxu0 }
  0xfb   :  { %v2323_v43 = vadd.f32 %v3478_v24, %v2253_v34  ;;  %v2256_v40 = vmul.f32 %v3476_v4, %v1246_v5  ;;  %v1248_v11 = vpop.f32.mrb[14].mxu1  ;;  %v1208_v18 = vpop.f32.mrb[15].mxu0 }
  0xfc   :  { %v2325_v36 = vadd.f32 %v3478_v24, %v2255_v30  ;;  %v2324_v21 = vadd.f32 %v3478_v24, %v2254_v31  ;;  %v1249_v51 = vpop.f32.mrb[15].mxu1 }
  0xfd   :  { %v2387_v56 = vmax.f32 %v2323_v43, 0.0  ;;  %v2326_v58 = vadd.f32 %v3478_v24, %v2256_v40 }
  0xfe   :  { %v2389_v9 = vmax.f32 %v2325_v36, 0.0  ;;  %v2388_v7 = vmax.f32 %v2324_v21, 0.0 }
  0xff   :  { %2451 = vst [vmem:[%s3804_s4 + $0x60] sm:$0xff] %v2387_v56  ;;  %v2390_v8 = vmax.f32 %v2326_v58, 0.0 }
 0x100   :  { %2453 = vst [vmem:[%s3804_s4 + $0x70] sm:$0xff] %v2389_v9  ;;  %2452 = vst [vmem:[%s3804_s4 + $0x68] sm:$0xff] %v2388_v7  ;;  %v1285_v35 = vpop.f32.mrb[16].mxu0 }
 0x101   :  { %2454 = vst [vmem:[%s3804_s4 + $0x78] sm:$0xff] %v2390_v8  ;;  %v2257_v62 = vmul.f32 %v3476_v4, %v1285_v35  ;;  %v1326_v45 = vpop.f32.mrb[16].mxu1  ;;  %v1287_v48 = vpop.f32.mrb[17].mxu0 }
 0x102   :  { %v2259_v25 = vmul.f32 %v3476_v4, %v1326_v45  ;;  %v2258_v27 = vmul.f32 %v3476_v4, %v1287_v48  ;;  %v1328_v26 = vpop.f32.mrb[17].mxu1  ;;  %v1289_v28 = vpop.f32.mrb[18].mxu0 }
 0x103   :  { %v2327_v60 = vadd.f32 %v3478_v24, %v2257_v62  ;;  %v2260_v63 = vmul.f32 %v3476_v4, %v1328_v26  ;;  %v1330_v0 = vpop.f32.mrb[18].mxu1  ;;  %v1290_v1 = vpop.f32.mrb[19].mxu0 }
 0x104   :  { %v2329_v52 = vadd.f32 %v3478_v24, %v2259_v25  ;;  %v2328_v54 = vadd.f32 %v3478_v24, %v2258_v27  ;;  %v1331_v41 = vpop.f32.mrb[19].mxu1 }
 0x105   :  { %v2391_v55 = vmax.f32 %v2327_v60, 0.0  ;;  %v2330_v39 = vadd.f32 %v3478_v24, %v2260_v63 }
 0x106   :  { %v2393_v3 = vmax.f32 %v2329_v52, 0.0  ;;  %v2392_v10 = vmax.f32 %v2328_v54, 0.0 }
 0x107   :  { %2455 = vst [vmem:[%s3804_s4 + $0x80] sm:$0xff] %v2391_v55  ;;  %v2394_v57 = vmax.f32 %v2330_v39, 0.0 }
 0x108   :  { %2457 = vst [vmem:[%s3804_s4 + $0x90] sm:$0xff] %v2393_v3  ;;  %2456 = vst [vmem:[%s3804_s4 + $0x88] sm:$0xff] %v2392_v10  ;;  %v1367_v14 = vpop.f32.mrb[20].mxu0 }
 0x109   :  { %2458 = vst [vmem:[%s3804_s4 + $0x98] sm:$0xff] %v2394_v57  ;;  %v2261_v19 = vmul.f32 %v3476_v4, %v1367_v14  ;;  %v1408_v2 = vpop.f32.mrb[20].mxu1  ;;  %v1369_v20 = vpop.f32.mrb[21].mxu0 }
 0x10a   :  { %v2263_v12 = vmul.f32 %v3476_v4, %v1408_v2  ;;  %v2262_v53 = vmul.f32 %v3476_v4, %v1369_v20  ;;  %v1410_v15 = vpop.f32.mrb[21].mxu1  ;;  %v1371_v50 = vpop.f32.mrb[22].mxu0 }
 0x10b   :  { %v2331_v46 = vadd.f32 %v3478_v24, %v2261_v19  ;;  %v2264_v47 = vmul.f32 %v3476_v4, %v1410_v15  ;;  %v1412_v49 = vpop.f32.mrb[22].mxu1  ;;  %v1372_v61 = vpop.f32.mrb[23].mxu0 }
 0x10c   :  { %v2333_v37 = vadd.f32 %v3478_v24, %v2263_v12  ;;  %v2332_v38 = vadd.f32 %v3478_v24, %v2262_v53  ;;  %v1413_v32 = vpop.f32.mrb[23].mxu1 }
 0x10d   :  { %v2395_v33 = vmax.f32 %v2331_v46, 0.0  ;;  %v2334_v22 = vadd.f32 %v3478_v24, %v2264_v47 }
 0x10e   :  { %v2397_v23 = vmax.f32 %v2333_v37, 0.0  ;;  %v2396_v13 = vmax.f32 %v2332_v38, 0.0 }
 0x10f   :  { %2459 = vst [vmem:[%s3804_s4 + $0xa0] sm:$0xff] %v2395_v33  ;;  %v2398_v29 = vmax.f32 %v2334_v22, 0.0 }
 0x110   :  { %2461 = vst [vmem:[%s3804_s4 + $0xb0] sm:$0xff] %v2397_v23  ;;  %2460 = vst [vmem:[%s3804_s4 + $0xa8] sm:$0xff] %v2396_v13  ;;  %v1449_v16 = vpop.f32.mrb[24].mxu0 }
 0x111   :  { %2462 = vst [vmem:[%s3804_s4 + $0xb8] sm:$0xff] %v2398_v29  ;;  %v2265_v17 = vmul.f32 %v3476_v4, %v1449_v16  ;;  %v1490_v42 = vpop.f32.mrb[24].mxu1  ;;  %v1451_v34 = vpop.f32.mrb[25].mxu0 }
 0x112   :  { %v2267_v6 = vmul.f32 %v3476_v4, %v1490_v42  ;;  %v2266_v59 = vmul.f32 %v3476_v4, %v1451_v34  ;;  %v1492_v30 = vpop.f32.mrb[25].mxu1  ;;  %v1453_v31 = vpop.f32.mrb[26].mxu0 }
 0x113   :  { %v2335_v5 = vadd.f32 %v3478_v24, %v2265_v17  ;;  %v2268_v44 = vmul.f32 %v3476_v4, %v1492_v30  ;;  %v1494_v43 = vpop.f32.mrb[26].mxu1  ;;  %v1454_v40 = vpop.f32.mrb[27].mxu0 }
 0x114   :  { %v2337_v11 = vadd.f32 %v3478_v24, %v2267_v6  ;;  %v2336_v18 = vadd.f32 %v3478_v24, %v2266_v59  ;;  %v1495_v36 = vpop.f32.mrb[27].mxu1 }
 0x115   :  { %v2399_v21 = vmax.f32 %v2335_v5, 0.0  ;;  %v2338_v51 = vadd.f32 %v3478_v24, %v2268_v44 }
 0x116   :  { %v2401_v56 = vmax.f32 %v2337_v11, 0.0  ;;  %v2400_v58 = vmax.f32 %v2336_v18, 0.0 }
 0x117   :  { %2463 = vst [vmem:[%s3804_s4 + $0xc0] sm:$0xff] %v2399_v21  ;;  %v2402_v9 = vmax.f32 %v2338_v51, 0.0 }
 0x118   :  { %2465 = vst [vmem:[%s3804_s4 + $0xd0] sm:$0xff] %v2401_v56  ;;  %2464 = vst [vmem:[%s3804_s4 + $0xc8] sm:$0xff] %v2400_v58  ;;  %v1531_v7 = vpop.f32.mrb[28].mxu0 }
 0x119   :  { %2466 = vst [vmem:[%s3804_s4 + $0xd8] sm:$0xff] %v2402_v9  ;;  %v2269_v8 = vmul.f32 %v3476_v4, %v1531_v7  ;;  %v1572_v35 = vpop.f32.mrb[28].mxu1  ;;  %v1533_v62 = vpop.f32.mrb[29].mxu0 }
 0x11a   :  { %v2271_v45 = vmul.f32 %v3476_v4, %v1572_v35  ;;  %v2270_v48 = vmul.f32 %v3476_v4, %v1533_v62  ;;  %v1574_v25 = vpop.f32.mrb[29].mxu1  ;;  %v1535_v27 = vpop.f32.mrb[30].mxu0 }
 0x11b   :  { %v2339_v26 = vadd.f32 %v3478_v24, %v2269_v8  ;;  %v2272_v28 = vmul.f32 %v3476_v4, %v1574_v25  ;;  %v1576_v60 = vpop.f32.mrb[30].mxu1  ;;  %v1536_v63 = vpop.f32.mrb[31].mxu0 }
 0x11c   :  { %v2341_v0 = vadd.f32 %v3478_v24, %v2271_v45  ;;  %v2340_v1 = vadd.f32 %v3478_v24, %v2270_v48  ;;  %v1577_v52 = vpop.f32.mrb[31].mxu1 }
 0x11d   :  { %v2403_v54 = vmax.f32 %v2339_v26, 0.0  ;;  %v2342_v41 = vadd.f32 %v3478_v24, %v2272_v28 }
 0x11e   :  { %v2405_v55 = vmax.f32 %v2341_v0, 0.0  ;;  %v2404_v39 = vmax.f32 %v2340_v1, 0.0 }
 0x11f   :  { %2467 = vst [vmem:[%s3804_s4 + $0xe0] sm:$0xff] %v2403_v54  ;;  %v2406_v3 = vmax.f32 %v2342_v41, 0.0 }
 0x120   :  { %2469 = vst [vmem:[%s3804_s4 + $0xf0] sm:$0xff] %v2405_v55  ;;  %2468 = vst [vmem:[%s3804_s4 + $0xe8] sm:$0xff] %v2404_v39  ;;  %v1613_v10 = vpop.f32.mrb[32].mxu0 }
 0x121   :  { %2470 = vst [vmem:[%s3804_s4 + $0xf8] sm:$0xff] %v2406_v3  ;;  %v2273_v57 = vmul.f32 %v3476_v4, %v1613_v10  ;;  %v1654_v14 = vpop.f32.mrb[32].mxu1  ;;  %v1615_v19 = vpop.f32.mrb[33].mxu0 }
 0x122   :  { %v2275_v2 = vmul.f32 %v3476_v4, %v1654_v14  ;;  %v2274_v20 = vmul.f32 %v3476_v4, %v1615_v19  ;;  %v1656_v12 = vpop.f32.mrb[33].mxu1  ;;  %v1617_v53 = vpop.f32.mrb[34].mxu0 }
 0x123   :  { %v2343_v15 = vadd.f32 %v3478_v24, %v2273_v57  ;;  %v2276_v50 = vmul.f32 %v3476_v4, %v1656_v12  ;;  %v1658_v46 = vpop.f32.mrb[34].mxu1  ;;  %v1618_v47 = vpop.f32.mrb[35].mxu0 }
 0x124   :  { %v2345_v49 = vadd.f32 %v3478_v24, %v2275_v2  ;;  %v2344_v61 = vadd.f32 %v3478_v24, %v2274_v20  ;;  %v1659_v37 = vpop.f32.mrb[35].mxu1 }
 0x125   :  { %v2407_v38 = vmax.f32 %v2343_v15, 0.0  ;;  %v2346_v32 = vadd.f32 %v3478_v24, %v2276_v50 }
 0x126   :  { %v2409_v33 = vmax.f32 %v2345_v49, 0.0  ;;  %v2408_v22 = vmax.f32 %v2344_v61, 0.0 }
 0x127   :  { %2471 = vst [vmem:[%s3804_s4 + $0x100] sm:$0xff] %v2407_v38  ;;  %v2410_v23 = vmax.f32 %v2346_v32, 0.0 }
 0x128   :  { %2473 = vst [vmem:[%s3804_s4 + $0x110] sm:$0xff] %v2409_v33  ;;  %2472 = vst [vmem:[%s3804_s4 + $0x108] sm:$0xff] %v2408_v22  ;;  %v1695_v13 = vpop.f32.mrb[36].mxu0 }
 0x129   :  { %2474 = vst [vmem:[%s3804_s4 + $0x118] sm:$0xff] %v2410_v23  ;;  %v2277_v29 = vmul.f32 %v3476_v4, %v1695_v13  ;;  %v1736_v16 = vpop.f32.mrb[36].mxu1  ;;  %v1697_v17 = vpop.f32.mrb[37].mxu0 }
 0x12a   :  { %v2279_v42 = vmul.f32 %v3476_v4, %v1736_v16  ;;  %v2278_v34 = vmul.f32 %v3476_v4, %v1697_v17  ;;  %v1738_v6 = vpop.f32.mrb[37].mxu1  ;;  %v1699_v59 = vpop.f32.mrb[38].mxu0 }
 0x12b   :  { %v2347_v30 = vadd.f32 %v3478_v24, %v2277_v29  ;;  %v2280_v31 = vmul.f32 %v3476_v4, %v1738_v6  ;;  %v1740_v5 = vpop.f32.mrb[38].mxu1  ;;  %v1700_v44 = vpop.f32.mrb[39].mxu0 }
 0x12c   :  { %v2349_v43 = vadd.f32 %v3478_v24, %v2279_v42  ;;  %v2348_v40 = vadd.f32 %v3478_v24, %v2278_v34  ;;  %v1741_v11 = vpop.f32.mrb[39].mxu1 }
 0x12d   :  { %v2411_v18 = vmax.f32 %v2347_v30, 0.0  ;;  %v2350_v36 = vadd.f32 %v3478_v24, %v2280_v31 }
 0x12e   :  { %v2413_v21 = vmax.f32 %v2349_v43, 0.0  ;;  %v2412_v51 = vmax.f32 %v2348_v40, 0.0 }
 0x12f   :  { %2475 = vst [vmem:[%s3804_s4 + $0x120] sm:$0xff] %v2411_v18  ;;  %v2414_v56 = vmax.f32 %v2350_v36, 0.0 }
 0x130   :  { %2477 = vst [vmem:[%s3804_s4 + $0x130] sm:$0xff] %v2413_v21  ;;  %2476 = vst [vmem:[%s3804_s4 + $0x128] sm:$0xff] %v2412_v51  ;;  %v1777_v58 = vpop.f32.mrb[40].mxu0 }
 0x131   :  { %2478 = vst [vmem:[%s3804_s4 + $0x138] sm:$0xff] %v2414_v56  ;;  %v2281_v9 = vmul.f32 %v3476_v4, %v1777_v58  ;;  %v1818_v7 = vpop.f32.mrb[40].mxu1  ;;  %v1779_v8 = vpop.f32.mrb[41].mxu0 }
 0x132   :  { %v2283_v35 = vmul.f32 %v3476_v4, %v1818_v7  ;;  %v2282_v62 = vmul.f32 %v3476_v4, %v1779_v8  ;;  %v1820_v45 = vpop.f32.mrb[41].mxu1  ;;  %v1781_v48 = vpop.f32.mrb[42].mxu0 }
 0x133   :  { %v2351_v25 = vadd.f32 %v3478_v24, %v2281_v9  ;;  %v2284_v27 = vmul.f32 %v3476_v4, %v1820_v45  ;;  %v1822_v26 = vpop.f32.mrb[42].mxu1  ;;  %v1782_v28 = vpop.f32.mrb[43].mxu0 }
 0x134   :  { %v2353_v60 = vadd.f32 %v3478_v24, %v2283_v35  ;;  %v2352_v63 = vadd.f32 %v3478_v24, %v2282_v62  ;;  %v1823_v0 = vpop.f32.mrb[43].mxu1 }
 0x135   :  { %v2415_v1 = vmax.f32 %v2351_v25, 0.0  ;;  %v2354_v52 = vadd.f32 %v3478_v24, %v2284_v27 }
 0x136   :  { %v2417_v54 = vmax.f32 %v2353_v60, 0.0  ;;  %v2416_v41 = vmax.f32 %v2352_v63, 0.0 }
 0x137   :  { %2479 = vst [vmem:[%s3804_s4 + $0x140] sm:$0xff] %v2415_v1  ;;  %v2418_v55 = vmax.f32 %v2354_v52, 0.0 }
 0x138   :  { %2481 = vst [vmem:[%s3804_s4 + $0x150] sm:$0xff] %v2417_v54  ;;  %2480 = vst [vmem:[%s3804_s4 + $0x148] sm:$0xff] %v2416_v41  ;;  %v1859_v39 = vpop.f32.mrb[44].mxu0 }
 0x139   :  { %2482 = vst [vmem:[%s3804_s4 + $0x158] sm:$0xff] %v2418_v55  ;;  %v2285_v3 = vmul.f32 %v3476_v4, %v1859_v39  ;;  %v1900_v10 = vpop.f32.mrb[44].mxu1  ;;  %v1861_v57 = vpop.f32.mrb[45].mxu0 }
 0x13a   :  { %v2287_v14 = vmul.f32 %v3476_v4, %v1900_v10  ;;  %v2286_v19 = vmul.f32 %v3476_v4, %v1861_v57  ;;  %v1902_v2 = vpop.f32.mrb[45].mxu1  ;;  %v1863_v20 = vpop.f32.mrb[46].mxu0 }
 0x13b   :  { %v2355_v12 = vadd.f32 %v3478_v24, %v2285_v3  ;;  %v2288_v53 = vmul.f32 %v3476_v4, %v1902_v2  ;;  %v1904_v15 = vpop.f32.mrb[46].mxu1  ;;  %v1864_v50 = vpop.f32.mrb[47].mxu0 }
 0x13c   :  { %v2357_v46 = vadd.f32 %v3478_v24, %v2287_v14  ;;  %v2356_v47 = vadd.f32 %v3478_v24, %v2286_v19  ;;  %v1905_v49 = vpop.f32.mrb[47].mxu1 }
 0x13d   :  { %v2419_v61 = vmax.f32 %v2355_v12, 0.0  ;;  %v2358_v37 = vadd.f32 %v3478_v24, %v2288_v53 }
 0x13e   :  { %v2421_v38 = vmax.f32 %v2357_v46, 0.0  ;;  %v2420_v32 = vmax.f32 %v2356_v47, 0.0 }
 0x13f   :  { %2483 = vst [vmem:[%s3804_s4 + $0x160] sm:$0xff] %v2419_v61  ;;  %v2422_v33 = vmax.f32 %v2358_v37, 0.0 }
 0x140   :  { %2485 = vst [vmem:[%s3804_s4 + $0x170] sm:$0xff] %v2421_v38  ;;  %2484 = vst [vmem:[%s3804_s4 + $0x168] sm:$0xff] %v2420_v32  ;;  %v1941_v22 = vpop.f32.mrb[48].mxu0 }
 0x141   :  { %2486 = vst [vmem:[%s3804_s4 + $0x178] sm:$0xff] %v2422_v33  ;;  %v2289_v23 = vmul.f32 %v3476_v4, %v1941_v22  ;;  %v1982_v13 = vpop.f32.mrb[48].mxu1  ;;  %v1943_v29 = vpop.f32.mrb[49].mxu0 }
 0x142   :  { %v2291_v16 = vmul.f32 %v3476_v4, %v1982_v13  ;;  %v2290_v17 = vmul.f32 %v3476_v4, %v1943_v29  ;;  %v1984_v42 = vpop.f32.mrb[49].mxu1  ;;  %v1945_v34 = vpop.f32.mrb[50].mxu0 }
 0x143   :  { %v2359_v6 = vadd.f32 %v3478_v24, %v2289_v23  ;;  %v2292_v59 = vmul.f32 %v3476_v4, %v1984_v42  ;;  %v1986_v30 = vpop.f32.mrb[50].mxu1  ;;  %v1946_v31 = vpop.f32.mrb[51].mxu0 }
 0x144   :  { %v2361_v5 = vadd.f32 %v3478_v24, %v2291_v16  ;;  %v2360_v44 = vadd.f32 %v3478_v24, %v2290_v17  ;;  %v1987_v43 = vpop.f32.mrb[51].mxu1 }
 0x145   :  { %v2423_v40 = vmax.f32 %v2359_v6, 0.0  ;;  %v2362_v11 = vadd.f32 %v3478_v24, %v2292_v59 }
 0x146   :  { %v2425_v18 = vmax.f32 %v2361_v5, 0.0  ;;  %v2424_v36 = vmax.f32 %v2360_v44, 0.0 }
 0x147   :  { %2487 = vst [vmem:[%s3804_s4 + $0x180] sm:$0xff] %v2423_v40  ;;  %v2426_v21 = vmax.f32 %v2362_v11, 0.0 }
 0x148   :  { %2489 = vst [vmem:[%s3804_s4 + $0x190] sm:$0xff] %v2425_v18  ;;  %2488 = vst [vmem:[%s3804_s4 + $0x188] sm:$0xff] %v2424_v36  ;;  %v2023_v51 = vpop.f32.mrb[52].mxu0 }
 0x149   :  { %2490 = vst [vmem:[%s3804_s4 + $0x198] sm:$0xff] %v2426_v21  ;;  %v2293_v56 = vmul.f32 %v3476_v4, %v2023_v51  ;;  %v2064_v58 = vpop.f32.mrb[52].mxu1  ;;  %v2025_v9 = vpop.f32.mrb[53].mxu0 }
 0x14a   :  { %v2295_v7 = vmul.f32 %v3476_v4, %v2064_v58  ;;  %v2294_v8 = vmul.f32 %v3476_v4, %v2025_v9  ;;  %v2066_v35 = vpop.f32.mrb[53].mxu1  ;;  %v2027_v62 = vpop.f32.mrb[54].mxu0 }
 0x14b   :  { %v2363_v45 = vadd.f32 %v3478_v24, %v2293_v56  ;;  %v2296_v48 = vmul.f32 %v3476_v4, %v2066_v35  ;;  %v2068_v25 = vpop.f32.mrb[54].mxu1  ;;  %v2028_v27 = vpop.f32.mrb[55].mxu0 }
 0x14c   :  { %v2365_v26 = vadd.f32 %v3478_v24, %v2295_v7  ;;  %v2364_v28 = vadd.f32 %v3478_v24, %v2294_v8  ;;  %v2069_v60 = vpop.f32.mrb[55].mxu1 }
 0x14d   :  { %v2427_v63 = vmax.f32 %v2363_v45, 0.0  ;;  %v2366_v0 = vadd.f32 %v3478_v24, %v2296_v48 }
 0x14e   :  { %v2429_v1 = vmax.f32 %v2365_v26, 0.0  ;;  %v2428_v52 = vmax.f32 %v2364_v28, 0.0 }
 0x14f   :  { %2491 = vst [vmem:[%s3804_s4 + $0x1a0] sm:$0xff] %v2427_v63  ;;  %v2430_v54 = vmax.f32 %v2366_v0, 0.0 }
 0x150   :  { %2493 = vst [vmem:[%s3804_s4 + $0x1b0] sm:$0xff] %v2429_v1  ;;  %2492 = vst [vmem:[%s3804_s4 + $0x1a8] sm:$0xff] %v2428_v52  ;;  %v2105_v41 = vpop.f32.mrb[56].mxu0 }
 0x151   :  { %2494 = vst [vmem:[%s3804_s4 + $0x1b8] sm:$0xff] %v2430_v54  ;;  %v2297_v55 = vmul.f32 %v3476_v4, %v2105_v41  ;;  %v2146_v39 = vpop.f32.mrb[56].mxu1  ;;  %v2107_v3 = vpop.f32.mrb[57].mxu0 }
 0x152   :  { %v2299_v10 = vmul.f32 %v3476_v4, %v2146_v39  ;;  %v2298_v57 = vmul.f32 %v3476_v4, %v2107_v3  ;;  %v2148_v14 = vpop.f32.mrb[57].mxu1  ;;  %v2109_v19 = vpop.f32.mrb[58].mxu0 }
 0x153   :  { %v2367_v2 = vadd.f32 %v3478_v24, %v2297_v55  ;;  %v2300_v20 = vmul.f32 %v3476_v4, %v2148_v14  ;;  %v2150_v12 = vpop.f32.mrb[58].mxu1  ;;  %v2110_v53 = vpop.f32.mrb[59].mxu0 }
 0x154   :  { %v2369_v15 = vadd.f32 %v3478_v24, %v2299_v10  ;;  %v2368_v50 = vadd.f32 %v3478_v24, %v2298_v57  ;;  %v2151_v46 = vpop.f32.mrb[59].mxu1 }
 0x155   :  { %v2431_v47 = vmax.f32 %v2367_v2, 0.0  ;;  %v2370_v49 = vadd.f32 %v3478_v24, %v2300_v20 }
 0x156   :  { %v2433_v61 = vmax.f32 %v2369_v15, 0.0  ;;  %v2432_v37 = vmax.f32 %v2368_v50, 0.0 }
 0x157   :  { %2495 = vst [vmem:[%s3804_s4 + $0x1c0] sm:$0xff] %v2431_v47  ;;  %v2434_v38 = vmax.f32 %v2370_v49, 0.0 }
 0x158   :  { %2497 = vst [vmem:[%s3804_s4 + $0x1d0] sm:$0xff] %v2433_v61  ;;  %2496 = vst [vmem:[%s3804_s4 + $0x1c8] sm:$0xff] %v2432_v37  ;;  %v2187_v32 = vpop.f32.mrb[60].mxu0 }
 0x159   :  { %2498 = vst [vmem:[%s3804_s4 + $0x1d8] sm:$0xff] %v2434_v38  ;;  %v2301_v33 = vmul.f32 %v3476_v4, %v2187_v32  ;;  %v2228_v22 = vpop.f32.mrb[60].mxu1  ;;  %v2189_v23 = vpop.f32.mrb[61].mxu0 }
 0x15a   :  { %v2303_v13 = vmul.f32 %v3476_v4, %v2228_v22  ;;  %v2302_v29 = vmul.f32 %v3476_v4, %v2189_v23  ;;  %v2230_v16 = vpop.f32.mrb[61].mxu1  ;;  %v2191_v17 = vpop.f32.mrb[62].mxu0 }
 0x15b   :  { %v2371_v42 = vadd.f32 %v3478_v24, %v2301_v33  ;;  %v2304_v34 = vmul.f32 %v3476_v4, %v2230_v16  ;;  %v2232_v6 = vpop.f32.mrb[62].mxu1  ;;  %v2192_v59 = vpop.f32.mrb[63].mxu0 }
 0x15c   :  { %v2373_v30 = vadd.f32 %v3478_v24, %v2303_v13  ;;  %v2372_v31 = vadd.f32 %v3478_v24, %v2302_v29  ;;  %v2233_v5 = vpop.f32.mrb[63].mxu1 }
 0x15d   :  { %v2435_v44 = vmax.f32 %v2371_v42, 0.0  ;;  %v2374_v43 = vadd.f32 %v3478_v24, %v2304_v34 }
 0x15e   :  { %v2437_v40 = vmax.f32 %v2373_v30, 0.0  ;;  %v2436_v11 = vmax.f32 %v2372_v31, 0.0 }
 0x15f   :  { %2499 = vst [vmem:[%s3804_s4 + $0x1e0] sm:$0xff] %v2435_v44  ;;  %v2438_v18 = vmax.f32 %v2374_v43, 0.0 }
 0x160   :  { %2501 = vst [vmem:[%s3804_s4 + $0x1f0] sm:$0xff] %v2437_v40  ;;  %2500 = vst [vmem:[%s3804_s4 + $0x1e8] sm:$0xff] %v2436_v11 }
 0x161   :  { %2502 = vst [vmem:[%s3804_s4 + $0x1f8] sm:$0xff] %v2438_v18 }

// kernel: classifier_forward.8
= control target key start
LH: loop header
LB: loop body
LE: loop exit
PB: predicated region body
PF: predicated region fallthrough
CT: control target
= control target key end

     0   :  { %v2019_v3 = vmov 0   ;;  %vm473_vm0 = vcmask 1043456   ;;  %vm469_vm1 = vcmask 588800   ;;  %vm933_vm2 = vcmask 64512   ;;  %s2628_s0 = inlined_call_operand.vmem [shape: bf16[72,2048], index: 0, kind: input, shape index: {}]   ;;  %s2629_s1 = inlined_call_operand.vmem [shape: bf16[8,72], index: 1, kind: input, shape index: {}]   ;;  %s2630_s2 = inlined_call_operand.vmem [shape: f32[8,1], index: 2, kind: input, shape index: {}]   ;;  %s2631_s3 = inlined_call_operand.vmem [shape: f32[8,1], index: 3, kind: input, shape index: {}]   ;;  %s2632_s6 = inlined_call_operand.vmem [shape: f32[16,1], index: 6, kind: input, shape index: {}]   ;;  %s2633_s8 = inlined_call_operand.vmem [shape: f32[8,1], index: 8, kind: input, shape index: {}]   ;;  %s2634_s4 = inlined_call_operand.vmem [shape: bf16[16,8], index: 4, kind: input, shape index: {}]   ;;  %s2635_s5 = inlined_call_operand.vmem [shape: f32[16,1], index: 5, kind: input, shape index: {}]   ;;  %s2636_s9 = inlined_call_operand.vmem [shape: f32[8,1], index: 9, kind: input, shape index: {}]   ;;  %s2637_s7 = inlined_call_operand.vmem [shape: bf16[8,16], index: 7, kind: input, shape index: {}]   ;;  %s2638_s10 = inlined_call_operand.vmem [shape: f32[8,2048], index: 10, kind: output, shape index: {}]  }
   0x1   :  { %v36_v0 = vld [vmem:[%s2628_s0] sm:$0xff]  ;;  %v37_v2 = vld [vmem:[%s2628_s0 + $0x8] sm:$0xff]  ;;  %554 = vmatprep.mubr.bf16.mxu0 %v2019_v3  ;;  %595 = vmatprep.mubr.bf16.mxu1 %v2019_v3  ;;  %v38_v39 = vld [vmem:[%s2628_s0 + $0x10] sm:$0xff]  ;;  %vm1466_vm3 = vcmask 130048  }
   0x2   :  { %v44_v1 = vld [vmem:[%s2628_s0 + $0x40] sm:$0xff]  ;;  %v45_v5 = vld [vmem:[%s2628_s0 + $0x48] sm:$0xff]  ;;  %2000 = vset.pattern.permute.xlu0 %v2019_v3  ;;  %2001 = vset.pattern.permute.xlu1 %v2019_v3  ;;  %v46_v40 = vld [vmem:[%s2628_s0 + $0x50] sm:$0xff] }
   0x3   :  { %v1879_v4 = vcombine.high %v36_v0, %v44_v1  ;;  %v1878_v6 = vcombine.low %v36_v0, %v44_v1  ;;  %v52_v7 = vld [vmem:[%s2628_s0 + $0x80] sm:$0xff]  ;;  %v1881_v9 = vcombine.high %v37_v2, %v45_v5  ;;  %v1880_v10 = vcombine.low %v37_v2, %v45_v5  ;;  %v53_v12 = vld [vmem:[%s2628_s0 + $0x88] sm:$0xff]  ;;  %v39_v41 = vld [vmem:[%s2628_s0 + $0x18] sm:$0xff] }
   0x4   :  { %v60_v8 = vld [vmem:[%s2628_s0 + $0xc0] sm:$0xff]  ;;  %v61_v13 = vld [vmem:[%s2628_s0 + $0xc8] sm:$0xff]  ;;  %v47_v42 = vld [vmem:[%s2628_s0 + $0x58] sm:$0xff]  ;;  %v1883_v44 = vcombine.high %v38_v39, %v46_v40  ;;  %v1882_v52 = vcombine.low %v38_v39, %v46_v40 }
   0x5   :  { %v1895_v11 = vcombine.high %v52_v7, %v60_v8  ;;  %v68_v14 = vld [vmem:[%s2628_s0 + $0x100] sm:$0xff]  ;;  %522 = vmatprep.subr.bf16.mxu0 %v1879_v4  ;;  %v1897_v15 = vcombine.high %v53_v12, %v61_v13  ;;  %v69_v17 = vld [vmem:[%s2628_s0 + $0x108] sm:$0xff]  ;;  %563 = vmatprep.subr.bf16.mxu1 %v1881_v9  ;;  %v1894_v19 = vcombine.low %v52_v7, %v60_v8  ;;  %v54_v47 = vld [vmem:[%s2628_s0 + $0x90] sm:$0xff] }
   0x6   :  { %v76_v16 = vld [vmem:[%s2628_s0 + $0x140] sm:$0xff]  ;;  %v77_v18 = vld [vmem:[%s2628_s0 + $0x148] sm:$0xff]  ;;  %523 = vmatpush1.bf16.msra.mxu0 %v1878_v6  ;;  %564 = vmatpush1.bf16.msra.mxu1 %v1880_v10  ;;  %v1896_v20 = vcombine.low %v53_v12, %v61_v13  ;;  %v1885_v46 = vcombine.high %v39_v41, %v47_v42  ;;  %v62_v48 = vld [vmem:[%s2628_s0 + $0xd0] sm:$0xff]  ;;  %v1884_v53 = vcombine.low %v39_v41, %v47_v42 }
   0x7   :  { %524 = vmatprep.subr.bf16.mxu0 %v1895_v11  ;;  %v1911_v21 = vcombine.high %v68_v14, %v76_v16  ;;  %565 = vmatprep.subr.bf16.mxu1 %v1897_v15  ;;  %v1913_v22 = vcombine.high %v69_v17, %v77_v18  ;;  %v84_v23 = vld [vmem:[%s2628_s0 + $0x180] sm:$0xff]  ;;  %v85_v25 = vld [vmem:[%s2628_s0 + $0x188] sm:$0xff]  ;;  %v1910_v27 = vcombine.low %v68_v14, %v76_v16  ;;  %v55_v49 = vld [vmem:[%s2628_s0 + $0x98] sm:$0xff] }
   0x8   :  { %v92_v24 = vld [vmem:[%s2628_s0 + $0x1c0] sm:$0xff]  ;;  %v93_v26 = vld [vmem:[%s2628_s0 + $0x1c8] sm:$0xff]  ;;  %v1912_v28 = vcombine.low %v69_v17, %v77_v18  ;;  %v63_v50 = vld [vmem:[%s2628_s0 + $0xd8] sm:$0xff]  ;;  %v1899_v54 = vcombine.high %v54_v47, %v62_v48  ;;  %v1898_v60 = vcombine.low %v54_v47, %v62_v48 }
   0x9   :  { %v1927_v29 = vcombine.high %v84_v23, %v92_v24  ;;  %v1929_v30 = vcombine.high %v85_v25, %v93_v26  ;;  %v100_v31 = vld [vmem:[%s2628_s0 + $0x200] sm:$0xff]  ;;  %v101_v32 = vld [vmem:[%s2628_s0 + $0x208] sm:$0xff]  ;;  %v1926_v33 = vcombine.low %v84_v23, %v92_v24  ;;  %v1928_v34 = vcombine.low %v85_v25, %v93_v26  ;;  %v70_v56 = vld [vmem:[%s2628_s0 + $0x110] sm:$0xff] }
   0xa   :  { %525 = vmatpush1.bf16.msra.mxu0 %v1894_v19  ;;  %566 = vmatpush1.bf16.msra.mxu1 %v1896_v20  ;;  %v1943_v35 = vcombine.high %v100_v31, %v100_v31  ;;  %v1942_v36 = vcombine.low %v100_v31, %v100_v31  ;;  %v1945_v37 = vcombine.high %v101_v32, %v101_v32  ;;  %v2164_v51 = vld [vmem:[%s2629_s1] sm:$0xf]  ;;  %v78_v57 = vld [vmem:[%s2628_s0 + $0x150] sm:$0xff]  ;;  %v71_v58 = vld [vmem:[%s2628_s0 + $0x118] sm:$0xff] }
   0xb   :  { %526 = vmatprep.subr.bf16.mxu0 %v1911_v21  ;;  %567 = vmatprep.subr.bf16.mxu1 %v1913_v22  ;;  %v1944_v38 = vcombine.low %v101_v32, %v101_v32  ;;  %v1901_v55 = vcombine.high %v55_v49, %v63_v50  ;;  %v79_v59 = vld [vmem:[%s2628_s0 + $0x158] sm:$0xff]  ;;  %v850_v61 = vld [vmem:[%s2630_s2] sm:$0xff]  ;;  %v1900_v62 = vcombine.low %v55_v49, %v63_v50  ;;  %v86_v1 = vld [vmem:[%s2628_s0 + $0x190] sm:$0xff] }
   0xc   :  { %v475_v43 = vsel %vm473_vm0, %v1942_v36, 0  ;;  %v1915_v63 = vcombine.high %v70_v56, %v78_v57  ;;  %v1917_v0 = vcombine.high %v71_v58, %v79_v59  ;;  %v94_v2 = vld [vmem:[%s2628_s0 + $0x1d0] sm:$0xff]  ;;  %v87_v4 = vld [vmem:[%s2628_s0 + $0x198] sm:$0xff]  ;;  %853 = vperm.xlu0 %2000, %v850_v61   ;;  %v1914_v6 = vcombine.low %v70_v56, %v78_v57  ;;  %v872_v7 = vld [vmem:[%s2631_s3] sm:$0xff] }
   0xd   :  { %v481_v45 = vsel %vm473_vm0, %v1944_v38, 0  ;;  %v95_v5 = vld [vmem:[%s2628_s0 + $0x1d8] sm:$0xff]  ;;  %v1916_v8 = vcombine.low %v71_v58, %v79_v59  ;;  %v1931_v9 = vcombine.high %v86_v1, %v94_v2  ;;  %v102_v11 = vld [vmem:[%s2628_s0 + $0x210] sm:$0xff]  ;;  %v1930_v13 = vcombine.low %v86_v1, %v94_v2  ;;  %v1373_v14 = vld [vmem:[%s2632_s6] sm:$0xff] }
   0xe   :  { %527 = vmatpush1.bf16.msra.mxu0 %v1910_v27  ;;  %568 = vmatpush1.bf16.msra.mxu1 %v1912_v28  ;;  %v1933_v10 = vcombine.high %v87_v4, %v95_v5  ;;  %v103_v12 = vld [vmem:[%s2628_s0 + $0x218] sm:$0xff]  ;;  %v1932_v15 = vcombine.low %v87_v4, %v95_v5  ;;  %v1947_v16 = vcombine.high %v102_v11, %v102_v11  ;;  %v40_v20 = vld [vmem:[%s2628_s0 + $0x20] sm:$0xff]  ;;  %v41_v22 = vld [vmem:[%s2628_s0 + $0x28] sm:$0xff] }
   0xf   :  { %528 = vmatprep.subr.bf16.mxu0 %v1927_v29  ;;  %569 = vmatprep.subr.bf16.mxu1 %v1929_v30  ;;  %v1946_v17 = vcombine.low %v102_v11, %v102_v11  ;;  %v1949_v18 = vcombine.high %v103_v12, %v103_v12  ;;  %v1948_v19 = vcombine.low %v103_v12, %v103_v12  ;;  %v48_v21 = vld [vmem:[%s2628_s0 + $0x60] sm:$0xff]  ;;  %v49_v23 = vld [vmem:[%s2628_s0 + $0x68] sm:$0xff]  ;;  %v51_v1 = vld [vmem:[%s2628_s0 + $0x78] sm:$0xff] }
  0x10   :  { %875 = vperm.xlu0 %2000, %v872_v7   ;;  %v1798_v24 = vld [vmem:[%s2633_s8] sm:$0xff]  ;;  %v1887_v26 = vcombine.high %v40_v20, %v48_v21  ;;  %v1889_v28 = vcombine.high %v41_v22, %v49_v23  ;;  %v57_v31 = vld [vmem:[%s2628_s0 + $0xa8] sm:$0xff]  ;;  %v58_v7 = vld [vmem:[%s2628_s0 + $0xb0] sm:$0xff] }
  0x11   :  { %v487_v25 = vsel %vm473_vm0, %v1946_v17, 0  ;;  %v493_v27 = vsel %vm473_vm0, %v1948_v19, 0  ;;  %v56_v29 = vld [vmem:[%s2628_s0 + $0xa0] sm:$0xff]  ;;  %v65_v32 = vld [vmem:[%s2628_s0 + $0xe8] sm:$0xff]  ;;  %v75_v17 = vld [vmem:[%s2628_s0 + $0x138] sm:$0xff] }
  0x12   :  { %529 = vmatpush1.bf16.msra.mxu0 %v1926_v33  ;;  %570 = vmatpush1.bf16.msra.mxu1 %v1928_v34  ;;  %v64_v30 = vld [vmem:[%s2628_s0 + $0xe0] sm:$0xff]  ;;  %v1886_v33 = vcombine.low %v40_v20, %v48_v21  ;;  %v1888_v34 = vcombine.low %v41_v22, %v49_v23  ;;  %v1905_v36 = vcombine.high %v57_v31, %v65_v32  ;;  %v73_v39 = vld [vmem:[%s2628_s0 + $0x128] sm:$0xff]  ;;  %v90_v23 = vld [vmem:[%s2628_s0 + $0x1b0] sm:$0xff] }
  0x13   :  { %1958 = vmatprep.subr.msk.bf16.mxu0 %vm473_vm0, %v1943_v35  ;;  %1960 = vmatprep.subr.msk.bf16.mxu1 %vm473_vm0, %v1945_v37  ;;  %v1903_v35 = vcombine.high %v56_v29, %v64_v30  ;;  %v72_v37 = vld [vmem:[%s2628_s0 + $0x120] sm:$0xff]  ;;  %v81_v40 = vld [vmem:[%s2628_s0 + $0x168] sm:$0xff]  ;;  %v1902_v41 = vcombine.low %v56_v29, %v64_v30  ;;  %v1904_v42 = vcombine.low %v57_v31, %v65_v32  ;;  %v106_v31 = vld [vmem:[%s2628_s0 + $0x230] sm:$0xff] }
  0x14   :  { %1377 = vperm.xlu0 %2000, %v1373_v14   ;;  %v80_v38 = vld [vmem:[%s2628_s0 + $0x160] sm:$0xff]  ;;  %v89_v47 = vld [vmem:[%s2628_s0 + $0x1a8] sm:$0xff]  ;;  %v1920_v50 = vcombine.low %v73_v39, %v81_v40  ;;  %v107_v32 = vld [vmem:[%s2628_s0 + $0x238] sm:$0xff] }
  0x15   :  { %v97_v48 = vld [vmem:[%s2628_s0 + $0x1e8] sm:$0xff]  ;;  %v1918_v49 = vcombine.low %v72_v37, %v80_v38 }
  0x16   :  { %531 = vmatpush1.bf16.msra.mxu0 %v475_v43  ;;  %572 = vmatpush1.bf16.msra.mxu1 %v481_v45  ;;  %v1919_v43 = vcombine.high %v72_v37, %v80_v38  ;;  %v88_v45 = vld [vmem:[%s2628_s0 + $0x1a0] sm:$0xff]  ;;  %v1936_v57 = vcombine.low %v89_v47, %v97_v48  ;;  %v1957_v37 = vcombine.high %v107_v32, %v107_v32 }
  0x17   :  { %604 = vmatprep.subr.bf16.mxu0 %v1883_v44  ;;  %645 = vmatprep.subr.bf16.mxu1 %v1885_v46  ;;  %v1921_v44 = vcombine.high %v73_v39, %v81_v40  ;;  %v96_v46 = vld [vmem:[%s2628_s0 + $0x1e0] sm:$0xff]  ;;  %v1956_v38 = vcombine.low %v107_v32, %v107_v32 }
  0x18   :  { %1801 = vperm.xlu0 %2000, %v1798_v24   ;;  %v1934_v56 = vcombine.low %v88_v45, %v96_v46  ;;  %v98_v24 = vld [vmem:[%s2628_s0 + $0x1f0] sm:$0xff] }
  0x19   :  { %1959 = vmatmul.mubr.msk.bf16.vlgmr.msra.gmra.mrb[0].mxu0 %vm469_vm1, %v2164_v51  ;;  %1961 = vmatmul.mubr.msk.bf16.vlgmr.msra.gmra.mrb[0].mxu1 %vm469_vm1, %v2164_v51  ;;  %v1939_v29 = vcombine.high %v90_v23, %v98_v24  ;;  %v517_v40 = vsel %vm473_vm0, %v1956_v38, 0 }
  0x1a   :  { %605 = vmatpush1.bf16.msra.mxu0 %v1882_v52  ;;  %646 = vmatpush1.bf16.msra.mxu1 %v1884_v53  ;;  %v1935_v52 = vcombine.high %v88_v45, %v96_v46  ;;  %v1937_v53 = vcombine.high %v89_v47, %v97_v48 }
  0x1b   :  { %606 = vmatprep.subr.bf16.mxu0 %v1899_v54  ;;  %647 = vmatprep.subr.bf16.mxu1 %v1901_v55  ;;  %v104_v54 = vld [vmem:[%s2628_s0 + $0x220] sm:$0xff]  ;;  %v105_v55 = vld [vmem:[%s2628_s0 + $0x228] sm:$0xff] }
  0x1c   :  { %636 = vmatprep.mubr.bf16.mxu0 %v2019_v3  ;;  %677 = vmatprep.mubr.bf16.mxu1 %v2019_v3  ;;  %v1951_v58 = vcombine.high %v104_v54, %v104_v54  ;;  %v1950_v59 = vcombine.low %v104_v54, %v104_v54  ;;  %v1952_v61 = vcombine.low %v105_v55, %v105_v55 }
  0x1e   :  { %607 = vmatpush1.bf16.msra.mxu0 %v1898_v60  ;;  %648 = vmatpush1.bf16.msra.mxu1 %v1900_v62  ;;  %v1953_v60 = vcombine.high %v105_v55, %v105_v55  ;;  %v42_v62 = vld [vmem:[%s2628_s0 + $0x30] sm:$0xff]  ;;  %v499_v2 = vsel %vm473_vm0, %v1950_v59, 0  ;;  %v505_v5 = vsel %vm473_vm0, %v1952_v61, 0 }
  0x1f   :  { %608 = vmatprep.subr.bf16.mxu0 %v1915_v63  ;;  %649 = vmatprep.subr.bf16.mxu1 %v1917_v0  ;;  %v50_v63 = vld [vmem:[%s2628_s0 + $0x70] sm:$0xff]  ;;  %v43_v0 = vld [vmem:[%s2628_s0 + $0x38] sm:$0xff] }
  0x20   :  { %v1891_v4 = vcombine.high %v42_v62, %v50_v63  ;;  %v1890_v11 = vcombine.low %v42_v62, %v50_v63  ;;  %v1892_v12 = vcombine.low %v43_v0, %v51_v1 }
  0x22   :  { %609 = vmatpush1.bf16.msra.mxu0 %v1914_v6  ;;  %650 = vmatpush1.bf16.msra.mxu1 %v1916_v8  ;;  %v1893_v6 = vcombine.high %v43_v0, %v51_v1  ;;  %v66_v8 = vld [vmem:[%s2628_s0 + $0xf0] sm:$0xff] }
  0x23   :  { %610 = vmatprep.subr.bf16.mxu0 %v1931_v9  ;;  %651 = vmatprep.subr.bf16.mxu1 %v1933_v10  ;;  %v59_v9 = vld [vmem:[%s2628_s0 + $0xb8] sm:$0xff]  ;;  %v1906_v19 = vcombine.low %v58_v7, %v66_v8 }
  0x24   :  { %v67_v10 = vld [vmem:[%s2628_s0 + $0xf8] sm:$0xff] }
  0x25   :  { %v1909_v14 = vcombine.high %v59_v9, %v67_v10  ;;  %v1908_v20 = vcombine.low %v59_v9, %v67_v10  ;;  %v2382_v10 = vld [vmem:[%s2634_s4] sm:$0xff]  }
  0x26   :  { %611 = vmatpush1.bf16.msra.mxu0 %v1930_v13  ;;  %652 = vmatpush1.bf16.msra.mxu1 %v1932_v15  ;;  %v1907_v13 = vcombine.high %v58_v7, %v66_v8  ;;  %v74_v15 = vld [vmem:[%s2628_s0 + $0x130] sm:$0xff] }
  0x27   :  { %1962 = vmatprep.subr.msk.bf16.mxu0 %vm473_vm0, %v1947_v16  ;;  %1964 = vmatprep.subr.msk.bf16.mxu1 %vm473_vm0, %v1949_v18  ;;  %v82_v16 = vld [vmem:[%s2628_s0 + $0x170] sm:$0xff]  ;;  %v83_v18 = vld [vmem:[%s2628_s0 + $0x178] sm:$0xff] }
  0x28   :  { %v1923_v21 = vcombine.high %v74_v15, %v82_v16  ;;  %v1925_v22 = vcombine.high %v75_v17, %v83_v18 }
  0x2a   :  { %613 = vmatpush1.bf16.msra.mxu0 %v487_v25  ;;  %654 = vmatpush1.bf16.msra.mxu1 %v493_v27  ;;  %v91_v25 = vld [vmem:[%s2628_s0 + $0x1b8] sm:$0xff]  ;;  %v1922_v27 = vcombine.low %v74_v15, %v82_v16 }
  0x2b   :  { %686 = vmatprep.subr.bf16.mxu0 %v1887_v26  ;;  %727 = vmatprep.subr.bf16.mxu1 %v1889_v28  ;;  %v99_v26 = vld [vmem:[%s2628_s0 + $0x1f8] sm:$0xff]  ;;  %v1924_v28 = vcombine.low %v75_v17, %v83_v18 }
  0x2c   :  { %v1941_v30 = vcombine.high %v91_v25, %v99_v26 }
  0x2d   :  { %1963 = vmatmul.mubr.msk.bf16.vlgmr.msra.gmra.mrb[4].mxu0 %vm469_vm1, %v2164_v51  ;;  %1965 = vmatmul.mubr.msk.bf16.vlgmr.msra.gmra.mrb[4].mxu1 %vm469_vm1, %v2164_v51 }
  0x2e   :  { %687 = vmatpush1.bf16.msra.mxu0 %v1886_v33  ;;  %728 = vmatpush1.bf16.msra.mxu1 %v1888_v34  ;;  %v1938_v33 = vcombine.low %v90_v23, %v98_v24  ;;  %v1940_v34 = vcombine.low %v91_v25, %v99_v26 }
  0x2f   :  { %688 = vmatprep.subr.bf16.mxu0 %v1903_v35  ;;  %729 = vmatprep.subr.bf16.mxu1 %v1905_v36  ;;  %v1955_v35 = vcombine.high %v106_v31, %v106_v31  ;;  %v1954_v36 = vcombine.low %v106_v31, %v106_v31 }
  0x30   :  { %718 = vmatprep.mubr.bf16.mxu0 %v2019_v3  ;;  %759 = vmatprep.mubr.bf16.mxu1 %v2019_v3 }
  0x31   :  { %v511_v39 = vsel %vm473_vm0, %v1954_v36, 0 }
  0x32   :  { %689 = vmatpush1.bf16.msra.mxu0 %v1902_v41  ;;  %730 = vmatpush1.bf16.msra.mxu1 %v1904_v42  ;;  %v1329_v41 = vld [vmem:[%s2635_s5] sm:$0xff]  ;;  %v1330_v42 = vld [vmem:[%s2635_s5 + $0x8] sm:$0xff] }
  0x33   :  { %690 = vmatprep.subr.bf16.mxu0 %v1919_v43  ;;  %731 = vmatprep.subr.bf16.mxu1 %v1921_v44  ;;  %v1374_v43 = vld [vmem:[%s2632_s6 + $0x8] sm:$0xff] }
  0x34   :  { %1333 = vperm.xlu1 %2001, %v1329_v41  }
  0x36   :  { %691 = vmatpush1.bf16.msra.mxu0 %v1918_v49  ;;  %732 = vmatpush1.bf16.msra.mxu1 %v1920_v50 }
  0x37   :  { %692 = vmatprep.subr.bf16.mxu0 %v1935_v52  ;;  %733 = vmatprep.subr.bf16.mxu1 %v1937_v53 }
  0x38   :  { %1338 = vperm.xlu1 %2001, %v1330_v42  }
  0x3a   :  { %693 = vmatpush1.bf16.msra.mxu0 %v1934_v56  ;;  %734 = vmatpush1.bf16.msra.mxu1 %v1936_v57 }
  0x3b   :  { %1966 = vmatprep.subr.msk.bf16.mxu0 %vm473_vm0, %v1951_v58  ;;  %1968 = vmatprep.subr.msk.bf16.mxu1 %vm473_vm0, %v1953_v60 }
  0x3c   :  { %1382 = vperm.xlu1 %2001, %v1374_v43  }
  0x3e   :  { %695 = vmatpush1.bf16.msra.mxu0 %v499_v2  ;;  %736 = vmatpush1.bf16.msra.mxu1 %v505_v5 }
  0x3f   :  { %768 = vmatprep.subr.bf16.mxu0 %v1891_v4  ;;  %809 = vmatprep.subr.bf16.mxu1 %v1893_v6 }
  0x41   :  { %1967 = vmatmul.mubr.msk.bf16.vlgmr.msra.gmra.mrb[8].mxu0 %vm469_vm1, %v2164_v51  ;;  %1969 = vmatmul.mubr.msk.bf16.vlgmr.msra.gmra.mrb[8].mxu1 %vm469_vm1, %v2164_v51 }
  0x42   :  { %769 = vmatpush1.bf16.msra.mxu0 %v1890_v11  ;;  %810 = vmatpush1.bf16.msra.mxu1 %v1892_v12 }
  0x43   :  { %770 = vmatprep.subr.bf16.mxu0 %v1907_v13  ;;  %811 = vmatprep.subr.bf16.mxu1 %v1909_v14 }
  0x44   :  { %800 = vmatprep.mubr.bf16.mxu0 %v2019_v3  ;;  %841 = vmatprep.mubr.bf16.mxu1 %v2019_v3 }
  0x46   :  { %771 = vmatpush1.bf16.msra.mxu0 %v1906_v19  ;;  %812 = vmatpush1.bf16.msra.mxu1 %v1908_v20 }
  0x47   :  { %772 = vmatprep.subr.bf16.mxu0 %v1923_v21  ;;  %813 = vmatprep.subr.bf16.mxu1 %v1925_v22 }
  0x4a   :  { %773 = vmatpush1.bf16.msra.mxu0 %v1922_v27  ;;  %814 = vmatpush1.bf16.msra.mxu1 %v1924_v28 }
  0x4b   :  { %774 = vmatprep.subr.bf16.mxu0 %v1939_v29  ;;  %815 = vmatprep.subr.bf16.mxu1 %v1941_v30 }
  0x4e   :  { %775 = vmatpush1.bf16.msra.mxu0 %v1938_v33  ;;  %816 = vmatpush1.bf16.msra.mxu1 %v1940_v34 }
  0x4f   :  { %1970 = vmatprep.subr.msk.bf16.mxu0 %vm473_vm0, %v1955_v35  ;;  %1972 = vmatprep.subr.msk.bf16.mxu1 %vm473_vm0, %v1957_v37 }
  0x52   :  { %777 = vmatpush1.bf16.msra.mxu0 %v511_v39  ;;  %818 = vmatpush1.bf16.msra.mxu1 %v517_v40 }
  0x55   :  { %1971 = vmatmul.mubr.msk.bf16.vlgmr.msra.gmra.mrb[12].mxu0 %vm469_vm1, %v2164_v51  ;;  %1973 = vmatmul.mubr.msk.bf16.vlgmr.msra.gmra.mrb[12].mxu1 %vm469_vm1, %v2164_v51  ;;  %v1820_v51 = vld [vmem:[%s2636_s9] sm:$0xff] }
  0x56   :  { %1017 = vmatprep.mubr.bf16.mxu0 %v2019_v3  ;;  %1060 = vmatprep.mubr.bf16.mxu1 %v2019_v3 }
  0x57   :  { %1823 = vperm.xlu1 %2001, %v1820_v51  }
  0x8b   :  { %v2364_v44 = vpop.permute.xlu0 %853 }
  0x8f   :  { %v2366_v46 = vpop.permute.xlu0 %875 }
  0xec   :  { %v556_v45 = vpop.f32.mrb[0].mxu0  ;;  %v597_v48 = vpop.f32.mrb[0].mxu1 }
  0xed   :  { %v856_v47 = vmul.f32 %v2364_v44, %v556_v45  ;;  %v558_v49 = vpop.f32.mrb[1].mxu0  ;;  %v858_v50 = vmul.f32 %v2364_v44, %v597_v48  ;;  %v599_v53 = vpop.f32.mrb[1].mxu1 }
  0xee   :  { %v857_v52 = vmul.f32 %v2364_v44, %v558_v49  ;;  %v560_v54 = vpop.f32.mrb[2].mxu0  ;;  %v859_v55 = vmul.f32 %v2364_v44, %v599_v53  ;;  %v601_v56 = vpop.f32.mrb[2].mxu1 }
  0xef   :  { %v561_v57 = vpop.f32.mrb[3].mxu0  ;;  %v878_v58 = vadd.f32 %v2366_v46, %v856_v47  ;;  %v602_v59 = vpop.f32.mrb[3].mxu1  ;;  %v880_v61 = vadd.f32 %v2366_v46, %v858_v50 }
  0xf0   :  { %v879_v60 = vadd.f32 %v2366_v46, %v857_v52  ;;  %v881_v62 = vadd.f32 %v2366_v46, %v859_v55 }
  0xf1   :  { %v894_v63 = vmax.f32 %v878_v58, 0.0  ;;  %v896_v1 = vmax.f32 %v880_v61, 0.0 }
  0xf2   :  { %v895_v0 = vmax.f32 %v879_v60, 0.0  ;;  %v897_v2 = vmax.f32 %v881_v62, 0.0 }
  0xf3   :  { %v912_v4 = vpack.c.bf16 %v894_v63, %v894_v63  ;;  %v914_v6 = vpack.c.bf16 %v896_v1, %v896_v1 }
  0xf4   :  { %v913_v5 = vpack.c.bf16 %v895_v0, %v895_v0  ;;  %v915_v7 = vpack.c.bf16 %v897_v2, %v897_v2 }
  0xf5   :  { %v938_v8 = vsel %vm473_vm0, %v912_v4, 0  ;;  %v944_v9 = vsel %vm473_vm0, %v914_v6, 0 }
  0xf6   :  { %1975 = vmatprep.subr.msk.bf16.mxu0 %vm473_vm0, %v913_v5  ;;  %1977 = vmatprep.subr.msk.bf16.mxu1 %vm473_vm0, %v915_v7 }
  0xf7   :  { %986 = vmatpush1.bf16.msra.mxu0 %v938_v8  ;;  %1029 = vmatpush1.bf16.msra.mxu1 %v944_v9 }
  0xfa   :  { %1976 = vmatmul.mubr.msk.bf16.vlgmr.msra.gmra.mrb[16].mxu0 %vm933_vm2, %v2382_v10  ;;  %1978 = vmatmul.mubr.msk.bf16.vlgmr.msra.gmra.mrb[16].mxu1 %vm933_vm2, %v2382_v10 }
  0xfb   :  { %1103 = vmatprep.mubr.bf16.mxu0 %v2019_v3  ;;  %1146 = vmatprep.mubr.bf16.mxu1 %v2019_v3 }
 0x100   :  { %v638_v11 = vpop.f32.mrb[4].mxu0  ;;  %v679_v13 = vpop.f32.mrb[4].mxu1 }
 0x101   :  { %v860_v12 = vmul.f32 %v2364_v44, %v638_v11  ;;  %v640_v14 = vpop.f32.mrb[5].mxu0  ;;  %v862_v15 = vmul.f32 %v2364_v44, %v679_v13  ;;  %v681_v17 = vpop.f32.mrb[5].mxu1 }
 0x102   :  { %v861_v16 = vmul.f32 %v2364_v44, %v640_v14  ;;  %v642_v18 = vpop.f32.mrb[6].mxu0  ;;  %v863_v20 = vmul.f32 %v2364_v44, %v681_v17  ;;  %v683_v21 = vpop.f32.mrb[6].mxu1 }
 0x103   :  { %v882_v19 = vadd.f32 %v2366_v46, %v860_v12  ;;  %v643_v22 = vpop.f32.mrb[7].mxu0  ;;  %v884_v23 = vadd.f32 %v2366_v46, %v862_v15  ;;  %v684_v25 = vpop.f32.mrb[7].mxu1 }
 0x104   :  { %v883_v24 = vadd.f32 %v2366_v46, %v861_v16  ;;  %v885_v27 = vadd.f32 %v2366_v46, %v863_v20 }
 0x105   :  { %v898_v26 = vmax.f32 %v882_v19, 0.0  ;;  %v900_v28 = vmax.f32 %v884_v23, 0.0 }
 0x106   :  { %v899_v29 = vmax.f32 %v883_v24, 0.0  ;;  %v901_v31 = vmax.f32 %v885_v27, 0.0 }
 0x107   :  { %v916_v30 = vpack.c.bf16 %v898_v26, %v898_v26  ;;  %v918_v32 = vpack.c.bf16 %v900_v28, %v900_v28 }
 0x108   :  { %v917_v33 = vpack.c.bf16 %v899_v29, %v899_v29  ;;  %v919_v34 = vpack.c.bf16 %v901_v31, %v901_v31  ;;  %v2449_v29 = vpop.permute.xlu0 %1377 }
 0x109   :  { %v950_v35 = vsel %vm473_vm0, %v916_v30, 0  ;;  %v956_v36 = vsel %vm473_vm0, %v918_v32, 0 }
 0x10a   :  { %1979 = vmatprep.subr.msk.bf16.mxu0 %vm473_vm0, %v917_v33  ;;  %1981 = vmatprep.subr.msk.bf16.mxu1 %vm473_vm0, %v919_v34 }
 0x10b   :  { %1072 = vmatpush1.bf16.msra.mxu0 %v950_v35  ;;  %1115 = vmatpush1.bf16.msra.mxu1 %v956_v36 }
 0x10e   :  { %1980 = vmatmul.mubr.msk.bf16.vlgmr.msra.gmra.mrb[20].mxu0 %vm933_vm2, %v2382_v10  ;;  %1982 = vmatmul.mubr.msk.bf16.vlgmr.msra.gmra.mrb[20].mxu1 %vm933_vm2, %v2382_v10 }
 0x10f   :  { %1189 = vmatprep.mubr.bf16.mxu0 %v2019_v3  ;;  %1232 = vmatprep.mubr.bf16.mxu1 %v2019_v3 }
 0x114   :  { %v720_v37 = vpop.f32.mrb[8].mxu0  ;;  %v761_v39 = vpop.f32.mrb[8].mxu1 }
 0x115   :  { %v864_v38 = vmul.f32 %v2364_v44, %v720_v37  ;;  %v722_v40 = vpop.f32.mrb[9].mxu0  ;;  %v866_v41 = vmul.f32 %v2364_v44, %v761_v39  ;;  %v763_v43 = vpop.f32.mrb[9].mxu1 }
 0x116   :  { %v865_v42 = vmul.f32 %v2364_v44, %v722_v40  ;;  %v724_v51 = vpop.f32.mrb[10].mxu0  ;;  %v867_v47 = vmul.f32 %v2364_v44, %v763_v43  ;;  %v765_v48 = vpop.f32.mrb[10].mxu1 }
 0x117   :  { %v886_v45 = vadd.f32 %v2366_v46, %v864_v38  ;;  %v725_v49 = vpop.f32.mrb[11].mxu0  ;;  %v888_v50 = vadd.f32 %v2366_v46, %v866_v41  ;;  %v766_v53 = vpop.f32.mrb[11].mxu1 }
 0x118   :  { %v887_v52 = vadd.f32 %v2366_v46, %v865_v42  ;;  %v889_v55 = vadd.f32 %v2366_v46, %v867_v47 }
 0x119   :  { %v902_v54 = vmax.f32 %v886_v45, 0.0  ;;  %v904_v56 = vmax.f32 %v888_v50, 0.0 }
 0x11a   :  { %v903_v57 = vmax.f32 %v887_v52, 0.0  ;;  %v905_v59 = vmax.f32 %v889_v55, 0.0 }
 0x11b   :  { %v920_v58 = vpack.c.bf16 %v902_v54, %v902_v54  ;;  %v922_v60 = vpack.c.bf16 %v904_v56, %v904_v56 }
 0x11c   :  { %v921_v61 = vpack.c.bf16 %v903_v57, %v903_v57  ;;  %v923_v62 = vpack.c.bf16 %v905_v59, %v905_v59 }
 0x11d   :  { %v962_v63 = vsel %vm473_vm0, %v920_v58, 0  ;;  %v968_v0 = vsel %vm473_vm0, %v922_v60, 0 }
 0x11e   :  { %1983 = vmatprep.subr.msk.bf16.mxu0 %vm473_vm0, %v921_v61  ;;  %1985 = vmatprep.subr.msk.bf16.mxu1 %vm473_vm0, %v923_v62 }
 0x11f   :  { %1158 = vmatpush1.bf16.msra.mxu0 %v962_v63  ;;  %1201 = vmatpush1.bf16.msra.mxu1 %v968_v0 }
 0x122   :  { %1984 = vmatmul.mubr.msk.bf16.vlgmr.msra.gmra.mrb[24].mxu0 %vm933_vm2, %v2382_v10  ;;  %1986 = vmatmul.mubr.msk.bf16.vlgmr.msra.gmra.mrb[24].mxu1 %vm933_vm2, %v2382_v10 }
 0x123   :  { %1275 = vmatprep.mubr.bf16.mxu0 %v2019_v3  ;;  %1318 = vmatprep.mubr.bf16.mxu1 %v2019_v3 }
 0x128   :  { %v802_v1 = vpop.f32.mrb[12].mxu0  ;;  %v843_v4 = vpop.f32.mrb[12].mxu1 }
 0x129   :  { %v868_v2 = vmul.f32 %v2364_v44, %v802_v1  ;;  %v804_v5 = vpop.f32.mrb[13].mxu0  ;;  %v870_v6 = vmul.f32 %v2364_v44, %v843_v4  ;;  %v845_v8 = vpop.f32.mrb[13].mxu1 }
 0x12a   :  { %v869_v7 = vmul.f32 %v2364_v44, %v804_v5  ;;  %v806_v9 = vpop.f32.mrb[14].mxu0  ;;  %v871_v12 = vmul.f32 %v2364_v44, %v845_v8  ;;  %v847_v13 = vpop.f32.mrb[14].mxu1  ;;  %v2472_v5 = vld [vmem:[%s2637_s7] sm:$0xf] }
 0x12b   :  { %v890_v11 = vadd.f32 %v2366_v46, %v868_v2  ;;  %v807_v14 = vpop.f32.mrb[15].mxu0  ;;  %v892_v15 = vadd.f32 %v2366_v46, %v870_v6  ;;  %v848_v17 = vpop.f32.mrb[15].mxu1 }
 0x12c   :  { %v891_v16 = vadd.f32 %v2366_v46, %v869_v7  ;;  %v893_v19 = vadd.f32 %v2366_v46, %v871_v12  ;;  %v2445_v46 = vpop.permute.xlu1 %1333 }
 0x12d   :  { %v906_v18 = vmax.f32 %v890_v11, 0.0  ;;  %v908_v20 = vmax.f32 %v892_v15, 0.0 }
 0x12e   :  { %v907_v21 = vmax.f32 %v891_v16, 0.0  ;;  %v909_v23 = vmax.f32 %v893_v19, 0.0 }
 0x12f   :  { %v924_v22 = vpack.c.bf16 %v906_v18, %v906_v18  ;;  %v926_v24 = vpack.c.bf16 %v908_v20, %v908_v20 }
 0x130   :  { %v925_v25 = vpack.c.bf16 %v907_v21, %v907_v21  ;;  %v927_v26 = vpack.c.bf16 %v909_v23, %v909_v23  ;;  %v2447_v28 = vpop.permute.xlu1 %1338 }
 0x131   :  { %v974_v27 = vsel %vm473_vm0, %v924_v22, 0  ;;  %v980_v44 = vsel %vm473_vm0, %v926_v24, 0 }
 0x132   :  { %1987 = vmatprep.subr.msk.bf16.mxu0 %vm473_vm0, %v925_v25  ;;  %1989 = vmatprep.subr.msk.bf16.mxu1 %vm473_vm0, %v927_v26 }
 0x133   :  { %1244 = vmatpush1.bf16.msra.mxu0 %v974_v27  ;;  %1287 = vmatpush1.bf16.msra.mxu1 %v980_v44 }
 0x134   :  { %v2451_v31 = vpop.permute.xlu1 %1382 }
 0x136   :  { %1988 = vmatmul.mubr.msk.bf16.vlgmr.msra.gmra.mrb[28].mxu0 %vm933_vm2, %v2382_v10  ;;  %1990 = vmatmul.mubr.msk.bf16.vlgmr.msra.gmra.mrb[28].mxu1 %vm933_vm2, %v2382_v10 }
 0x137   :  { %1502 = vmatprep.mubr.bf16.mxu0 %v2019_v3  ;;  %1543 = vmatprep.mubr.bf16.mxu1 %v2019_v3 }
 0x1cd   :  { %v1019_v30 = vpop.f32.mrb[16].mxu0  ;;  %v1062_v33 = vpop.f32.mrb[16].mxu1 }
 0x1ce   :  { %v1341_v32 = vmul.f32 %v2445_v46, %v1019_v30  ;;  %v1021_v34 = vpop.f32.mrb[17].mxu0  ;;  %v1343_v35 = vmul.f32 %v2445_v46, %v1062_v33  ;;  %v1064_v36 = vpop.f32.mrb[17].mxu1 }
 0x1cf   :  { %v1342_v10 = vmul.f32 %v2445_v46, %v1021_v34  ;;  %v1023_v37 = vpop.f32.mrb[18].mxu0  ;;  %v1344_v39 = vmul.f32 %v2445_v46, %v1064_v36  ;;  %v1066_v41 = vpop.f32.mrb[18].mxu1 }
 0x1d0   :  { %v1385_v38 = vadd.f32 %v2449_v29, %v1341_v32  ;;  %v1357_v40 = vmul.f32 %v2447_v28, %v1023_v37  ;;  %v1025_v42 = vpop.f32.mrb[19].mxu0  ;;  %v1387_v43 = vadd.f32 %v2449_v29, %v1343_v35  ;;  %v1359_v45 = vmul.f32 %v2447_v28, %v1066_v41  ;;  %v1068_v48 = vpop.f32.mrb[19].mxu1 }
 0x1d1   :  { %v1386_v51 = vadd.f32 %v2449_v29, %v1342_v10  ;;  %v1358_v47 = vmul.f32 %v2447_v28, %v1025_v42  ;;  %v1388_v49 = vadd.f32 %v2449_v29, %v1344_v39  ;;  %v1360_v50 = vmul.f32 %v2447_v28, %v1068_v48 }
 0x1d2   :  { %v1401_v52 = vadd.f32 %v2451_v31, %v1357_v40  ;;  %v1403_v54 = vadd.f32 %v2451_v31, %v1359_v45  ;;  %v1417_v55 = vmax.f32 %v1385_v38, 0.0  ;;  %v1419_v58 = vmax.f32 %v1387_v43, 0.0 }
 0x1d3   :  { %v1402_v53 = vadd.f32 %v2451_v31, %v1358_v47  ;;  %v1404_v56 = vadd.f32 %v2451_v31, %v1360_v50  ;;  %v1418_v59 = vmax.f32 %v1386_v51, 0.0  ;;  %v1420_v62 = vmax.f32 %v1388_v49, 0.0 }
 0x1d4   :  { %v1433_v57 = vmax.f32 %v1401_v52, 0.0  ;;  %v1435_v61 = vmax.f32 %v1403_v54, 0.0 }
 0x1d5   :  { %v1434_v60 = vmax.f32 %v1402_v53, 0.0  ;;  %v1436_v63 = vmax.f32 %v1404_v56, 0.0 }
 0x1d6   :  { %v1450_v0 = vpack.c.bf16 %v1433_v57, %v1417_v55  ;;  %v1452_v2 = vpack.c.bf16 %v1435_v61, %v1419_v58 }
 0x1d7   :  { %v1451_v1 = vpack.c.bf16 %v1434_v60, %v1418_v59  ;;  %v1453_v4 = vpack.c.bf16 %v1436_v63, %v1420_v62 }
 0x1d9   :  { %1470 = vmatprep.subr.bf16.mxu0 %v1451_v1  ;;  %1511 = vmatprep.subr.bf16.mxu1 %v1453_v4 }
 0x1da   :  { %1471 = vmatpush1.bf16.msra.mxu0 %v1450_v0  ;;  %1512 = vmatpush1.bf16.msra.mxu1 %v1452_v2 }
 0x1dd   :  { %1991 = vmatmul.mubr.msk.bf16.vlgmr.msra.gmra.mrb[32].mxu0 %vm1466_vm3, %v2472_v5  ;;  %1992 = vmatmul.mubr.msk.bf16.vlgmr.msra.gmra.mrb[32].mxu1 %vm1466_vm3, %v2472_v5 }
 0x1de   :  { %1584 = vmatprep.mubr.bf16.mxu0 %v2019_v3  ;;  %1625 = vmatprep.mubr.bf16.mxu1 %v2019_v3 }
 0x1e1   :  { %v1105_v6 = vpop.f32.mrb[20].mxu0  ;;  %v1148_v8 = vpop.f32.mrb[20].mxu1 }
 0x1e2   :  { %v1345_v7 = vmul.f32 %v2445_v46, %v1105_v6  ;;  %v1107_v9 = vpop.f32.mrb[21].mxu0  ;;  %v1347_v11 = vmul.f32 %v2445_v46, %v1148_v8  ;;  %v1150_v13 = vpop.f32.mrb[21].mxu1 }
 0x1e3   :  { %v1346_v12 = vmul.f32 %v2445_v46, %v1107_v9  ;;  %v1109_v14 = vpop.f32.mrb[22].mxu0  ;;  %v1348_v16 = vmul.f32 %v2445_v46, %v1150_v13  ;;  %v1152_v18 = vpop.f32.mrb[22].mxu1 }
 0x1e4   :  { %v1389_v15 = vadd.f32 %v2449_v29, %v1345_v7  ;;  %v1361_v17 = vmul.f32 %v2447_v28, %v1109_v14  ;;  %v1111_v19 = vpop.f32.mrb[23].mxu0  ;;  %v1391_v20 = vadd.f32 %v2449_v29, %v1347_v11  ;;  %v1363_v22 = vmul.f32 %v2447_v28, %v1152_v18  ;;  %v1154_v24 = vpop.f32.mrb[23].mxu1 }
 0x1e5   :  { %v1390_v21 = vadd.f32 %v2449_v29, %v1346_v12  ;;  %v1362_v23 = vmul.f32 %v2447_v28, %v1111_v19  ;;  %v1392_v25 = vadd.f32 %v2449_v29, %v1348_v16  ;;  %v1364_v27 = vmul.f32 %v2447_v28, %v1154_v24 }
 0x1e6   :  { %v1405_v26 = vadd.f32 %v2451_v31, %v1361_v17  ;;  %v1407_v44 = vadd.f32 %v2451_v31, %v1363_v22  ;;  %v1421_v32 = vmax.f32 %v1389_v15, 0.0  ;;  %v1423_v35 = vmax.f32 %v1391_v20, 0.0 }
 0x1e7   :  { %v1406_v30 = vadd.f32 %v2451_v31, %v1362_v23  ;;  %v1408_v34 = vadd.f32 %v2451_v31, %v1364_v27  ;;  %v1422_v10 = vmax.f32 %v1390_v21, 0.0  ;;  %v1424_v38 = vmax.f32 %v1392_v25, 0.0 }
 0x1e8   :  { %v1437_v33 = vmax.f32 %v1405_v26, 0.0  ;;  %v1439_v36 = vmax.f32 %v1407_v44, 0.0 }
 0x1e9   :  { %v1438_v37 = vmax.f32 %v1406_v30, 0.0  ;;  %v1440_v40 = vmax.f32 %v1408_v34, 0.0 }
 0x1ea   :  { %v1454_v39 = vpack.c.bf16 %v1437_v33, %v1421_v32  ;;  %v1456_v41 = vpack.c.bf16 %v1439_v36, %v1423_v35 }
 0x1eb   :  { %v1455_v42 = vpack.c.bf16 %v1438_v37, %v1422_v10  ;;  %v1457_v43 = vpack.c.bf16 %v1440_v40, %v1424_v38 }
 0x1ed   :  { %1552 = vmatprep.subr.bf16.mxu0 %v1455_v42  ;;  %1593 = vmatprep.subr.bf16.mxu1 %v1457_v43 }
 0x1ee   :  { %1553 = vmatpush1.bf16.msra.mxu0 %v1454_v39  ;;  %1594 = vmatpush1.bf16.msra.mxu1 %v1456_v41 }
 0x1f1   :  { %1993 = vmatmul.mubr.msk.bf16.vlgmr.msra.gmra.mrb[36].mxu0 %vm1466_vm3, %v2472_v5  ;;  %1994 = vmatmul.mubr.msk.bf16.vlgmr.msra.gmra.mrb[36].mxu1 %vm1466_vm3, %v2472_v5 }
 0x1f2   :  { %1666 = vmatprep.mubr.bf16.mxu0 %v2019_v3  ;;  %1707 = vmatprep.mubr.bf16.mxu1 %v2019_v3 }
 0x1f5   :  { %v1191_v51 = vpop.f32.mrb[24].mxu0  ;;  %v1234_v47 = vpop.f32.mrb[24].mxu1 }
 0x1f6   :  { %v1349_v45 = vmul.f32 %v2445_v46, %v1191_v51  ;;  %v1193_v48 = vpop.f32.mrb[25].mxu0  ;;  %v1351_v49 = vmul.f32 %v2445_v46, %v1234_v47  ;;  %v1236_v52 = vpop.f32.mrb[25].mxu1 }
 0x1f7   :  { %v1350_v50 = vmul.f32 %v2445_v46, %v1193_v48  ;;  %v1195_v53 = vpop.f32.mrb[26].mxu0  ;;  %v1352_v55 = vmul.f32 %v2445_v46, %v1236_v52  ;;  %v1238_v57 = vpop.f32.mrb[26].mxu1 }
 0x1f8   :  { %v1393_v54 = vadd.f32 %v2449_v29, %v1349_v45  ;;  %v1365_v56 = vmul.f32 %v2447_v28, %v1195_v53  ;;  %v1197_v58 = vpop.f32.mrb[27].mxu0  ;;  %v1395_v59 = vadd.f32 %v2449_v29, %v1351_v49  ;;  %v1367_v61 = vmul.f32 %v2447_v28, %v1238_v57  ;;  %v1240_v63 = vpop.f32.mrb[27].mxu1 }
 0x1f9   :  { %v1394_v60 = vadd.f32 %v2449_v29, %v1350_v50  ;;  %v1366_v62 = vmul.f32 %v2447_v28, %v1197_v58  ;;  %v1396_v0 = vadd.f32 %v2449_v29, %v1352_v55  ;;  %v1368_v2 = vmul.f32 %v2447_v28, %v1240_v63 }
 0x1fa   :  { %v1409_v1 = vadd.f32 %v2451_v31, %v1365_v56  ;;  %v1411_v4 = vadd.f32 %v2451_v31, %v1367_v61  ;;  %v1425_v7 = vmax.f32 %v1393_v54, 0.0  ;;  %v1427_v11 = vmax.f32 %v1395_v59, 0.0 }
 0x1fb   :  { %v1410_v6 = vadd.f32 %v2451_v31, %v1366_v62  ;;  %v1412_v9 = vadd.f32 %v2451_v31, %v1368_v2  ;;  %v1426_v12 = vmax.f32 %v1394_v60, 0.0  ;;  %v1428_v15 = vmax.f32 %v1396_v0, 0.0 }
 0x1fc   :  { %v1441_v8 = vmax.f32 %v1409_v1, 0.0  ;;  %v1443_v13 = vmax.f32 %v1411_v4, 0.0 }
 0x1fd   :  { %v1442_v14 = vmax.f32 %v1410_v6, 0.0  ;;  %v1444_v17 = vmax.f32 %v1412_v9, 0.0 }
 0x1fe   :  { %v1458_v16 = vpack.c.bf16 %v1441_v8, %v1425_v7  ;;  %v1460_v18 = vpack.c.bf16 %v1443_v13, %v1427_v11 }
 0x1ff   :  { %v1459_v19 = vpack.c.bf16 %v1442_v14, %v1426_v12  ;;  %v1461_v20 = vpack.c.bf16 %v1444_v17, %v1428_v15 }
 0x201   :  { %1634 = vmatprep.subr.bf16.mxu0 %v1459_v19  ;;  %1675 = vmatprep.subr.bf16.mxu1 %v1461_v20 }
 0x202   :  { %1635 = vmatpush1.bf16.msra.mxu0 %v1458_v16  ;;  %1676 = vmatpush1.bf16.msra.mxu1 %v1460_v18 }
 0x205   :  { %1995 = vmatmul.mubr.msk.bf16.vlgmr.msra.gmra.mrb[40].mxu0 %vm1466_vm3, %v2472_v5  ;;  %1996 = vmatmul.mubr.msk.bf16.vlgmr.msra.gmra.mrb[40].mxu1 %vm1466_vm3, %v2472_v5 }
 0x206   :  { %1748 = vmatprep.mubr.bf16.mxu0 %v2019_v3  ;;  %1789 = vmatprep.mubr.bf16.mxu1 %v2019_v3 }
 0x209   :  { %v1277_v21 = vpop.f32.mrb[28].mxu0  ;;  %v1320_v23 = vpop.f32.mrb[28].mxu1 }
 0x20a   :  { %v1353_v22 = vmul.f32 %v2445_v46, %v1277_v21  ;;  %v1279_v24 = vpop.f32.mrb[29].mxu0  ;;  %v1355_v25 = vmul.f32 %v2445_v46, %v1320_v23  ;;  %v1322_v27 = vpop.f32.mrb[29].mxu1 }
 0x20b   :  { %v1354_v26 = vmul.f32 %v2445_v46, %v1279_v24  ;;  %v1281_v44 = vpop.f32.mrb[30].mxu0  ;;  %v1356_v32 = vmul.f32 %v2445_v46, %v1322_v27  ;;  %v1324_v34 = vpop.f32.mrb[30].mxu1 }
 0x20c   :  { %v1397_v30 = vadd.f32 %v2449_v29, %v1353_v22  ;;  %v1369_v33 = vmul.f32 %v2447_v28, %v1281_v44  ;;  %v1283_v35 = vpop.f32.mrb[31].mxu0  ;;  %v1399_v3 = vadd.f32 %v2449_v29, %v1355_v25  ;;  %v1371_v36 = vmul.f32 %v2447_v28, %v1324_v34  ;;  %v1326_v38 = vpop.f32.mrb[31].mxu1 }
 0x20d   :  { %v1398_v10 = vadd.f32 %v2449_v29, %v1354_v26  ;;  %v1370_v37 = vmul.f32 %v2447_v28, %v1283_v35  ;;  %v1400_v39 = vadd.f32 %v2449_v29, %v1356_v32  ;;  %v1372_v41 = vmul.f32 %v2447_v28, %v1326_v38  ;;  %v2544_v28 = vpop.permute.xlu0 %1801 }
 0x20e   :  { %v1413_v40 = vadd.f32 %v2451_v31, %v1369_v33  ;;  %v1415_v46 = vadd.f32 %v2451_v31, %v1371_v36  ;;  %v1429_v43 = vmax.f32 %v1397_v30, 0.0  ;;  %v1431_v47 = vmax.f32 %v1399_v3, 0.0 }
 0x20f   :  { %v1414_v42 = vadd.f32 %v2451_v31, %v1370_v37  ;;  %v1416_v45 = vadd.f32 %v2451_v31, %v1372_v41  ;;  %v1430_v48 = vmax.f32 %v1398_v10, 0.0  ;;  %v1432_v52 = vmax.f32 %v1400_v39, 0.0  ;;  %v2546_v31 = vpop.permute.xlu1 %1823 }
 0x210   :  { %v1445_v51 = vmax.f32 %v1413_v40, 0.0  ;;  %v1447_v49 = vmax.f32 %v1415_v46, 0.0 }
 0x211   :  { %v1446_v50 = vmax.f32 %v1414_v42, 0.0  ;;  %v1448_v54 = vmax.f32 %v1416_v45, 0.0 }
 0x212   :  { %v1462_v53 = vpack.c.bf16 %v1445_v51, %v1429_v43  ;;  %v1464_v29 = vpack.c.bf16 %v1447_v49, %v1431_v47 }
 0x213   :  { %v1463_v55 = vpack.c.bf16 %v1446_v50, %v1430_v48  ;;  %v1465_v56 = vpack.c.bf16 %v1448_v54, %v1432_v52 }
 0x215   :  { %1716 = vmatprep.subr.bf16.mxu0 %v1463_v55  ;;  %1757 = vmatprep.subr.bf16.mxu1 %v1465_v56 }
 0x216   :  { %1717 = vmatpush1.bf16.msra.mxu0 %v1462_v53  ;;  %1758 = vmatpush1.bf16.msra.mxu1 %v1464_v29 }
 0x219   :  { %1997 = vmatmul.mubr.msk.bf16.vlgmr.msra.gmra.mrb[44].mxu0 %vm1466_vm3, %v2472_v5  ;;  %1998 = vmatmul.mubr.msk.bf16.vlgmr.msra.gmra.mrb[44].mxu1 %vm1466_vm3, %v2472_v5 }
 0x2b0   :  { %v1504_v57 = vpop.f32.mrb[32].mxu0  ;;  %v1545_v59 = vpop.f32.mrb[32].mxu1 }
 0x2b1   :  { %v1804_v58 = vmul.f32 %v2544_v28, %v1504_v57  ;;  %v1506_v60 = vpop.f32.mrb[33].mxu0  ;;  %v1806_v61 = vmul.f32 %v2544_v28, %v1545_v59  ;;  %v1547_v63 = vpop.f32.mrb[33].mxu1 }
 0x2b2   :  { %v1805_v62 = vmul.f32 %v2544_v28, %v1506_v60  ;;  %v1508_v0 = vpop.f32.mrb[34].mxu0  ;;  %v1807_v2 = vmul.f32 %v2544_v28, %v1547_v63  ;;  %v1549_v5 = vpop.f32.mrb[34].mxu1 }
 0x2b3   :  { %v1826_v1 = vadd.f32 %v2546_v31, %v1804_v58  ;;  %v1509_v4 = vpop.f32.mrb[35].mxu0  ;;  %v1828_v6 = vadd.f32 %v2546_v31, %v1806_v61  ;;  %v1550_v8 = vpop.f32.mrb[35].mxu1 }
 0x2b4   :  { %v1827_v7 = vadd.f32 %v2546_v31, %v1805_v62  ;;  %v1829_v11 = vadd.f32 %v2546_v31, %v1807_v2 }
 0x2b5   :  { %v1842_v9 = vmax.f32 %v1826_v1, 0.0  ;;  %v1844_v12 = vmax.f32 %v1828_v6, 0.0 }
 0x2b6   :  { %v1843_v13 = vmax.f32 %v1827_v7, 0.0  ;;  %v1845_v14 = vmax.f32 %v1829_v11, 0.0 }
 0x2b7   :  { %1858 = vst [vmem:[%s2638_s10] sm:$0xff] %v1842_v9  ;;  %1860 = vst [vmem:[%s2638_s10 + $0x10] sm:$0xff] %v1844_v12 }
 0x2b8   :  { %1859 = vst [vmem:[%s2638_s10 + $0x8] sm:$0xff] %v1843_v13  ;;  %1861 = vst [vmem:[%s2638_s10 + $0x18] sm:$0xff] %v1845_v14 }
 0x2c4   :  { %v1586_v15 = vpop.f32.mrb[36].mxu0  ;;  %v1627_v17 = vpop.f32.mrb[36].mxu1 }
 0x2c5   :  { %v1808_v16 = vmul.f32 %v2544_v28, %v1586_v15  ;;  %v1588_v18 = vpop.f32.mrb[37].mxu0  ;;  %v1810_v19 = vmul.f32 %v2544_v28, %v1627_v17  ;;  %v1629_v21 = vpop.f32.mrb[37].mxu1 }
 0x2c6   :  { %v1809_v20 = vmul.f32 %v2544_v28, %v1588_v18  ;;  %v1590_v22 = vpop.f32.mrb[38].mxu0  ;;  %v1811_v24 = vmul.f32 %v2544_v28, %v1629_v21  ;;  %v1631_v25 = vpop.f32.mrb[38].mxu1 }
 0x2c7   :  { %v1830_v23 = vadd.f32 %v2546_v31, %v1808_v16  ;;  %v1591_v26 = vpop.f32.mrb[39].mxu0  ;;  %v1832_v27 = vadd.f32 %v2546_v31, %v1810_v19  ;;  %v1632_v30 = vpop.f32.mrb[39].mxu1 }
 0x2c8   :  { %v1831_v44 = vadd.f32 %v2546_v31, %v1809_v20  ;;  %v1833_v33 = vadd.f32 %v2546_v31, %v1811_v24 }
 0x2c9   :  { %v1846_v32 = vmax.f32 %v1830_v23, 0.0  ;;  %v1848_v34 = vmax.f32 %v1832_v27, 0.0 }
 0x2ca   :  { %v1847_v35 = vmax.f32 %v1831_v44, 0.0  ;;  %v1849_v3 = vmax.f32 %v1833_v33, 0.0 }
 0x2cb   :  { %1862 = vst [vmem:[%s2638_s10 + $0x20] sm:$0xff] %v1846_v32  ;;  %1864 = vst [vmem:[%s2638_s10 + $0x30] sm:$0xff] %v1848_v34 }
 0x2cc   :  { %1863 = vst [vmem:[%s2638_s10 + $0x28] sm:$0xff] %v1847_v35  ;;  %1865 = vst [vmem:[%s2638_s10 + $0x38] sm:$0xff] %v1849_v3 }
 0x2d8   :  { %v1668_v10 = vpop.f32.mrb[40].mxu0  ;;  %v1709_v37 = vpop.f32.mrb[40].mxu1 }
 0x2d9   :  { %v1812_v36 = vmul.f32 %v2544_v28, %v1668_v10  ;;  %v1670_v38 = vpop.f32.mrb[41].mxu0  ;;  %v1814_v39 = vmul.f32 %v2544_v28, %v1709_v37  ;;  %v1711_v41 = vpop.f32.mrb[41].mxu1 }
 0x2da   :  { %v1813_v40 = vmul.f32 %v2544_v28, %v1670_v38  ;;  %v1672_v46 = vpop.f32.mrb[42].mxu0  ;;  %v1815_v43 = vmul.f32 %v2544_v28, %v1711_v41  ;;  %v1713_v51 = vpop.f32.mrb[42].mxu1 }
 0x2db   :  { %v1834_v42 = vadd.f32 %v2546_v31, %v1812_v36  ;;  %v1673_v45 = vpop.f32.mrb[43].mxu0  ;;  %v1836_v47 = vadd.f32 %v2546_v31, %v1814_v39  ;;  %v1714_v49 = vpop.f32.mrb[43].mxu1 }
 0x2dc   :  { %v1835_v48 = vadd.f32 %v2546_v31, %v1813_v40  ;;  %v1837_v52 = vadd.f32 %v2546_v31, %v1815_v43 }
 0x2dd   :  { %v1850_v50 = vmax.f32 %v1834_v42, 0.0  ;;  %v1852_v53 = vmax.f32 %v1836_v47, 0.0 }
 0x2de   :  { %v1851_v54 = vmax.f32 %v1835_v48, 0.0  ;;  %v1853_v29 = vmax.f32 %v1837_v52, 0.0 }
 0x2df   :  { %1866 = vst [vmem:[%s2638_s10 + $0x40] sm:$0xff] %v1850_v50  ;;  %1868 = vst [vmem:[%s2638_s10 + $0x50] sm:$0xff] %v1852_v53 }
 0x2e0   :  { %1867 = vst [vmem:[%s2638_s10 + $0x48] sm:$0xff] %v1851_v54  ;;  %1869 = vst [vmem:[%s2638_s10 + $0x58] sm:$0xff] %v1853_v29 }
 0x2ec   :  { %v1750_v55 = vpop.f32.mrb[44].mxu0  ;;  %v1791_v57 = vpop.f32.mrb[44].mxu1 }
 0x2ed   :  { %v1816_v56 = vmul.f32 %v2544_v28, %v1750_v55  ;;  %v1752_v58 = vpop.f32.mrb[45].mxu0  ;;  %v1818_v59 = vmul.f32 %v2544_v28, %v1791_v57  ;;  %v1793_v61 = vpop.f32.mrb[45].mxu1 }
 0x2ee   :  { %v1817_v60 = vmul.f32 %v2544_v28, %v1752_v58  ;;  %v1754_v62 = vpop.f32.mrb[46].mxu0  ;;  %v1819_v0 = vmul.f32 %v2544_v28, %v1793_v61  ;;  %v1795_v1 = vpop.f32.mrb[46].mxu1 }
 0x2ef   :  { %v1838_v63 = vadd.f32 %v2546_v31, %v1816_v56  ;;  %v1755_v2 = vpop.f32.mrb[47].mxu0  ;;  %v1840_v5 = vadd.f32 %v2546_v31, %v1818_v59  ;;  %v1796_v6 = vpop.f32.mrb[47].mxu1 }
 0x2f0   :  { %v1839_v4 = vadd.f32 %v2546_v31, %v1817_v60  ;;  %v1841_v8 = vadd.f32 %v2546_v31, %v1819_v0 }
 0x2f1   :  { %v1854_v7 = vmax.f32 %v1838_v63, 0.0  ;;  %v1856_v9 = vmax.f32 %v1840_v5, 0.0 }
 0x2f2   :  { %v1855_v11 = vmax.f32 %v1839_v4, 0.0  ;;  %v1857_v12 = vmax.f32 %v1841_v8, 0.0 }
 0x2f3   :  { %1870 = vst [vmem:[%s2638_s10 + $0x60] sm:$0xff] %v1854_v7  ;;  %1872 = vst [vmem:[%s2638_s10 + $0x70] sm:$0xff] %v1856_v9 }
 0x2f4   :  { %1871 = vst [vmem:[%s2638_s10 + $0x68] sm:$0xff] %v1855_v11  ;;  %1873 = vst [vmem:[%s2638_s10 + $0x78] sm:$0xff] %v1857_v12 }

// kernel: classifier_forward.9
= control target key start
LH: loop header
LB: loop body
LE: loop exit
PB: predicated region body
PF: predicated region fallthrough
CT: control target
= control target key end

     0   :  { %v615_v1 = vmov 0   ;;  %vm149_vm0 = vcmask 1043456   ;;  %vm145_vm1 = vcmask 588800   ;;  %vm279_vm2 = vcmask 64512   ;;  %s786_s0 = inlined_call_operand.vmem [shape: bf16[72,512], index: 0, kind: input, shape index: {}]   ;;  %s787_s2 = inlined_call_operand.vmem [shape: f32[8,1], index: 2, kind: input, shape index: {}]   ;;  %s788_s3 = inlined_call_operand.vmem [shape: f32[8,1], index: 3, kind: input, shape index: {}]   ;;  %s789_s6 = inlined_call_operand.vmem [shape: f32[16,1], index: 6, kind: input, shape index: {}]   ;;  %s790_s1 = inlined_call_operand.vmem [shape: bf16[8,72], index: 1, kind: input, shape index: {}]   ;;  %s791_s8 = inlined_call_operand.vmem [shape: f32[8,1], index: 8, kind: input, shape index: {}]   ;;  %s792_s4 = inlined_call_operand.vmem [shape: bf16[16,8], index: 4, kind: input, shape index: {}]   ;;  %s793_s5 = inlined_call_operand.vmem [shape: f32[16,1], index: 5, kind: input, shape index: {}]   ;;  %s794_s9 = inlined_call_operand.vmem [shape: f32[8,1], index: 9, kind: input, shape index: {}]   ;;  %s795_s7 = inlined_call_operand.vmem [shape: bf16[8,16], index: 7, kind: input, shape index: {}]   ;;  %s796_s10 = inlined_call_operand.vmem [shape: f32[8,512], index: 10, kind: output, shape index: {}]  }
   0x1   :  { %v586_v0 = vld [vmem:[%s786_s0 + $0x4] ss:$16 sps:$4 sm:$0xff]   ;;  %194 = vmatprep.mubr.bf16.mxu0 %v615_v1  ;;  %235 = vmatprep.mubr.bf16.mxu1 %v615_v1  ;;  %v588_v2 = vld [vmem:[%s786_s0 + $0xc] ss:$16 sps:$4 sm:$0xff]   ;;  %v590_v3 = vld [vmem:[%s786_s0] ss:$16 sps:$4 sm:$0xff]  }
   0x2   :  { %584 = vset.pattern.permute.xlu0 %v615_v1  ;;  %585 = vset.pattern.permute.xlu1 %v615_v1  ;;  %v591_v4 = vld [vmem:[%s786_s0 + $0x8] ss:$16 sps:$4 sm:$0xff]   ;;  %v592_v5 = vld [vmem:[%s786_s0 + $0x24] ss:$16 sps:$4 sm:$0xff]   ;;  %v594_v6 = vld [vmem:[%s786_s0 + $0x2c] ss:$16 sps:$4 sm:$0xff]  }
   0x3   :  { %162 = vmatprep.subr.bf16.mxu0 %v586_v0  ;;  %203 = vmatprep.subr.bf16.mxu1 %v588_v2  ;;  %v596_v7 = vld [vmem:[%s786_s0 + $0x20] ss:$16 sps:$4 sm:$0xff]   ;;  %v597_v8 = vld [vmem:[%s786_s0 + $0x28] ss:$16 sps:$4 sm:$0xff]   ;;  %v598_v9 = vld [vmem:[%s786_s0 + $0x44] ss:$16 sps:$4 sm:$0xff]  }
   0x4   :  { %163 = vmatpush1.bf16.msra.mxu0 %v590_v3  ;;  %204 = vmatpush1.bf16.msra.mxu1 %v591_v4  ;;  %v600_v10 = vld [vmem:[%s786_s0 + $0x4c] ss:$16 sps:$4 sm:$0xff]   ;;  %v602_v11 = vld [vmem:[%s786_s0 + $0x40] ss:$16 sps:$4 sm:$0xff]   ;;  %v603_v12 = vld [vmem:[%s786_s0 + $0x48] ss:$16 sps:$4 sm:$0xff]  }
   0x5   :  { %164 = vmatprep.subr.bf16.mxu0 %v592_v5  ;;  %205 = vmatprep.subr.bf16.mxu1 %v594_v6  ;;  %v604_v13 = vld [vmem:[%s786_s0 + $0x64] ss:$16 sps:$4 sm:$0xff]   ;;  %v606_v14 = vld [vmem:[%s786_s0 + $0x6c] ss:$16 sps:$4 sm:$0xff]   ;;  %v608_v18 = vld [vmem:[%s786_s0 + $0x60] ss:$16 sps:$4 sm:$0xff]  }
   0x6   :  { %v52_v15 = vld [vmem:[%s786_s0 + $0x80] sm:$0xff]  ;;  %v53_v16 = vld [vmem:[%s786_s0 + $0x88] sm:$0xff]  ;;  %vm434_vm3 = vcmask 130048  }
   0x7   :  { %v244_v17 = vld [vmem:[%s787_s2] sm:$0xff]  ;;  %v609_v19 = vld [vmem:[%s786_s0 + $0x68] ss:$16 sps:$4 sm:$0xff]   ;;  %v569_v20 = vcombine.high %v52_v15, %v52_v15  ;;  %v571_v21 = vcombine.high %v53_v16, %v53_v16  ;;  %v568_v22 = vcombine.low %v52_v15, %v52_v15  ;;  %v570_v23 = vcombine.low %v53_v16, %v53_v16 }
   0x8   :  { %165 = vmatpush1.bf16.msra.mxu0 %v596_v7  ;;  %206 = vmatpush1.bf16.msra.mxu1 %v597_v8  ;;  %v254_v24 = vld [vmem:[%s788_s3] sm:$0xff]  ;;  %v382_v31 = vld [vmem:[%s793_s5 + $0x8] sm:$0xff] }
   0x9   :  { %166 = vmatprep.subr.bf16.mxu0 %v598_v9  ;;  %207 = vmatprep.subr.bf16.mxu1 %v600_v10  ;;  %v151_v25 = vsel %vm149_vm0, %v568_v22, 0  ;;  %v157_v26 = vsel %vm149_vm0, %v570_v23, 0  ;;  %v401_v27 = vld [vmem:[%s789_s6] sm:$0xff]  ;;  %v402_v32 = vld [vmem:[%s789_s6 + $0x8] sm:$0xff] }
   0xa   :  { %247 = vperm.xlu0 %584, %v244_v17   ;;  %v54_v28 = vld [vmem:[%s790_s1] sm:$0xf] }
   0xb   :  { %v520_v29 = vld [vmem:[%s791_s8] sm:$0xff] }
   0xc   :  { %167 = vmatpush1.bf16.msra.mxu0 %v602_v11  ;;  %208 = vmatpush1.bf16.msra.mxu1 %v603_v12  ;;  %v381_v30 = vld [vmem:[%s793_s5] sm:$0xff] }
   0xd   :  { %168 = vmatprep.subr.bf16.mxu0 %v604_v13  ;;  %209 = vmatprep.subr.bf16.mxu1 %v606_v14  ;;  %v530_v33 = vld [vmem:[%s794_s9] sm:$0xff] }
   0xe   :  { %257 = vperm.xlu0 %584, %v254_v24   ;;  %385 = vperm.xlu1 %585, %v381_v30   ;;  %v614_v62 = vld [vmem:[%s792_s4] sm:$0xff]  }
  0x10   :  { %169 = vmatpush1.bf16.msra.mxu0 %v608_v18  ;;  %210 = vmatpush1.bf16.msra.mxu1 %v609_v19 }
  0x11   :  { %572 = vmatprep.subr.msk.bf16.mxu0 %vm149_vm0, %v569_v20  ;;  %574 = vmatprep.subr.msk.bf16.mxu1 %vm149_vm0, %v571_v21 }
  0x12   :  { %405 = vperm.xlu0 %584, %v401_v27   ;;  %390 = vperm.xlu1 %585, %v382_v31  }
  0x14   :  { %171 = vmatpush1.bf16.msra.mxu0 %v151_v25  ;;  %212 = vmatpush1.bf16.msra.mxu1 %v157_v26 }
  0x16   :  { %523 = vperm.xlu0 %584, %v520_v29   ;;  %410 = vperm.xlu1 %585, %v402_v32  }
  0x17   :  { %573 = vmatmul.mubr.msk.bf16.vlgmr.msra.gmra.mrb[0].mxu0 %vm145_vm1, %v54_v28  ;;  %575 = vmatmul.mubr.msk.bf16.vlgmr.msra.gmra.mrb[0].mxu1 %vm145_vm1, %v54_v28 }
  0x18   :  { %327 = vmatprep.mubr.bf16.mxu0 %v615_v1  ;;  %370 = vmatprep.mubr.bf16.mxu1 %v615_v1 }
  0x1a   :  { %533 = vperm.xlu1 %585, %v530_v33  }
  0x89   :  { %v248_v34 = vpop.permute.xlu0 %247 }
  0x8d   :  { %v258_v35 = vpop.permute.xlu0 %257  ;;  %v386_v63 = vpop.permute.xlu1 %385 }
  0x91   :  { %v391_v0 = vpop.permute.xlu1 %390  ;;  %v406_v2 = vpop.permute.xlu0 %405 }
  0xea   :  { %v196_v36 = vpop.f32.mrb[0].mxu0  ;;  %v237_v37 = vpop.f32.mrb[0].mxu1 }
  0xeb   :  { %v250_v38 = vmul.f32 %v248_v34, %v196_v36  ;;  %v252_v39 = vmul.f32 %v248_v34, %v237_v37  ;;  %v198_v40 = vpop.f32.mrb[1].mxu0  ;;  %v239_v41 = vpop.f32.mrb[1].mxu1 }
  0xec   :  { %v251_v42 = vmul.f32 %v248_v34, %v198_v40  ;;  %v253_v43 = vmul.f32 %v248_v34, %v239_v41  ;;  %v200_v44 = vpop.f32.mrb[2].mxu0  ;;  %v241_v45 = vpop.f32.mrb[2].mxu1 }
  0xed   :  { %v260_v46 = vadd.f32 %v258_v35, %v250_v38  ;;  %v262_v47 = vadd.f32 %v258_v35, %v252_v39  ;;  %v201_v48 = vpop.f32.mrb[3].mxu0  ;;  %v242_v49 = vpop.f32.mrb[3].mxu1  ;;  %v429_v39 = vld [vmem:[%s795_s7] sm:$0xf] }
  0xee   :  { %v261_v50 = vadd.f32 %v258_v35, %v251_v42  ;;  %v263_v51 = vadd.f32 %v258_v35, %v253_v43  ;;  %v524_v40 = vpop.permute.xlu0 %523 }
  0xef   :  { %v264_v52 = vmax.f32 %v260_v46, 0.0  ;;  %v266_v53 = vmax.f32 %v262_v47, 0.0 }
  0xf0   :  { %v265_v54 = vmax.f32 %v261_v50, 0.0  ;;  %v267_v55 = vmax.f32 %v263_v51, 0.0 }
  0xf1   :  { %v270_v56 = vpack.c.bf16 %v264_v52, %v264_v52  ;;  %v272_v57 = vpack.c.bf16 %v266_v53, %v266_v53 }
  0xf2   :  { %v271_v58 = vpack.c.bf16 %v265_v54, %v265_v54  ;;  %v273_v59 = vpack.c.bf16 %v267_v55, %v267_v55 }
  0xf3   :  { %v284_v60 = vsel %vm149_vm0, %v270_v56, 0  ;;  %v290_v61 = vsel %vm149_vm0, %v272_v57, 0 }
  0xf4   :  { %577 = vmatprep.subr.msk.bf16.mxu0 %vm149_vm0, %v271_v58  ;;  %579 = vmatprep.subr.msk.bf16.mxu1 %vm149_vm0, %v273_v59 }
  0xf5   :  { %296 = vmatpush1.bf16.msra.mxu0 %v284_v60  ;;  %339 = vmatpush1.bf16.msra.mxu1 %v290_v61 }
  0xf8   :  { %578 = vmatmul.mubr.msk.bf16.vlgmr.msra.gmra.mrb[4].mxu0 %vm279_vm2, %v614_v62  ;;  %580 = vmatmul.mubr.msk.bf16.vlgmr.msra.gmra.mrb[4].mxu1 %vm279_vm2, %v614_v62 }
  0xf9   :  { %470 = vmatprep.mubr.bf16.mxu0 %v615_v1  ;;  %511 = vmatprep.mubr.bf16.mxu1 %v615_v1  ;;  %v411_v1 = vpop.permute.xlu1 %410 }
  0xfd   :  { %v534_v41 = vpop.permute.xlu1 %533 }
 0x1cb   :  { %v329_v3 = vpop.f32.mrb[4].mxu0  ;;  %v372_v4 = vpop.f32.mrb[4].mxu1 }
 0x1cc   :  { %v393_v5 = vmul.f32 %v386_v63, %v329_v3  ;;  %v395_v6 = vmul.f32 %v386_v63, %v372_v4  ;;  %v331_v7 = vpop.f32.mrb[5].mxu0  ;;  %v374_v8 = vpop.f32.mrb[5].mxu1 }
 0x1cd   :  { %v394_v9 = vmul.f32 %v386_v63, %v331_v7  ;;  %v396_v10 = vmul.f32 %v386_v63, %v374_v8  ;;  %v333_v11 = vpop.f32.mrb[6].mxu0  ;;  %v376_v12 = vpop.f32.mrb[6].mxu1 }
 0x1ce   :  { %v413_v13 = vadd.f32 %v406_v2, %v393_v5  ;;  %v415_v14 = vadd.f32 %v406_v2, %v395_v6  ;;  %v397_v15 = vmul.f32 %v391_v0, %v333_v11  ;;  %v399_v16 = vmul.f32 %v391_v0, %v376_v12  ;;  %v335_v17 = vpop.f32.mrb[7].mxu0  ;;  %v378_v18 = vpop.f32.mrb[7].mxu1 }
 0x1cf   :  { %v414_v19 = vadd.f32 %v406_v2, %v394_v9  ;;  %v416_v20 = vadd.f32 %v406_v2, %v396_v10  ;;  %v398_v21 = vmul.f32 %v391_v0, %v335_v17  ;;  %v400_v22 = vmul.f32 %v391_v0, %v378_v18 }
 0x1d0   :  { %v417_v23 = vadd.f32 %v411_v1, %v397_v15  ;;  %v419_v24 = vadd.f32 %v411_v1, %v399_v16  ;;  %v421_v27 = vmax.f32 %v413_v13, 0.0  ;;  %v423_v28 = vmax.f32 %v415_v14, 0.0 }
 0x1d1   :  { %v418_v25 = vadd.f32 %v411_v1, %v398_v21  ;;  %v420_v26 = vadd.f32 %v411_v1, %v400_v22  ;;  %v422_v31 = vmax.f32 %v414_v19, 0.0  ;;  %v424_v32 = vmax.f32 %v416_v20, 0.0 }
 0x1d2   :  { %v425_v29 = vmax.f32 %v417_v23, 0.0  ;;  %v427_v30 = vmax.f32 %v419_v24, 0.0 }
 0x1d3   :  { %v426_v33 = vmax.f32 %v418_v25, 0.0  ;;  %v428_v34 = vmax.f32 %v420_v26, 0.0 }
 0x1d4   :  { %v430_v35 = vpack.c.bf16 %v425_v29, %v421_v27  ;;  %v432_v36 = vpack.c.bf16 %v427_v30, %v423_v28 }
 0x1d5   :  { %v431_v37 = vpack.c.bf16 %v426_v33, %v422_v31  ;;  %v433_v38 = vpack.c.bf16 %v428_v34, %v424_v32 }
 0x1d7   :  { %438 = vmatprep.subr.bf16.mxu0 %v431_v37  ;;  %479 = vmatprep.subr.bf16.mxu1 %v433_v38 }
 0x1d8   :  { %439 = vmatpush1.bf16.msra.mxu0 %v430_v35  ;;  %480 = vmatpush1.bf16.msra.mxu1 %v432_v36 }
 0x1db   :  { %581 = vmatmul.mubr.msk.bf16.vlgmr.msra.gmra.mrb[8].mxu0 %vm434_vm3, %v429_v39  ;;  %582 = vmatmul.mubr.msk.bf16.vlgmr.msra.gmra.mrb[8].mxu1 %vm434_vm3, %v429_v39 }
 0x2ae   :  { %v472_v42 = vpop.f32.mrb[8].mxu0  ;;  %v513_v43 = vpop.f32.mrb[8].mxu1 }
 0x2af   :  { %v526_v44 = vmul.f32 %v524_v40, %v472_v42  ;;  %v528_v45 = vmul.f32 %v524_v40, %v513_v43  ;;  %v474_v46 = vpop.f32.mrb[9].mxu0  ;;  %v515_v47 = vpop.f32.mrb[9].mxu1 }
 0x2b0   :  { %v527_v48 = vmul.f32 %v524_v40, %v474_v46  ;;  %v529_v49 = vmul.f32 %v524_v40, %v515_v47  ;;  %v476_v50 = vpop.f32.mrb[10].mxu0  ;;  %v517_v51 = vpop.f32.mrb[10].mxu1 }
 0x2b1   :  { %v536_v52 = vadd.f32 %v534_v41, %v526_v44  ;;  %v538_v53 = vadd.f32 %v534_v41, %v528_v45  ;;  %v477_v54 = vpop.f32.mrb[11].mxu0  ;;  %v518_v55 = vpop.f32.mrb[11].mxu1 }
 0x2b2   :  { %v537_v56 = vadd.f32 %v534_v41, %v527_v48  ;;  %v539_v57 = vadd.f32 %v534_v41, %v529_v49 }
 0x2b3   :  { %v540_v58 = vmax.f32 %v536_v52, 0.0  ;;  %v542_v59 = vmax.f32 %v538_v53, 0.0 }
 0x2b4   :  { %v541_v60 = vmax.f32 %v537_v56, 0.0  ;;  %v543_v61 = vmax.f32 %v539_v57, 0.0 }
 0x2b5   :  { %544 = vst [vmem:[%s796_s10] sm:$0xff] %v540_v58  ;;  %546 = vst [vmem:[%s796_s10 + $0x10] sm:$0xff] %v542_v59 }
 0x2b6   :  { %545 = vst [vmem:[%s796_s10 + $0x8] sm:$0xff] %v541_v60  ;;  %547 = vst [vmem:[%s796_s10 + $0x18] sm:$0xff] %v543_v61 }

// kernel: classifier_forward.10
= control target key start
LH: loop header
LB: loop body
LE: loop exit
PB: predicated region body
PF: predicated region fallthrough
CT: control target
= control target key end

     0   :  { %v344_v0 = vmov 0.0   ;;  %vm345_vm0 = vmmov 0   ;;  %v346_v2 = vmov 0   ;;  %vm77_vm1 = vcmask 1043456   ;;  %s468_s0 = inlined_call_operand.vmem [shape: bf16[72,128], index: 0, kind: input, shape index: {}]   ;;  %s469_s2 = inlined_call_operand.vmem [shape: f32[8,1], index: 2, kind: input, shape index: {}]   ;;  %s470_s3 = inlined_call_operand.vmem [shape: f32[8,1], index: 3, kind: input, shape index: {}]   ;;  %s471_s6 = inlined_call_operand.vmem [shape: f32[16,1], index: 6, kind: input, shape index: {}]   ;;  %s472_s8 = inlined_call_operand.vmem [shape: f32[8,1], index: 8, kind: input, shape index: {}]   ;;  %s473_s1 = inlined_call_operand.vmem [shape: bf16[8,72], index: 1, kind: input, shape index: {}]   ;;  %s474_s4 = inlined_call_operand.vmem [shape: bf16[16,8], index: 4, kind: input, shape index: {}]   ;;  %s475_s5 = inlined_call_operand.vmem [shape: f32[16,1], index: 5, kind: input, shape index: {}]   ;;  %s476_s9 = inlined_call_operand.vmem [shape: f32[8,1], index: 9, kind: input, shape index: {}]   ;;  %s477_s7 = inlined_call_operand.vmem [shape: bf16[8,16], index: 7, kind: input, shape index: {}]   ;;  %s478_s10 = inlined_call_operand.vmem [shape: f32[8,128], index: 10, kind: output, shape index: {}]  }
   0x1   :  { %307 = vmatprep.subr.bf16.mxu0 %v344_v0  ;;  %v338_v1 = vld [vmem:[%s468_s0] sm:$0xff]   ;;  %317 = vmatprep.mubr.msk.bf16.mxu0 %vm345_vm0, %v344_v0  ;;  %v339_v3 = vld [vmem:[%s468_s0 + $0x8] sm:$0xff]   ;;  %v340_v5 = vld [vmem:[%s468_s0 + $0x10] sm:$0xff]   ;;  %vm73_vm2 = vcmask 588800   ;;  %vm144_vm3 = vcmask 64512   ;;  %vm224_vm4 = vcmask 130048  }
   0x2   :  { %336 = vset.pattern.permute.xlu0 %v346_v2  ;;  %321 = vmatprep.subr.bf16.mxu1 %v344_v0  ;;  %v121_v4 = vld [vmem:[%s469_s2] sm:$0xff]  ;;  %v341_v7 = vld [vmem:[%s468_s0 + $0x18] sm:$0xff]   ;;  %v193_v14 = vld [vmem:[%s475_s5 + $0x8] sm:$0xff] }
   0x3   :  { %308 = vmatpush3.bf16.msra.mxu0 %v338_v1  ;;  %323 = vmatprep.mubr.msk.bf16.mxu1 %vm345_vm0, %v344_v0  ;;  %v128_v6 = vld [vmem:[%s470_s3] sm:$0xff]  ;;  %v207_v15 = vld [vmem:[%s471_s6 + $0x8] sm:$0xff] }
   0x4   :  { %309 = vmatprep.subr.bf16.mxu0 %v344_v0  ;;  %337 = vset.pattern.permute.xlu1 %v346_v2  ;;  %v342_v8 = vld [vmem:[%s468_s0 + $0x20] ss:$0 sps:$4 sm:$0xff]  }
   0x5   :  { %124 = vperm.xlu0 %336, %v121_v4   ;;  %v206_v9 = vld [vmem:[%s471_s6] sm:$0xff]  ;;  %v79_v10 = vsel %vm77_vm1, %v342_v8, 0 }
   0x6   :  { %v268_v11 = vld [vmem:[%s472_s8] sm:$0xff] }
   0x7   :  { %310 = vmatpush3.bf16.msra.mxu0 %v339_v3  ;;  %v45_v12 = vld [vmem:[%s473_s1] sm:$0xf] }
   0x8   :  { %311 = vmatprep.subr.bf16.mxu0 %v344_v0  ;;  %v192_v13 = vld [vmem:[%s475_s5] sm:$0xff] }
   0x9   :  { %131 = vperm.xlu0 %336, %v128_v6   ;;  %196 = vperm.xlu1 %337, %v192_v13   ;;  %v275_v16 = vld [vmem:[%s476_s9] sm:$0xff] }
   0xa   :  { %v343_v28 = vld [vmem:[%s474_s4] sm:$0xff]  }
   0xb   :  { %312 = vmatpush3.bf16.msra.mxu0 %v340_v5  ;;  %v222_v44 = vld [vmem:[%s477_s7] sm:$0xf] }
   0xc   :  { %313 = vmatprep.subr.bf16.mxu0 %v344_v0 }
   0xd   :  { %210 = vperm.xlu0 %336, %v206_v9   ;;  %201 = vperm.xlu1 %337, %v193_v14  }
   0xf   :  { %314 = vmatpush3.bf16.msra.mxu0 %v341_v7 }
  0x10   :  { %315 = vmatprep.subr.bf16.mxu0 %v344_v0 }
  0x11   :  { %271 = vperm.xlu0 %336, %v268_v11   ;;  %215 = vperm.xlu1 %337, %v207_v15  }
  0x13   :  { %316 = vmatpush3.bf16.msra.mxu0 %v79_v10 }
  0x15   :  { %278 = vperm.xlu1 %337, %v275_v16  }
  0x16   :  { %318 = vmatmul.mubr.msk.bf16.vlgmr.msra.gmra.mrb[0].mxu0 %vm73_vm2, %v45_v12 }
  0x84   :  { %v125_v17 = vpop.permute.xlu0 %124 }
  0x88   :  { %v132_v21 = vpop.permute.xlu0 %131  ;;  %v197_v29 = vpop.permute.xlu1 %196 }
  0x8c   :  { %v202_v30 = vpop.permute.xlu1 %201  ;;  %v211_v34 = vpop.permute.xlu0 %210 }
  0x90   :  { %v216_v39 = vpop.permute.xlu1 %215  ;;  %v272_v45 = vpop.permute.xlu0 %271 }
  0x94   :  { %v279_v49 = vpop.permute.xlu1 %278 }
  0xe9   :  { %v115_v18 = vpop.f32.mrb[0].mxu0 }
  0xea   :  { %v127_v19 = vmul.f32 %v125_v17, %v115_v18  ;;  %v319_v20 = vpop.f32.mrb[1].mxu0 }
  0xeb   :  { %v118_v22 = vpop.f32.mrb[2].mxu0 }
  0xec   :  { %v134_v23 = vadd.f32 %v132_v21, %v127_v19  ;;  %v320_v24 = vpop.f32.mrb[3].mxu0 }
  0xee   :  { %v135_v25 = vmax.f32 %v134_v23, 0.0 }
  0xf0   :  { %v138_v26 = vpack.c.bf16 %v135_v25, %v135_v25 }
  0xf2   :  { %v149_v27 = vsel %vm77_vm1, %v138_v26, 0 }
  0xf3   :  { %322 = vmatpush3.bf16.msra.mxu1 %v149_v27 }
  0xf4   :  { %327 = vmatprep.subr.bf16.mxu1 %v344_v0 }
  0xf6   :  { %324 = vmatmul.mubr.msk.bf16.vlgmr.msra.gmra.mrb[0].mxu1 %vm144_vm3, %v343_v28 }
  0xf7   :  { %329 = vmatprep.mubr.msk.bf16.mxu1 %vm345_vm0, %v344_v0 }
 0x1c9   :  { %v185_v31 = vpop.f32.mrb[0].mxu1 }
 0x1ca   :  { %v204_v32 = vmul.f32 %v197_v29, %v185_v31  ;;  %v325_v33 = vpop.f32.mrb[1].mxu1 }
 0x1cb   :  { %v188_v35 = vpop.f32.mrb[2].mxu1 }
 0x1cc   :  { %v218_v36 = vadd.f32 %v211_v34, %v204_v32  ;;  %v205_v37 = vmul.f32 %v202_v30, %v188_v35  ;;  %v326_v38 = vpop.f32.mrb[3].mxu1 }
 0x1ce   :  { %v219_v40 = vadd.f32 %v216_v39, %v205_v37  ;;  %v220_v41 = vmax.f32 %v218_v36, 0.0 }
 0x1d0   :  { %v221_v42 = vmax.f32 %v219_v40, 0.0 }
 0x1d2   :  { %v223_v43 = vpack.c.bf16 %v221_v42, %v220_v41 }
 0x1d4   :  { %328 = vmatpush3.bf16.msra.mxu1 %v223_v43 }
 0x1d7   :  { %330 = vmatmul.mubr.msk.bf16.vlgmr.msra.gmra.mrb[4].mxu1 %vm224_vm4, %v222_v44 }
 0x2aa   :  { %v262_v46 = vpop.f32.mrb[4].mxu1 }
 0x2ab   :  { %v274_v47 = vmul.f32 %v272_v45, %v262_v46  ;;  %v331_v48 = vpop.f32.mrb[5].mxu1 }
 0x2ac   :  { %v265_v50 = vpop.f32.mrb[6].mxu1 }
 0x2ad   :  { %v281_v51 = vadd.f32 %v279_v49, %v274_v47  ;;  %v332_v52 = vpop.f32.mrb[7].mxu1 }
 0x2af   :  { %v282_v53 = vmax.f32 %v281_v51, 0.0 }
 0x2b1   :  { %283 = vst [vmem:[%s478_s10] sm:$0xff] %v282_v53 }

// kernel: classifier_forward.6
= control target key start
LH: loop header
LB: loop body
LE: loop exit
PB: predicated region body
PF: predicated region fallthrough
CT: control target
= control target key end

     0   :  { %v6096_v3 = vmov 0.0   ;;  %vm76_vm0 = vcmask 130048   ;;  %v66_v14 = vlaneseq  ;;  %v6098_v36 = vmov 0.0|0.0   ;;  %s7017_s1 = inlined_call_operand.vmem [shape: f32[16,256], index: 1, kind: input, shape index: {}]   ;;  %s7018_s2 = inlined_call_operand.vmem [shape: f32[16,256], index: 2, kind: input, shape index: {}]   ;;  %s7019_s0 = inlined_call_operand.vmem [shape: f32[16,16], index: 0, kind: input, shape index: {}]   ;;  %s7020_s3 = inlined_call_operand.vmem [shape: f32[1,256], index: 3, kind: input, shape index: {}]   ;;  %s7021_s4 = inlined_call_operand.vmem [shape: f32[64,16], index: 4, kind: input, shape index: {}]   ;;  %s7022_s5 = inlined_call_operand.vmem [shape: f32[16,256], index: 5, kind: input, shape index: {}]   ;;  %s7023_s6 = inlined_call_operand.vmem [shape: f32[16,256], index: 6, kind: input, shape index: {}]   ;;  %s7024_s7 = inlined_call_operand.vmem [shape: f32[1,256], index: 7, kind: input, shape index: {}]   ;;  %s7025_s8 = inlined_call_operand.vmem [shape: f32[64,16], index: 8, kind: input, shape index: {}]   ;;  %s7026_s11 = inlined_call_operand.vmem [shape: f32[16,16], index: 11, kind: input, shape index: {}]   ;;  %s7027_s9 = inlined_call_operand.vmem [shape: f32[8,1,16], index: 9, kind: input, shape index: {}]   ;;  %s7028_s10 = inlined_call_operand.vmem [shape: f32[8,1,16], index: 10, kind: input, shape index: {}]   ;;  %s7029_s12 = inlined_call_operand.vmem [shape: f32[1,16], index: 12, kind: input, shape index: {}]   ;;  %s7030_s16 = inlined_call_operand.<no memory space> [shape: f32[1,1], index: 16, kind: input, shape index: {}]   ;;  %s7031_s13 = inlined_call_operand.vmem [shape: f32[8,1,16], index: 13, kind: input, shape index: {}]   ;;  %s7032_s14 = inlined_call_operand.vmem [shape: f32[8,1,16], index: 14, kind: input, shape index: {}]   ;;  %s7033_s15 = inlined_call_operand.vmem [shape: f32[1,16], index: 15, kind: input, shape index: {}]   ;;  %s7034_s17 = inlined_call_operand.vmem [shape: f32[2,16], index: 17, kind: output, shape index: {}]  }
   0x1   :  { %7037 = sst [smem:[#allocation3_spill]] %s7017_s1  ;;  %147 = vmatprep.mubr.f32.mxu0 %v6096_v3  ;;  %239 = vmatprep.mubr.f32.mxu1 %v6096_v3  ;;  %v58_v13 = vld [vmem:[%s7019_s0] sm:$0xff]  ;;  %v59_v35 = vld [vmem:[%s7019_s0 + $0x8] sm:$0xff]  ;;  %v166_v39 = vld [vmem:[%s7021_s4 + $0x10] sm:$0xff]  ;;  %vm6099_vm1 = vmmov 0   ;;  %vm273_vm2 = vcmask 523264  }
   0x2   :  { %7038 = sst [smem:[#allocation4_spill]] %s7018_s2  ;;  %s7039_s26 = sld [smem:[#allocation3_spill]]  ;;  %v6232_v15 = vshrl.u32 %v66_v14, 7  ;;  %v64_v17 = vld [vmem:[%s7020_s3] sm:$0x3]  ;;  %v165_v38 = vld [vmem:[%s7021_s4 + $0x8] sm:$0xff] }
   0x3   :  { %s7040_s20 = sld [smem:[#allocation4_spill]]  ;;  %s6097_s3 = smov 64   ;;  %v164_v37 = vld [vmem:[%s7021_s4] sm:$0xff]  ;;  %v167_v41 = vld [vmem:[%s7021_s4 + $0x18] sm:$0xff]  ;;  %v169_v44 = vld [vmem:[%s7021_s4 + $0x28] sm:$0xff]  ;;  %vm3600_vm3 = vcmask 123904  }
   0x4   :  { %v68_v16 = vsub.s32 0, %v6232_v15  ;;  %v72_v24 = vsub.s32 1, %v6232_v15  ;;  %v6270_v40 = vpack.c.bf16 %v165_v38, %v164_v37  ;;  %v6279_v42 = vpack.c.bf16 %v167_v41, %v166_v39  ;;  %v168_v43 = vld [vmem:[%s7021_s4 + $0x20] sm:$0xff]  ;;  %v170_v46 = vld [vmem:[%s7021_s4 + $0x30] sm:$0xff]  ;;  %v171_v47 = vld [vmem:[%s7021_s4 + $0x38] sm:$0xff] }
   0x5   :  { %v6289_v45 = vpack.c.bf16 %v169_v44, %v168_v43  ;;  %v6299_v48 = vpack.c.bf16 %v171_v47, %v170_v46  ;;  %v2212_v15 = vld [vmem:[%s7025_s8 + $0x8] sm:$0xff] }
   0x6   :  { %v6240_v18 = vrot.slane %v64_v17, %v68_v16  ;;  %v6249_v27 = vrot.slane %v64_v17, %v72_v24 }
   0x8   :  { %v61_v0 = vld [vmem:[%s7039_s26 + $0x8] sm:$0xff]  ;;  %v63_v1 = vld [vmem:[%s7039_s26 + $0x18] sm:$0xff]  ;;  %v60_v2 = vld [vmem:[%s7039_s26] sm:$0xff] }
   0x9   :  { %v5513_v4 = vpack.c.bf16 %v63_v1, %v61_v0  ;;  %v62_v5 = vld [vmem:[%s7039_s26 + $0x10] sm:$0xff]  ;;  %v161_v6 = vld [vmem:[%s7040_s20 + $0x8] sm:$0xff]  ;;  %v163_v7 = vld [vmem:[%s7040_s20 + $0x18] sm:$0xff] }
   0xa   :  { %v5515_v8 = vpack.c.bf16 %v62_v5, %v60_v2  ;;  %v6211_v9 = vpack.c.bf16 %v163_v7, %v161_v6  ;;  %v160_v10 = vld [vmem:[%s7040_s20] sm:$0xff]  ;;  %v162_v11 = vld [vmem:[%s7040_s20 + $0x10] sm:$0xff] }
   0xb   :  { %5514 = vmatprep.subr.bf16.mxu0 %v5513_v4  ;;  %v6219_v12 = vpack.c.bf16 %v162_v11, %v160_v10 }
   0xc   :  { %5516 = vmatpush1.bf16.msra.mxu0 %v5515_v8  ;;  %5518 = vmatprep.subr.bf16.mxu1 %v6211_v9 }
   0xd   :  { %5520 = vmatpush1.bf16.msra.mxu1 %v6219_v12  ;;  %5521 = vmatprep.subr.bf16.mxu0 %v6098_v36 }
   0xe   :  { %5534 = vmatprep.subr.bf16.mxu1 %v6211_v9 }
   0xf   :  { %4834 = vmatmul.mubr.msk.f32.vlgmr.msra.gmra.mrb[0].mxu0 %vm76_vm0, %v58_v13 }
  0x10   :  { %240 = vmatmul.mubr.f32.vlgmr.msra.gmra.mrb[0].mxu1 %v6096_v3  ;;  %153 = vmatprep.mubr.f32.mxu0 %v6096_v3 }
  0x11   :  { %5536 = vmatpush1.bf16.msra.mxu1 %v6219_v12  ;;  %413 = vmatprep.mubr.f32.mxu1 %v6096_v3 }
  0x12   :  { %5537 = vmatprep.subr.bf16.mxu1 %v6098_v36  ;;  %5523 = vmatpush3.bf16.msra.mxu0 %v6270_v40 }
  0x13   :  { %4835 = vmatmul.mubr.msk.f32.gmra.mrb[2].mxu0 %vm76_vm0, %v59_v35  ;;  %5524 = vmatprep.subr.bf16.mxu0 %v6098_v36 }
  0x14   :  { %5169 = vmatprep.mubr.msk.f32.mxu0 %vm6099_vm1, %v6096_v3 }
  0x16   :  { %5526 = vmatpush3.bf16.msra.mxu0 %v6279_v42 }
  0x17   :  { %5527 = vmatprep.subr.bf16.mxu0 %v6098_v36 }
  0x1a   :  { %5529 = vmatpush3.bf16.msra.mxu0 %v6289_v45 }
  0x1b   :  { %5530 = vmatprep.subr.bf16.mxu0 %v6098_v36 }
  0x1e   :  { %5532 = vmatpush3.bf16.msra.mxu0 %v6299_v48 }
  0x1f   :  { %5550 = vmatprep.subr.bf16.mxu0 %v6211_v9 }
  0xe2   :  { %v149_v19 = vpop.f32.mrb[0].mxu0 }
  0xe3   :  { %v6243_v20 = vadd.f32 %v149_v19, %v6240_v18  ;;  %v151_v21 = vpop.f32.mrb[1].mxu0  ;;  %v241_v22 = vpop.f32.mrb[0].mxu1 }
  0xe4   :  { %v243_v23 = vpop.f32.mrb[1].mxu1  ;;  %v6252_v28 = vadd.f32 %v151_v21, %v6249_v27 }
  0xe5   :  { %v246_v25 = vadd.f32 %v241_v22, %v6243_v20 }
  0xe6   :  { %v247_v29 = vadd.f32 %v243_v23, %v6252_v28  ;;  %v6305_v58 = vpop.f32.mrb[2].mxu0 }
  0xe7   :  { %v4836_v26 = vmul.f32 -1.442695, %v246_v25  ;;  %v6307_v59 = vpop.f32.mrb[3].mxu0 }
  0xe8   :  { %v4837_v49 = vmul.f32 -1.442695, %v247_v29 }
  0xe9   :  { %5868 = vpow2.f32 %v4836_v26 }
  0xea   :  { %5870 = vtanh.f32 %v247_v29 }
  0xf3   :  { %v5869_v30 = vpop.eup %5868 }
  0xf4   :  { %v251_v31 = vadd.f32 1.0, %v5869_v30  ;;  %v5871_v32 = vpop.eup %5870 }
  0xf6   :  { %5872 = vrcp.f32 %v251_v31 }
  0xf7   :  { %5874 = vpow2.f32 %v4837_v49 }
 0x100   :  { %v5873_v33 = vpop.eup %5872 }
 0x101   :  { %v262_v34 = vmul.f32 %v5873_v33, %v5871_v32  ;;  %v5875_v50 = vpop.eup %5874  ;;  %v261_v52 = vmul.f32 0.0, %v5873_v33 }
 0x102   :  { %v258_v51 = vadd.f32 1.0, %v5875_v50 }
 0x103   :  { %264 = vrot.lane.b32.xlu0 %v262_v34, %s6097_s3 }
 0x104   :  { %5876 = vrcp.f32 %v258_v51 }
 0x10e   :  { %v5877_v55 = vpop.eup %5876 }
 0x175   :  { %v265_v53 = vpop.permute.xlu0 %264 }
 0x176   :  { %v267_v54 = vadd.f32 %v265_v53, %v261_v52 }
 0x178   :  { %5878 = vtanh.f32 %v267_v54  ;;  %v442_v11 = vrot.slane %v267_v54, 6 }
 0x182   :  { %v5879_v56 = vpop.eup %5878 }
 0x183   :  { %v269_v57 = vmul.f32 %v5879_v56, %v5877_v55 }
 0x185   :  { %271 = vrot.lane.b32.xlu0 %v269_v57, %s6097_s3 }
 0x1f7   :  { %v272_v60 = vpop.permute.xlu0 %271 }
 0x1f8   :  { %5170 = vmatmul.mubr.msk.f32.vlgmr.msra.gmra.mrb[4].mxu0 %vm273_vm2, %v272_v60 }
 0x1f9   :  { %5552 = vmatpush1.bf16.msra.mxu0 %v6219_v12  ;;  %596 = vmatprep.mubr.f32.mxu0 %v6096_v3 }
 0x1fa   :  { %5553 = vmatprep.subr.bf16.mxu0 %v6098_v36 }
 0x2cb   :  { %v6313_v61 = vpop.f32.mrb[4].mxu0 }
 0x2cc   :  { %v5171_v62 = vpop.f32.mrb[5].mxu0  ;;  %4839 = vmatmul.mubr.msk.f32.vlgmr.msra.gmra.mrb[2].mxu1 %vm76_vm0, %v6313_v61 }
 0x2cd   :  { %5539 = vmatpush3.bf16.msra.mxu1 %v6270_v40  ;;  %5188 = vmatprep.mubr.msk.f32.mxu1 %vm6099_vm1, %v6096_v3 }
 0x2ce   :  { %5540 = vmatprep.subr.bf16.mxu1 %v6098_v36 }
 0x2d1   :  { %5542 = vmatpush3.bf16.msra.mxu1 %v6279_v42 }
 0x2d2   :  { %5543 = vmatprep.subr.bf16.mxu1 %v6098_v36 }
 0x2d5   :  { %5545 = vmatpush3.bf16.msra.mxu1 %v6289_v45 }
 0x2d6   :  { %5546 = vmatprep.subr.bf16.mxu1 %v6098_v36 }
 0x2d9   :  { %5548 = vmatpush3.bf16.msra.mxu1 %v6299_v48 }
 0x2da   :  { %5566 = vmatprep.subr.bf16.mxu1 %v6211_v9 }
 0x39f   :  { %v415_v63 = vpop.f32.mrb[2].mxu1 }
 0x3a0   :  { %v422_v0 = vrot.slane %v415_v63, 6  ;;  %v417_v1 = vpop.f32.mrb[3].mxu1 }
 0x3a1   :  { %v423_v5 = vrot.slane %v417_v1, 6 }
 0x3a2   :  { %v426_v2 = vadd.f32 %v422_v0, %v6243_v20 }
 0x3a3   :  { %v427_v6 = vadd.f32 %v423_v5, %v6252_v28 }
 0x3a4   :  { %v4840_v4 = vmul.f32 -1.442695, %v426_v2 }
 0x3a5   :  { %v4841_v19 = vmul.f32 -1.442695, %v427_v6 }
 0x3a6   :  { %5880 = vpow2.f32 %v4840_v4 }
 0x3a7   :  { %5882 = vtanh.f32 %v427_v6 }
 0x3b0   :  { %v5881_v7 = vpop.eup %5880 }
 0x3b1   :  { %v431_v8 = vadd.f32 1.0, %v5881_v7  ;;  %v5883_v10 = vpop.eup %5882 }
 0x3b3   :  { %5884 = vrcp.f32 %v431_v8 }
 0x3b4   :  { %5886 = vpow2.f32 %v4841_v19 }
 0x3bd   :  { %v5885_v13 = vpop.eup %5884 }
 0x3be   :  { %v445_v14 = vmul.f32 %v5885_v13, %v5883_v10  ;;  %v444_v17 = vmul.f32 %v5885_v13, %v442_v11  ;;  %v5887_v21 = vpop.eup %5886 }
 0x3bf   :  { %v438_v22 = vadd.f32 1.0, %v5887_v21 }
 0x3c0   :  { %447 = vrot.lane.b32.xlu1 %v445_v14, %s6097_s3 }
 0x3c1   :  { %5888 = vrcp.f32 %v438_v22 }
 0x3cb   :  { %v5889_v26 = vpop.eup %5888 }
 0x432   :  { %v448_v23 = vpop.permute.xlu1 %447 }
 0x433   :  { %v450_v25 = vadd.f32 %v448_v23, %v444_v17 }
 0x435   :  { %5890 = vtanh.f32 %v450_v25  ;;  %v625_v50 = vrot.slane %v450_v25, 6 }
 0x43f   :  { %v5891_v29 = vpop.eup %5890 }
 0x440   :  { %v452_v30 = vmul.f32 %v5891_v29, %v5889_v26 }
 0x442   :  { %v454_v31 = vrot.slane %v452_v30, 2 }
 0x444   :  { %455 = vrot.lane.b32.xlu1 %v454_v31, %s6097_s3 }
 0x4b6   :  { %v456_v32 = vpop.permute.xlu1 %455 }
 0x4b7   :  { %5189 = vmatmul.mubr.msk.f32.vlgmr.msra.gmra.mrb[4].mxu1 %vm273_vm2, %v456_v32 }
 0x4b8   :  { %5568 = vmatpush1.bf16.msra.mxu1 %v6219_v12  ;;  %779 = vmatprep.mubr.f32.mxu1 %v6096_v3 }
 0x4b9   :  { %5569 = vmatprep.subr.bf16.mxu1 %v6098_v36 }
 0x58a   :  { %v6335_v33 = vpop.f32.mrb[4].mxu1 }
 0x58b   :  { %v5190_v34 = vpop.f32.mrb[5].mxu1  ;;  %4843 = vmatmul.mubr.msk.f32.vlgmr.msra.gmra.mrb[6].mxu0 %vm76_vm0, %v6335_v33 }
 0x58c   :  { %5555 = vmatpush3.bf16.msra.mxu0 %v6270_v40  ;;  %5207 = vmatprep.mubr.msk.f32.mxu0 %vm6099_vm1, %v6096_v3 }
 0x58d   :  { %5556 = vmatprep.subr.bf16.mxu0 %v6098_v36 }
 0x590   :  { %5558 = vmatpush3.bf16.msra.mxu0 %v6279_v42 }
 0x591   :  { %5559 = vmatprep.subr.bf16.mxu0 %v6098_v36 }
 0x594   :  { %5561 = vmatpush3.bf16.msra.mxu0 %v6289_v45 }
 0x595   :  { %5562 = vmatprep.subr.bf16.mxu0 %v6098_v36 }
 0x598   :  { %5564 = vmatpush3.bf16.msra.mxu0 %v6299_v48 }
 0x599   :  { %5582 = vmatprep.subr.bf16.mxu0 %v6211_v9 }
 0x65e   :  { %v598_v35 = vpop.f32.mrb[6].mxu0 }
 0x65f   :  { %v605_v37 = vrot.slane %v598_v35, 4  ;;  %v600_v38 = vpop.f32.mrb[7].mxu0 }
 0x660   :  { %v606_v43 = vrot.slane %v600_v38, 4 }
 0x661   :  { %v609_v39 = vadd.f32 %v605_v37, %v6243_v20 }
 0x662   :  { %v610_v44 = vadd.f32 %v606_v43, %v6252_v28  ;;  %v6395_v43 = vadd.f32 %v6305_v58, %v6240_v18 }
 0x663   :  { %v4844_v41 = vmul.f32 -1.442695, %v609_v39 }
 0x664   :  { %v4845_v54 = vmul.f32 -1.442695, %v610_v44 }
 0x665   :  { %5892 = vpow2.f32 %v4844_v41 }
 0x666   :  { %5894 = vtanh.f32 %v610_v44 }
 0x66f   :  { %v5893_v46 = vpop.eup %5892 }
 0x670   :  { %v614_v47 = vadd.f32 1.0, %v5893_v46  ;;  %v5895_v49 = vpop.eup %5894 }
 0x672   :  { %5896 = vrcp.f32 %v614_v47 }
 0x673   :  { %5898 = vpow2.f32 %v4845_v54 }
 0x67c   :  { %v5897_v51 = vpop.eup %5896 }
 0x67d   :  { %v628_v52 = vmul.f32 %v5897_v51, %v5895_v49  ;;  %v627_v53 = vmul.f32 %v5897_v51, %v625_v50  ;;  %v5899_v55 = vpop.eup %5898  ;;  %v6400_v50 = vadd.f32 %v6307_v59, %v6249_v27 }
 0x67e   :  { %v621_v56 = vadd.f32 1.0, %v5899_v55 }
 0x67f   :  { %630 = vrot.lane.b32.xlu0 %v628_v52, %s6097_s3 }
 0x680   :  { %5900 = vrcp.f32 %v621_v56 }
 0x68a   :  { %v5901_v62 = vpop.eup %5900 }
 0x6f1   :  { %v631_v57 = vpop.permute.xlu0 %630 }
 0x6f2   :  { %v633_v60 = vadd.f32 %v631_v57, %v627_v53 }
 0x6f4   :  { %5902 = vtanh.f32 %v633_v60  ;;  %v808_v22 = vrot.slane %v633_v60, 6 }
 0x6fe   :  { %v5903_v63 = vpop.eup %5902 }
 0x6ff   :  { %v635_v0 = vmul.f32 %v5903_v63, %v5901_v62 }
 0x701   :  { %v637_v1 = vrot.slane %v635_v0, 4 }
 0x703   :  { %638 = vrot.lane.b32.xlu1 %v637_v1, %s6097_s3 }
 0x775   :  { %v639_v2 = vpop.permute.xlu1 %638 }
 0x776   :  { %5208 = vmatmul.mubr.msk.f32.vlgmr.msra.gmra.mrb[8].mxu0 %vm273_vm2, %v639_v2 }
 0x777   :  { %5584 = vmatpush1.bf16.msra.mxu0 %v6219_v12  ;;  %962 = vmatprep.mubr.f32.mxu0 %v6096_v3 }
 0x778   :  { %5585 = vmatprep.subr.bf16.mxu0 %v6098_v36 }
 0x849   :  { %v6357_v4 = vpop.f32.mrb[8].mxu0 }
 0x84a   :  { %v5209_v5 = vpop.f32.mrb[9].mxu0  ;;  %4847 = vmatmul.mubr.msk.f32.vlgmr.msra.gmra.mrb[6].mxu1 %vm76_vm0, %v6357_v4 }
 0x84b   :  { %5571 = vmatpush3.bf16.msra.mxu1 %v6270_v40  ;;  %5226 = vmatprep.mubr.msk.f32.mxu1 %vm6099_vm1, %v6096_v3 }
 0x84c   :  { %5572 = vmatprep.subr.bf16.mxu1 %v6098_v36 }
 0x84f   :  { %5574 = vmatpush3.bf16.msra.mxu1 %v6279_v42 }
 0x850   :  { %5575 = vmatprep.subr.bf16.mxu1 %v6098_v36 }
 0x853   :  { %5577 = vmatpush3.bf16.msra.mxu1 %v6289_v45 }
 0x854   :  { %5578 = vmatprep.subr.bf16.mxu1 %v6098_v36 }
 0x857   :  { %5580 = vmatpush3.bf16.msra.mxu1 %v6299_v48 }
 0x858   :  { %5598 = vmatprep.subr.bf16.mxu1 %v6211_v9 }
 0x91d   :  { %v781_v6 = vpop.f32.mrb[6].mxu1 }
 0x91e   :  { %v788_v7 = vrot.slane %v781_v6, 2  ;;  %v783_v8 = vpop.f32.mrb[7].mxu1 }
 0x91f   :  { %v789_v13 = vrot.slane %v783_v8, 2 }
 0x920   :  { %v792_v10 = vadd.f32 %v788_v7, %v6243_v20 }
 0x921   :  { %v793_v14 = vadd.f32 %v789_v13, %v6252_v28 }
 0x922   :  { %v4848_v11 = vmul.f32 -1.442695, %v792_v10 }
 0x923   :  { %v4849_v29 = vmul.f32 -1.442695, %v793_v14 }
 0x924   :  { %5904 = vpow2.f32 %v4848_v11 }
 0x925   :  { %5906 = vtanh.f32 %v793_v14 }
 0x92e   :  { %v5905_v17 = vpop.eup %5904 }
 0x92f   :  { %v797_v19 = vadd.f32 1.0, %v5905_v17  ;;  %v5907_v21 = vpop.eup %5906 }
 0x931   :  { %5908 = vrcp.f32 %v797_v19 }
 0x932   :  { %5910 = vpow2.f32 %v4849_v29 }
 0x93b   :  { %v5909_v23 = vpop.eup %5908 }
 0x93c   :  { %v811_v25 = vmul.f32 %v5909_v23, %v5907_v21  ;;  %v810_v26 = vmul.f32 %v5909_v23, %v808_v22  ;;  %v5911_v30 = vpop.eup %5910 }
 0x93d   :  { %v804_v20 = vadd.f32 1.0, %v5911_v30 }
 0x93e   :  { %813 = vrot.lane.b32.xlu0 %v811_v25, %s6097_s3 }
 0x93f   :  { %5912 = vrcp.f32 %v804_v20 }
 0x949   :  { %v5913_v28 = vpop.eup %5912 }
 0x9b0   :  { %v814_v31 = vpop.permute.xlu0 %813 }
 0x9b1   :  { %v816_v32 = vadd.f32 %v814_v31, %v810_v26 }
 0x9b3   :  { %5914 = vtanh.f32 %v816_v32  ;;  %v985_v55 = vrot.slane %v816_v32, 6 }
 0x9bd   :  { %v5915_v34 = vpop.eup %5914 }
 0x9be   :  { %v818_v35 = vmul.f32 %v5915_v34, %v5913_v28 }
 0x9c0   :  { %v820_v37 = vrot.slane %v818_v35, 6 }
 0x9c2   :  { %821 = vrot.lane.b32.xlu1 %v820_v37, %s6097_s3 }
 0xa34   :  { %v822_v38 = vpop.permute.xlu1 %821 }
 0xa35   :  { %5227 = vmatmul.mubr.msk.f32.vlgmr.msra.gmra.mrb[8].mxu1 %vm273_vm2, %v822_v38 }
 0xa36   :  { %5600 = vmatpush1.bf16.msra.mxu1 %v6219_v12  ;;  %1138 = vmatprep.mubr.f32.mxu1 %v6096_v3 }
 0xa37   :  { %5601 = vmatprep.subr.bf16.mxu1 %v6098_v36 }
 0xb08   :  { %v6379_v39 = vpop.f32.mrb[8].mxu1 }
 0xb09   :  { %v5228_v41 = vpop.f32.mrb[9].mxu1  ;;  %4851 = vmatmul.mubr.msk.f32.vlgmr.msra.gmra.mrb[10].mxu0 %vm76_vm0, %v6379_v39 }
 0xb0a   :  { %5587 = vmatpush3.bf16.msra.mxu0 %v6270_v40  ;;  %5245 = vmatprep.mubr.msk.f32.mxu0 %vm6099_vm1, %v6096_v3 }
 0xb0b   :  { %5588 = vmatprep.subr.bf16.mxu0 %v6098_v36 }
 0xb0e   :  { %5590 = vmatpush3.bf16.msra.mxu0 %v6279_v42 }
 0xb0f   :  { %5591 = vmatprep.subr.bf16.mxu0 %v6098_v36 }
 0xb12   :  { %5593 = vmatpush3.bf16.msra.mxu0 %v6289_v45 }
 0xb13   :  { %5594 = vmatprep.subr.bf16.mxu0 %v6098_v36 }
 0xb16   :  { %5596 = vmatpush3.bf16.msra.mxu0 %v6299_v48 }
 0xb17   :  { %5614 = vmatprep.subr.bf16.mxu0 %v6211_v9 }
 0xbdc   :  { %v964_v44 = vpop.f32.mrb[10].mxu0 }
 0xbdd   :  { %v969_v46 = vadd.f32 %v964_v44, %v6395_v43  ;;  %v966_v47 = vpop.f32.mrb[11].mxu0 }
 0xbde   :  { %v970_v51 = vadd.f32 %v966_v47, %v6400_v50 }
 0xbdf   :  { %v4852_v49 = vmul.f32 -1.442695, %v969_v46 }
 0xbe0   :  { %v4853_v57 = vmul.f32 -1.442695, %v970_v51 }
 0xbe1   :  { %5916 = vpow2.f32 %v4852_v49 }
 0xbe2   :  { %5918 = vtanh.f32 %v970_v51 }
 0xbeb   :  { %v5917_v52 = vpop.eup %5916 }
 0xbec   :  { %v974_v53 = vadd.f32 1.0, %v5917_v52  ;;  %v5919_v54 = vpop.eup %5918 }
 0xbee   :  { %5920 = vrcp.f32 %v974_v53 }
 0xbef   :  { %5922 = vpow2.f32 %v4853_v57 }
 0xbf8   :  { %v5921_v18 = vpop.eup %5920 }
 0xbf9   :  { %v988_v58 = vmul.f32 %v5921_v18, %v5919_v54  ;;  %v987_v56 = vmul.f32 %v5921_v18, %v985_v55  ;;  %v5923_v60 = vpop.eup %5922 }
 0xbfa   :  { %v981_v62 = vadd.f32 1.0, %v5923_v60 }
 0xbfb   :  { %990 = vrot.lane.b32.xlu0 %v988_v58, %s6097_s3 }
 0xbfc   :  { %5924 = vrcp.f32 %v981_v62 }
 0xc06   :  { %v5925_v59 = vpop.eup %5924 }
 0xc6d   :  { %v991_v63 = vpop.permute.xlu0 %990 }
 0xc6e   :  { %v993_v27 = vadd.f32 %v991_v63, %v987_v56 }
 0xc70   :  { %5926 = vtanh.f32 %v993_v27  ;;  %v1167_v23 = vrot.slane %v993_v27, 6 }
 0xc7a   :  { %v5927_v0 = vpop.eup %5926 }
 0xc7b   :  { %v995_v1 = vmul.f32 %v5927_v0, %v5925_v59 }
 0xc7d   :  { %997 = vrot.lane.b32.xlu1 %v995_v1, %s6097_s3  ;;  %v1621_v1 = vld [vmem:[%s7022_s5 + $0x8] sm:$0xff] }
 0xcef   :  { %v998_v2 = vpop.permute.xlu1 %997 }
 0xcf0   :  { %5246 = vmatmul.mubr.msk.f32.vlgmr.msra.gmra.mrb[12].mxu0 %vm273_vm2, %v998_v2  ;;  %v1623_v2 = vld [vmem:[%s7022_s5 + $0x18] sm:$0xff] }
 0xcf1   :  { %5616 = vmatpush1.bf16.msra.mxu0 %v6219_v12  ;;  %1321 = vmatprep.mubr.f32.mxu0 %v6096_v3 }
 0xcf2   :  { %5617 = vmatprep.subr.bf16.mxu0 %v6098_v36 }
 0xdc3   :  { %v6409_v5 = vpop.f32.mrb[12].mxu0 }
 0xdc4   :  { %v5247_v6 = vpop.f32.mrb[13].mxu0  ;;  %4855 = vmatmul.mubr.msk.f32.vlgmr.msra.gmra.mrb[10].mxu1 %vm76_vm0, %v6409_v5 }
 0xdc5   :  { %5603 = vmatpush3.bf16.msra.mxu1 %v6270_v40  ;;  %5264 = vmatprep.mubr.msk.f32.mxu1 %vm6099_vm1, %v6096_v3  ;;  %v6456_v6 = vpack.c.bf16 %v1623_v2, %v1621_v1  ;;  %v2214_v1 = vld [vmem:[%s7025_s8 + $0x18] sm:$0xff] }
 0xdc6   :  { %5604 = vmatprep.subr.bf16.mxu1 %v6098_v36 }
 0xdc9   :  { %5606 = vmatpush3.bf16.msra.mxu1 %v6279_v42 }
 0xdca   :  { %5607 = vmatprep.subr.bf16.mxu1 %v6098_v36 }
 0xdcd   :  { %5609 = vmatpush3.bf16.msra.mxu1 %v6289_v45 }
 0xdce   :  { %5610 = vmatprep.subr.bf16.mxu1 %v6098_v36 }
 0xdd1   :  { %5612 = vmatpush3.bf16.msra.mxu1 %v6299_v48 }
 0xdd2   :  { %5630 = vmatprep.subr.bf16.mxu1 %v6211_v9 }
 0xe97   :  { %v1140_v7 = vpop.f32.mrb[10].mxu1 }
 0xe98   :  { %v1147_v8 = vrot.slane %v1140_v7, 6  ;;  %v1142_v10 = vpop.f32.mrb[11].mxu1 }
 0xe99   :  { %v1148_v14 = vrot.slane %v1142_v10, 6 }
 0xe9a   :  { %v1151_v11 = vadd.f32 %v1147_v8, %v6395_v43 }
 0xe9b   :  { %v1152_v17 = vadd.f32 %v1148_v14, %v6400_v50  ;;  %v1622_v14 = vld [vmem:[%s7022_s5 + $0x10] sm:$0xff] }
 0xe9c   :  { %v4856_v13 = vmul.f32 -1.442695, %v1151_v11 }
 0xe9d   :  { %v4857_v9 = vmul.f32 -1.442695, %v1152_v17 }
 0xe9e   :  { %5928 = vpow2.f32 %v4856_v13  ;;  %v1620_v13 = vld [vmem:[%s7022_s5] sm:$0xff] }
 0xe9f   :  { %5930 = vtanh.f32 %v1152_v17  ;;  %v6466_v17 = vpack.c.bf16 %v1622_v14, %v1620_v13 }
 0xea8   :  { %v5929_v19 = vpop.eup %5928 }
 0xea9   :  { %v1156_v21 = vadd.f32 1.0, %v5929_v19  ;;  %v5931_v22 = vpop.eup %5930 }
 0xeab   :  { %5932 = vrcp.f32 %v1156_v21 }
 0xeac   :  { %5934 = vpow2.f32 %v4857_v9 }
 0xeb5   :  { %v5933_v25 = vpop.eup %5932 }
 0xeb6   :  { %v1170_v26 = vmul.f32 %v5933_v25, %v5931_v22  ;;  %v1169_v29 = vmul.f32 %v5933_v25, %v1167_v23  ;;  %v5935_v30 = vpop.eup %5934 }
 0xeb7   :  { %v1163_v20 = vadd.f32 1.0, %v5935_v30 }
 0xeb8   :  { %1172 = vrot.lane.b32.xlu0 %v1170_v26, %s6097_s3 }
 0xeb9   :  { %5936 = vrcp.f32 %v1163_v20 }
 0xec3   :  { %v5937_v28 = vpop.eup %5936 }
 0xf2a   :  { %v1173_v31 = vpop.permute.xlu0 %1172 }
 0xf2b   :  { %v1175_v32 = vadd.f32 %v1173_v31, %v1169_v29 }
 0xf2d   :  { %5938 = vtanh.f32 %v1175_v32  ;;  %v1350_v58 = vrot.slane %v1175_v32, 6 }
 0xf37   :  { %v5939_v34 = vpop.eup %5938 }
 0xf38   :  { %v1177_v35 = vmul.f32 %v5939_v34, %v5937_v28 }
 0xf3a   :  { %v1179_v37 = vrot.slane %v1177_v35, 2 }
 0xf3c   :  { %1180 = vrot.lane.b32.xlu1 %v1179_v37, %s6097_s3 }
 0xfae   :  { %v1181_v38 = vpop.permute.xlu1 %1180 }
 0xfaf   :  { %5265 = vmatmul.mubr.msk.f32.vlgmr.msra.gmra.mrb[12].mxu1 %vm273_vm2, %v1181_v38 }
 0xfb0   :  { %5632 = vmatpush1.bf16.msra.mxu1 %v6219_v12  ;;  %1504 = vmatprep.mubr.f32.mxu1 %v6096_v3 }
 0xfb1   :  { %5633 = vmatprep.subr.bf16.mxu1 %v6098_v36 }
0x1082   :  { %v6431_v41 = vpop.f32.mrb[12].mxu1 }
0x1083   :  { %v5266_v44 = vpop.f32.mrb[13].mxu1  ;;  %4859 = vmatmul.mubr.msk.f32.vlgmr.msra.gmra.mrb[14].mxu0 %vm76_vm0, %v6431_v41 }
0x1084   :  { %5619 = vmatpush3.bf16.msra.mxu0 %v6270_v40  ;;  %5283 = vmatprep.mubr.msk.f32.mxu0 %vm6099_vm1, %v6096_v3  ;;  %v2210_v44 = vld [vmem:[%s7023_s6 + $0x18] sm:$0xff] }
0x1085   :  { %5620 = vmatprep.subr.bf16.mxu0 %v6098_v36 }
0x1088   :  { %5622 = vmatpush3.bf16.msra.mxu0 %v6279_v42 }
0x1089   :  { %5623 = vmatprep.subr.bf16.mxu0 %v6098_v36 }
0x108c   :  { %5625 = vmatpush3.bf16.msra.mxu0 %v6289_v45 }
0x108d   :  { %5626 = vmatprep.subr.bf16.mxu0 %v6098_v36 }
0x1090   :  { %5628 = vmatpush3.bf16.msra.mxu0 %v6299_v48 }
0x1091   :  { %5646 = vmatprep.subr.bf16.mxu0 %v6456_v6 }
0x1156   :  { %v1323_v12 = vpop.f32.mrb[14].mxu0 }
0x1157   :  { %v1330_v46 = vrot.slane %v1323_v12, 4  ;;  %v1325_v47 = vpop.f32.mrb[15].mxu0  ;;  %v2207_v12 = vld [vmem:[%s7023_s6] sm:$0xff] }
0x1158   :  { %v1331_v52 = vrot.slane %v1325_v47, 4 }
0x1159   :  { %v1334_v49 = vadd.f32 %v1330_v46, %v6395_v43  ;;  %v2209_v46 = vld [vmem:[%s7023_s6 + $0x10] sm:$0xff] }
0x115a   :  { %v1335_v53 = vadd.f32 %v1331_v52, %v6400_v50  ;;  %v6539_v47 = vpack.c.bf16 %v2209_v46, %v2207_v12  ;;  %v1624_v52 = vld [vmem:[%s7024_s7] sm:$0x3] }
0x115b   :  { %v4860_v51 = vmul.f32 -1.442695, %v1334_v49 }
0x115c   :  { %v4861_v62 = vmul.f32 -1.442695, %v1335_v53 }
0x115d   :  { %5940 = vpow2.f32 %v4860_v51 }
0x115e   :  { %5942 = vtanh.f32 %v1335_v53  ;;  %v6554_v53 = vrot.slane %v1624_v52, %v68_v16 }
0x1167   :  { %v5941_v54 = vpop.eup %5940 }
0x1168   :  { %v1339_v55 = vadd.f32 1.0, %v5941_v54  ;;  %v5943_v18 = vpop.eup %5942 }
0x116a   :  { %5944 = vrcp.f32 %v1339_v55 }
0x116b   :  { %5946 = vpow2.f32 %v4861_v62 }
0x1174   :  { %v5945_v56 = vpop.eup %5944 }
0x1175   :  { %v1353_v57 = vmul.f32 %v5945_v56, %v5943_v18  ;;  %v1352_v60 = vmul.f32 %v5945_v56, %v1350_v58  ;;  %v5947_v63 = vpop.eup %5946  ;;  %v6559_v56 = vrot.slane %v1624_v52, %v72_v24  ;;  %v2213_v24 = vld [vmem:[%s7025_s8 + $0x10] sm:$0xff] }
0x1176   :  { %v1346_v27 = vadd.f32 1.0, %v5947_v63  ;;  %v6578_v2 = vpack.c.bf16 %v2214_v1, %v2213_v24 }
0x1177   :  { %1355 = vrot.lane.b32.xlu0 %v1353_v57, %s6097_s3 }
0x1178   :  { %5948 = vrcp.f32 %v1346_v27 }
0x1182   :  { %v5949_v7 = vpop.eup %5948 }
0x11e9   :  { %v1356_v59 = vpop.permute.xlu0 %1355 }
0x11ea   :  { %v6447_v0 = vadd.f32 %v1356_v59, %v1352_v60  ;;  %v2211_v59 = vld [vmem:[%s7025_s8] sm:$0xff] }
0x11ec   :  { %5950 = vtanh.f32 %v6447_v0  ;;  %v1533_v9 = vrot.slane %v6447_v0, 6  ;;  %v6572_v0 = vpack.c.bf16 %v2212_v15, %v2211_v59 }
0x11f6   :  { %v5951_v8 = vpop.eup %5950 }
0x11f7   :  { %v1360_v10 = vmul.f32 %v5951_v8, %v5949_v7  ;;  %v2216_v7 = vld [vmem:[%s7025_s8 + $0x28] sm:$0xff] }
0x11f9   :  { %v1362_v11 = vrot.slane %v1360_v10, 4  ;;  %v2217_v10 = vld [vmem:[%s7025_s8 + $0x30] sm:$0xff] }
0x11fb   :  { %1363 = vrot.lane.b32.xlu1 %v1362_v11, %s6097_s3  ;;  %v2218_v11 = vld [vmem:[%s7025_s8 + $0x38] sm:$0xff] }
0x11fc   :  { %v6598_v13 = vpack.c.bf16 %v2218_v11, %v2217_v10 }
0x126d   :  { %v1364_v19 = vpop.permute.xlu1 %1363 }
0x126e   :  { %5284 = vmatmul.mubr.msk.f32.vlgmr.msra.gmra.mrb[16].mxu0 %vm273_vm2, %v1364_v19 }
0x126f   :  { %5648 = vmatpush1.bf16.msra.mxu0 %v6466_v17  ;;  %1700 = vmatprep.mubr.f32.mxu0 %v6096_v3 }
0x1270   :  { %5650 = vmatprep.subr.bf16.mxu0 %v6456_v6 }
0x1272   :  { %4867 = vmatmul.mubr.msk.f32.vlgmr.msra.gmra.mrb[18].mxu0 %vm76_vm0, %v6313_v61 }
0x1273   :  { %5652 = vmatpush1.bf16.msra.mxu0 %v6466_v17  ;;  %1771 = vmatprep.mubr.f32.mxu0 %v6096_v3 }
0x1274   :  { %5658 = vmatprep.subr.bf16.mxu0 %v6456_v6 }
0x1276   :  { %4868 = vmatmul.mubr.msk.f32.vlgmr.msra.gmra.mrb[20].mxu0 %vm76_vm0, %v6335_v33 }
0x1277   :  { %5660 = vmatpush1.bf16.msra.mxu0 %v6466_v17  ;;  %1913 = vmatprep.mubr.f32.mxu0 %v6096_v3 }
0x1278   :  { %5666 = vmatprep.subr.bf16.mxu0 %v6456_v6 }
0x127a   :  { %4870 = vmatmul.mubr.msk.f32.vlgmr.msra.gmra.mrb[22].mxu0 %vm76_vm0, %v6379_v39 }
0x127b   :  { %5668 = vmatpush1.bf16.msra.mxu0 %v6466_v17  ;;  %2055 = vmatprep.mubr.f32.mxu0 %v6096_v3 }
0x127c   :  { %5674 = vmatprep.subr.bf16.mxu0 %v6456_v6 }
0x127e   :  { %4872 = vmatmul.mubr.msk.f32.vlgmr.msra.gmra.mrb[24].mxu0 %vm76_vm0, %v6431_v41 }
0x127f   :  { %5676 = vmatpush1.bf16.msra.mxu0 %v6466_v17  ;;  %2200 = vmatprep.mubr.f32.mxu0 %v6096_v3 }
0x1341   :  { %v1433_v61 = vpop.f32.mrb[16].mxu0 }
0x1342   :  { %v5285_v33 = vpop.f32.mrb[17].mxu0  ;;  %4863 = vmatmul.mubr.msk.f32.vlgmr.msra.gmra.mrb[14].mxu1 %vm76_vm0, %v1433_v61 }
0x1343   :  { %5635 = vmatpush3.bf16.msra.mxu1 %v6270_v40  ;;  %5302 = vmatprep.mubr.msk.f32.mxu1 %vm6099_vm1, %v6096_v3 }
0x1344   :  { %5636 = vmatprep.subr.bf16.mxu1 %v6098_v36 }
0x1347   :  { %5638 = vmatpush3.bf16.msra.mxu1 %v6279_v42 }
0x1348   :  { %5639 = vmatprep.subr.bf16.mxu1 %v6098_v36 }
0x134b   :  { %5641 = vmatpush3.bf16.msra.mxu1 %v6289_v45 }
0x134c   :  { %5642 = vmatprep.subr.bf16.mxu1 %v6098_v36 }
0x134f   :  { %5644 = vmatpush3.bf16.msra.mxu1 %v6299_v48 }
0x1350   :  { %5654 = vmatprep.subr.bf16.mxu1 %v6456_v6 }
0x1415   :  { %v1506_v39 = vpop.f32.mrb[14].mxu1 }
0x1416   :  { %v1513_v21 = vrot.slane %v1506_v39, 2  ;;  %v1508_v40 = vpop.f32.mrb[15].mxu1 }
0x1417   :  { %v1514_v25 = vrot.slane %v1508_v40, 2 }
0x1418   :  { %v1517_v22 = vadd.f32 %v1513_v21, %v6395_v43 }
0x1419   :  { %v1518_v42 = vadd.f32 %v1514_v25, %v6400_v50 }
0x141a   :  { %v4864_v23 = vmul.f32 -1.442695, %v1517_v22 }
0x141b   :  { %v4865_v31 = vmul.f32 -1.442695, %v1518_v42 }
0x141c   :  { %5952 = vpow2.f32 %v4864_v23 }
0x141d   :  { %5954 = vtanh.f32 %v1518_v42 }
0x1426   :  { %v5953_v26 = vpop.eup %5952 }
0x1427   :  { %v1522_v29 = vadd.f32 1.0, %v5953_v26  ;;  %v5955_v45 = vpop.eup %5954 }
0x1429   :  { %5956 = vrcp.f32 %v1522_v29 }
0x142a   :  { %5958 = vpow2.f32 %v4865_v31 }
0x1433   :  { %v5957_v48 = vpop.eup %5956 }
0x1434   :  { %v1536_v30 = vmul.f32 %v5957_v48, %v5955_v45  ;;  %v1535_v20 = vmul.f32 %v5957_v48, %v1533_v9  ;;  %v5959_v43 = vpop.eup %5958 }
0x1435   :  { %v1529_v32 = vadd.f32 1.0, %v5959_v43 }
0x1436   :  { %1538 = vrot.lane.b32.xlu0 %v1536_v30, %s6097_s3 }
0x1437   :  { %5960 = vrcp.f32 %v1529_v32 }
0x1441   :  { %v5961_v50 = vpop.eup %5960 }
0x14a8   :  { %v1539_v28 = vpop.permute.xlu0 %1538 }
0x14a9   :  { %v1541_v34 = vadd.f32 %v1539_v28, %v1535_v20 }
0x14ab   :  { %5962 = vtanh.f32 %v1541_v34 }
0x14b5   :  { %v5963_v35 = vpop.eup %5962 }
0x14b6   :  { %v1543_v37 = vmul.f32 %v5963_v35, %v5961_v50 }
0x14b8   :  { %v1545_v38 = vrot.slane %v1543_v37, 6 }
0x14ba   :  { %1546 = vrot.lane.b32.xlu1 %v1545_v38, %s6097_s3 }
0x152c   :  { %v1547_v41 = vpop.permute.xlu1 %1546 }
0x152d   :  { %5303 = vmatmul.mubr.msk.f32.vlgmr.msra.gmra.mrb[16].mxu1 %vm273_vm2, %v1547_v41 }
0x152e   :  { %5656 = vmatpush1.bf16.msra.mxu1 %v6466_v17  ;;  %1842 = vmatprep.mubr.f32.mxu1 %v6096_v3 }
0x152f   :  { %5662 = vmatprep.subr.bf16.mxu1 %v6456_v6 }
0x1531   :  { %4869 = vmatmul.mubr.msk.f32.vlgmr.msra.gmra.mrb[18].mxu1 %vm76_vm0, %v6357_v4  ;;  %v2208_v4 = vld [vmem:[%s7023_s6 + $0x8] sm:$0xff] }
0x1532   :  { %5664 = vmatpush1.bf16.msra.mxu1 %v6466_v17  ;;  %1984 = vmatprep.mubr.f32.mxu1 %v6096_v3 }
0x1533   :  { %5670 = vmatprep.subr.bf16.mxu1 %v6456_v6  ;;  %v2215_v6 = vld [vmem:[%s7025_s8 + $0x20] sm:$0xff] }
0x1534   :  { %v6588_v8 = vpack.c.bf16 %v2216_v7, %v2215_v6 }
0x1535   :  { %4871 = vmatmul.mubr.msk.f32.vlgmr.msra.gmra.mrb[20].mxu1 %vm76_vm0, %v6409_v5  ;;  %v6530_v5 = vpack.c.bf16 %v2210_v44, %v2208_v4 }
0x1536   :  { %5672 = vmatpush1.bf16.msra.mxu1 %v6466_v17  ;;  %2126 = vmatprep.mubr.f32.mxu1 %v6096_v3 }
0x1537   :  { %5681 = vmatprep.subr.bf16.mxu1 %v6098_v36  ;;  %5678 = vmatprep.subr.bf16.mxu0 %v6530_v5 }
0x1539   :  { %4873 = vmatmul.mubr.msk.f32.vlgmr.msra.gmra.mrb[22].mxu1 %vm76_vm0, %v1433_v61 }
0x153a   :  { %5321 = vmatprep.mubr.msk.f32.mxu1 %vm6099_vm1, %v6096_v3  ;;  %5683 = vmatpush3.bf16.msra.mxu1 %v6572_v0 }
0x153b   :  { %5684 = vmatprep.subr.bf16.mxu1 %v6098_v36 }
0x153e   :  { %5686 = vmatpush3.bf16.msra.mxu1 %v6578_v2 }
0x153f   :  { %5687 = vmatprep.subr.bf16.mxu1 %v6098_v36 }
0x1542   :  { %5689 = vmatpush3.bf16.msra.mxu1 %v6588_v8 }
0x1543   :  { %5690 = vmatprep.subr.bf16.mxu1 %v6098_v36 }
0x1546   :  { %5692 = vmatpush3.bf16.msra.mxu1 %v6598_v13 }
0x1547   :  { %5710 = vmatprep.subr.bf16.mxu1 %v6530_v5 }
0x1600   :  { %v1616_v49 = vpop.f32.mrb[16].mxu1 }
0x1601   :  { %v5304_v51 = vpop.f32.mrb[17].mxu1  ;;  %4874 = vmatmul.mubr.msk.f32.vlgmr.msra.gmra.mrb[26].mxu0 %vm76_vm0, %v1616_v49 }
0x1602   :  { %5680 = vmatpush1.bf16.msra.mxu0 %v6539_v47  ;;  %2283 = vmatprep.mubr.f32.mxu0 %v6096_v3 }
0x1603   :  { %5694 = vmatprep.subr.bf16.mxu0 %v6530_v5 }
0x1605   :  { %2284 = vmatmul.mubr.f32.vlgmr.msra.gmra.mrb[18].mxu0 %v6096_v3 }
0x1606   :  { %5696 = vmatpush1.bf16.msra.mxu0 %v6539_v47  ;;  %2456 = vmatprep.mubr.f32.mxu0 %v6096_v3 }
0x1607   :  { %5697 = vmatprep.subr.bf16.mxu0 %v6098_v36 }
0x16d8   :  { %v2285_v54 = vpop.f32.mrb[18].mxu0 }
0x16d9   :  { %v5829_v55 = vadd.f32 %v2285_v54, %v6554_v53  ;;  %v2287_v18 = vpop.f32.mrb[19].mxu0 }
0x16da   :  { %v5830_v57 = vadd.f32 %v2287_v18, %v6559_v56 }
0x16db   :  { %v4875_v58 = vmul.f32 -1.442695, %v5829_v55 }
0x16dc   :  { %v4876_v14 = vmul.f32 -1.442695, %v5830_v57 }
0x16dd   :  { %5964 = vpow2.f32 %v4875_v58 }
0x16de   :  { %5966 = vtanh.f32 %v5830_v57 }
0x16e7   :  { %v5965_v60 = vpop.eup %5964 }
0x16e8   :  { %v2295_v62 = vadd.f32 1.0, %v5965_v60  ;;  %v5967_v63 = vpop.eup %5966 }
0x16ea   :  { %5968 = vrcp.f32 %v2295_v62 }
0x16eb   :  { %5970 = vpow2.f32 %v4876_v14 }
0x16f4   :  { %v5969_v27 = vpop.eup %5968 }
0x16f5   :  { %v2306_v16 = vmul.f32 %v5969_v27, %v5967_v63  ;;  %v5971_v17 = vpop.eup %5970  ;;  %v2305_v61 = vmul.f32 0.0, %v5969_v27 }
0x16f6   :  { %v2302_v19 = vadd.f32 1.0, %v5971_v17 }
0x16f7   :  { %2308 = vrot.lane.b32.xlu0 %v2306_v16, %s6097_s3 }
0x16f8   :  { %5972 = vrcp.f32 %v2302_v19 }
0x1702   :  { %v5973_v21 = vpop.eup %5972 }
0x1769   :  { %v2309_v33 = vpop.permute.xlu0 %2308 }
0x176a   :  { %v2311_v39 = vadd.f32 %v2309_v33, %v2305_v61 }
0x176c   :  { %5974 = vtanh.f32 %v2311_v39 }
0x1776   :  { %v5975_v40 = vpop.eup %5974 }
0x1777   :  { %v2313_v22 = vmul.f32 %v5975_v40, %v5973_v21 }
0x1779   :  { %2315 = vrot.lane.b32.xlu1 %v2313_v22, %s6097_s3 }
0x17eb   :  { %v2316_v23 = vpop.permute.xlu1 %2315 }
0x17ec   :  { %5322 = vmatmul.mubr.msk.f32.vlgmr.msra.gmra.mrb[24].mxu1 %vm273_vm2, %v2316_v23 }
0x17ed   :  { %5712 = vmatpush1.bf16.msra.mxu1 %v6539_v47  ;;  %2629 = vmatprep.mubr.f32.mxu1 %v6096_v3 }
0x17ee   :  { %5713 = vmatprep.subr.bf16.mxu1 %v6098_v36 }
0x18bf   :  { %v6608_v25 = vpop.f32.mrb[24].mxu1 }
0x18c0   :  { %v5323_v42 = vpop.f32.mrb[25].mxu1  ;;  %4878 = vmatmul.mubr.msk.f32.vlgmr.msra.gmra.mrb[20].mxu0 %vm76_vm0, %v6608_v25 }
0x18c1   :  { %5699 = vmatpush3.bf16.msra.mxu0 %v6572_v0  ;;  %5340 = vmatprep.mubr.msk.f32.mxu0 %vm6099_vm1, %v6096_v3 }
0x18c2   :  { %5700 = vmatprep.subr.bf16.mxu0 %v6098_v36 }
0x18c5   :  { %5702 = vmatpush3.bf16.msra.mxu0 %v6578_v2 }
0x18c6   :  { %5703 = vmatprep.subr.bf16.mxu0 %v6098_v36 }
0x18c9   :  { %5705 = vmatpush3.bf16.msra.mxu0 %v6588_v8 }
0x18ca   :  { %5706 = vmatprep.subr.bf16.mxu0 %v6098_v36 }
0x18cd   :  { %5708 = vmatpush3.bf16.msra.mxu0 %v6598_v13 }
0x18ce   :  { %5726 = vmatprep.subr.bf16.mxu0 %v6530_v5 }
0x1993   :  { %v2458_v26 = vpop.f32.mrb[20].mxu0 }
0x1994   :  { %v5831_v29 = vadd.f32 %v2458_v26, %v6554_v53  ;;  %v2460_v45 = vpop.f32.mrb[21].mxu0 }
0x1995   :  { %v5832_v48 = vadd.f32 %v2460_v45, %v6559_v56 }
0x1996   :  { %v4879_v9 = vmul.f32 -1.442695, %v5831_v29 }
0x1997   :  { %v4880_v28 = vmul.f32 -1.442695, %v5832_v48 }
0x1998   :  { %5976 = vpow2.f32 %v4879_v9 }
0x1999   :  { %5978 = vtanh.f32 %v5832_v48 }
0x19a2   :  { %v5977_v30 = vpop.eup %5976 }
0x19a3   :  { %v2468_v20 = vadd.f32 1.0, %v5977_v30  ;;  %v5979_v31 = vpop.eup %5978 }
0x19a5   :  { %5980 = vrcp.f32 %v2468_v20 }
0x19a6   :  { %5982 = vpow2.f32 %v4880_v28 }
0x19af   :  { %v5981_v43 = vpop.eup %5980 }
0x19b0   :  { %v2479_v32 = vmul.f32 %v5981_v43, %v5979_v31  ;;  %v5983_v34 = vpop.eup %5982  ;;  %v2478_v35 = vmul.f32 %v5981_v43, %v2311_v39 }
0x19b1   :  { %v2475_v50 = vadd.f32 1.0, %v5983_v34 }
0x19b2   :  { %2481 = vrot.lane.b32.xlu0 %v2479_v32, %s6097_s3 }
0x19b3   :  { %5984 = vrcp.f32 %v2475_v50 }
0x19bd   :  { %v5985_v41 = vpop.eup %5984 }
0x1a24   :  { %v2482_v37 = vpop.permute.xlu0 %2481 }
0x1a25   :  { %v2484_v38 = vadd.f32 %v2482_v37, %v2478_v35 }
0x1a27   :  { %5986 = vtanh.f32 %v2484_v38 }
0x1a31   :  { %v5987_v4 = vpop.eup %5986 }
0x1a32   :  { %v2486_v44 = vmul.f32 %v5987_v4, %v5985_v41 }
0x1a34   :  { %2488 = vrot.lane.b32.xlu1 %v2486_v44, %s6097_s3 }
0x1aa6   :  { %v2489_v12 = vpop.permute.xlu1 %2488 }
0x1aa7   :  { %5341 = vmatmul.mubr.msk.f32.vlgmr.msra.gmra.mrb[28].mxu0 %vm273_vm2, %v2489_v12 }
0x1aa8   :  { %5728 = vmatpush1.bf16.msra.mxu0 %v6539_v47  ;;  %2802 = vmatprep.mubr.f32.mxu0 %v6096_v3 }
0x1aa9   :  { %5729 = vmatprep.subr.bf16.mxu0 %v6098_v36 }
0x1b7a   :  { %v6630_v46 = vpop.f32.mrb[28].mxu0 }
0x1b7b   :  { %v5342_v49 = vpop.f32.mrb[29].mxu0  ;;  %4882 = vmatmul.mubr.msk.f32.vlgmr.msra.gmra.mrb[18].mxu1 %vm76_vm0, %v6630_v46 }
0x1b7c   :  { %5715 = vmatpush3.bf16.msra.mxu1 %v6572_v0  ;;  %5359 = vmatprep.mubr.msk.f32.mxu1 %vm6099_vm1, %v6096_v3 }
0x1b7d   :  { %5716 = vmatprep.subr.bf16.mxu1 %v6098_v36 }
0x1b80   :  { %5718 = vmatpush3.bf16.msra.mxu1 %v6578_v2 }
0x1b81   :  { %5719 = vmatprep.subr.bf16.mxu1 %v6098_v36 }
0x1b84   :  { %5721 = vmatpush3.bf16.msra.mxu1 %v6588_v8 }
0x1b85   :  { %5722 = vmatprep.subr.bf16.mxu1 %v6098_v36 }
0x1b88   :  { %5724 = vmatpush3.bf16.msra.mxu1 %v6598_v13 }
0x1b89   :  { %5742 = vmatprep.subr.bf16.mxu1 %v6530_v5 }
0x1c4e   :  { %v2631_v51 = vpop.f32.mrb[18].mxu1 }
0x1c4f   :  { %v5833_v52 = vadd.f32 %v2631_v51, %v6554_v53  ;;  %v2633_v54 = vpop.f32.mrb[19].mxu1 }
0x1c50   :  { %v5834_v18 = vadd.f32 %v2633_v54, %v6559_v56 }
0x1c51   :  { %v4883_v55 = vmul.f32 -1.442695, %v5833_v52 }
0x1c52   :  { %v4884_v27 = vmul.f32 -1.442695, %v5834_v18 }
0x1c53   :  { %5988 = vpow2.f32 %v4883_v55 }
0x1c54   :  { %5990 = vtanh.f32 %v5834_v18 }
0x1c5d   :  { %v5989_v58 = vpop.eup %5988 }
0x1c5e   :  { %v2641_v57 = vadd.f32 1.0, %v5989_v58  ;;  %v5991_v60 = vpop.eup %5990 }
0x1c60   :  { %5992 = vrcp.f32 %v2641_v57 }
0x1c61   :  { %5994 = vpow2.f32 %v4884_v27 }
0x1c6a   :  { %v5993_v62 = vpop.eup %5992 }
0x1c6b   :  { %v2652_v63 = vmul.f32 %v5993_v62, %v5991_v60  ;;  %v5995_v16 = vpop.eup %5994  ;;  %v2651_v15 = vmul.f32 %v5993_v62, %v2484_v38 }
0x1c6c   :  { %v2648_v59 = vadd.f32 1.0, %v5995_v16 }
0x1c6d   :  { %2654 = vrot.lane.b32.xlu0 %v2652_v63, %s6097_s3 }
0x1c6e   :  { %5996 = vrcp.f32 %v2648_v59 }
0x1c78   :  { %v5997_v6 = vpop.eup %5996 }
0x1cdf   :  { %v2655_v24 = vpop.permute.xlu0 %2654 }
0x1ce0   :  { %v2657_v1 = vadd.f32 %v2655_v24, %v2651_v15 }
0x1ce2   :  { %5998 = vtanh.f32 %v2657_v1 }
0x1cec   :  { %v5999_v7 = vpop.eup %5998 }
0x1ced   :  { %v2659_v10 = vmul.f32 %v5999_v7, %v5997_v6 }
0x1cef   :  { %2661 = vrot.lane.b32.xlu1 %v2659_v10, %s6097_s3 }
0x1d61   :  { %v2662_v11 = vpop.permute.xlu1 %2661 }
0x1d62   :  { %5360 = vmatmul.mubr.msk.f32.vlgmr.msra.gmra.mrb[26].mxu1 %vm273_vm2, %v2662_v11 }
0x1d63   :  { %5744 = vmatpush1.bf16.msra.mxu1 %v6539_v47  ;;  %2975 = vmatprep.mubr.f32.mxu1 %v6096_v3 }
0x1d64   :  { %5745 = vmatprep.subr.bf16.mxu1 %v6098_v36 }
0x1e35   :  { %v6652_v14 = vpop.f32.mrb[26].mxu1 }
0x1e36   :  { %v5361_v17 = vpop.f32.mrb[27].mxu1  ;;  %4886 = vmatmul.mubr.msk.f32.vlgmr.msra.gmra.mrb[22].mxu0 %vm76_vm0, %v6652_v14 }
0x1e37   :  { %5731 = vmatpush3.bf16.msra.mxu0 %v6572_v0  ;;  %5378 = vmatprep.mubr.msk.f32.mxu0 %vm6099_vm1, %v6096_v3 }
0x1e38   :  { %5732 = vmatprep.subr.bf16.mxu0 %v6098_v36 }
0x1e3b   :  { %5734 = vmatpush3.bf16.msra.mxu0 %v6578_v2 }
0x1e3c   :  { %5735 = vmatprep.subr.bf16.mxu0 %v6098_v36 }
0x1e3f   :  { %5737 = vmatpush3.bf16.msra.mxu0 %v6588_v8 }
0x1e40   :  { %5738 = vmatprep.subr.bf16.mxu0 %v6098_v36 }
0x1e43   :  { %5740 = vmatpush3.bf16.msra.mxu0 %v6598_v13 }
0x1e44   :  { %5758 = vmatprep.subr.bf16.mxu0 %v6530_v5 }
0x1f09   :  { %v2804_v19 = vpop.f32.mrb[22].mxu0 }
0x1f0a   :  { %v5835_v61 = vadd.f32 %v2804_v19, %v6554_v53  ;;  %v2806_v33 = vpop.f32.mrb[23].mxu0 }
0x1f0b   :  { %v5836_v21 = vadd.f32 %v2806_v33, %v6559_v56 }
0x1f0c   :  { %v4887_v39 = vmul.f32 -1.442695, %v5835_v61 }
0x1f0d   :  { %v4888_v29 = vmul.f32 -1.442695, %v5836_v21 }
0x1f0e   :  { %6000 = vpow2.f32 %v4887_v39 }
0x1f0f   :  { %6002 = vtanh.f32 %v5836_v21 }
0x1f18   :  { %v6001_v40 = vpop.eup %6000 }
0x1f19   :  { %v2814_v22 = vadd.f32 1.0, %v6001_v40  ;;  %v6003_v23 = vpop.eup %6002 }
0x1f1b   :  { %6004 = vrcp.f32 %v2814_v22 }
0x1f1c   :  { %6006 = vpow2.f32 %v4888_v29 }
0x1f25   :  { %v6005_v42 = vpop.eup %6004 }
0x1f26   :  { %v2825_v26 = vmul.f32 %v6005_v42, %v6003_v23  ;;  %v6007_v45 = vpop.eup %6006  ;;  %v2824_v48 = vmul.f32 %v6005_v42, %v2657_v1 }
0x1f27   :  { %v2821_v9 = vadd.f32 1.0, %v6007_v45 }
0x1f28   :  { %2827 = vrot.lane.b32.xlu0 %v2825_v26, %s6097_s3 }
0x1f29   :  { %6008 = vrcp.f32 %v2821_v9 }
0x1f33   :  { %v6009_v31 = vpop.eup %6008 }
0x1f9a   :  { %v2828_v30 = vpop.permute.xlu0 %2827 }
0x1f9b   :  { %v2830_v20 = vadd.f32 %v2828_v30, %v2824_v48 }
0x1f9d   :  { %6010 = vtanh.f32 %v2830_v20 }
0x1fa7   :  { %v6011_v43 = vpop.eup %6010 }
0x1fa8   :  { %v2832_v32 = vmul.f32 %v6011_v43, %v6009_v31 }
0x1faa   :  { %2834 = vrot.lane.b32.xlu1 %v2832_v32, %s6097_s3 }
0x201c   :  { %v2835_v28 = vpop.permute.xlu1 %2834 }
0x201d   :  { %5379 = vmatmul.mubr.msk.f32.vlgmr.msra.gmra.mrb[30].mxu0 %vm273_vm2, %v2835_v28 }
0x201e   :  { %5760 = vmatpush1.bf16.msra.mxu0 %v6539_v47  ;;  %3148 = vmatprep.mubr.f32.mxu0 %v6096_v3 }
0x201f   :  { %5761 = vmatprep.subr.bf16.mxu0 %v6098_v36 }
0x20f0   :  { %v6674_v34 = vpop.f32.mrb[30].mxu0 }
0x20f1   :  { %v5380_v50 = vpop.f32.mrb[31].mxu0  ;;  %4890 = vmatmul.mubr.msk.f32.vlgmr.msra.gmra.mrb[20].mxu1 %vm76_vm0, %v6674_v34 }
0x20f2   :  { %5747 = vmatpush3.bf16.msra.mxu1 %v6572_v0  ;;  %5397 = vmatprep.mubr.msk.f32.mxu1 %vm6099_vm1, %v6096_v3 }
0x20f3   :  { %5748 = vmatprep.subr.bf16.mxu1 %v6098_v36 }
0x20f6   :  { %5750 = vmatpush3.bf16.msra.mxu1 %v6578_v2 }
0x20f7   :  { %5751 = vmatprep.subr.bf16.mxu1 %v6098_v36 }
0x20fa   :  { %5753 = vmatpush3.bf16.msra.mxu1 %v6588_v8 }
0x20fb   :  { %5754 = vmatprep.subr.bf16.mxu1 %v6098_v36 }
0x20fe   :  { %5756 = vmatpush3.bf16.msra.mxu1 %v6598_v13 }
0x20ff   :  { %5774 = vmatprep.subr.bf16.mxu1 %v6530_v5 }
0x21c4   :  { %v2977_v35 = vpop.f32.mrb[20].mxu1 }
0x21c5   :  { %v5837_v37 = vadd.f32 %v2977_v35, %v6554_v53  ;;  %v2979_v38 = vpop.f32.mrb[21].mxu1 }
0x21c6   :  { %v5838_v4 = vadd.f32 %v2979_v38, %v6559_v56 }
0x21c7   :  { %v4891_v41 = vmul.f32 -1.442695, %v5837_v37 }
0x21c8   :  { %v4892_v54 = vmul.f32 -1.442695, %v5838_v4 }
0x21c9   :  { %6012 = vpow2.f32 %v4891_v41 }
0x21ca   :  { %6014 = vtanh.f32 %v5838_v4 }
0x21d3   :  { %v6013_v44 = vpop.eup %6012 }
0x21d4   :  { %v2987_v12 = vadd.f32 1.0, %v6013_v44  ;;  %v6015_v49 = vpop.eup %6014 }
0x21d6   :  { %6016 = vrcp.f32 %v2987_v12 }
0x21d7   :  { %6018 = vpow2.f32 %v4892_v54 }
0x21e0   :  { %v6017_v51 = vpop.eup %6016 }
0x21e1   :  { %v2998_v52 = vmul.f32 %v6017_v51, %v6015_v49  ;;  %v6019_v55 = vpop.eup %6018  ;;  %v2997_v58 = vmul.f32 %v6017_v51, %v2830_v20 }
0x21e2   :  { %v2994_v18 = vadd.f32 1.0, %v6019_v55 }
0x21e3   :  { %3000 = vrot.lane.b32.xlu0 %v2998_v52, %s6097_s3 }
0x21e4   :  { %6020 = vrcp.f32 %v2994_v18 }
0x21ee   :  { %v6021_v62 = vpop.eup %6020 }
0x2255   :  { %v3001_v57 = vpop.permute.xlu0 %3000 }
0x2256   :  { %v3003_v60 = vadd.f32 %v3001_v57, %v2997_v58 }
0x2258   :  { %6022 = vtanh.f32 %v3003_v60 }
0x2262   :  { %v6023_v63 = vpop.eup %6022 }
0x2263   :  { %v3005_v27 = vmul.f32 %v6023_v63, %v6021_v62 }
0x2265   :  { %3007 = vrot.lane.b32.xlu1 %v3005_v27, %s6097_s3 }
0x22d7   :  { %v3008_v16 = vpop.permute.xlu1 %3007 }
0x22d8   :  { %5398 = vmatmul.mubr.msk.f32.vlgmr.msra.gmra.mrb[28].mxu1 %vm273_vm2, %v3008_v16 }
0x22d9   :  { %5776 = vmatpush1.bf16.msra.mxu1 %v6539_v47  ;;  %3321 = vmatprep.mubr.f32.mxu1 %v6096_v3 }
0x22da   :  { %5777 = vmatprep.subr.bf16.mxu1 %v6098_v36 }
0x23ab   :  { %v6696_v59 = vpop.f32.mrb[28].mxu1 }
0x23ac   :  { %v5399_v15 = vpop.f32.mrb[29].mxu1  ;;  %4894 = vmatmul.mubr.msk.f32.vlgmr.msra.gmra.mrb[24].mxu0 %vm76_vm0, %v6696_v59 }
0x23ad   :  { %5763 = vmatpush3.bf16.msra.mxu0 %v6572_v0  ;;  %5416 = vmatprep.mubr.msk.f32.mxu0 %vm6099_vm1, %v6096_v3 }
0x23ae   :  { %5764 = vmatprep.subr.bf16.mxu0 %v6098_v36 }
0x23b1   :  { %5766 = vmatpush3.bf16.msra.mxu0 %v6578_v2 }
0x23b2   :  { %5767 = vmatprep.subr.bf16.mxu0 %v6098_v36 }
0x23b5   :  { %5769 = vmatpush3.bf16.msra.mxu0 %v6588_v8 }
0x23b6   :  { %5770 = vmatprep.subr.bf16.mxu0 %v6098_v36 }
0x23b9   :  { %5772 = vmatpush3.bf16.msra.mxu0 %v6598_v13 }
0x23ba   :  { %5790 = vmatprep.subr.bf16.mxu0 %v6530_v5 }
0x247f   :  { %v3150_v24 = vpop.f32.mrb[24].mxu0 }
0x2480   :  { %v5839_v1 = vadd.f32 %v3150_v24, %v6554_v53  ;;  %v3152_v6 = vpop.f32.mrb[25].mxu0 }
0x2481   :  { %v5840_v10 = vadd.f32 %v3152_v6, %v6559_v56 }
0x2482   :  { %v4895_v7 = vmul.f32 -1.442695, %v5839_v1 }
0x2483   :  { %v4896_v39 = vmul.f32 -1.442695, %v5840_v10 }
0x2484   :  { %6024 = vpow2.f32 %v4895_v7 }
0x2485   :  { %6026 = vtanh.f32 %v5840_v10 }
0x248e   :  { %v6025_v11 = vpop.eup %6024 }
0x248f   :  { %v3160_v17 = vadd.f32 1.0, %v6025_v11  ;;  %v6027_v19 = vpop.eup %6026 }
0x2491   :  { %6028 = vrcp.f32 %v3160_v17 }
0x2492   :  { %6030 = vpow2.f32 %v4896_v39  ;;  %v3605_v39 = vsel %vm3600_vm3, %v6630_v46, 0.0 }
0x249b   :  { %v6029_v61 = vpop.eup %6028 }
0x249c   :  { %v3171_v33 = vmul.f32 %v6029_v61, %v6027_v19  ;;  %v6031_v5 = vpop.eup %6030  ;;  %v3170_v40 = vmul.f32 %v6029_v61, %v3003_v60 }
0x249d   :  { %v3167_v21 = vadd.f32 1.0, %v6031_v5  ;;  %v3617_v5 = vsel %vm3600_vm3, %v6696_v59, 0.0 }
0x249e   :  { %3173 = vrot.lane.b32.xlu0 %v3171_v33, %s6097_s3 }
0x249f   :  { %6032 = vrcp.f32 %v3167_v21 }
0x24a9   :  { %v6033_v42 = vpop.eup %6032 }
0x2510   :  { %v3174_v22 = vpop.permute.xlu0 %3173 }
0x2511   :  { %v3176_v23 = vadd.f32 %v3174_v22, %v3170_v40 }
0x2513   :  { %6034 = vtanh.f32 %v3176_v23 }
0x251d   :  { %v6035_v26 = vpop.eup %6034 }
0x251e   :  { %v3178_v29 = vmul.f32 %v6035_v26, %v6033_v42 }
0x2520   :  { %3180 = vrot.lane.b32.xlu1 %v3178_v29, %s6097_s3 }
0x2592   :  { %v3181_v45 = vpop.permute.xlu1 %3180 }
0x2593   :  { %5417 = vmatmul.mubr.msk.f32.vlgmr.msra.gmra.mrb[32].mxu0 %vm273_vm2, %v3181_v45 }
0x2594   :  { %5792 = vmatpush1.bf16.msra.mxu0 %v6539_v47  ;;  %3494 = vmatprep.mubr.f32.mxu0 %v6096_v3 }
0x2595   :  { %5793 = vmatprep.subr.bf16.mxu0 %v6098_v36 }
0x2666   :  { %v6718_v9 = vpop.f32.mrb[32].mxu0 }
0x2667   :  { %v5418_v48 = vpop.f32.mrb[33].mxu0  ;;  %4898 = vmatmul.mubr.msk.f32.vlgmr.msra.gmra.mrb[22].mxu1 %vm76_vm0, %v6718_v9  ;;  %v3621_v24 = vsel %vm3600_vm3, %v6718_v9, 0.0 }
0x2668   :  { %5779 = vmatpush3.bf16.msra.mxu1 %v6572_v0  ;;  %5435 = vmatprep.mubr.msk.f32.mxu1 %vm6099_vm1, %v6096_v3 }
0x2669   :  { %5780 = vmatprep.subr.bf16.mxu1 %v6098_v36 }
0x266c   :  { %5782 = vmatpush3.bf16.msra.mxu1 %v6578_v2 }
0x266d   :  { %5783 = vmatprep.subr.bf16.mxu1 %v6098_v36 }
0x2670   :  { %5785 = vmatpush3.bf16.msra.mxu1 %v6588_v8 }
0x2671   :  { %5786 = vmatprep.subr.bf16.mxu1 %v6098_v36 }
0x2674   :  { %5788 = vmatpush3.bf16.msra.mxu1 %v6598_v13 }
0x2675   :  { %5805 = vmatprep.subr.bf16.mxu1 %v6098_v36 }
0x273a   :  { %v3323_v47 = vpop.f32.mrb[22].mxu1 }
0x273b   :  { %v5841_v30 = vadd.f32 %v3323_v47, %v6554_v53  ;;  %v3325_v20 = vpop.f32.mrb[23].mxu1 }
0x273c   :  { %v5842_v43 = vadd.f32 %v3325_v20, %v6559_v56 }
0x273d   :  { %v4899_v31 = vmul.f32 -1.442695, %v5841_v30 }
0x273e   :  { %v4900_v38 = vmul.f32 -1.442695, %v5842_v43 }
0x273f   :  { %6036 = vpow2.f32 %v4899_v31 }
0x2740   :  { %6038 = vtanh.f32 %v5842_v43 }
0x2749   :  { %v6037_v32 = vpop.eup %6036 }
0x274a   :  { %v3333_v28 = vadd.f32 1.0, %v6037_v32  ;;  %v6039_v50 = vpop.eup %6038 }
0x274c   :  { %6040 = vrcp.f32 %v3333_v28 }
0x274d   :  { %6042 = vpow2.f32 %v4900_v38 }
0x2756   :  { %v6041_v35 = vpop.eup %6040 }
0x2757   :  { %v3344_v37 = vmul.f32 %v6041_v35, %v6039_v50  ;;  %v6043_v41 = vpop.eup %6042  ;;  %v3343_v44 = vmul.f32 %v6041_v35, %v3176_v23 }
0x2758   :  { %v3340_v4 = vadd.f32 1.0, %v6043_v41 }
0x2759   :  { %3346 = vrot.lane.b32.xlu0 %v3344_v37, %s6097_s3 }
0x275a   :  { %6044 = vrcp.f32 %v3340_v4 }
0x2764   :  { %v6045_v51 = vpop.eup %6044 }
0x27cb   :  { %v3347_v12 = vpop.permute.xlu0 %3346 }
0x27cc   :  { %v3349_v49 = vadd.f32 %v3347_v12, %v3343_v44 }
0x27ce   :  { %6046 = vtanh.f32 %v3349_v49 }
0x27d8   :  { %v6047_v52 = vpop.eup %6046 }
0x27d9   :  { %v3351_v54 = vmul.f32 %v6047_v52, %v6045_v51 }
0x27db   :  { %3353 = vrot.lane.b32.xlu1 %v3351_v54, %s6097_s3 }
0x284d   :  { %v3354_v55 = vpop.permute.xlu1 %3353 }
0x284e   :  { %5436 = vmatmul.mubr.msk.f32.vlgmr.msra.gmra.mrb[30].mxu1 %vm273_vm2, %v3354_v55 }
0x284f   :  { %5461 = vmatprep.mubr.msk.f32.mxu1 %vm6099_vm1, %v6096_v3 }
0x2921   :  { %v6739_v18 = vpop.f32.mrb[30].mxu1 }
0x2922   :  { %v5437_v58 = vpop.f32.mrb[31].mxu1  ;;  %4902 = vmatmul.mubr.msk.f32.vlgmr.msra.gmra.mrb[26].mxu0 %vm76_vm0, %v6739_v18  ;;  %v3625_v21 = vsel %vm3600_vm3, %v6739_v18, 0.0 }
0x2923   :  { %5795 = vmatpush3.bf16.msra.mxu0 %v6572_v0  ;;  %5454 = vmatprep.mubr.msk.f32.mxu0 %vm6099_vm1, %v6096_v3 }
0x2924   :  { %5796 = vmatprep.subr.bf16.mxu0 %v6098_v36 }
0x2927   :  { %5798 = vmatpush3.bf16.msra.mxu0 %v6578_v2 }
0x2928   :  { %5799 = vmatprep.subr.bf16.mxu0 %v6098_v36 }
0x292b   :  { %5801 = vmatpush3.bf16.msra.mxu0 %v6588_v8 }
0x292c   :  { %5802 = vmatprep.subr.bf16.mxu0 %v6098_v36 }
0x292f   :  { %5804 = vmatpush3.bf16.msra.mxu0 %v6598_v13  ;;  %v3601_v13 = vsel %vm3600_vm3, %v6608_v25, 0.0 }
0x2930   :  { %5814 = vmatprep.subr.bf16.mxu0 %v6098_v36 }
0x29f5   :  { %v3496_v57 = vpop.f32.mrb[26].mxu0 }
0x29f6   :  { %v5843_v0 = vadd.f32 %v3496_v57, %v6554_v53  ;;  %v3498_v60 = vpop.f32.mrb[27].mxu0  ;;  %v3609_v53 = vsel %vm3600_vm3, %v6652_v14, 0.0 }
0x29f7   :  { %v5844_v63 = vadd.f32 %v3498_v60, %v6559_v56  ;;  %v3613_v56 = vsel %vm3600_vm3, %v6674_v34, 0.0 }
0x29f8   :  { %v4903_v62 = vmul.f32 -1.442695, %v5843_v0 }
0x29f9   :  { %v4904_v1 = vmul.f32 -1.442695, %v5844_v63 }
0x29fa   :  { %6048 = vpow2.f32 %v4903_v62 }
0x29fb   :  { %6050 = vtanh.f32 %v5844_v63 }
0x2a04   :  { %v6049_v27 = vpop.eup %6048 }
0x2a05   :  { %v3506_v2 = vadd.f32 1.0, %v6049_v27  ;;  %v6051_v16 = vpop.eup %6050 }
0x2a07   :  { %6052 = vrcp.f32 %v3506_v2 }
0x2a08   :  { %6054 = vpow2.f32 %v4904_v1 }
0x2a11   :  { %v6053_v8 = vpop.eup %6052 }
0x2a12   :  { %v3517_v15 = vmul.f32 %v6053_v8, %v6051_v16  ;;  %v6055_v6 = vpop.eup %6054  ;;  %v3516_v10 = vmul.f32 %v6053_v8, %v3349_v49 }
0x2a13   :  { %v3513_v7 = vadd.f32 1.0, %v6055_v6  ;;  %v3686_v6 = vld [vmem:[%s7026_s11] sm:$0xff] }
0x2a14   :  { %3519 = vrot.lane.b32.xlu0 %v3517_v15, %s6097_s3 }
0x2a15   :  { %6056 = vrcp.f32 %v3513_v7  ;;  %v3687_v7 = vld [vmem:[%s7026_s11 + $0x8] sm:$0xff] }
0x2a1f   :  { %v6057_v19 = vpop.eup %6056 }
0x2a33   :  { %3602 = vadd.xlane.f32.xlu0 %v3601_v13 }
0x2a37   :  { %3610 = vadd.xlane.f32.xlu0 %v3609_v53 }
0x2a3b   :  { %3614 = vadd.xlane.f32.xlu0 %v3613_v56 }
0x2a3f   :  { %3622 = vadd.xlane.f32.xlu0 %v3621_v24 }
0x2a86   :  { %v3520_v11 = vpop.permute.xlu0 %3519 }
0x2a87   :  { %v3522_v17 = vadd.f32 %v3520_v11, %v3516_v10  ;;  %v6820_v10 = vpack.c.bf16 %v3687_v7, %v3686_v6 }
0x2a89   :  { %6058 = vtanh.f32 %v3522_v17  ;;  %5807 = vmatpush3.bf16.msra.mxu1 %v6820_v10 }
0x2a8a   :  { %5808 = vmatprep.subr.bf16.mxu1 %v6098_v36 }
0x2a93   :  { %v6059_v61 = vpop.eup %6058 }
0x2a94   :  { %v3524_v33 = vmul.f32 %v6059_v61, %v6057_v19 }
0x2a96   :  { %3526 = vrot.lane.b32.xlu1 %v3524_v33, %s6097_s3 }
0x2aba   :  { %3606 = vadd.xlane.f32.xlu1 %v3605_v39 }
0x2abe   :  { %3618 = vadd.xlane.f32.xlu1 %v3617_v5 }
0x2ac0   :  { %v3603_v26 = vpop.xlane.xlu0 %3602 }
0x2ac2   :  { %3626 = vadd.xlane.f32.xlu1 %v3625_v21 }
0x2ac4   :  { %v3611_v48 = vpop.xlane.xlu0 %3610 }
0x2ac8   :  { %v3615_v30 = vpop.xlane.xlu0 %3614 }
0x2acc   :  { %v3623_v32 = vpop.xlane.xlu0 %3622 }
0x2b08   :  { %v3527_v40 = vpop.permute.xlu1 %3526 }
0x2b09   :  { %5455 = vmatmul.mubr.msk.f32.vlgmr.msra.gmra.mrb[34].mxu0 %vm273_vm2, %v3527_v40 }
0x2b0a   :  { %5482 = vmatprep.mubr.msk.f32.mxu0 %vm6099_vm1, %v6096_v3  ;;  %5816 = vmatpush3.bf16.msra.mxu0 %v6820_v10 }
0x2b0b   :  { %5820 = vmatprep.subr.bf16.mxu0 %v6098_v36 }
0x2b47   :  { %v3607_v29 = vpop.xlane.xlu1 %3606 }
0x2b48   :  { %v3608_v45 = vadd.f32 %v3607_v29, %v3603_v26 }
0x2b4a   :  { %v3612_v47 = vadd.f32 %v3611_v48, %v3608_v45 }
0x2b4b   :  { %v3619_v31 = vpop.xlane.xlu1 %3618 }
0x2b4c   :  { %v3616_v20 = vadd.f32 %v3615_v30, %v3612_v47 }
0x2b4e   :  { %v3620_v43 = vadd.f32 %v3619_v31, %v3616_v20  ;;  %v4906_v31 = vld [vmem:[%s7027_s9] ss:$0 sm:$0xff] }
0x2b4f   :  { %v3627_v50 = vpop.xlane.xlu1 %3626 }
0x2b50   :  { %v3624_v28 = vadd.f32 %v3623_v32, %v3620_v43  ;;  %v4921_v43 = vld [vmem:[%s7027_s9 + $0x3] ss:$0 sm:$0xff] }
0x2b52   :  { %v3628_v35 = vadd.f32 %v3627_v50, %v3624_v28  ;;  %v4907_v28 = vld [vmem:[%s7028_s10] ss:$0 sm:$0xff] }
0x2bdc   :  { %v6774_v22 = vpop.f32.mrb[34].mxu0 }
0x2bdd   :  { %v5456_v23 = vpop.f32.mrb[35].mxu0  ;;  %v3629_v42 = vsel %vm3600_vm3, %v6774_v22, 0.0 }
0x2bde   :  { %3630 = vadd.xlane.f32.xlu0 %v3629_v42 }
0x2c6b   :  { %v3631_v37 = vpop.xlane.xlu0 %3630 }
0x2c6c   :  { %v3632_v38 = vadd.f32 %v3631_v37, %v3628_v35 }
0x2c6e   :  { %v3634_v41 = vmul.f32 0.0078125, %v3632_v38  ;;  %v4923_v38 = vld [vmem:[%s7028_s10 + $0x3] ss:$0 sm:$0xff] }
0x2c70   :  { %v6779_v4 = vsub.f32 %v6630_v46, %v3634_v41  ;;  %v3635_v44 = vsub.f32 %v6608_v25, %v3634_v41  ;;  %v6783_v12 = vsub.f32 %v6674_v34, %v3634_v41  ;;  %v6786_v49 = vsub.f32 %v6652_v14, %v3634_v41 }
0x2c71   :  { %v3665_v54 = vsub.f32 %v6718_v9, %v3634_v41  ;;  %v6792_v55 = vsub.f32 %v6696_v59, %v3634_v41  ;;  %v3677_v62 = vsub.f32 %v6774_v22, %v3634_v41  ;;  %v6802_v63 = vsub.f32 %v6739_v18, %v3634_v41  ;;  %v4911_v41 = vld [vmem:[%s7027_s9 + $0x1] ss:$0 sm:$0xff] }
0x2c72   :  { %v3642_v51 = vmul.f32 %v6779_v4, %v6779_v4  ;;  %v3636_v52 = vmul.f32 %v3635_v44, %v3635_v44  ;;  %v3654_v0 = vmul.f32 %v6783_v12, %v6783_v12  ;;  %v3648_v60 = vmul.f32 %v6786_v49, %v6786_v49 }
0x2c73   :  { %v3666_v16 = vmul.f32 %v3665_v54, %v3665_v54  ;;  %v3660_v8 = vmul.f32 %v6792_v55, %v6792_v55  ;;  %v3678_v53 = vmul.f32 %v3677_v62, %v3677_v62  ;;  %v3672_v56 = vmul.f32 %v6802_v63, %v6802_v63 }
0x2c74   :  { %v3643_v58 = vsel %vm3600_vm3, %v3642_v51, 0.0  ;;  %v3637_v57 = vsel %vm3600_vm3, %v3636_v52, 0.0  ;;  %v3655_v27 = vsel %vm3600_vm3, %v3654_v0, 0.0  ;;  %v3649_v2 = vsel %vm3600_vm3, %v3648_v60, 0.0  ;;  %v4916_v60 = vld [vmem:[%s7027_s9 + $0x2] ss:$0 sm:$0xff] }
0x2c75   :  { %3644 = vadd.xlane.f32.xlu0 %v3643_v58  ;;  %3638 = vadd.xlane.f32.xlu1 %v3637_v57  ;;  %v3667_v15 = vsel %vm3600_vm3, %v3666_v16, 0.0  ;;  %v3661_v13 = vsel %vm3600_vm3, %v3660_v8, 0.0  ;;  %v3679_v24 = vsel %vm3600_vm3, %v3678_v53, 0.0  ;;  %v3673_v1 = vsel %vm3600_vm3, %v3672_v56, 0.0  ;;  %v4918_v53 = vld [vmem:[%s7028_s10 + $0x2] ss:$0 sm:$0xff] }
0x2c76   :  { %v4926_v56 = vld [vmem:[%s7027_s9 + $0x4] ss:$0 sm:$0xff] }
0x2c79   :  { %3656 = vadd.xlane.f32.xlu0 %v3655_v27  ;;  %3650 = vadd.xlane.f32.xlu1 %v3649_v2  ;;  %v4913_v27 = vld [vmem:[%s7028_s10 + $0x1] ss:$0 sm:$0xff]  ;;  %v4933_v2 = vld [vmem:[%s7028_s10 + $0x5] ss:$0 sm:$0xff] }
0x2c7d   :  { %3668 = vadd.xlane.f32.xlu0 %v3667_v15  ;;  %3662 = vadd.xlane.f32.xlu1 %v3661_v13 }
0x2c81   :  { %3680 = vadd.xlane.f32.xlu0 %v3679_v24  ;;  %3674 = vadd.xlane.f32.xlu1 %v3673_v1 }
0x2d02   :  { %v3645_v11 = vpop.xlane.xlu0 %3644  ;;  %v3639_v17 = vpop.xlane.xlu1 %3638 }
0x2d03   :  { %v3646_v19 = vadd.f32 %v3645_v11, %v3639_v17  ;;  %v4928_v11 = vld [vmem:[%s7028_s10 + $0x4] ss:$0 sm:$0xff]  ;;  %v4936_v17 = vld [vmem:[%s7027_s9 + $0x6] ss:$0 sm:$0xff] }
0x2d06   :  { %v3657_v61 = vpop.xlane.xlu0 %3656  ;;  %v3651_v33 = vpop.xlane.xlu1 %3650 }
0x2d07   :  { %v3652_v39 = vadd.f32 %v3651_v33, %v3646_v19 }
0x2d09   :  { %v3658_v5 = vadd.f32 %v3657_v61, %v3652_v39  ;;  %v4938_v61 = vld [vmem:[%s7028_s10 + $0x6] ss:$0 sm:$0xff] }
0x2d0a   :  { %v3669_v21 = vpop.xlane.xlu0 %3668  ;;  %v3663_v40 = vpop.xlane.xlu1 %3662 }
0x2d0b   :  { %v3664_v23 = vadd.f32 %v3663_v40, %v3658_v5 }
0x2d0d   :  { %v3670_v42 = vadd.f32 %v3669_v21, %v3664_v23 }
0x2d0e   :  { %v3675_v26 = vpop.xlane.xlu1 %3674  ;;  %v3681_v45 = vpop.xlane.xlu0 %3680 }
0x2d0f   :  { %v3676_v29 = vadd.f32 %v3675_v26, %v3670_v42 }
0x2d11   :  { %v3682_v48 = vadd.f32 %v3681_v45, %v3676_v29 }
0x2d13   :  { %v3683_v47 = vmul.f32 0.0078125, %v3682_v48 }
0x2d15   :  { %v3684_v30 = vadd.f32 1e-05, %v3683_v47 }
0x2d17   :  { %6060 = vrsqrt.f32 %v3684_v30 }
0x2d21   :  { %v6061_v20 = vpop.eup %6060 }
0x2d22   :  { %v3689_v32 = vmul.f32 %v6061_v20, %v3635_v44  ;;  %v3969_v50 = vmul.f32 %v6061_v20, %v6783_v12  ;;  %v3785_v35 = vmul.f32 %v6061_v20, %v6779_v4  ;;  %v4153_v37 = vmul.f32 %v6061_v20, %v3665_v54  ;;  %v4931_v44 = vld [vmem:[%s7027_s9 + $0x5] ss:$0 sm:$0xff] }
0x2d23   :  { %v3877_v58 = vmul.f32 %v6061_v20, %v6786_v49  ;;  %v4337_v12 = vmul.f32 %v6061_v20, %v3677_v62  ;;  %v4941_v49 = vld [vmem:[%s7027_s9 + $0x7] ss:$0 sm:$0xff]  ;;  %v4061_v16 = vmul.f32 %v6061_v20, %v6792_v55  ;;  %v4245_v24 = vmul.f32 %v6061_v20, %v6802_v63 }
0x2d24   :  { %v3697_v51 = vmul.f32 %v4906_v31, %v3689_v32  ;;  %v3978_v52 = vmul.f32 %v4921_v43, %v3969_v50  ;;  %v3794_v54 = vmul.f32 %v4911_v41, %v3785_v35  ;;  %v4162_v0 = vmul.f32 %v4931_v44, %v4153_v37  ;;  %v4943_v55 = vld [vmem:[%s7028_s10 + $0x7] ss:$0 sm:$0xff] }
0x2d25   :  { %v3886_v62 = vmul.f32 %v4916_v60, %v3877_v58  ;;  %v4346_v13 = vmul.f32 %v4941_v49, %v4337_v12  ;;  %v4070_v7 = vmul.f32 %v4926_v56, %v4061_v16  ;;  %v4254_v19 = vmul.f32 %v4936_v17, %v4245_v24 }
0x2d26   :  { %v3705_v57 = vadd.f32 %v4907_v28, %v3697_v51  ;;  %v3987_v4 = vadd.f32 %v4923_v38, %v3978_v52  ;;  %v3803_v8 = vadd.f32 %v4913_v27, %v3794_v54  ;;  %v4171_v15 = vadd.f32 %v4933_v2, %v4162_v0 }
0x2d27   :  { %v3895_v1 = vadd.f32 %v4918_v53, %v3886_v62  ;;  %v4355_v6 = vadd.f32 %v4943_v55, %v4346_v13  ;;  %v4079_v63 = vadd.f32 %v4928_v11, %v4070_v7  ;;  %v4263_v33 = vadd.f32 %v4938_v61, %v4254_v19 }
0x2d28   :  { %5462 = vmatmul.mubr.msk.f32.vlgmr.msra.gmra.mrb[32].mxu1 %vm76_vm0, %v3705_v57  ;;  %5483 = vmatmul.mubr.msk.f32.vlgmr.msra.gmra.mrb[36].mxu0 %vm76_vm0, %v3987_v4 }
0x2d29   :  { %5810 = vmatpush3.bf16.msra.mxu1 %v6820_v10  ;;  %5822 = vmatpush3.bf16.msra.mxu0 %v6820_v10 }
0x2d2a   :  { %5468 = vmatprep.mubr.msk.f32.mxu1 %vm6099_vm1, %v6096_v3  ;;  %5811 = vmatprep.subr.bf16.mxu1 %v6098_v36 }
0x2d2b   :  { %5496 = vmatprep.mubr.msk.f32.mxu0 %vm6099_vm1, %v6096_v3  ;;  %5826 = vmatprep.subr.bf16.mxu0 %v6098_v36 }
0x2d2c   :  { %5469 = vmatmul.mubr.msk.f32.vlgmr.msra.gmra.mrb[34].mxu1 %vm76_vm0, %v3803_v8  ;;  %5497 = vmatmul.mubr.msk.f32.vlgmr.msra.gmra.mrb[38].mxu0 %vm76_vm0, %v4171_v15 }
0x2d2d   :  { %5813 = vmatpush3.bf16.msra.mxu1 %v6820_v10  ;;  %5828 = vmatpush3.bf16.msra.mxu0 %v6820_v10 }
0x2d2e   :  { %5475 = vmatprep.mubr.msk.f32.mxu1 %vm6099_vm1, %v6096_v3  ;;  %5817 = vmatprep.subr.bf16.mxu1 %v6098_v36 }
0x2d2f   :  { %5510 = vmatprep.mubr.msk.f32.mxu0 %vm6099_vm1, %v6096_v3 }
0x2d30   :  { %5476 = vmatmul.mubr.msk.f32.vlgmr.msra.gmra.mrb[36].mxu1 %vm76_vm0, %v3895_v1  ;;  %5511 = vmatmul.mubr.msk.f32.vlgmr.msra.gmra.mrb[40].mxu0 %vm76_vm0, %v4355_v6 }
0x2d31   :  { %5819 = vmatpush3.bf16.msra.mxu1 %v6820_v10  ;;  %5489 = vmatprep.mubr.msk.f32.mxu1 %vm6099_vm1, %v6096_v3 }
0x2d32   :  { %5823 = vmatprep.subr.bf16.mxu1 %v6098_v36  ;;  %v4908_v36 = vld [vmem:[%s7029_s12] ss:$0 sm:$0xff] }
0x2d34   :  { %5490 = vmatmul.mubr.msk.f32.vlgmr.msra.gmra.mrb[38].mxu1 %vm76_vm0, %v4079_v63 }
0x2d35   :  { %5825 = vmatpush3.bf16.msra.mxu1 %v6820_v10  ;;  %5503 = vmatprep.mubr.msk.f32.mxu1 %vm6099_vm1, %v6096_v3 }
0x2d38   :  { %5504 = vmatmul.mubr.msk.f32.vlgmr.msra.gmra.mrb[40].mxu1 %vm76_vm0, %v4263_v33 }
0x2dfb   :  { %v3781_v39 = vpop.f32.mrb[32].mxu1  ;;  %v4057_v5 = vpop.f32.mrb[36].mxu0 }
0x2dfc   :  { %v3782_v21 = vadd.f32 %v4908_v36, %v3781_v39  ;;  %v5463_v40 = vpop.f32.mrb[33].mxu1  ;;  %v5484_v23 = vpop.f32.mrb[37].mxu0  ;;  %v4058_v48 = vadd.f32 %v4908_v36, %v4057_v5 }
0x2dfe   :  { %v4429_v42 = vsel %vm3600_vm3, %v3782_v21, 0.0  ;;  %v4441_v50 = vsel %vm3600_vm3, %v4058_v48, 0.0 }
0x2dff   :  { %v4241_v26 = vpop.f32.mrb[38].mxu0  ;;  %4430 = vadd.xlane.f32.xlu1 %v4429_v42  ;;  %v3873_v10 = vpop.f32.mrb[34].mxu1 }
0x2e00   :  { %v3874_v29 = vadd.f32 %v4908_v36, %v3873_v10  ;;  %v5470_v45 = vpop.f32.mrb[35].mxu1  ;;  %v5498_v3 = vpop.f32.mrb[39].mxu0  ;;  %v4242_v28 = vadd.f32 %v4908_v36, %v4241_v26 }
0x2e02   :  { %v4433_v47 = vsel %vm3600_vm3, %v3874_v29, 0.0  ;;  %v4449_v51 = vsel %vm3600_vm3, %v4242_v28, 0.0 }
0x2e03   :  { %v4425_v30 = vpop.f32.mrb[40].mxu0  ;;  %4434 = vadd.xlane.f32.xlu0 %v4433_v47  ;;  %v3965_v20 = vpop.f32.mrb[36].mxu1 }
0x2e04   :  { %v3966_v31 = vadd.f32 %v4908_v36, %v3965_v20  ;;  %v5477_v43 = vpop.f32.mrb[37].mxu1  ;;  %v5512_v32 = vpop.f32.mrb[41].mxu0  ;;  %v4426_v44 = vadd.f32 %v4908_v36, %v4425_v30 }
0x2e05   :  { %v22_v43 = vstv %s7030_s16 }
0x2e06   :  { %v4437_v35 = vsel %vm3600_vm3, %v3966_v31, 0.0  ;;  %v4457_v4 = vsel %vm3600_vm3, %v4426_v44, 0.0  ;;  %23 = vst [vmem:[#allocation2] sm:$0x1] %v22_v43 }
0x2e07   :  { %4442 = vadd.xlane.f32.xlu0 %v4441_v50  ;;  %4438 = vadd.xlane.f32.xlu1 %v4437_v35  ;;  %v4149_v37 = vpop.f32.mrb[38].mxu1 }
0x2e08   :  { %v4150_v38 = vadd.f32 %v4908_v36, %v4149_v37  ;;  %v5491_v41 = vpop.f32.mrb[39].mxu1 }
0x2e0a   :  { %v4445_v52 = vsel %vm3600_vm3, %v4150_v38, 0.0 }
0x2e0b   :  { %4450 = vadd.xlane.f32.xlu0 %v4449_v51  ;;  %4446 = vadd.xlane.f32.xlu1 %v4445_v52  ;;  %v4333_v58 = vpop.f32.mrb[40].mxu1 }
0x2e0c   :  { %v4334_v12 = vadd.f32 %v4908_v36, %v4333_v58  ;;  %v5505_v57 = vpop.f32.mrb[41].mxu1 }
0x2e0e   :  { %v4453_v54 = vsel %vm3600_vm3, %v4334_v12, 0.0 }
0x2e0f   :  { %4458 = vadd.xlane.f32.xlu0 %v4457_v4  ;;  %4454 = vadd.xlane.f32.xlu1 %v4453_v54 }
0x2e8c   :  { %v4431_v0 = vpop.xlane.xlu1 %4430 }
0x2e90   :  { %v4435_v60 = vpop.xlane.xlu0 %4434 }
0x2e91   :  { %v4436_v27 = vadd.f32 %v4435_v60, %v4431_v0 }
0x2e94   :  { %v4443_v2 = vpop.xlane.xlu0 %4442  ;;  %v4439_v49 = vpop.xlane.xlu1 %4438 }
0x2e95   :  { %v4440_v62 = vadd.f32 %v4439_v49, %v4436_v27  ;;  %v4961_v27 = vld [vmem:[%s7031_s13 + $0x3] ss:$0 sm:$0xff]  ;;  %v4945_v49 = vld [vmem:[%s7031_s13] ss:$0 sm:$0xff] }
0x2e97   :  { %v4444_v16 = vadd.f32 %v4443_v2, %v4440_v62  ;;  %v4951_v62 = vld [vmem:[%s7031_s13 + $0x1] ss:$0 sm:$0xff] }
0x2e98   :  { %v4451_v8 = vpop.xlane.xlu0 %4450  ;;  %v4447_v15 = vpop.xlane.xlu1 %4446 }
0x2e99   :  { %v4448_v13 = vadd.f32 %v4447_v15, %v4444_v16  ;;  %v4956_v16 = vld [vmem:[%s7031_s13 + $0x2] ss:$0 sm:$0xff] }
0x2e9b   :  { %v4452_v53 = vadd.f32 %v4451_v8, %v4448_v13 }
0x2e9c   :  { %v4455_v55 = vpop.xlane.xlu1 %4454  ;;  %v4459_v24 = vpop.xlane.xlu0 %4458 }
0x2e9d   :  { %v4456_v56 = vadd.f32 %v4455_v55, %v4452_v53  ;;  %v4963_v55 = vld [vmem:[%s7032_s14 + $0x3] ss:$0 sm:$0xff] }
0x2e9f   :  { %v4460_v1 = vadd.f32 %v4459_v24, %v4456_v56  ;;  %v4946_v56 = vld [vmem:[%s7032_s14] ss:$0 sm:$0xff]  ;;  %v4953_v24 = vld [vmem:[%s7032_s14 + $0x1] ss:$0 sm:$0xff] }
0x2ea1   :  { %v4461_v6 = vmul.f32 0.0078125, %v4460_v1 }
0x2ea3   :  { %v4468_v7 = vsub.f32 %v3874_v29, %v4461_v6  ;;  %v4462_v11 = vsub.f32 %v3782_v21, %v4461_v6  ;;  %v4480_v17 = vsub.f32 %v4058_v48, %v4461_v6  ;;  %v4474_v63 = vsub.f32 %v3966_v31, %v4461_v6 }
0x2ea4   :  { %v6920_v33 = vsub.f32 %v4242_v28, %v4461_v6  ;;  %v4486_v36 = vsub.f32 %v4150_v38, %v4461_v6  ;;  %v6924_v42 = vsub.f32 %v4426_v44, %v4461_v6  ;;  %v6926_v26 = vsub.f32 %v4334_v12, %v4461_v6 }
0x2ea5   :  { %v4469_v19 = vmul.f32 %v4468_v7, %v4468_v7  ;;  %v4463_v61 = vmul.f32 %v4462_v11, %v4462_v11  ;;  %v4481_v40 = vmul.f32 %v4480_v17, %v4480_v17  ;;  %v4475_v23 = vmul.f32 %v4474_v63, %v4474_v63 }
0x2ea6   :  { %v4493_v29 = vmul.f32 %v6920_v33, %v6920_v33  ;;  %v4487_v45 = vmul.f32 %v4486_v36, %v4486_v36  ;;  %v4505_v47 = vmul.f32 %v6924_v42, %v6924_v42  ;;  %v4499_v30 = vmul.f32 %v6926_v26, %v6926_v26 }
0x2ea7   :  { %v4470_v39 = vsel %vm3600_vm3, %v4469_v19, 0.0  ;;  %v4464_v5 = vsel %vm3600_vm3, %v4463_v61, 0.0  ;;  %v4482_v21 = vsel %vm3600_vm3, %v4481_v40, 0.0  ;;  %v4476_v10 = vsel %vm3600_vm3, %v4475_v23, 0.0  ;;  %v4947_v40 = vld [vmem:[%s7033_s15] ss:$0 sm:$0xff] }
0x2ea8   :  { %4471 = vadd.xlane.f32.xlu0 %v4470_v39  ;;  %4465 = vadd.xlane.f32.xlu1 %v4464_v5  ;;  %v4494_v3 = vsel %vm3600_vm3, %v4493_v29, 0.0  ;;  %v4488_v48 = vsel %vm3600_vm3, %v4487_v45, 0.0  ;;  %v4506_v20 = vsel %vm3600_vm3, %v4505_v47, 0.0  ;;  %v4500_v31 = vsel %vm3600_vm3, %v4499_v30, 0.0 }
0x2eac   :  { %4483 = vadd.xlane.f32.xlu0 %v4482_v21  ;;  %4477 = vadd.xlane.f32.xlu1 %v4476_v10  ;;  %v4971_v21 = vld [vmem:[%s7031_s13 + $0x5] ss:$0 sm:$0xff] }
0x2eb0   :  { %4495 = vadd.xlane.f32.xlu0 %v4494_v3  ;;  %4489 = vadd.xlane.f32.xlu1 %v4488_v48  ;;  %v4968_v48 = vld [vmem:[%s7032_s14 + $0x4] ss:$0 sm:$0xff] }
0x2eb4   :  { %4507 = vadd.xlane.f32.xlu0 %v4506_v20  ;;  %4501 = vadd.xlane.f32.xlu1 %v4500_v31 }
0x2f35   :  { %v4472_v32 = vpop.xlane.xlu0 %4471  ;;  %v4466_v28 = vpop.xlane.xlu1 %4465 }
0x2f36   :  { %v4473_v50 = vadd.f32 %v4472_v32, %v4466_v28 }
0x2f39   :  { %v4484_v35 = vpop.xlane.xlu0 %4483  ;;  %v4478_v37 = vpop.xlane.xlu1 %4477 }
0x2f3a   :  { %v4479_v38 = vadd.f32 %v4478_v37, %v4473_v50  ;;  %v4973_v37 = vld [vmem:[%s7032_s14 + $0x5] ss:$0 sm:$0xff] }
0x2f3c   :  { %v4485_v41 = vadd.f32 %v4484_v35, %v4479_v38  ;;  %v4976_v35 = vld [vmem:[%s7031_s13 + $0x6] ss:$0 sm:$0xff] }
0x2f3d   :  { %v4496_v44 = vpop.xlane.xlu0 %4495  ;;  %v4490_v51 = vpop.xlane.xlu1 %4489 }
0x2f3e   :  { %v4491_v52 = vadd.f32 %v4490_v51, %v4485_v41 }
0x2f40   :  { %v4497_v58 = vadd.f32 %v4496_v44, %v4491_v52 }
0x2f41   :  { %v4502_v12 = vpop.xlane.xlu1 %4501  ;;  %v4508_v4 = vpop.xlane.xlu0 %4507 }
0x2f42   :  { %v4503_v57 = vadd.f32 %v4502_v12, %v4497_v58  ;;  %v4981_v58 = vld [vmem:[%s7031_s13 + $0x7] ss:$0 sm:$0xff]  ;;  %v4978_v12 = vld [vmem:[%s7032_s14 + $0x6] ss:$0 sm:$0xff] }
0x2f44   :  { %v4509_v54 = vadd.f32 %v4508_v4, %v4503_v57 }
0x2f46   :  { %v4510_v0 = vmul.f32 0.0078125, %v4509_v54 }
0x2f48   :  { %v4511_v60 = vadd.f32 1e-05, %v4510_v0 }
0x2f4a   :  { %6062 = vrsqrt.f32 %v4511_v60  ;;  %v4983_v60 = vld [vmem:[%s7032_s14 + $0x7] ss:$0 sm:$0xff] }
0x2f54   :  { %v6063_v2 = vpop.eup %6062 }
0x2f55   :  { %v4639_v8 = vmul.f32 %v6063_v2, %v4480_v17  ;;  %v4515_v15 = vmul.f32 %v6063_v2, %v4462_v11  ;;  %v4563_v13 = vmul.f32 %v6063_v2, %v4468_v7  ;;  %v4601_v53 = vmul.f32 %v6063_v2, %v4474_v63  ;;  %v4966_v7 = vld [vmem:[%s7031_s13 + $0x4] ss:$0 sm:$0xff]  ;;  %v4958_v11 = vld [vmem:[%s7032_s14 + $0x2] ss:$0 sm:$0xff] }
0x2f56   :  { %v4677_v1 = vmul.f32 %v6063_v2, %v4486_v36  ;;  %v4715_v23 = vmul.f32 %v6063_v2, %v6920_v33  ;;  %v4753_v43 = vmul.f32 %v6063_v2, %v6926_v26  ;;  %v4791_v41 = vmul.f32 %v6063_v2, %v6924_v42 }
0x2f57   :  { %v4648_v6 = vmul.f32 %v4961_v27, %v4639_v8  ;;  %v4523_v19 = vmul.f32 %v4945_v49, %v4515_v15  ;;  %v4572_v61 = vmul.f32 %v4951_v62, %v4563_v13  ;;  %v4610_v17 = vmul.f32 %v4956_v16, %v4601_v53 }
0x2f58   :  { %v4686_v36 = vmul.f32 %v4966_v7, %v4677_v1  ;;  %v4724_v31 = vmul.f32 %v4971_v21, %v4715_v23  ;;  %v4762_v38 = vmul.f32 %v4976_v35, %v4753_v43  ;;  %v4800_v57 = vmul.f32 %v4981_v58, %v4791_v41 }
0x2f59   :  { %v4657_v63 = vadd.f32 %v4963_v55, %v4648_v6  ;;  %v4531_v39 = vadd.f32 %v4946_v56, %v4523_v19  ;;  %v4581_v5 = vadd.f32 %v4953_v24, %v4572_v61  ;;  %v4619_v3 = vadd.f32 %v4958_v11, %v4610_v17  ;;  %v4948_v24 = vld [vmem:[#allocation2] ss:$0 sm:$0xff] }
0x2f5a   :  { %v4695_v20 = vadd.f32 %v4968_v48, %v4686_v36  ;;  %v4733_v52 = vadd.f32 %v4973_v37, %v4724_v31  ;;  %v4771_v42 = vadd.f32 %v4978_v12, %v4762_v38  ;;  %v4809_v62 = vadd.f32 %v4983_v60, %v4800_v57 }
0x2f5b   :  { %v4658_v10 = vmax.f32 %v4657_v63, 0.0  ;;  %v4532_v29 = vmax.f32 %v4531_v39, 0.0  ;;  %v4582_v45 = vmax.f32 %v4581_v5, 0.0  ;;  %v4620_v50 = vmax.f32 %v4619_v3, 0.0 }
0x2f5c   :  { %v4696_v51 = vmax.f32 %v4695_v20, 0.0  ;;  %v4734_v0 = vmax.f32 %v4733_v52, 0.0  ;;  %v4772_v49 = vmax.f32 %v4771_v42, 0.0  ;;  %v4810_v15 = vmax.f32 %v4809_v62, 0.0 }
0x2f5d   :  { %v4659_v47 = vmul.f32 %v4947_v40, %v4658_v10  ;;  %v4539_v30 = vmul.f32 %v4947_v40, %v4532_v29  ;;  %v4583_v28 = vmul.f32 %v4947_v40, %v4582_v45  ;;  %v4621_v44 = vmul.f32 %v4947_v40, %v4620_v50 }
0x2f5e   :  { %v4697_v54 = vmul.f32 %v4947_v40, %v4696_v51  ;;  %v4735_v2 = vmul.f32 %v4947_v40, %v4734_v0  ;;  %v4773_v8 = vmul.f32 %v4947_v40, %v4772_v49  ;;  %v4811_v53 = vmul.f32 %v4947_v40, %v4810_v15 }
0x2f5f   :  { %v4660_v33 = vsel %vm3600_vm3, %v4659_v47, 0.0  ;;  %v4540_v32 = vsel %vm3600_vm3, %v4539_v30, 0.0  ;;  %v4584_v26 = vsel %vm3600_vm3, %v4583_v28, 0.0  ;;  %v4622_v4 = vsel %vm3600_vm3, %v4621_v44, 0.0 }
0x2f60   :  { %4661 = vadd.xlane.f32.xlu0 %v4660_v33  ;;  %4541 = vadd.xlane.f32.xlu1 %v4540_v32  ;;  %v4698_v27 = vsel %vm3600_vm3, %v4697_v54, 0.0  ;;  %v4736_v16 = vsel %vm3600_vm3, %v4735_v2, 0.0  ;;  %v4774_v13 = vsel %vm3600_vm3, %v4773_v8, 0.0  ;;  %v4812_v55 = vsel %vm3600_vm3, %v4811_v53, 0.0 }
0x2f61   :  { %v6100_v56 = vmov 0  }
0x2f62   :  { %5866 = vset.pattern.permute.xlu0 %v6100_v56  ;;  %5867 = vset.pattern.permute.xlu1 %v6100_v56 }
0x2f64   :  { %4585 = vadd.xlane.f32.xlu1 %v4584_v26 }
0x2f68   :  { %4623 = vadd.xlane.f32.xlu1 %v4622_v4 }
0x2f6c   :  { %4699 = vadd.xlane.f32.xlu1 %v4698_v27 }
0x2f70   :  { %4737 = vadd.xlane.f32.xlu1 %v4736_v16 }
0x2f74   :  { %4775 = vadd.xlane.f32.xlu1 %v4774_v13 }
0x2f78   :  { %4813 = vadd.xlane.f32.xlu1 %v4812_v55 }
0x2fed   :  { %v4662_v1 = vpop.xlane.xlu0 %4661  ;;  %v4542_v6 = vpop.xlane.xlu1 %4541 }
0x2fee   :  { %v4663_v19 = vadd.f32 %v4948_v24, %v4662_v1  ;;  %v4549_v61 = vadd.f32 %v4948_v24, %v4542_v6 }
0x2ff0   :  { %v4964_v17 = vmul.f32 -1.442695, %v4663_v19  ;;  %v4949_v7 = vmul.f32 -1.442695, %v4549_v61 }
0x2ff1   :  { %v4586_v11 = vpop.xlane.xlu1 %4585 }
0x2ff2   :  { %v4587_v63 = vadd.f32 %v4948_v24, %v4586_v11  ;;  %6064 = vpow2.f32 %v4949_v7 }
0x2ff3   :  { %6066 = vpow2.f32 %v4964_v17 }
0x2ff4   :  { %v4954_v39 = vmul.f32 -1.442695, %v4587_v63 }
0x2ff5   :  { %v4624_v5 = vpop.xlane.xlu1 %4623 }
0x2ff6   :  { %6068 = vpow2.f32 %v4954_v39  ;;  %v4625_v40 = vadd.f32 %v4948_v24, %v4624_v5 }
0x2ff8   :  { %v4959_v36 = vmul.f32 -1.442695, %v4625_v40 }
0x2ff9   :  { %v4700_v23 = vpop.xlane.xlu1 %4699 }
0x2ffa   :  { %6070 = vpow2.f32 %v4959_v36  ;;  %v4701_v21 = vadd.f32 %v4948_v24, %v4700_v23 }
0x2ffc   :  { %v4969_v10 = vmul.f32 -1.442695, %v4701_v21  ;;  %v6065_v29 = vpop.eup %6064 }
0x2ffd   :  { %v4738_v45 = vpop.xlane.xlu1 %4737  ;;  %v6067_v3 = vpop.eup %6066  ;;  %v4553_v48 = vadd.f32 1.0, %v6065_v29 }
0x2ffe   :  { %6072 = vpow2.f32 %v4969_v10  ;;  %v4739_v47 = vadd.f32 %v4948_v24, %v4738_v45  ;;  %v4667_v31 = vadd.f32 1.0, %v6067_v3 }
0x2fff   :  { %6074 = vrcp.f32 %v4553_v48 }
0x3000   :  { %v6069_v30 = vpop.eup %6068  ;;  %v4974_v20 = vmul.f32 -1.442695, %v4739_v47 }
0x3001   :  { %v4591_v43 = vadd.f32 1.0, %v6069_v30  ;;  %v4776_v33 = vpop.xlane.xlu1 %4775 }
0x3002   :  { %6076 = vpow2.f32 %v4974_v20  ;;  %v4777_v32 = vadd.f32 %v4948_v24, %v4776_v33 }
0x3003   :  { %6078 = vrcp.f32 %v4591_v43 }
0x3004   :  { %v6071_v28 = vpop.eup %6070  ;;  %v4979_v50 = vmul.f32 -1.442695, %v4777_v32  ;;  %6080 = vrcp.f32 %v4667_v31 }
0x3005   :  { %v4629_v35 = vadd.f32 1.0, %v6071_v28  ;;  %v4814_v37 = vpop.xlane.xlu1 %4813 }
0x3006   :  { %6082 = vpow2.f32 %v4979_v50  ;;  %v4815_v38 = vadd.f32 %v4948_v24, %v4814_v37 }
0x3007   :  { %6084 = vrcp.f32 %v4629_v35 }
0x3008   :  { %v6073_v41 = vpop.eup %6072  ;;  %v4984_v26 = vmul.f32 -1.442695, %v4815_v38 }
0x3009   :  { %v4705_v44 = vadd.f32 1.0, %v6073_v41  ;;  %v6075_v51 = vpop.eup %6074 }
0x300a   :  { %6086 = vpow2.f32 %v4984_v26  ;;  %4558 = vperm.xlu0 %5866, %v6075_v51  }
0x300b   :  { %6088 = vrcp.f32 %v4705_v44 }
0x300c   :  { %v6077_v52 = vpop.eup %6076 }
0x300d   :  { %v6079_v58 = vpop.eup %6078  ;;  %v4743_v12 = vadd.f32 1.0, %v6077_v52 }
0x300e   :  { %4596 = vperm.xlu1 %5867, %v6079_v58   ;;  %v6081_v57 = vpop.eup %6080 }
0x300f   :  { %6090 = vrcp.f32 %v4743_v12 }
0x3010   :  { %v6083_v4 = vpop.eup %6082 }
0x3011   :  { %v6085_v54 = vpop.eup %6084  ;;  %v4781_v0 = vadd.f32 1.0, %v6083_v4 }
0x3012   :  { %4672 = vperm.xlu1 %5867, %v6081_v57   ;;  %4634 = vperm.xlu0 %5866, %v6085_v54  }
0x3013   :  { %6092 = vrcp.f32 %v4781_v0 }
0x3014   :  { %v6087_v42 = vpop.eup %6086 }
0x3015   :  { %v6089_v60 = vpop.eup %6088  ;;  %v4819_v27 = vadd.f32 1.0, %v6087_v42 }
0x3016   :  { %4710 = vperm.xlu0 %5866, %v6089_v60  }
0x3017   :  { %6094 = vrcp.f32 %v4819_v27 }
0x3019   :  { %v6091_v2 = vpop.eup %6090 }
0x301a   :  { %4748 = vperm.xlu1 %5867, %v6091_v2  }
0x301d   :  { %v6093_v49 = vpop.eup %6092 }
0x301e   :  { %4786 = vperm.xlu1 %5867, %v6093_v49  }
0x3021   :  { %v6095_v62 = vpop.eup %6094 }
0x3022   :  { %4824 = vperm.xlu1 %5867, %v6095_v62  }
0x3089   :  { %v4559_v16 = vpop.permute.xlu0 %4558 }
0x308a   :  { %v4561_v15 = vmul.f32 %v4559_v16, %v6608_v25 }
0x308d   :  { %v4597_v8 = vpop.permute.xlu1 %4596 }
0x308e   :  { %v4599_v13 = vmul.f32 %v4597_v8, %v6630_v46 }
0x3090   :  { %v4600_v53 = vadd.f32 %v4599_v13, %v4561_v15 }
0x3091   :  { %v4635_v55 = vpop.permute.xlu0 %4634  ;;  %v4673_v56 = vpop.permute.xlu1 %4672 }
0x3092   :  { %v4637_v24 = vmul.f32 %v4635_v55, %v6652_v14  ;;  %v4675_v6 = vmul.f32 %v4673_v56, %v6674_v34 }
0x3094   :  { %v4638_v1 = vadd.f32 %v4637_v24, %v4600_v53 }
0x3095   :  { %v4711_v19 = vpop.permute.xlu0 %4710 }
0x3096   :  { %v4676_v61 = vadd.f32 %v4675_v6, %v4638_v1  ;;  %v4713_v17 = vmul.f32 %v4711_v19, %v6696_v59 }
0x3098   :  { %v4714_v7 = vadd.f32 %v4713_v17, %v4676_v61 }
0x3099   :  { %v4749_v11 = vpop.permute.xlu1 %4748 }
0x309a   :  { %v4751_v63 = vmul.f32 %v4749_v11, %v6718_v9 }
0x309c   :  { %v4752_v39 = vadd.f32 %v4751_v63, %v4714_v7 }
0x309d   :  { %v4787_v25 = vpop.permute.xlu1 %4786 }
0x309e   :  { %v4789_v46 = vmul.f32 %v4787_v25, %v6739_v18 }
0x30a0   :  { %v4790_v5 = vadd.f32 %v4789_v46, %v4752_v39 }
0x30a1   :  { %v4825_v40 = vpop.permute.xlu1 %4824 }
0x30a2   :  { %v4827_v36 = vmul.f32 %v4825_v40, %v6774_v22 }
0x30a4   :  { %v4828_v14 = vadd.f32 %v4827_v36, %v4790_v5 }
0x30a6   :  { %4829 = vst.msk [vmem:[%s7034_s17] sm:$0x3] %vm3600_vm3, %v4828_v14 }

// kernel: classifier_forward.11
= control target key start
LH: loop header
LB: loop body
LE: loop exit
PB: predicated region body
PF: predicated region fallthrough
CT: control target
= control target key end

     0   :  { %s3131_s0 = inlined_call_operand.vmem [shape: bf16[2,1152], index: 0, kind: input, shape index: {}]   ;;  %s3132_s1 = inlined_call_operand.vmem [shape: bf16[1152,128], index: 1, kind: input, shape index: {}]   ;;  %s3133_s2 = inlined_call_operand.vmem [shape: f32[1,128], index: 2, kind: input, shape index: {}]   ;;  %s3134_s3 = inlined_call_operand.vmem [shape: f32[1,128], index: 3, kind: input, shape index: {}]   ;;  %s3135_s4 = inlined_call_operand.vmem [shape: bf16[128,256], index: 4, kind: input, shape index: {}]   ;;  %s3136_s5 = inlined_call_operand.vmem [shape: f32[1,256], index: 5, kind: input, shape index: {}]   ;;  %s3137_s6 = inlined_call_operand.vmem [shape: f32[1,256], index: 6, kind: input, shape index: {}]   ;;  %s3138_s7 = inlined_call_operand.vmem [shape: f32[256,16], index: 7, kind: input, shape index: {}]   ;;  %s3139_s8 = inlined_call_operand.vmem [shape: f32[1,16], index: 8, kind: input, shape index: {}]   ;;  %s3140_s9 = inlined_call_operand.vmem [shape: f32[1,16], index: 9, kind: input, shape index: {}]   ;;  %s3141_s10 = inlined_call_operand.vmem [shape: f32[16,16], index: 10, kind: input, shape index: {}]   ;;  %s3142_s11 = inlined_call_operand.vmem [shape: f32[1,16], index: 11, kind: input, shape index: {}]   ;;  %s3143_s12 = inlined_call_operand.vmem [shape: f32[16,256], index: 12, kind: input, shape index: {}]   ;;  %s3144_s13 = inlined_call_operand.vmem [shape: bf16[256,16], index: 13, kind: input, shape index: {}]   ;;  %s3145_s14 = inlined_call_operand.vmem [shape: f32[1,16], index: 14, kind: input, shape index: {}]   ;;  %s3146_s15 = inlined_call_operand.vmem [shape: f32[1,16], index: 15, kind: input, shape index: {}]   ;;  %s3147_s16 = inlined_call_operand.vmem [shape: f32[2,16], index: 16, kind: input, shape index: {}]   ;;  %s3148_s17 = inlined_call_operand.vmem [shape: f32[16,32], index: 17, kind: input, shape index: {}]   ;;  %s3149_s18 = inlined_call_operand.vmem [shape: f32[16,32], index: 18, kind: input, shape index: {}]   ;;  %s3150_s19 = inlined_call_operand.vmem [shape: f32[1,32], index: 19, kind: input, shape index: {}]   ;;  %s3151_s20 = inlined_call_operand.vmem [shape: f32[1,32], index: 20, kind: input, shape index: {}]   ;;  %s3152_s21 = inlined_call_operand.vmem [shape: f32[1,32], index: 21, kind: input, shape index: {}]   ;;  %s3153_s22 = inlined_call_operand.vmem [shape: f32[32,3], index: 22, kind: input, shape index: {}]   ;;  %s3154_s23 = inlined_call_operand.vmem [shape: f32[1,3], index: 23, kind: input, shape index: {}]   ;;  %s3155_s24 = inlined_call_operand.hbm [shape: f32[2,3], index: 24, kind: output, shape index: {}]  }
   0x1   :  { %3160 = sst [smem:[#allocation5_spill]] %s3131_s0 }
   0x2   :  { %3161 = sst [smem:[#allocation6_spill]] %s3132_s1 }
   0x3   :  { %3162 = sst [smem:[#allocation7_spill]] %s3133_s2 }
   0x4   :  { %3163 = sst [smem:[#allocation8_spill]] %s3134_s3 }
   0x5   :  { %3164 = sst [smem:[#allocation9_spill]] %s3135_s4 }
   0x6   :  { %3165 = sst [smem:[#allocation10_spill]] %s3136_s5 }
   0x7   :  { %3166 = sst [smem:[#allocation11_spill]] %s3137_s6 }
   0x8   :  { %3167 = sst [smem:[#allocation12_spill]] %s3138_s7 }
   0x9   :  { %3168 = sst [smem:[#allocation13_spill]] %s3139_s8 }
   0xa   :  { %s3169_s27 = sld [smem:[#allocation6_spill]]  ;;  %v231_v29 = vlaneseq  ;;  %v2429_v35 = vmov 1966171168   ;;  %s3170_s4 = sld [smem:[#allocation5_spill]]  ;;  %vm2431_vm0 = vmmov 0  }
   0xb   :  { %v229_v36 = vunpack.c.l.s4 %v2429_v35 }
   0xc   :  { %v2656_v33 = vshrl.u32 %v231_v29, 7 }
   0xd   :  { %v230_v39 = vunpack.c.0.s8 %v229_v36 }
   0xf   :  { %v2668_v41 = vsub.s32 %v230_v39, %v2656_v33 }
  0x10   :  { %v2286_v0 = vld [vmem:[%s3169_s27 + $0x40] sm:$0xff]   ;;  %v2290_v4 = vld [vmem:[%s3169_s27 + $0x48] sm:$0xff]   ;;  %v2294_v8 = vld [vmem:[%s3169_s27 + $0x50] sm:$0xff]  }
  0x11   :  { %v2287_v1 = vld [vmem:[%s3169_s27 + $0xc0] sm:$0xff]   ;;  %2009 = vmatprep.subr.bf16.mxu0 %v2286_v0  ;;  %v2291_v5 = vld [vmem:[%s3169_s27 + $0xc8] sm:$0xff]   ;;  %v2295_v9 = vld [vmem:[%s3169_s27 + $0xd0] sm:$0xff]  }
  0x12   :  { %v2288_v2 = vld [vmem:[%s3169_s27] sm:$0xff]   ;;  %2031 = vmatprep.subr.bf16.mxu1 %v2287_v1  ;;  %v2292_v6 = vld [vmem:[%s3169_s27 + $0x8] sm:$0xff]   ;;  %v2296_v10 = vld [vmem:[%s3169_s27 + $0x10] sm:$0xff]  }
  0x13   :  { %v2289_v3 = vld [vmem:[%s3169_s27 + $0x80] sm:$0xff]   ;;  %2010 = vmatpush3.bf16.msra.mxu0 %v2288_v2  ;;  %v2293_v7 = vld [vmem:[%s3169_s27 + $0x88] sm:$0xff]   ;;  %v2297_v11 = vld [vmem:[%s3169_s27 + $0x90] sm:$0xff]  }
  0x14   :  { %2032 = vmatpush3.bf16.msra.mxu1 %v2289_v3  ;;  %2011 = vmatprep.subr.bf16.mxu0 %v2290_v4  ;;  %v2298_v12 = vld [vmem:[%s3169_s27 + $0x58] sm:$0xff]   ;;  %v2302_v16 = vld [vmem:[%s3169_s27 + $0x60] sm:$0xff]   ;;  %v2306_v20 = vld [vmem:[%s3169_s27 + $0x68] sm:$0xff]  }
  0x15   :  { %2033 = vmatprep.subr.bf16.mxu1 %v2291_v5  ;;  %v2299_v13 = vld [vmem:[%s3169_s27 + $0xd8] sm:$0xff]   ;;  %v2303_v17 = vld [vmem:[%s3169_s27 + $0xe0] sm:$0xff]   ;;  %v2307_v21 = vld [vmem:[%s3169_s27 + $0xe8] sm:$0xff]  }
  0x16   :  { %v2300_v14 = vld [vmem:[%s3169_s27 + $0x18] sm:$0xff]   ;;  %v2304_v18 = vld [vmem:[%s3169_s27 + $0x20] sm:$0xff]   ;;  %v2308_v22 = vld [vmem:[%s3169_s27 + $0x28] sm:$0xff]  }
  0x17   :  { %2012 = vmatpush3.bf16.msra.mxu0 %v2292_v6  ;;  %v2301_v15 = vld [vmem:[%s3169_s27 + $0x98] sm:$0xff]   ;;  %v2305_v19 = vld [vmem:[%s3169_s27 + $0xa0] sm:$0xff]   ;;  %v2309_v23 = vld [vmem:[%s3169_s27 + $0xa8] sm:$0xff]  }
  0x18   :  { %2034 = vmatpush3.bf16.msra.mxu1 %v2293_v7  ;;  %2013 = vmatprep.subr.bf16.mxu0 %v2294_v8  ;;  %v2310_v24 = vld [vmem:[%s3169_s27 + $0x70] sm:$0xff]   ;;  %v2314_v28 = vld [vmem:[%s3169_s27 + $0x78] sm:$0xff]   ;;  %v2319_v34 = vld [vmem:[%s3169_s27 + $0x140] sm:$0xff]  }
  0x19   :  { %2035 = vmatprep.subr.bf16.mxu1 %v2295_v9  ;;  %v2311_v25 = vld [vmem:[%s3169_s27 + $0xf0] sm:$0xff]   ;;  %v2315_v30 = vld [vmem:[%s3169_s27 + $0xf8] sm:$0xff]   ;;  %v79_v37 = vld [vmem:[%s3170_s4] sm:$0xff] }
  0x1a   :  { %v2312_v26 = vld [vmem:[%s3169_s27 + $0x30] sm:$0xff]   ;;  %v2316_v31 = vld [vmem:[%s3169_s27 + $0x38] sm:$0xff]   ;;  %v227_v38 = vcombine.high %v79_v37, %v79_v37  ;;  %v2321_v40 = vld [vmem:[%s3169_s27 + $0x1c0] sm:$0xff]   ;;  %v234_v42 = vrot.slane %v79_v37, %v2668_v41 }
  0x1b   :  { %2014 = vmatpush3.bf16.msra.mxu0 %v2296_v10  ;;  %v2313_v27 = vld [vmem:[%s3169_s27 + $0xb0] sm:$0xff]   ;;  %v2317_v32 = vld [vmem:[%s3169_s27 + $0xb8] sm:$0xff]   ;;  %v2320_v48 = vld [vmem:[%s3169_s27 + $0x100] sm:$0xff]  }
  0x1c   :  { %2036 = vmatpush3.bf16.msra.mxu1 %v2297_v11  ;;  %2015 = vmatprep.subr.bf16.mxu0 %v2298_v12  ;;  %v2672_v43 = vrot.slane %v227_v38, %v2668_v41  ;;  %v242_v44 = vcombine.high %v234_v42, %v234_v42  ;;  %v250_v45 = vrot.slane %v234_v42, %v2668_v41  ;;  %v2323_v51 = vld [vmem:[%s3169_s27 + $0x148] sm:$0xff]   ;;  %v2322_v53 = vld [vmem:[%s3169_s27 + $0x180] sm:$0xff]   ;;  %v2327_v57 = vld [vmem:[%s3169_s27 + $0x150] sm:$0xff]  }
  0x1d   :  { %2037 = vmatprep.subr.bf16.mxu1 %v2299_v13  ;;  %v2325_v54 = vld [vmem:[%s3169_s27 + $0x1c8] sm:$0xff]   ;;  %v2329_v59 = vld [vmem:[%s3169_s27 + $0x1d0] sm:$0xff]   ;;  %v2331_v61 = vld [vmem:[%s3169_s27 + $0x158] sm:$0xff]  }
  0x1e   :  { %v243_v46 = vcombine.high %v2672_v43, %v2672_v43  ;;  %v264_v47 = vrot.slane %v242_v44, %v2668_v41  ;;  %v272_v50 = vcombine.high %v250_v45, %v250_v45  ;;  %v2324_v56 = vld [vmem:[%s3169_s27 + $0x108] sm:$0xff]   ;;  %v2328_v60 = vld [vmem:[%s3169_s27 + $0x110] sm:$0xff]   ;;  %v2333_v63 = vld [vmem:[%s3169_s27 + $0x1d8] sm:$0xff]  }
  0x1f   :  { %2016 = vmatpush3.bf16.msra.mxu0 %v2300_v14  ;;  %v2326_v58 = vld [vmem:[%s3169_s27 + $0x188] sm:$0xff]   ;;  %v2330_v62 = vld [vmem:[%s3169_s27 + $0x190] sm:$0xff]   ;;  %v2332_v0 = vld [vmem:[%s3169_s27 + $0x118] sm:$0xff]  }
  0x20   :  { %2038 = vmatpush3.bf16.msra.mxu1 %v2301_v15  ;;  %2017 = vmatprep.subr.bf16.mxu0 %v2302_v16  ;;  %v271_v49 = vrot.slane %v243_v46, %v2668_v41  ;;  %v274_v52 = vcombine.high %v264_v47, %v264_v47  ;;  %v2335_v1 = vld [vmem:[%s3169_s27 + $0x160] sm:$0xff]   ;;  %v2334_v2 = vld [vmem:[%s3169_s27 + $0x198] sm:$0xff]   ;;  %v2339_v5 = vld [vmem:[%s3169_s27 + $0x168] sm:$0xff]  }
  0x21   :  { %2039 = vmatprep.subr.bf16.mxu1 %v2303_v17  ;;  %763 = vmatprep.mubr.bf16.mxu0 %v264_v47  ;;  %v2337_v3 = vld [vmem:[%s3169_s27 + $0x1e0] sm:$0xff]   ;;  %v2341_v7 = vld [vmem:[%s3169_s27 + $0x1e8] sm:$0xff]   ;;  %v2343_v9 = vld [vmem:[%s3169_s27 + $0x170] sm:$0xff]  }
  0x22   :  { %v275_v55 = vcombine.high %v271_v49, %v271_v49  ;;  %803 = vmatprep.mubr.bf16.mxu1 %v274_v52  ;;  %v2336_v4 = vld [vmem:[%s3169_s27 + $0x120] sm:$0xff]   ;;  %v2340_v8 = vld [vmem:[%s3169_s27 + $0x128] sm:$0xff]   ;;  %v2345_v11 = vld [vmem:[%s3169_s27 + $0x1f0] sm:$0xff]  }
  0x23   :  { %2018 = vmatpush3.bf16.msra.mxu0 %v2304_v18  ;;  %v2338_v6 = vld [vmem:[%s3169_s27 + $0x1a0] sm:$0xff]   ;;  %v2342_v10 = vld [vmem:[%s3169_s27 + $0x1a8] sm:$0xff]   ;;  %v2344_v12 = vld [vmem:[%s3169_s27 + $0x130] sm:$0xff]   ;;  %v257_v18 = vrot.slane %v2672_v43, %v2668_v41 }
  0x24   :  { %2040 = vmatpush3.bf16.msra.mxu1 %v2305_v19  ;;  %2019 = vmatprep.subr.bf16.mxu0 %v2306_v20  ;;  %v2347_v13 = vld [vmem:[%s3169_s27 + $0x178] sm:$0xff]   ;;  %v2346_v14 = vld [vmem:[%s3169_s27 + $0x1b0] sm:$0xff]   ;;  %v2351_v19 = vld [vmem:[%s3169_s27 + $0x200] sm:$0xff]   ;;  %v2430_v20 = vmov 0.0  }
  0x25   :  { %2041 = vmatprep.subr.bf16.mxu1 %v2307_v21  ;;  %v2349_v15 = vld [vmem:[%s3169_s27 + $0x1f8] sm:$0xff]   ;;  %v273_v21 = vcombine.high %v257_v18, %v257_v18 }
  0x26   :  { %v2348_v16 = vld [vmem:[%s3169_s27 + $0x138] sm:$0xff]  }
  0x27   :  { %2020 = vmatpush3.bf16.msra.mxu0 %v2308_v22  ;;  %v2350_v17 = vld [vmem:[%s3169_s27 + $0x1b8] sm:$0xff]   ;;  %v2352_v22 = vld [vmem:[%s3169_s27 + $0x208] sm:$0xff]  }
  0x28   :  { %2042 = vmatpush3.bf16.msra.mxu1 %v2309_v23  ;;  %2021 = vmatprep.subr.bf16.mxu0 %v2310_v24  ;;  %v2353_v23 = vld [vmem:[%s3169_s27 + $0x210] sm:$0xff]   ;;  %v2354_v24 = vld [vmem:[%s3169_s27 + $0x218] sm:$0xff]  }
  0x29   :  { %2043 = vmatprep.subr.bf16.mxu1 %v2311_v25 }
  0x2b   :  { %2022 = vmatpush3.bf16.msra.mxu0 %v2312_v26 }
  0x2c   :  { %2044 = vmatpush3.bf16.msra.mxu1 %v2313_v27  ;;  %2023 = vmatprep.subr.bf16.mxu0 %v2314_v28 }
  0x2d   :  { %2045 = vmatprep.subr.bf16.mxu1 %v2315_v30 }
  0x2f   :  { %2024 = vmatpush3.bf16.msra.mxu0 %v2316_v31 }
  0x30   :  { %2046 = vmatpush3.bf16.msra.mxu1 %v2317_v32  ;;  %2053 = vmatprep.subr.bf16.mxu0 %v2319_v34 }
  0x31   :  { %2075 = vmatprep.subr.bf16.mxu1 %v2321_v40 }
  0x32   :  { %764 = vmatmul.mubr.bf16.vlgmr.msra.gmra.mrb[0].mxu0 %v250_v45 }
  0x33   :  { %2054 = vmatpush3.bf16.msra.mxu0 %v2320_v48  ;;  %804 = vmatmul.mubr.bf16.vlgmr.msra.gmra.mrb[0].mxu1 %v272_v50 }
  0x34   :  { %2055 = vmatprep.subr.bf16.mxu0 %v2323_v51  ;;  %2076 = vmatpush3.bf16.msra.mxu1 %v2322_v53 }
  0x35   :  { %843 = vmatprep.mubr.bf16.mxu0 %v271_v49  ;;  %2077 = vmatprep.subr.bf16.mxu1 %v2325_v54 }
  0x36   :  { %883 = vmatprep.mubr.bf16.mxu1 %v275_v55 }
  0x37   :  { %2056 = vmatpush3.bf16.msra.mxu0 %v2324_v56 }
  0x38   :  { %2057 = vmatprep.subr.bf16.mxu0 %v2327_v57  ;;  %2078 = vmatpush3.bf16.msra.mxu1 %v2326_v58 }
  0x39   :  { %2079 = vmatprep.subr.bf16.mxu1 %v2329_v59 }
  0x3b   :  { %2058 = vmatpush3.bf16.msra.mxu0 %v2328_v60 }
  0x3c   :  { %2059 = vmatprep.subr.bf16.mxu0 %v2331_v61  ;;  %2080 = vmatpush3.bf16.msra.mxu1 %v2330_v62 }
  0x3d   :  { %2081 = vmatprep.subr.bf16.mxu1 %v2333_v63 }
  0x3f   :  { %2060 = vmatpush3.bf16.msra.mxu0 %v2332_v0 }
  0x40   :  { %2061 = vmatprep.subr.bf16.mxu0 %v2335_v1  ;;  %2082 = vmatpush3.bf16.msra.mxu1 %v2334_v2 }
  0x41   :  { %2083 = vmatprep.subr.bf16.mxu1 %v2337_v3 }
  0x43   :  { %2062 = vmatpush3.bf16.msra.mxu0 %v2336_v4 }
  0x44   :  { %2063 = vmatprep.subr.bf16.mxu0 %v2339_v5  ;;  %2084 = vmatpush3.bf16.msra.mxu1 %v2338_v6 }
  0x45   :  { %2085 = vmatprep.subr.bf16.mxu1 %v2341_v7 }
  0x47   :  { %2064 = vmatpush3.bf16.msra.mxu0 %v2340_v8 }
  0x48   :  { %2065 = vmatprep.subr.bf16.mxu0 %v2343_v9  ;;  %2086 = vmatpush3.bf16.msra.mxu1 %v2342_v10 }
  0x49   :  { %2087 = vmatprep.subr.bf16.mxu1 %v2345_v11 }
  0x4b   :  { %2066 = vmatpush3.bf16.msra.mxu0 %v2344_v12 }
  0x4c   :  { %2067 = vmatprep.subr.bf16.mxu0 %v2347_v13  ;;  %2088 = vmatpush3.bf16.msra.mxu1 %v2346_v14 }
  0x4d   :  { %2089 = vmatprep.subr.bf16.mxu1 %v2349_v15 }
  0x4f   :  { %2068 = vmatpush3.bf16.msra.mxu0 %v2348_v16 }
  0x50   :  { %2177 = vmatprep.subr.bf16.mxu0 %v2430_v20  ;;  %2090 = vmatpush3.bf16.msra.mxu1 %v2350_v17 }
  0x52   :  { %844 = vmatmul.mubr.bf16.vlgmr.msra.gmra.mrb[4].mxu0 %v257_v18 }
  0x53   :  { %2178 = vmatpush3.bf16.msra.mxu0 %v2351_v19  ;;  %2193 = vmatprep.mubr.msk.bf16.mxu0 %vm2431_vm0, %v2430_v20 }
  0x54   :  { %884 = vmatmul.mubr.bf16.vlgmr.msra.gmra.mrb[4].mxu1 %v273_v21  ;;  %2179 = vmatprep.subr.bf16.mxu0 %v2430_v20 }
  0x57   :  { %2180 = vmatpush3.bf16.msra.mxu0 %v2352_v22 }
  0x58   :  { %2181 = vmatprep.subr.bf16.mxu0 %v2430_v20 }
  0x5b   :  { %2182 = vmatpush3.bf16.msra.mxu0 %v2353_v23 }
  0x5c   :  { %2183 = vmatprep.subr.bf16.mxu0 %v2430_v20 }
  0x5d   :  { %29 = vsyncpa [#allocation3], 0  ;;  %v2355_v25 = vld [vmem:[%s3169_s27 + $0x220] sm:$0xff]   ;;  %v2356_v26 = vld [vmem:[%s3169_s27 + $0x228] sm:$0xff]   ;;  %s3171_s6 = sld [smem:[#allocation9_spill]]  ;;  %v2432_v48 = vmov 0  }
  0x5e   :  { %v2357_v27 = vld [vmem:[%s3169_s27 + $0x230] sm:$0xff]   ;;  %v2358_v28 = vld [vmem:[%s3169_s27 + $0x238] sm:$0xff]   ;;  %v1888_v29 = vld.sshfl [vmem:[%s3170_s4 + $0x8] sm:$0x1 pattern:$0x75316420]  ;;  %1077 = vmatprep.mubr.bf16.mxu1 %v2432_v48 }
  0x5f   :  { %2184 = vmatpush3.bf16.msra.mxu0 %v2354_v24  ;;  %v289_v30 = vrot.slane %v1888_v29, %v2668_v41  ;;  %s3172_s4 = sld [smem:[#allocation12_spill]]  ;;  %s3174_s28 = sld [smem:[#allocation8_spill]]  ;;  %vm1244_vm1 = vcmask 130048   ;;  %vm1318_vm2 = vcmask 123904   ;;  %vm1755_vm3 = vcmask 254976  }
  0x60   :  { %2185 = vmatprep.subr.bf16.mxu0 %v2430_v20  ;;  %s3175_s7 = sld [smem:[#allocation10_spill]]  ;;  %s3176_s25 = sld [smem:[#allocation11_spill]]  ;;  %vm1798_vm4 = vcmask 261120   ;;  %vm1872_vm5 = vcmask 17408  }
  0x63   :  { %2186 = vmatpush3.bf16.msra.mxu0 %v2355_v25  ;;  %v2359_v31 = vld [vmem:[%s3171_s6] ss:$8 sps:$4 sm:$0xff]   ;;  %v2361_v32 = vld [vmem:[%s3171_s6 + $0x4] ss:$8 sps:$4 sm:$0xff]   ;;  %v2364_v34 = vld [vmem:[%s3171_s6 + $0x14] ss:$8 sps:$4 sm:$0xff]  }
  0x64   :  { %2187 = vmatprep.subr.bf16.mxu0 %v2430_v20  ;;  %1045 = vmatprep.subr.bf16.mxu1 %v2361_v32  ;;  %v2362_v35 = vld [vmem:[%s3171_s6 + $0x10] ss:$8 sps:$4 sm:$0xff]   ;;  %v2367_v36 = vld [vmem:[%s3171_s6 + $0x24] ss:$8 sps:$4 sm:$0xff]   ;;  %v2365_v37 = vld [vmem:[%s3171_s6 + $0x20] ss:$8 sps:$4 sm:$0xff]  }
  0x65   :  { %1046 = vmatpush1.bf16.msra.mxu1 %v2359_v31  ;;  %v2370_v38 = vld [vmem:[%s3171_s6 + $0x34] ss:$8 sps:$4 sm:$0xff]   ;;  %v2368_v39 = vld [vmem:[%s3171_s6 + $0x30] ss:$8 sps:$4 sm:$0xff]   ;;  %v2373_v40 = vld [vmem:[%s3171_s6 + $0x44] ss:$8 sps:$4 sm:$0xff]  }
  0x66   :  { %1047 = vmatprep.subr.bf16.mxu1 %v2364_v34  ;;  %v2371_v41 = vld [vmem:[%s3171_s6 + $0x40] ss:$8 sps:$4 sm:$0xff]   ;;  %v2376_v42 = vld [vmem:[%s3171_s6 + $0x54] ss:$8 sps:$4 sm:$0xff]   ;;  %v2374_v43 = vld [vmem:[%s3171_s6 + $0x50] ss:$8 sps:$4 sm:$0xff]  }
  0x67   :  { %2188 = vmatpush3.bf16.msra.mxu0 %v2356_v26  ;;  %v2379_v44 = vld [vmem:[%s3171_s6 + $0x64] ss:$8 sps:$4 sm:$0xff]   ;;  %v2377_v45 = vld [vmem:[%s3171_s6 + $0x60] ss:$8 sps:$4 sm:$0xff]   ;;  %v2382_v46 = vld [vmem:[%s3171_s6 + $0x74] ss:$8 sps:$4 sm:$0xff]  }
  0x68   :  { %2189 = vmatprep.subr.bf16.mxu0 %v2430_v20  ;;  %v2380_v47 = vld [vmem:[%s3171_s6 + $0x70] ss:$8 sps:$4 sm:$0xff]   ;;  %v1132_v49 = vld [vmem:[%s3172_s4 + $0x80] sm:$0xff]  ;;  %v1133_v50 = vld [vmem:[%s3172_s4 + $0x88] sm:$0xff]  ;;  %s3173_s6 = sld [smem:[#allocation7_spill]] }
  0x69   :  { %1048 = vmatpush1.bf16.msra.mxu1 %v2362_v35  ;;  %v1116_v51 = vld [vmem:[%s3172_s4] sm:$0xff]  ;;  %v2229_v52 = vpack.c.bf16 %v1133_v50, %v1132_v49  ;;  %v1117_v53 = vld [vmem:[%s3172_s4 + $0x8] sm:$0xff]  ;;  %v1134_v54 = vld [vmem:[%s3172_s4 + $0x90] sm:$0xff] }
  0x6a   :  { %1049 = vmatprep.subr.bf16.mxu1 %v2367_v36  ;;  %v1135_v55 = vld [vmem:[%s3172_s4 + $0x98] sm:$0xff]  ;;  %v2231_v56 = vpack.c.bf16 %v1117_v53, %v1116_v51  ;;  %v1118_v58 = vld [vmem:[%s3172_s4 + $0x10] sm:$0xff]  ;;  %v1136_v60 = vld [vmem:[%s3172_s4 + $0xa0] sm:$0xff] }
  0x6b   :  { %2190 = vmatpush3.bf16.msra.mxu0 %v2357_v27  ;;  %v2233_v57 = vpack.c.bf16 %v1135_v55, %v1134_v54  ;;  %v1119_v59 = vld [vmem:[%s3172_s4 + $0x18] sm:$0xff]  ;;  %v1137_v61 = vld [vmem:[%s3172_s4 + $0xa8] sm:$0xff]  ;;  %v1120_v0 = vld [vmem:[%s3172_s4 + $0x20] sm:$0xff] }
  0x6c   :  { %2191 = vmatprep.subr.bf16.mxu0 %v2430_v20  ;;  %v2235_v62 = vpack.c.bf16 %v1119_v59, %v1118_v58  ;;  %v2237_v63 = vpack.c.bf16 %v1137_v61, %v1136_v60  ;;  %v1121_v1 = vld [vmem:[%s3172_s4 + $0x28] sm:$0xff]  ;;  %v1138_v2 = vld [vmem:[%s3172_s4 + $0xb0] sm:$0xff]  ;;  %v1139_v3 = vld [vmem:[%s3172_s4 + $0xb8] sm:$0xff] }
  0x6d   :  { %1050 = vmatpush1.bf16.msra.mxu1 %v2365_v37  ;;  %v2239_v4 = vpack.c.bf16 %v1121_v1, %v1120_v0  ;;  %v2241_v5 = vpack.c.bf16 %v1139_v3, %v1138_v2  ;;  %v1122_v6 = vld [vmem:[%s3172_s4 + $0x30] sm:$0xff]  ;;  %v1123_v7 = vld [vmem:[%s3172_s4 + $0x38] sm:$0xff]  ;;  %v1140_v8 = vld [vmem:[%s3172_s4 + $0xc0] sm:$0xff] }
  0x6e   :  { %1051 = vmatprep.subr.bf16.mxu1 %v2370_v38  ;;  %v1141_v9 = vld [vmem:[%s3172_s4 + $0xc8] sm:$0xff]  ;;  %v2243_v10 = vpack.c.bf16 %v1123_v7, %v1122_v6  ;;  %v1124_v12 = vld [vmem:[%s3172_s4 + $0x40] sm:$0xff]  ;;  %v1142_v14 = vld [vmem:[%s3172_s4 + $0xd0] sm:$0xff]  ;;  %v1094_v7 = vsub.s32 1, %v2656_v33 }
  0x6f   :  { %2192 = vmatpush3.bf16.msra.mxu0 %v2358_v28  ;;  %v2245_v11 = vpack.c.bf16 %v1141_v9, %v1140_v8  ;;  %v1125_v13 = vld [vmem:[%s3172_s4 + $0x48] sm:$0xff]  ;;  %v1143_v15 = vld [vmem:[%s3172_s4 + $0xd8] sm:$0xff]  ;;  %v1126_v18 = vld [vmem:[%s3172_s4 + $0x50] sm:$0xff] }
  0x70   :  { %2230 = vmatprep.subr.bf16.mxu0 %v2229_v52  ;;  %v2247_v16 = vpack.c.bf16 %v1125_v13, %v1124_v12  ;;  %v2249_v17 = vpack.c.bf16 %v1143_v15, %v1142_v14  ;;  %v1127_v19 = vld [vmem:[%s3172_s4 + $0x58] sm:$0xff]  ;;  %v1962_v50 = vld [vmem:[%s3174_s28] ss:$0 sm:$0xff]  ;;  %v1145_v58 = vld [vmem:[%s3172_s4 + $0xe8] sm:$0xff]  ;;  %s3177_s28 = sld [smem:[#allocation13_spill]] }
  0x71   :  { %1052 = vmatpush1.bf16.msra.mxu1 %v2368_v39  ;;  %v2251_v21 = vpack.c.bf16 %v1127_v19, %v1126_v18  ;;  %v1128_v60 = vld [vmem:[%s3172_s4 + $0x60] sm:$0xff]  ;;  %v1129_v61 = vld [vmem:[%s3172_s4 + $0x68] sm:$0xff]  ;;  %v1147_v0 = vld [vmem:[%s3172_s4 + $0xf8] sm:$0xff] }
  0x72   :  { %2194 = vmatmul.mubr.bf16.vlgmr.msra.gmra.mrb[8].mxu0 %v289_v30  ;;  %1053 = vmatprep.subr.bf16.mxu1 %v2373_v40  ;;  %v1130_v2 = vld [vmem:[%s3172_s4 + $0x70] sm:$0xff]  ;;  %v1131_v3 = vld [vmem:[%s3172_s4 + $0x78] sm:$0xff]  ;;  %v1086_v6 = vld [vmem:[%s3175_s7] sm:$0x3] }
  0x73   :  { %2232 = vmatpush3.bf16.msra.mxu0 %v2231_v56  ;;  %v1100_v8 = vld [vmem:[%s3176_s25] sm:$0x3] }
  0x74   :  { %2234 = vmatprep.subr.bf16.mxu0 %v2233_v57  ;;  %v1144_v57 = vld [vmem:[%s3172_s4 + $0xe0] sm:$0xff]  ;;  %v1109_v13 = vrot.slane %v1100_v8, %v1094_v7 }
  0x75   :  { %1054 = vmatpush1.bf16.msra.mxu1 %v2371_v41  ;;  %v2253_v59 = vpack.c.bf16 %v1145_v58, %v1144_v57  ;;  %v2385_v57 = vld [vmem:[%s3144_s13 + $0x48] sm:$0xff]  }
  0x76   :  { %1055 = vmatprep.subr.bf16.mxu1 %v2376_v42  ;;  %v2386_v58 = vld [vmem:[%s3144_s13 + $0x8] sm:$0xff]  }
  0x77   :  { %2236 = vmatpush3.bf16.msra.mxu0 %v2235_v62  ;;  %v2255_v62 = vpack.c.bf16 %v1129_v61, %v1128_v60  ;;  %v2388_v60 = vld [vmem:[%s3144_s13 + $0x10] sm:$0xff]   ;;  %v2389_v61 = vld [vmem:[%s3144_s13 + $0x58] sm:$0xff]  }
  0x78   :  { %2238 = vmatprep.subr.bf16.mxu0 %v2237_v63  ;;  %v1146_v63 = vld [vmem:[%s3172_s4 + $0xf0] sm:$0xff] }
  0x79   :  { %1056 = vmatpush1.bf16.msra.mxu1 %v2374_v43  ;;  %v2257_v1 = vpack.c.bf16 %v1147_v0, %v1146_v63  ;;  %v2391_v63 = vld [vmem:[%s3144_s13 + $0x60] sm:$0xff]  }
  0x7a   :  { %1057 = vmatprep.subr.bf16.mxu1 %v2379_v44  ;;  %v2392_v0 = vld [vmem:[%s3144_s13 + $0x20] sm:$0xff]  }
  0x7b   :  { %2240 = vmatpush3.bf16.msra.mxu0 %v2239_v4  ;;  %v2259_v4 = vpack.c.bf16 %v1131_v3, %v1130_v2  ;;  %v2394_v2 = vld [vmem:[%s3144_s13 + $0x28] sm:$0xff]   ;;  %v2395_v3 = vld [vmem:[%s3144_s13 + $0x70] sm:$0xff]  }
  0x7c   :  { %2242 = vmatprep.subr.bf16.mxu0 %v2241_v5  ;;  %v1090_v5 = vsub.s32 0, %v2656_v33 }
  0x7d   :  { %1058 = vmatpush1.bf16.msra.mxu1 %v2377_v45 }
  0x7e   :  { %1059 = vmatprep.subr.bf16.mxu1 %v2382_v46  ;;  %v1091_v9 = vrot.slane %v1086_v6, %v1090_v5 }
  0x7f   :  { %2244 = vmatpush3.bf16.msra.mxu0 %v2243_v10  ;;  %v1095_v10 = vrot.slane %v1086_v6, %v1094_v7  ;;  %v2398_v6 = vld [vmem:[%s3144_s13 + $0x38] sm:$0xff]  }
  0x80   :  { %2246 = vmatprep.subr.bf16.mxu0 %v2245_v11  ;;  %v1105_v11 = vrot.slane %v1100_v8, %v1090_v5  ;;  %v2397_v5 = vld [vmem:[%s3144_s13 + $0x78] sm:$0xff]  }
  0x81   :  { %1060 = vmatpush1.bf16.msra.mxu1 %v2380_v47  ;;  %v1961_v47 = vld [vmem:[%s3173_s6] ss:$0 sm:$0xff] }
  0x83   :  { %2248 = vmatpush3.bf16.msra.mxu0 %v2247_v16 }
  0x84   :  { %2250 = vmatprep.subr.bf16.mxu0 %v2249_v17 }
  0x87   :  { %2252 = vmatpush3.bf16.msra.mxu0 %v2251_v21 }
  0x88   :  { %2254 = vmatprep.subr.bf16.mxu0 %v2253_v59  ;;  %v2387_v59 = vld [vmem:[%s3144_s13 + $0x50] sm:$0xff]  }
  0x8b   :  { %2256 = vmatpush3.bf16.msra.mxu0 %v2255_v62  ;;  %v2390_v62 = vld [vmem:[%s3144_s13 + $0x18] sm:$0xff]  }
  0x8c   :  { %2258 = vmatprep.subr.bf16.mxu0 %v2257_v1  ;;  %v2393_v1 = vld [vmem:[%s3144_s13 + $0x68] sm:$0xff]  }
  0x8f   :  { %2260 = vmatpush3.bf16.msra.mxu0 %v2259_v4  ;;  %v2396_v4 = vld [vmem:[%s3144_s13 + $0x30] sm:$0xff]  }
 0x105   :  { %v2025_v22 = vpop.f32.mrb[0].mxu0 }
 0x106   :  { %v2026_v23 = vpop.f32.mrb[1].mxu0  ;;  %v2047_v24 = vpop.f32.mrb[0].mxu1 }
 0x107   :  { %v2027_v25 = vadd.f32 %v2026_v23, %v2025_v22  ;;  %v2028_v26 = vpop.f32.mrb[2].mxu0  ;;  %v2048_v27 = vpop.f32.mrb[1].mxu1  ;;  %v1235_v23 = vld [vmem:[%s3141_s10] sm:$0xff] }
 0x108   :  { %v2029_v28 = vpop.f32.mrb[3].mxu0  ;;  %v2049_v29 = vadd.f32 %v2048_v27, %v2047_v24  ;;  %v2050_v30 = vpop.f32.mrb[2].mxu1  ;;  %v1236_v24 = vld [vmem:[%s3141_s10 + $0x8] sm:$0xff]  ;;  %v2433_v26 = vmov 0.0|0.0  }
 0x109   :  { %v2051_v31 = vpop.f32.mrb[3].mxu1  ;;  %2261 = vmatprep.subr.bf16.mxu1 %v2433_v26  ;;  %2268 = vmatprep.subr.bf16.mxu0 %v2433_v26 }
 0x10a   :  { %v806_v32 = vadd.f32 %v2049_v29, %v2027_v25  ;;  %v2262_v25 = vpack.c.bf16 %v1236_v24, %v1235_v23  ;;  %v1979_v29 = vld [vmem:[%s3177_s28] ss:$0 sm:$0xff] }
 0x10b   :  { %v1980_v31 = vld [vmem:[%s3140_s9] ss:$0 sm:$0xff] }
 0x10c   :  { %v2001_v23 = vld [vmem:[%s3146_s15] ss:$0 sm:$0xff] }
 0x125   :  { %v2069_v34 = vpop.f32.mrb[4].mxu0 }
 0x126   :  { %v2070_v35 = vpop.f32.mrb[5].mxu0 }
 0x127   :  { %v2071_v36 = vadd.f32 %v2070_v35, %v2069_v34  ;;  %v2072_v37 = vpop.f32.mrb[6].mxu0  ;;  %v2091_v38 = vpop.f32.mrb[4].mxu1 }
 0x128   :  { %v2073_v39 = vpop.f32.mrb[7].mxu0  ;;  %v2092_v40 = vpop.f32.mrb[5].mxu1 }
 0x129   :  { %v846_v41 = vadd.f32 %v2071_v36, %v806_v32  ;;  %v2093_v42 = vadd.f32 %v2092_v40, %v2091_v38  ;;  %v2094_v43 = vpop.f32.mrb[6].mxu1  ;;  %v1981_v36 = vld [vmem:[%s3142_s11] ss:$0 sm:$0xff] }
 0x12a   :  { %v2095_v44 = vpop.f32.mrb[7].mxu1 }
 0x12b   :  { %v886_v45 = vadd.f32 %v2093_v42, %v846_v41 }
 0x145   :  { %v925_v46 = vpop.f32.mrb[8].mxu0 }
 0x146   :  { %v926_v48 = vadd.f32 %v925_v46, %v886_v45  ;;  %v2195_v49 = vpop.f32.mrb[9].mxu0  ;;  %v1331_v46 = vld [vmem:[%s3143_s12 + $0x8] sm:$0xff] }
 0x147   :  { %v928_v51 = vpop.f32.mrb[10].mxu0  ;;  %v1330_v49 = vld [vmem:[%s3143_s12] sm:$0xff] }
 0x148   :  { %v938_v52 = vmul.f32 %v1961_v47, %v926_v48  ;;  %v2196_v53 = vpop.f32.mrb[11].mxu0  ;;  %v1333_v47 = vld [vmem:[%s3143_s12 + $0x18] sm:$0xff] }
 0x149   :  { %v2264_v48 = vpack.c.bf16 %v1333_v47, %v1331_v46  ;;  %v1789_v46 = vld [vmem:[%s3153_s22 + $0x10] sm:$0xff]  ;;  %v1790_v47 = vld [vmem:[%s3153_s22 + $0x18] sm:$0xff] }
 0x14a   :  { %v946_v54 = vadd.f32 %v1962_v50, %v938_v52  ;;  %v1332_v50 = vld [vmem:[%s3143_s12 + $0x10] sm:$0xff]  ;;  %v2383_v52 = vld [vmem:[%s3144_s13 + $0x40] sm:$0xff]  }
 0x14b   :  { %v2266_v51 = vpack.c.bf16 %v1332_v50, %v1330_v49 }
 0x14c   :  { %v947_v55 = vmax.f32 %v946_v54, 0.0 }
 0x14e   :  { %v948_v56 = vpack.c.bf16 %v947_v55, %v947_v55  ;;  %v2384_v55 = vld [vmem:[%s3144_s13] sm:$0xff]   ;;  %s2434_s13 = smov [#allocation2]  }
 0x14f   :  { %s1880_s3 = sshll.u32 %s2434_s13, 4  ;;  %s1881_s3 = int_to_ptr.vmem [resolvable:$true] %s1880_s3 }
 0x150   :  { %1078 = vmatmul.mubr.bf16.vlgmr.msra.gmra.mrb[8].mxu1 %v948_v56  ;;  %p2410_p1 = scmp.lt.s32.totalorder %s1881_s3, %s1881_s3 }
 0x151   :  { %2201 = vmatprep.mubr.msk.f32.mxu1 %vm2431_vm0, %v2430_v20  ;;  %2263 = vmatpush3.bf16.msra.mxu1 %v2262_v25 }
 0x152   :  { %2265 = vmatprep.subr.bf16.mxu1 %v2264_v48  ;;  %v2278_v48 = vpack.c.bf16 %v1790_v47, %v1789_v46 }
 0x223   :  { %v1079_v12 = vpop.f32.mrb[8].mxu1 }
 0x224   :  { %v1098_v14 = vmul.f32 %v1091_v9, %v1079_v12  ;;  %v1081_v15 = vpop.f32.mrb[9].mxu1 }
 0x225   :  { %v1099_v16 = vmul.f32 %v1095_v10, %v1081_v15  ;;  %v1083_v17 = vpop.f32.mrb[10].mxu1 }
 0x226   :  { %v2969_v18 = vadd.f32 %v1105_v11, %v1098_v14  ;;  %v1084_v19 = vpop.f32.mrb[11].mxu1  ;;  %v1600_v14 = vld [vmem:[%s3149_s18 + $0x8] sm:$0xff] }
 0x227   :  { %v2971_v21 = vadd.f32 %v1109_v13, %v1099_v16  ;;  %v1599_v13 = vld [vmem:[%s3149_s18] sm:$0xff] }
 0x228   :  { %v1114_v22 = vmax.f32 %v2969_v18, 0.0  ;;  %v2269_v15 = vpack.c.bf16 %v1600_v14, %v1599_v13  ;;  %v2000_v18 = vld [vmem:[%s3145_s14] ss:$0 sm:$0xff] }
 0x229   :  { %v1115_v33 = vmax.f32 %v2971_v21, 0.0 }
 0x22b   :  { %1212 = vmatprep.mubr.f32.mxu0 %v1115_v33 }
 0x22c   :  { %1213 = vmatmul.mubr.f32.vlgmr.msra.gmra.mrb[12].mxu0 %v1114_v22 }
 0x22d   :  { %2208 = vmatprep.mubr.msk.f32.mxu0 %vm2431_vm0, %v2430_v20  ;;  %2270 = vmatpush3.bf16.msra.mxu0 %v2269_v15 }
 0x22e   :  { %2271 = vmatprep.subr.bf16.mxu0 %v2433_v26 }
 0x2ff   :  { %v2138_v27 = vpop.f32.mrb[12].mxu0 }
 0x300   :  { %v2139_v28 = vpop.f32.mrb[13].mxu0 }
 0x301   :  { %v2140_v30 = vadd.f32 %v2139_v28, %v2138_v27 }
 0x303   :  { %v1225_v32 = vmul.f32 %v2140_v30, %v1979_v29  ;;  %v1596_v29 = vld [vmem:[%s3147_s16] sm:$0x3] }
 0x305   :  { %v1233_v34 = vadd.f32 %v1980_v31, %v1225_v32 }
 0x307   :  { %v1234_v35 = vmax.f32 %v1233_v34, 0.0  ;;  %v2004_v34 = vld [vmem:[%s3150_s19] ss:$0 sm:$0xff] }
 0x309   :  { %2202 = vmatmul.mubr.msk.f32.vlgmr.msra.gmra.mrb[12].mxu1 %vm1244_vm1, %v1234_v35 }
 0x30a   :  { %1401 = vmatprep.mubr.f32.mxu1 %v2430_v20  ;;  %2267 = vmatpush1.bf16.msra.mxu1 %v2266_v51 }
 0x30b   :  { %2144 = vmatprep.subr.bf16.mxu1 %v2383_v52 }
 0x3dc   :  { %v1314_v37 = vpop.f32.mrb[12].mxu1 }
 0x3dd   :  { %v1315_v38 = vadd.f32 %v1981_v36, %v1314_v37  ;;  %v2203_v39 = vpop.f32.mrb[13].mxu1 }
 0x3df   :  { %v1319_v40 = vsel %vm1318_vm2, %v1315_v38, -inf }
 0x3e0   :  { %1320 = vmax.xlane.f32.xlu0 %v1319_v40 }
 0x46d   :  { %v1321_v41 = vpop.xlane.xlu0 %1320 }
 0x46e   :  { %v1322_v42 = vsub.f32 %v1315_v38, %v1321_v41 }
 0x470   :  { %v1323_v43 = vmul.f32 1.442695, %v1322_v42 }
 0x472   :  { %2399 = vpow2.f32 %v1323_v43 }
 0x47c   :  { %v2400_v44 = vpop.eup %2399 }
 0x47d   :  { %v1325_v45 = vsel %vm1318_vm2, %v2400_v44, 0.0 }
 0x47e   :  { %1326 = vadd.xlane.f32.xlu0 %v1325_v45 }
 0x50b   :  { %v1327_v53 = vpop.xlane.xlu0 %1326 }
 0x50c   :  { %2401 = vrcp.f32 %v1327_v53  ;;  %v2005_v53 = vld [vmem:[%s3151_s20] ss:$0 sm:$0xff]  ;;  %s2405_s20 = scalar_lea.vmem %s1881_s3, 32 }
 0x50d   :  { %p2406_p0 = scmp.ne.s32.totalorder %s1881_s3, %s2405_s20  ;;  %p2411_p2 = scmp.lt.s32.totalorder %s2405_s20, %s2405_s20 }
 0x50f   :  { %p2412_p3 = por %p2411_p2, %p2410_p1 }
 0x511   :  { %p2413_p4 = pnand %p2412_p3, %p2406_p0 }
 0x516   :  { %v2402_v54 = vpop.eup %2401 }
 0x517   :  { %v1329_v56 = vmul.f32 %v2402_v54, %v2400_v44  ;;  %v1788_v44 = vld [vmem:[%s3153_s22 + $0x8] sm:$0xff] }
 0x519   :  { %1983 = vmatmul.mubr.msk.f32.vlgmr.msra.gmra.mrb[14].mxu1 %vm1244_vm1, %v1329_v56 }
 0x51a   :  { %2145 = vmatpush3.bf16.msra.mxu1 %v2384_v55  ;;  %v2006_v55 = vld [vmem:[%s3152_s21] ss:$0 sm:$0xff] }
 0x51b   :  { %2146 = vmatprep.subr.bf16.mxu1 %v2385_v57 }
 0x51e   :  { %2147 = vmatpush3.bf16.msra.mxu1 %v2386_v58 }
 0x51f   :  { %2148 = vmatprep.subr.bf16.mxu1 %v2387_v59 }
 0x522   :  { %2149 = vmatpush3.bf16.msra.mxu1 %v2388_v60 }
 0x523   :  { %2150 = vmatprep.subr.bf16.mxu1 %v2389_v61 }
 0x526   :  { %2151 = vmatpush3.bf16.msra.mxu1 %v2390_v62 }
 0x527   :  { %2152 = vmatprep.subr.bf16.mxu1 %v2391_v63 }
 0x52a   :  { %2153 = vmatpush3.bf16.msra.mxu1 %v2392_v0 }
 0x52b   :  { %2154 = vmatprep.subr.bf16.mxu1 %v2393_v1 }
 0x52e   :  { %2155 = vmatpush3.bf16.msra.mxu1 %v2394_v2 }
 0x52f   :  { %2156 = vmatprep.subr.bf16.mxu1 %v2395_v3 }
 0x532   :  { %2157 = vmatpush3.bf16.msra.mxu1 %v2396_v4 }
 0x533   :  { %2158 = vmatprep.subr.bf16.mxu1 %v2397_v5 }
 0x536   :  { %2159 = vmatpush3.bf16.msra.mxu1 %v2398_v6 }
 0x5ec   :  { %v1403_v7 = vpop.f32.mrb[14].mxu1 }
 0x5ed   :  { %v1408_v8 = vmul.f32 %v1403_v7, %v1114_v22  ;;  %v1405_v9 = vpop.f32.mrb[15].mxu1  ;;  %v1598_v22 = vld [vmem:[%s3148_s17 + $0x8] sm:$0xff] }
 0x5ee   :  { %v1409_v10 = vmul.f32 %v1405_v9, %v1115_v33  ;;  %v1597_v33 = vld [vmem:[%s3148_s17] sm:$0xff] }
 0x5ef   :  { %v1410_v12 = vpack.c.bf16 %v1408_v8, %v1408_v8  ;;  %v2272_v27 = vpack.c.bf16 %v1598_v22, %v1597_v33 }
 0x5f0   :  { %v1411_v11 = vpack.c.bf16 %v1409_v10, %v1409_v10 }
 0x5f2   :  { %1572 = vmatprep.mubr.bf16.mxu1 %v1411_v11 }
 0x5f3   :  { %1573 = vmatmul.mubr.bf16.vlgmr.msra.gmra.mrb[16].mxu1 %v1410_v12 }
 0x6c6   :  { %v2160_v16 = vpop.f32.mrb[16].mxu1 }
 0x6c7   :  { %v2161_v17 = vpop.f32.mrb[17].mxu1 }
 0x6c8   :  { %v2162_v19 = vadd.f32 %v2161_v17, %v2160_v16  ;;  %v2163_v21 = vpop.f32.mrb[18].mxu1 }
 0x6c9   :  { %v2164_v24 = vpop.f32.mrb[19].mxu1 }
 0x6ca   :  { %v1587_v25 = vmul.f32 %v2162_v19, %v2000_v18 }
 0x6cc   :  { %v1595_v28 = vadd.f32 %v2001_v23, %v1587_v25 }
 0x6ce   :  { %2209 = vmatmul.mubr.msk.f32.vlgmr.msra.gmra.mrb[14].mxu0 %vm1244_vm1, %v1595_v28 }
 0x6cf   :  { %2273 = vmatpush3.bf16.msra.mxu0 %v2272_v27  ;;  %2215 = vmatprep.mubr.msk.f32.mxu0 %vm2431_vm0, %v2430_v20 }
 0x6d0   :  { %2274 = vmatprep.subr.bf16.mxu0 %v2433_v26 }
 0x6d2   :  { %2216 = vmatmul.mubr.msk.f32.vlgmr.msra.gmra.mrb[16].mxu0 %vm1244_vm1, %v1596_v29 }
 0x6d3   :  { %2226 = vmatprep.mubr.msk.f32.mxu0 %vm2431_vm0, %v2430_v20  ;;  %v1787_v20 = vld [vmem:[%s3153_s22] sm:$0xff] }
 0x6d4   :  { %v2275_v45 = vpack.c.bf16 %v1788_v44, %v1787_v20 }
 0x6d6   :  { %2276 = vmatpush3.bf16.msra.mxu0 %v2275_v45 }
 0x6d7   :  { %2277 = vmatprep.subr.bf16.mxu0 %v2433_v26  ;;  %v2007_v26 = vld [vmem:[%s3154_s23] ss:$0 sm:$0xff] }
 0x6da   :  { %2279 = vmatpush3.bf16.msra.mxu0 %v2278_v48 }
 0x7a1   :  { %v1670_v30 = vpop.f32.mrb[14].mxu0 }
 0x7a2   :  { %v2210_v31 = vpop.f32.mrb[15].mxu0 }
 0x7a5   :  { %v1743_v32 = vpop.f32.mrb[16].mxu0 }
 0x7a6   :  { %v1744_v35 = vadd.f32 %v1743_v32, %v1670_v30  ;;  %v2217_v36 = vpop.f32.mrb[17].mxu0 }
 0x7a8   :  { %v1754_v37 = vadd.f32 %v2004_v34, %v1744_v35 }
 0x7aa   :  { %v1756_v38 = vsel %vm1755_vm3, %v1754_v37, 0.0 }
 0x7ab   :  { %1757 = vadd.xlane.f32.xlu1 %v1756_v38 }
 0x838   :  { %v1758_v39 = vpop.xlane.xlu1 %1757 }
 0x839   :  { %v1760_v40 = vmul.f32 0.03125, %v1758_v39 }
 0x83b   :  { %v1761_v41 = vsub.f32 %v1754_v37, %v1760_v40 }
 0x83d   :  { %v1762_v42 = vmul.f32 %v1761_v41, %v1761_v41 }
 0x83f   :  { %v1763_v43 = vsel %vm1755_vm3, %v1762_v42, 0.0 }
 0x840   :  { %1764 = vadd.xlane.f32.xlu1 %v1763_v43 }
 0x8cd   :  { %v1765_v49 = vpop.xlane.xlu1 %1764 }
 0x8ce   :  { %v1766_v50 = vmul.f32 0.03125, %v1765_v49 }
 0x8d0   :  { %v1767_v51 = vadd.f32 1e-05, %v1766_v50 }
 0x8d2   :  { %2403 = vrsqrt.f32 %v1767_v51 }
 0x8dc   :  { %v2404_v52 = vpop.eup %2403 }
 0x8dd   :  { %v1769_v54 = vmul.f32 %v2404_v52, %v1761_v41 }
 0x8df   :  { %v1777_v56 = vmul.f32 %v2005_v53, %v1769_v54 }
 0x8e1   :  { %v1785_v57 = vadd.f32 %v2006_v55, %v1777_v56 }
 0x8e3   :  { %v1786_v58 = vmax.f32 %v1785_v57, 0.0 }
 0x8e5   :  { %2227 = vmatmul.mubr.msk.f32.vlgmr.msra.gmra.mrb[18].mxu0 %vm1798_vm4, %v1786_v58 }
 0x9b8   :  { %v1868_v59 = vpop.f32.mrb[18].mxu0 }
 0x9b9   :  { %v1869_v60 = vadd.f32 %v2007_v26, %v1868_v59  ;;  %v2228_v61 = vpop.f32.mrb[19].mxu0 }
 0x9bb   :  { %1873 = vst.msk [vmem:[#allocation2] sm:$0x3] %vm1872_vm5, %v1869_v60 }
 0x9bc   :  { %2416 = shalt.err (!%p2413_p4)
}
 0x9bd   :  { %s2417_s4 = scalar_lea.hbm %s3155_s24, 32 }
 0x9be   :  { %p2418_p5 = scmp.ne.s32.totalorder %s3155_s24, %s2417_s4  ;;  %p2421_p6 = scmp.lt.u32.totalorder %s2417_s4, %s3155_s24 }
 0x9c0   :  { %p2423_p7 = pnand %p2421_p6, %p2418_p5 }
 0x9c2   :  { %2426 = shalt.err (!%p2423_p7)
}
 0x9c3   :  { %1883 = dma.vmem_to_hbm [thread:$0]  %s1881_s3, 32, %s3155_s24, [#allocation3]  }
 0x9c4   :  { %2427 = dma.done.wait [#allocation3], 32  }
 0x9c5   :  { %2428 = vsyncadd [#allocation3], 4294967264 }
 0x9c6   :  { %1887 = vsyncpa [#allocation3], 1 }

</bundles_post_ra>
